<compile_context>
chip_gen: v7x
topology: tpu7x:2x2x1
jax: 0.10.0
libtpu: 0.0.40
codegen_flags: <defaults>
</compile_context>

<pallas_src>
import jax
import jax.numpy as jnp
from jax.experimental import pallas as pl
from jax.experimental.pallas import tpu as pltpu


def _round_up(x, m):
    return ((x + m - 1) // m) * m


def mlp_decoder_kernel(za_ref, zbT_ref, w2_ref, b2_ref, out_ref):
    """Compute one (TM, TN) tile of the (N, N) probability matrix.

    za_ref : (TM, H)  f32 row-side fc1 activations  z @ W1[:, :L].T   (no bias)
    zbT_ref: (H, TN)  f32 col-side fc1 activations (z @ W1[:, L:].T + b1).T
    w2_ref : (H,)     f32 fc2 weight, SMEM scalars
    b2_ref : (1,)     f32 fc2 bias, SMEM scalar
    out_ref: (TM, TN) f32 sigmoid probabilities
    """
    tm, hidden = za_ref.shape
    tn = out_ref.shape[1]

    za = za_ref[...]                                     # (TM, H), vreg-resident
    acc = jnp.zeros((tm, tn), dtype=jnp.float32)         # (TM, TN), vreg-resident

    # Static unroll over H: per step this is a lane-broadcast of za[:, h], a
    # sublane-broadcast of zbT[h, :], then add + relu + scalar-mul + accumulate
    # (pure VALU work) -- no (TM, TN, H) intermediate ever exists.
    for h in range(hidden):
        a_col = za[:, h:h + 1]                           # (TM, 1)  static lane slice
        b_row = zbT_ref[h:h + 1, :]                      # (1, TN)  static row read
        acc = acc + w2_ref[h] * jnp.maximum(a_col + b_row, 0.0)

    out_ref[...] = jax.nn.sigmoid(acc + b2_ref[0])


def mlp_decoder(z, w1, b1, w2, b2, *, tm=64, tn=128):
    """z: (N, L) f32. w1: (H, 2L), b1: (H,), w2: (1, H), b2: (1,) — PyTorch layout."""
    n, latent = z.shape
    hidden = w1.shape[0]
    hi = jax.lax.Precision.HIGHEST

    # ---- Hoisted (plain JAX) prep: both fc1 halves, f32 throughout. ----
    w1a = jnp.transpose(w1[:, :latent])                          # (L, H)
    w1b = jnp.transpose(w1[:, latent:])                          # (L, H)
    za = jnp.dot(z, w1a, precision=hi).astype(jnp.float32)       # (N, H), bias-free
    zbT = jnp.transpose(jnp.dot(z, w1b, precision=hi) + b1)      # (H, N), b1 folded
    zbT = zbT.astype(jnp.float32)
    w2_s = w2.reshape(hidden).astype(jnp.float32)
    b2_s = b2.reshape(1).astype(jnp.float32)

    # ---- Adaptive tiling: lane-dense (>=128 wide) output columns at scale,
    #      tile multiples via padding, and >=2 grid steps for v7x megacore. ----
    tm_e = min(tm, _round_up(n, 8))
    tn_e = min(tn, _round_up(n, 128))
    nr = _round_up(n, tm_e)
    nc = _round_up(n, tn_e)
    if (nr // tm_e) * (nc // tn_e) < 2 and nr > 8:
        # Split the row axis in two so both v7x TensorCores get a tile.
        tm_e = _round_up(-(-nr // 2), 8)
        nr = _round_up(n, tm_e)

    if nr != n:
        za = jnp.pad(za, ((0, nr - n), (0, 0)))
    if nc != n:
        zbT = jnp.pad(zbT, ((0, 0), (0, nc - n)))

    grid = (nr // tm_e, nc // tn_e)

    out = pl.pallas_call(
        mlp_decoder_kernel,
        out_shape=jax.ShapeDtypeStruct((nr, nc), jnp.float32),
        grid_spec=pltpu.PrefetchScalarGridSpec(
            num_scalar_prefetch=0,
            grid=grid,
            in_specs=[
                pl.BlockSpec((tm_e, hidden), lambda i, j: (i, 0)),   # za row tile
                pl.BlockSpec((hidden, tn_e), lambda i, j: (0, j)),   # zbT col tile
                pl.BlockSpec(memory_space=pltpu.MemorySpace.SMEM),   # w2 scalars
                pl.BlockSpec(memory_space=pltpu.MemorySpace.SMEM),   # b2 scalar
            ],
            out_specs=pl.BlockSpec((tm_e, tn_e), lambda i, j: (i, j)),
        ),
        compiler_params=pltpu.CompilerParams(
            dimension_semantics=("parallel", "parallel"),
            vmem_limit_bytes=32 * 1024 * 1024,
        ),
    )(za, zbT, w2_s, b2_s)

    return out[:n, :n]


def mlp_decoder_ref(z, w1, b1, w2, b2):
    """Pure-JAX reference matching the PyTorch forward exactly (f32)."""
    hi = jax.lax.Precision.HIGHEST
    n = z.shape[0]
    row = jnp.repeat(z[:, None, :], n, axis=1)
    col = jnp.repeat(z[None, :, :], n, axis=0)
    pair = jnp.concatenate([row, col], axis=-1)                        # (N, N, 2L)
    h = jax.nn.relu(jnp.einsum('ijk,hk->ijh', pair, w1, precision=hi) + b1)
    logits = jnp.einsum('ijh,oh->ijo', h, w2, precision=hi) + b2       # (N, N, 1)
    return jnp.squeeze(jax.nn.sigmoid(logits), axis=-1)                # (N, N)


if __name__ == "__main__":
    latent_dim = 16
    hidden = 256
    n = 16  # number of nodes (batch of latents)

    key = jax.random.PRNGKey(0)
    kz, kw1, kb1, kw2, kb2 = jax.random.split(key, 5)

    z = jax.random.normal(kz, (n, latent_dim), dtype=jnp.float32)
    # Deterministic synthetic parameters (nn.Linear shape conventions).
    w1 = jax.random.normal(kw1, (hidden, 2 * latent_dim), dtype=jnp.float32) * 0.1
    b1 = jax.random.normal(kb1, (hidden,), dtype=jnp.float32) * 0.1
    w2 = jax.random.normal(kw2, (1, hidden), dtype=jnp.float32) * 0.1
    b2 = jax.random.normal(kb2, (1,), dtype=jnp.float32) * 0.1

    out = mlp_decoder(z, w1, b1, w2, b2)
    out = jax.block_until_ready(out)

    ref = mlp_decoder_ref(z, w1, b1, w2, b2)
    assert out.shape == (n, n), out.shape
    # Everything is f32 end-to-end now -> tight tolerance.
    assert jnp.allclose(out, ref, atol=1e-4, rtol=1e-4), float(
        jnp.max(jnp.abs(out - ref)))

    print("KERNEL_OK")
</pallas_src>

<mosaic_0001>
module attributes {stable_mosaic.version = 11 : i64} {
  func.func @mlp_decoder_kernel(%arg0: i32, %arg1: i32, %arg2: memref<8x256xf32, #tpu.memory_space<vmem>>, %arg3: memref<256x128xf32, #tpu.memory_space<vmem>>, %arg4: memref<256xf32, #tpu.memory_space<smem>>, %arg5: memref<1xf32, #tpu.memory_space<smem>>, %arg6: memref<8x128xf32, #tpu.memory_space<vmem>>) attributes {dimension_semantics = [#tpu.dimension_semantics<parallel>, #tpu.dimension_semantics<parallel>], iteration_bounds = array<i64: 2, 1>, scalar_prefetch = 0 : i64, scratch_operands = 0 : i64, tpu.core_type = #tpu.core_type<tc>, window_params = [{transform_indices = @transform_0, window_bounds = array<i64: 8, 256>}, {transform_indices = @transform_1, window_bounds = array<i64: 256, 128>}, {transform_indices = @transform_2, window_bounds = array<i64: 256>}, {transform_indices = @transform_3, window_bounds = array<i64: 1>}, {transform_indices = @transform_4, window_bounds = array<i64: 8, 128>}]} {
    %c0 = arith.constant 0 : index
    %c0_0 = arith.constant 0 : index
    %0 = vector.load %arg2[%c0, %c0_0] : memref<8x256xf32, #tpu.memory_space<vmem>>, vector<8x256xf32>
    %cst = arith.constant 0.000000e+00 : f32
    %1 = vector.broadcast %cst : f32 to vector<8x128xf32>
    %2 = vector.extract_strided_slice %0 {offsets = [0, 0], sizes = [8, 1], strides = [1, 1]} : vector<8x256xf32> to vector<8x1xf32>
    %c0_1 = arith.constant 0 : index
    %c0_2 = arith.constant 0 : index
    %3 = vector.load %arg3[%c0_1, %c0_2] : memref<256x128xf32, #tpu.memory_space<vmem>>, vector<1x128xf32>
    %c0_3 = arith.constant 0 : index
    %4 = memref.load %arg4[%c0_3] : memref<256xf32, #tpu.memory_space<smem>>
    %5 = vector.broadcast %2 : vector<8x1xf32> to vector<8x128xf32>
    %6 = vector.broadcast %3 : vector<1x128xf32> to vector<8x128xf32>
    %7 = arith.addf %5, %6 : vector<8x128xf32>
    %cst_4 = arith.constant 0.000000e+00 : f32
    %8 = vector.broadcast %cst_4 : f32 to vector<8x128xf32>
    %9 = arith.maximumf %7, %8 : vector<8x128xf32>
    %10 = vector.broadcast %4 : f32 to vector<8x128xf32>
    %11 = arith.mulf %10, %9 : vector<8x128xf32>
    %12 = arith.addf %1, %11 : vector<8x128xf32>
    %13 = vector.extract_strided_slice %0 {offsets = [0, 1], sizes = [8, 1], strides = [1, 1]} : vector<8x256xf32> to vector<8x1xf32>
    %c1 = arith.constant 1 : index
    %c0_5 = arith.constant 0 : index
    %14 = vector.load %arg3[%c1, %c0_5] : memref<256x128xf32, #tpu.memory_space<vmem>>, vector<1x128xf32>
    %c1_6 = arith.constant 1 : index
    %15 = memref.load %arg4[%c1_6] : memref<256xf32, #tpu.memory_space<smem>>
    %16 = vector.broadcast %13 : vector<8x1xf32> to vector<8x128xf32>
    %17 = vector.broadcast %14 : vector<1x128xf32> to vector<8x128xf32>
    %18 = arith.addf %16, %17 : vector<8x128xf32>
    %cst_7 = arith.constant 0.000000e+00 : f32
    %19 = vector.broadcast %cst_7 : f32 to vector<8x128xf32>
    %20 = arith.maximumf %18, %19 : vector<8x128xf32>
    %21 = vector.broadcast %15 : f32 to vector<8x128xf32>
    %22 = arith.mulf %21, %20 : vector<8x128xf32>
    %23 = arith.addf %12, %22 : vector<8x128xf32>
    %24 = vector.extract_strided_slice %0 {offsets = [0, 2], sizes = [8, 1], strides = [1, 1]} : vector<8x256xf32> to vector<8x1xf32>
    %c2 = arith.constant 2 : index
    %c0_8 = arith.constant 0 : index
    %25 = vector.load %arg3[%c2, %c0_8] : memref<256x128xf32, #tpu.memory_space<vmem>>, vector<1x128xf32>
    %c2_9 = arith.constant 2 : index
    %26 = memref.load %arg4[%c2_9] : memref<256xf32, #tpu.memory_space<smem>>
    %27 = vector.broadcast %24 : vector<8x1xf32> to vector<8x128xf32>
    %28 = vector.broadcast %25 : vector<1x128xf32> to vector<8x128xf32>
    %29 = arith.addf %27, %28 : vector<8x128xf32>
    %cst_10 = arith.constant 0.000000e+00 : f32
    %30 = vector.broadcast %cst_10 : f32 to vector<8x128xf32>
    %31 = arith.maximumf %29, %30 : vector<8x128xf32>
    %32 = vector.broadcast %26 : f32 to vector<8x128xf32>
    %33 = arith.mulf %32, %31 : vector<8x128xf32>
    %34 = arith.addf %23, %33 : vector<8x128xf32>
    %35 = vector.extract_strided_slice %0 {offsets = [0, 3], sizes = [8, 1], strides = [1, 1]} : vector<8x256xf32> to vector<8x1xf32>
    %c3 = arith.constant 3 : index
    %c0_11 = arith.constant 0 : index
    %36 = vector.load %arg3[%c3, %c0_11] : memref<256x128xf32, #tpu.memory_space<vmem>>, vector<1x128xf32>
    %c3_12 = arith.constant 3 : index
    %37 = memref.load %arg4[%c3_12] : memref<256xf32, #tpu.memory_space<smem>>
    %38 = vector.broadcast %35 : vector<8x1xf32> to vector<8x128xf32>
    %39 = vector.broadcast %36 : vector<1x128xf32> to vector<8x128xf32>
    %40 = arith.addf %38, %39 : vector<8x128xf32>
    %cst_13 = arith.constant 0.000000e+00 : f32
    %41 = vector.broadcast %cst_13 : f32 to vector<8x128xf32>
    %42 = arith.maximumf %40, %41 : vector<8x128xf32>
    %43 = vector.broadcast %37 : f32 to vector<8x128xf32>
    %44 = arith.mulf %43, %42 : vector<8x128xf32>
    %45 = arith.addf %34, %44 : vector<8x128xf32>
    %46 = vector.extract_strided_slice %0 {offsets = [0, 4], sizes = [8, 1], strides = [1, 1]} : vector<8x256xf32> to vector<8x1xf32>
    %c4 = arith.constant 4 : index
    %c0_14 = arith.constant 0 : index
    %47 = vector.load %arg3[%c4, %c0_14] : memref<256x128xf32, #tpu.memory_space<vmem>>, vector<1x128xf32>
    %c4_15 = arith.constant 4 : index
    %48 = memref.load %arg4[%c4_15] : memref<256xf32, #tpu.memory_space<smem>>
    %49 = vector.broadcast %46 : vector<8x1xf32> to vector<8x128xf32>
    %50 = vector.broadcast %47 : vector<1x128xf32> to vector<8x128xf32>
    %51 = arith.addf %49, %50 : vector<8x128xf32>
    %cst_16 = arith.constant 0.000000e+00 : f32
    %52 = vector.broadcast %cst_16 : f32 to vector<8x128xf32>
    %53 = arith.maximumf %51, %52 : vector<8x128xf32>
    %54 = vector.broadcast %48 : f32 to vector<8x128xf32>
    %55 = arith.mulf %54, %53 : vector<8x128xf32>
    %56 = arith.addf %45, %55 : vector<8x128xf32>
    %57 = vector.extract_strided_slice %0 {offsets = [0, 5], sizes = [8, 1], strides = [1, 1]} : vector<8x256xf32> to vector<8x1xf32>
    %c5 = arith.constant 5 : index
    %c0_17 = arith.constant 0 : index
    %58 = vector.load %arg3[%c5, %c0_17] : memref<256x128xf32, #tpu.memory_space<vmem>>, vector<1x128xf32>
    %c5_18 = arith.constant 5 : index
    %59 = memref.load %arg4[%c5_18] : memref<256xf32, #tpu.memory_space<smem>>
    %60 = vector.broadcast %57 : vector<8x1xf32> to vector<8x128xf32>
    %61 = vector.broadcast %58 : vector<1x128xf32> to vector<8x128xf32>
    %62 = arith.addf %60, %61 : vector<8x128xf32>
    %cst_19 = arith.constant 0.000000e+00 : f32
    %63 = vector.broadcast %cst_19 : f32 to vector<8x128xf32>
    %64 = arith.maximumf %62, %63 : vector<8x128xf32>
    %65 = vector.broadcast %59 : f32 to vector<8x128xf32>
    %66 = arith.mulf %65, %64 : vector<8x128xf32>
    %67 = arith.addf %56, %66 : vector<8x128xf32>
    %68 = vector.extract_strided_slice %0 {offsets = [0, 6], sizes = [8, 1], strides = [1, 1]} : vector<8x256xf32> to vector<8x1xf32>
    %c6 = arith.constant 6 : index
    %c0_20 = arith.constant 0 : index
    %69 = vector.load %arg3[%c6, %c0_20] : memref<256x128xf32, #tpu.memory_space<vmem>>, vector<1x128xf32>
    %c6_21 = arith.constant 6 : index
    %70 = memref.load %arg4[%c6_21] : memref<256xf32, #tpu.memory_space<smem>>
    %71 = vector.broadcast %68 : vector<8x1xf32> to vector<8x128xf32>
    %72 = vector.broadcast %69 : vector<1x128xf32> to vector<8x128xf32>
    %73 = arith.addf %71, %72 : vector<8x128xf32>
    %cst_22 = arith.constant 0.000000e+00 : f32
    %74 = vector.broadcast %cst_22 : f32 to vector<8x128xf32>
    %75 = arith.maximumf %73, %74 : vector<8x128xf32>
    %76 = vector.broadcast %70 : f32 to vector<8x128xf32>
    %77 = arith.mulf %76, %75 : vector<8x128xf32>
    %78 = arith.addf %67, %77 : vector<8x128xf32>
    %79 = vector.extract_strided_slice %0 {offsets = [0, 7], sizes = [8, 1], strides = [1, 1]} : vector<8x256xf32> to vector<8x1xf32>
    %c7 = arith.constant 7 : index
    %c0_23 = arith.constant 0 : index
    %80 = vector.load %arg3[%c7, %c0_23] : memref<256x128xf32, #tpu.memory_space<vmem>>, vector<1x128xf32>
    %c7_24 = arith.constant 7 : index
    %81 = memref.load %arg4[%c7_24] : memref<256xf32, #tpu.memory_space<smem>>
    %82 = vector.broadcast %79 : vector<8x1xf32> to vector<8x128xf32>
    %83 = vector.broadcast %80 : vector<1x128xf32> to vector<8x128xf32>
    %84 = arith.addf %82, %83 : vector<8x128xf32>
    %cst_25 = arith.constant 0.000000e+00 : f32
    %85 = vector.broadcast %cst_25 : f32 to vector<8x128xf32>
    %86 = arith.maximumf %84, %85 : vector<8x128xf32>
    %87 = vector.broadcast %81 : f32 to vector<8x128xf32>
    %88 = arith.mulf %87, %86 : vector<8x128xf32>
    %89 = arith.addf %78, %88 : vector<8x128xf32>
    %90 = vector.extract_strided_slice %0 {offsets = [0, 8], sizes = [8, 1], strides = [1, 1]} : vector<8x256xf32> to vector<8x1xf32>
    %c8 = arith.constant 8 : index
    %c0_26 = arith.constant 0 : index
    %91 = vector.load %arg3[%c8, %c0_26] : memref<256x128xf32, #tpu.memory_space<vmem>>, vector<1x128xf32>
    %c8_27 = arith.constant 8 : index
    %92 = memref.load %arg4[%c8_27] : memref<256xf32, #tpu.memory_space<smem>>
    %93 = vector.broadcast %90 : vector<8x1xf32> to vector<8x128xf32>
    %94 = vector.broadcast %91 : vector<1x128xf32> to vector<8x128xf32>
    %95 = arith.addf %93, %94 : vector<8x128xf32>
    %cst_28 = arith.constant 0.000000e+00 : f32
    %96 = vector.broadcast %cst_28 : f32 to vector<8x128xf32>
    %97 = arith.maximumf %95, %96 : vector<8x128xf32>
    %98 = vector.broadcast %92 : f32 to vector<8x128xf32>
    %99 = arith.mulf %98, %97 : vector<8x128xf32>
    %100 = arith.addf %89, %99 : vector<8x128xf32>
    %101 = vector.extract_strided_slice %0 {offsets = [0, 9], sizes = [8, 1], strides = [1, 1]} : vector<8x256xf32> to vector<8x1xf32>
    %c9 = arith.constant 9 : index
    %c0_29 = arith.constant 0 : index
    %102 = vector.load %arg3[%c9, %c0_29] : memref<256x128xf32, #tpu.memory_space<vmem>>, vector<1x128xf32>
    %c9_30 = arith.constant 9 : index
    %103 = memref.load %arg4[%c9_30] : memref<256xf32, #tpu.memory_space<smem>>
    %104 = vector.broadcast %101 : vector<8x1xf32> to vector<8x128xf32>
    %105 = vector.broadcast %102 : vector<1x128xf32> to vector<8x128xf32>
    %106 = arith.addf %104, %105 : vector<8x128xf32>
    %cst_31 = arith.constant 0.000000e+00 : f32
    %107 = vector.broadcast %cst_31 : f32 to vector<8x128xf32>
    %108 = arith.maximumf %106, %107 : vector<8x128xf32>
    %109 = vector.broadcast %103 : f32 to vector<8x128xf32>
    %110 = arith.mulf %109, %108 : vector<8x128xf32>
    %111 = arith.addf %100, %110 : vector<8x128xf32>
    %112 = vector.extract_strided_slice %0 {offsets = [0, 10], sizes = [8, 1], strides = [1, 1]} : vector<8x256xf32> to vector<8x1xf32>
    %c10 = arith.constant 10 : index
    %c0_32 = arith.constant 0 : index
    %113 = vector.load %arg3[%c10, %c0_32] : memref<256x128xf32, #tpu.memory_space<vmem>>, vector<1x128xf32>
    %c10_33 = arith.constant 10 : index
    %114 = memref.load %arg4[%c10_33] : memref<256xf32, #tpu.memory_space<smem>>
    %115 = vector.broadcast %112 : vector<8x1xf32> to vector<8x128xf32>
    %116 = vector.broadcast %113 : vector<1x128xf32> to vector<8x128xf32>
    %117 = arith.addf %115, %116 : vector<8x128xf32>
    %cst_34 = arith.constant 0.000000e+00 : f32
    %118 = vector.broadcast %cst_34 : f32 to vector<8x128xf32>
    %119 = arith.maximumf %117, %118 : vector<8x128xf32>
    %120 = vector.broadcast %114 : f32 to vector<8x128xf32>
    %121 = arith.mulf %120, %119 : vector<8x128xf32>
    %122 = arith.addf %111, %121 : vector<8x128xf32>
    %123 = vector.extract_strided_slice %0 {offsets = [0, 11], sizes = [8, 1], strides = [1, 1]} : vector<8x256xf32> to vector<8x1xf32>
    %c11 = arith.constant 11 : index
    %c0_35 = arith.constant 0 : index
    %124 = vector.load %arg3[%c11, %c0_35] : memref<256x128xf32, #tpu.memory_space<vmem>>, vector<1x128xf32>
    %c11_36 = arith.constant 11 : index
    %125 = memref.load %arg4[%c11_36] : memref<256xf32, #tpu.memory_space<smem>>
    %126 = vector.broadcast %123 : vector<8x1xf32> to vector<8x128xf32>
    %127 = vector.broadcast %124 : vector<1x128xf32> to vector<8x128xf32>
    %128 = arith.addf %126, %127 : vector<8x128xf32>
    %cst_37 = arith.constant 0.000000e+00 : f32
    %129 = vector.broadcast %cst_37 : f32 to vector<8x128xf32>
    %130 = arith.maximumf %128, %129 : vector<8x128xf32>
    %131 = vector.broadcast %125 : f32 to vector<8x128xf32>
    %132 = arith.mulf %131, %130 : vector<8x128xf32>
    %133 = arith.addf %122, %132 : vector<8x128xf32>
    %134 = vector.extract_strided_slice %0 {offsets = [0, 12], sizes = [8, 1], strides = [1, 1]} : vector<8x256xf32> to vector<8x1xf32>
    %c12 = arith.constant 12 : index
    %c0_38 = arith.constant 0 : index
    %135 = vector.load %arg3[%c12, %c0_38] : memref<256x128xf32, #tpu.memory_space<vmem>>, vector<1x128xf32>
    %c12_39 = arith.constant 12 : index
    %136 = memref.load %arg4[%c12_39] : memref<256xf32, #tpu.memory_space<smem>>
    %137 = vector.broadcast %134 : vector<8x1xf32> to vector<8x128xf32>
    %138 = vector.broadcast %135 : vector<1x128xf32> to vector<8x128xf32>
    %139 = arith.addf %137, %138 : vector<8x128xf32>
    %cst_40 = arith.constant 0.000000e+00 : f32
    %140 = vector.broadcast %cst_40 : f32 to vector<8x128xf32>
    %141 = arith.maximumf %139, %140 : vector<8x128xf32>
    %142 = vector.broadcast %136 : f32 to vector<8x128xf32>
    %143 = arith.mulf %142, %141 : vector<8x128xf32>
    %144 = arith.addf %133, %143 : vector<8x128xf32>
    %145 = vector.extract_strided_slice %0 {offsets = [0, 13], sizes = [8, 1], strides = [1, 1]} : vector<8x256xf32> to vector<8x1xf32>
    %c13 = arith.constant 13 : index
    %c0_41 = arith.constant 0 : index
    %146 = vector.load %arg3[%c13, %c0_41] : memref<256x128xf32, #tpu.memory_space<vmem>>, vector<1x128xf32>
    %c13_42 = arith.constant 13 : index
    %147 = memref.load %arg4[%c13_42] : memref<256xf32, #tpu.memory_space<smem>>
    %148 = vector.broadcast %145 : vector<8x1xf32> to vector<8x128xf32>
    %149 = vector.broadcast %146 : vector<1x128xf32> to vector<8x128xf32>
    %150 = arith.addf %148, %149 : vector<8x128xf32>
    %cst_43 = arith.constant 0.000000e+00 : f32
    %151 = vector.broadcast %cst_43 : f32 to vector<8x128xf32>
    %152 = arith.maximumf %150, %151 : vector<8x128xf32>
    %153 = vector.broadcast %147 : f32 to vector<8x128xf32>
    %154 = arith.mulf %153, %152 : vector<8x128xf32>
    %155 = arith.addf %144, %154 : vector<8x128xf32>
    %156 = vector.extract_strided_slice %0 {offsets = [0, 14], sizes = [8, 1], strides = [1, 1]} : vector<8x256xf32> to vector<8x1xf32>
    %c14 = arith.constant 14 : index
    %c0_44 = arith.constant 0 : index
    %157 = vector.load %arg3[%c14, %c0_44] : memref<256x128xf32, #tpu.memory_space<vmem>>, vector<1x128xf32>
    %c14_45 = arith.constant 14 : index
    %158 = memref.load %arg4[%c14_45] : memref<256xf32, #tpu.memory_space<smem>>
    %159 = vector.broadcast %156 : vector<8x1xf32> to vector<8x128xf32>
    %160 = vector.broadcast %157 : vector<1x128xf32> to vector<8x128xf32>
    %161 = arith.addf %159, %160 : vector<8x128xf32>
    %cst_46 = arith.constant 0.000000e+00 : f32
    %162 = vector.broadcast %cst_46 : f32 to vector<8x128xf32>
    %163 = arith.maximumf %161, %162 : vector<8x128xf32>
    %164 = vector.broadcast %158 : f32 to vector<8x128xf32>
    %165 = arith.mulf %164, %163 : vector<8x128xf32>
    %166 = arith.addf %155, %165 : vector<8x128xf32>
    %167 = vector.extract_strided_slice %0 {offsets = [0, 15], sizes = [8, 1], strides = [1, 1]} : vector<8x256xf32> to vector<8x1xf32>
    %c15 = arith.constant 15 : index
    %c0_47 = arith.constant 0 : index
    %168 = vector.load %arg3[%c15, %c0_47] : memref<256x128xf32, #tpu.memory_space<vmem>>, vector<1x128xf32>
    %c15_48 = arith.constant 15 : index
    %169 = memref.load %arg4[%c15_48] : memref<256xf32, #tpu.memory_space<smem>>
    %170 = vector.broadcast %167 : vector<8x1xf32> to vector<8x128xf32>
    %171 = vector.broadcast %168 : vector<1x128xf32> to vector<8x128xf32>
    %172 = arith.addf %170, %171 : vector<8x128xf32>
    %cst_49 = arith.constant 0.000000e+00 : f32
    %173 = vector.broadcast %cst_49 : f32 to vector<8x128xf32>
    %174 = arith.maximumf %172, %173 : vector<8x128xf32>
    %175 = vector.broadcast %169 : f32 to vector<8x128xf32>
    %176 = arith.mulf %175, %174 : vector<8x128xf32>
    %177 = arith.addf %166, %176 : vector<8x128xf32>
    %178 = vector.extract_strided_slice %0 {offsets = [0, 16], sizes = [8, 1], strides = [1, 1]} : vector<8x256xf32> to vector<8x1xf32>
    %c16 = arith.constant 16 : index
    %c0_50 = arith.constant 0 : index
    %179 = vector.load %arg3[%c16, %c0_50] : memref<256x128xf32, #tpu.memory_space<vmem>>, vector<1x128xf32>
    %c16_51 = arith.constant 16 : index
    %180 = memref.load %arg4[%c16_51] : memref<256xf32, #tpu.memory_space<smem>>
    %181 = vector.broadcast %178 : vector<8x1xf32> to vector<8x128xf32>
    %182 = vector.broadcast %179 : vector<1x128xf32> to vector<8x128xf32>
    %183 = arith.addf %181, %182 : vector<8x128xf32>
    %cst_52 = arith.constant 0.000000e+00 : f32
    %184 = vector.broadcast %cst_52 : f32 to vector<8x128xf32>
    %185 = arith.maximumf %183, %184 : vector<8x128xf32>
    %186 = vector.broadcast %180 : f32 to vector<8x128xf32>
    %187 = arith.mulf %186, %185 : vector<8x128xf32>
    %188 = arith.addf %177, %187 : vector<8x128xf32>
    %189 = vector.extract_strided_slice %0 {offsets = [0, 17], sizes = [8, 1], strides = [1, 1]} : vector<8x256xf32> to vector<8x1xf32>
    %c17 = arith.constant 17 : index
    %c0_53 = arith.constant 0 : index
    %190 = vector.load %arg3[%c17, %c0_53] : memref<256x128xf32, #tpu.memory_space<vmem>>, vector<1x128xf32>
    %c17_54 = arith.constant 17 : index
    %191 = memref.load %arg4[%c17_54] : memref<256xf32, #tpu.memory_space<smem>>
    %192 = vector.broadcast %189 : vector<8x1xf32> to vector<8x128xf32>
    %193 = vector.broadcast %190 : vector<1x128xf32> to vector<8x128xf32>
    %194 = arith.addf %192, %193 : vector<8x128xf32>
    %cst_55 = arith.constant 0.000000e+00 : f32
    %195 = vector.broadcast %cst_55 : f32 to vector<8x128xf32>
    %196 = arith.maximumf %194, %195 : vector<8x128xf32>
    %197 = vector.broadcast %191 : f32 to vector<8x128xf32>
    %198 = arith.mulf %197, %196 : vector<8x128xf32>
    %199 = arith.addf %188, %198 : vector<8x128xf32>
    %200 = vector.extract_strided_slice %0 {offsets = [0, 18], sizes = [8, 1], strides = [1, 1]} : vector<8x256xf32> to vector<8x1xf32>
    %c18 = arith.constant 18 : index
    %c0_56 = arith.constant 0 : index
    %201 = vector.load %arg3[%c18, %c0_56] : memref<256x128xf32, #tpu.memory_space<vmem>>, vector<1x128xf32>
    %c18_57 = arith.constant 18 : index
    %202 = memref.load %arg4[%c18_57] : memref<256xf32, #tpu.memory_space<smem>>
    %203 = vector.broadcast %200 : vector<8x1xf32> to vector<8x128xf32>
    %204 = vector.broadcast %201 : vector<1x128xf32> to vector<8x128xf32>
    %205 = arith.addf %203, %204 : vector<8x128xf32>
    %cst_58 = arith.constant 0.000000e+00 : f32
    %206 = vector.broadcast %cst_58 : f32 to vector<8x128xf32>
    %207 = arith.maximumf %205, %206 : vector<8x128xf32>
    %208 = vector.broadcast %202 : f32 to vector<8x128xf32>
    %209 = arith.mulf %208, %207 : vector<8x128xf32>
    %210 = arith.addf %199, %209 : vector<8x128xf32>
    %211 = vector.extract_strided_slice %0 {offsets = [0, 19], sizes = [8, 1], strides = [1, 1]} : vector<8x256xf32> to vector<8x1xf32>
    %c19 = arith.constant 19 : index
    %c0_59 = arith.constant 0 : index
    %212 = vector.load %arg3[%c19, %c0_59] : memref<256x128xf32, #tpu.memory_space<vmem>>, vector<1x128xf32>
    %c19_60 = arith.constant 19 : index
    %213 = memref.load %arg4[%c19_60] : memref<256xf32, #tpu.memory_space<smem>>
    %214 = vector.broadcast %211 : vector<8x1xf32> to vector<8x128xf32>
    %215 = vector.broadcast %212 : vector<1x128xf32> to vector<8x128xf32>
    %216 = arith.addf %214, %215 : vector<8x128xf32>
    %cst_61 = arith.constant 0.000000e+00 : f32
    %217 = vector.broadcast %cst_61 : f32 to vector<8x128xf32>
    %218 = arith.maximumf %216, %217 : vector<8x128xf32>
    %219 = vector.broadcast %213 : f32 to vector<8x128xf32>
    %220 = arith.mulf %219, %218 : vector<8x128xf32>
    %221 = arith.addf %210, %220 : vector<8x128xf32>
    %222 = vector.extract_strided_slice %0 {offsets = [0, 20], sizes = [8, 1], strides = [1, 1]} : vector<8x256xf32> to vector<8x1xf32>
    %c20 = arith.constant 20 : index
    %c0_62 = arith.constant 0 : index
    %223 = vector.load %arg3[%c20, %c0_62] : memref<256x128xf32, #tpu.memory_space<vmem>>, vector<1x128xf32>
    %c20_63 = arith.constant 20 : index
    %224 = memref.load %arg4[%c20_63] : memref<256xf32, #tpu.memory_space<smem>>
    %225 = vector.broadcast %222 : vector<8x1xf32> to vector<8x128xf32>
    %226 = vector.broadcast %223 : vector<1x128xf32> to vector<8x128xf32>
    %227 = arith.addf %225, %226 : vector<8x128xf32>
    %cst_64 = arith.constant 0.000000e+00 : f32
    %228 = vector.broadcast %cst_64 : f32 to vector<8x128xf32>
    %229 = arith.maximumf %227, %228 : vector<8x128xf32>
    %230 = vector.broadcast %224 : f32 to vector<8x128xf32>
    %231 = arith.mulf %230, %229 : vector<8x128xf32>
    %232 = arith.addf %221, %231 : vector<8x128xf32>
    %233 = vector.extract_strided_slice %0 {offsets = [0, 21], sizes = [8, 1], strides = [1, 1]} : vector<8x256xf32> to vector<8x1xf32>
    %c21 = arith.constant 21 : index
    %c0_65 = arith.constant 0 : index
    %234 = vector.load %arg3[%c21, %c0_65] : memref<256x128xf32, #tpu.memory_space<vmem>>, vector<1x128xf32>
    %c21_66 = arith.constant 21 : index
    %235 = memref.load %arg4[%c21_66] : memref<256xf32, #tpu.memory_space<smem>>
    %236 = vector.broadcast %233 : vector<8x1xf32> to vector<8x128xf32>
    %237 = vector.broadcast %234 : vector<1x128xf32> to vector<8x128xf32>
    %238 = arith.addf %236, %237 : vector<8x128xf32>
    %cst_67 = arith.constant 0.000000e+00 : f32
    %239 = vector.broadcast %cst_67 : f32 to vector<8x128xf32>
    %240 = arith.maximumf %238, %239 : vector<8x128xf32>
    %241 = vector.broadcast %235 : f32 to vector<8x128xf32>
    %242 = arith.mulf %241, %240 : vector<8x128xf32>
    %243 = arith.addf %232, %242 : vector<8x128xf32>
    %244 = vector.extract_strided_slice %0 {offsets = [0, 22], sizes = [8, 1], strides = [1, 1]} : vector<8x256xf32> to vector<8x1xf32>
    %c22 = arith.constant 22 : index
    %c0_68 = arith.constant 0 : index
    %245 = vector.load %arg3[%c22, %c0_68] : memref<256x128xf32, #tpu.memory_space<vmem>>, vector<1x128xf32>
    %c22_69 = arith.constant 22 : index
    %246 = memref.load %arg4[%c22_69] : memref<256xf32, #tpu.memory_space<smem>>
    %247 = vector.broadcast %244 : vector<8x1xf32> to vector<8x128xf32>
    %248 = vector.broadcast %245 : vector<1x128xf32> to vector<8x128xf32>
    %249 = arith.addf %247, %248 : vector<8x128xf32>
    %cst_70 = arith.constant 0.000000e+00 : f32
    %250 = vector.broadcast %cst_70 : f32 to vector<8x128xf32>
    %251 = arith.maximumf %249, %250 : vector<8x128xf32>
    %252 = vector.broadcast %246 : f32 to vector<8x128xf32>
    %253 = arith.mulf %252, %251 : vector<8x128xf32>
    %254 = arith.addf %243, %253 : vector<8x128xf32>
    %255 = vector.extract_strided_slice %0 {offsets = [0, 23], sizes = [8, 1], strides = [1, 1]} : vector<8x256xf32> to vector<8x1xf32>
    %c23 = arith.constant 23 : index
    %c0_71 = arith.constant 0 : index
    %256 = vector.load %arg3[%c23, %c0_71] : memref<256x128xf32, #tpu.memory_space<vmem>>, vector<1x128xf32>
    %c23_72 = arith.constant 23 : index
    %257 = memref.load %arg4[%c23_72] : memref<256xf32, #tpu.memory_space<smem>>
    %258 = vector.broadcast %255 : vector<8x1xf32> to vector<8x128xf32>
    %259 = vector.broadcast %256 : vector<1x128xf32> to vector<8x128xf32>
    %260 = arith.addf %258, %259 : vector<8x128xf32>
    %cst_73 = arith.constant 0.000000e+00 : f32
    %261 = vector.broadcast %cst_73 : f32 to vector<8x128xf32>
    %262 = arith.maximumf %260, %261 : vector<8x128xf32>
    %263 = vector.broadcast %257 : f32 to vector<8x128xf32>
    %264 = arith.mulf %263, %262 : vector<8x128xf32>
    %265 = arith.addf %254, %264 : vector<8x128xf32>
    %266 = vector.extract_strided_slice %0 {offsets = [0, 24], sizes = [8, 1], strides = [1, 1]} : vector<8x256xf32> to vector<8x1xf32>
    %c24 = arith.constant 24 : index
    %c0_74 = arith.constant 0 : index
    %267 = vector.load %arg3[%c24, %c0_74] : memref<256x128xf32, #tpu.memory_space<vmem>>, vector<1x128xf32>
    %c24_75 = arith.constant 24 : index
    %268 = memref.load %arg4[%c24_75] : memref<256xf32, #tpu.memory_space<smem>>
    %269 = vector.broadcast %266 : vector<8x1xf32> to vector<8x128xf32>
    %270 = vector.broadcast %267 : vector<1x128xf32> to vector<8x128xf32>
    %271 = arith.addf %269, %270 : vector<8x128xf32>
    %cst_76 = arith.constant 0.000000e+00 : f32
    %272 = vector.broadcast %cst_76 : f32 to vector<8x128xf32>
    %273 = arith.maximumf %271, %272 : vector<8x128xf32>
    %274 = vector.broadcast %268 : f32 to vector<8x128xf32>
    %275 = arith.mulf %274, %273 : vector<8x128xf32>
    %276 = arith.addf %265, %275 : vector<8x128xf32>
    %277 = vector.extract_strided_slice %0 {offsets = [0, 25], sizes = [8, 1], strides = [1, 1]} : vector<8x256xf32> to vector<8x1xf32>
    %c25 = arith.constant 25 : index
    %c0_77 = arith.constant 0 : index
    %278 = vector.load %arg3[%c25, %c0_77] : memref<256x128xf32, #tpu.memory_space<vmem>>, vector<1x128xf32>
    %c25_78 = arith.constant 25 : index
    %279 = memref.load %arg4[%c25_78] : memref<256xf32, #tpu.memory_space<smem>>
    %280 = vector.broadcast %277 : vector<8x1xf32> to vector<8x128xf32>
    %281 = vector.broadcast %278 : vector<1x128xf32> to vector<8x128xf32>
    %282 = arith.addf %280, %281 : vector<8x128xf32>
    %cst_79 = arith.constant 0.000000e+00 : f32
    %283 = vector.broadcast %cst_79 : f32 to vector<8x128xf32>
    %284 = arith.maximumf %282, %283 : vector<8x128xf32>
    %285 = vector.broadcast %279 : f32 to vector<8x128xf32>
    %286 = arith.mulf %285, %284 : vector<8x128xf32>
    %287 = arith.addf %276, %286 : vector<8x128xf32>
    %288 = vector.extract_strided_slice %0 {offsets = [0, 26], sizes = [8, 1], strides = [1, 1]} : vector<8x256xf32> to vector<8x1xf32>
    %c26 = arith.constant 26 : index
    %c0_80 = arith.constant 0 : index
    %289 = vector.load %arg3[%c26, %c0_80] : memref<256x128xf32, #tpu.memory_space<vmem>>, vector<1x128xf32>
    %c26_81 = arith.constant 26 : index
    %290 = memref.load %arg4[%c26_81] : memref<256xf32, #tpu.memory_space<smem>>
    %291 = vector.broadcast %288 : vector<8x1xf32> to vector<8x128xf32>
    %292 = vector.broadcast %289 : vector<1x128xf32> to vector<8x128xf32>
    %293 = arith.addf %291, %292 : vector<8x128xf32>
    %cst_82 = arith.constant 0.000000e+00 : f32
    %294 = vector.broadcast %cst_82 : f32 to vector<8x128xf32>
    %295 = arith.maximumf %293, %294 : vector<8x128xf32>
    %296 = vector.broadcast %290 : f32 to vector<8x128xf32>
    %297 = arith.mulf %296, %295 : vector<8x128xf32>
    %298 = arith.addf %287, %297 : vector<8x128xf32>
    %299 = vector.extract_strided_slice %0 {offsets = [0, 27], sizes = [8, 1], strides = [1, 1]} : vector<8x256xf32> to vector<8x1xf32>
    %c27 = arith.constant 27 : index
    %c0_83 = arith.constant 0 : index
    %300 = vector.load %arg3[%c27, %c0_83] : memref<256x128xf32, #tpu.memory_space<vmem>>, vector<1x128xf32>
    %c27_84 = arith.constant 27 : index
    %301 = memref.load %arg4[%c27_84] : memref<256xf32, #tpu.memory_space<smem>>
    %302 = vector.broadcast %299 : vector<8x1xf32> to vector<8x128xf32>
    %303 = vector.broadcast %300 : vector<1x128xf32> to vector<8x128xf32>
    %304 = arith.addf %302, %303 : vector<8x128xf32>
    %cst_85 = arith.constant 0.000000e+00 : f32
    %305 = vector.broadcast %cst_85 : f32 to vector<8x128xf32>
    %306 = arith.maximumf %304, %305 : vector<8x128xf32>
    %307 = vector.broadcast %301 : f32 to vector<8x128xf32>
    %308 = arith.mulf %307, %306 : vector<8x128xf32>
    %309 = arith.addf %298, %308 : vector<8x128xf32>
    %310 = vector.extract_strided_slice %0 {offsets = [0, 28], sizes = [8, 1], strides = [1, 1]} : vector<8x256xf32> to vector<8x1xf32>
    %c28 = arith.constant 28 : index
    %c0_86 = arith.constant 0 : index
    %311 = vector.load %arg3[%c28, %c0_86] : memref<256x128xf32, #tpu.memory_space<vmem>>, vector<1x128xf32>
    %c28_87 = arith.constant 28 : index
    %312 = memref.load %arg4[%c28_87] : memref<256xf32, #tpu.memory_space<smem>>
    %313 = vector.broadcast %310 : vector<8x1xf32> to vector<8x128xf32>
    %314 = vector.broadcast %311 : vector<1x128xf32> to vector<8x128xf32>
    %315 = arith.addf %313, %314 : vector<8x128xf32>
    %cst_88 = arith.constant 0.000000e+00 : f32
    %316 = vector.broadcast %cst_88 : f32 to vector<8x128xf32>
    %317 = arith.maximumf %315, %316 : vector<8x128xf32>
    %318 = vector.broadcast %312 : f32 to vector<8x128xf32>
    %319 = arith.mulf %318, %317 : vector<8x128xf32>
    %320 = arith.addf %309, %319 : vector<8x128xf32>
    %321 = vector.extract_strided_slice %0 {offsets = [0, 29], sizes = [8, 1], strides = [1, 1]} : vector<8x256xf32> to vector<8x1xf32>
    %c29 = arith.constant 29 : index
    %c0_89 = arith.constant 0 : index
    %322 = vector.load %arg3[%c29, %c0_89] : memref<256x128xf32, #tpu.memory_space<vmem>>, vector<1x128xf32>
    %c29_90 = arith.constant 29 : index
    %323 = memref.load %arg4[%c29_90] : memref<256xf32, #tpu.memory_space<smem>>
    %324 = vector.broadcast %321 : vector<8x1xf32> to vector<8x128xf32>
    %325 = vector.broadcast %322 : vector<1x128xf32> to vector<8x128xf32>
    %326 = arith.addf %324, %325 : vector<8x128xf32>
    %cst_91 = arith.constant 0.000000e+00 : f32
    %327 = vector.broadcast %cst_91 : f32 to vector<8x128xf32>
    %328 = arith.maximumf %326, %327 : vector<8x128xf32>
    %329 = vector.broadcast %323 : f32 to vector<8x128xf32>
    %330 = arith.mulf %329, %328 : vector<8x128xf32>
    %331 = arith.addf %320, %330 : vector<8x128xf32>
    %332 = vector.extract_strided_slice %0 {offsets = [0, 30], sizes = [8, 1], strides = [1, 1]} : vector<8x256xf32> to vector<8x1xf32>
    %c30 = arith.constant 30 : index
    %c0_92 = arith.constant 0 : index
    %333 = vector.load %arg3[%c30, %c0_92] : memref<256x128xf32, #tpu.memory_space<vmem>>, vector<1x128xf32>
    %c30_93 = arith.constant 30 : index
    %334 = memref.load %arg4[%c30_93] : memref<256xf32, #tpu.memory_space<smem>>
    %335 = vector.broadcast %332 : vector<8x1xf32> to vector<8x128xf32>
    %336 = vector.broadcast %333 : vector<1x128xf32> to vector<8x128xf32>
    %337 = arith.addf %335, %336 : vector<8x128xf32>
    %cst_94 = arith.constant 0.000000e+00 : f32
    %338 = vector.broadcast %cst_94 : f32 to vector<8x128xf32>
    %339 = arith.maximumf %337, %338 : vector<8x128xf32>
    %340 = vector.broadcast %334 : f32 to vector<8x128xf32>
    %341 = arith.mulf %340, %339 : vector<8x128xf32>
    %342 = arith.addf %331, %341 : vector<8x128xf32>
    %343 = vector.extract_strided_slice %0 {offsets = [0, 31], sizes = [8, 1], strides = [1, 1]} : vector<8x256xf32> to vector<8x1xf32>
    %c31 = arith.constant 31 : index
    %c0_95 = arith.constant 0 : index
    %344 = vector.load %arg3[%c31, %c0_95] : memref<256x128xf32, #tpu.memory_space<vmem>>, vector<1x128xf32>
    %c31_96 = arith.constant 31 : index
    %345 = memref.load %arg4[%c31_96] : memref<256xf32, #tpu.memory_space<smem>>
    %346 = vector.broadcast %343 : vector<8x1xf32> to vector<8x128xf32>
    %347 = vector.broadcast %344 : vector<1x128xf32> to vector<8x128xf32>
    %348 = arith.addf %346, %347 : vector<8x128xf32>
    %cst_97 = arith.constant 0.000000e+00 : f32
    %349 = vector.broadcast %cst_97 : f32 to vector<8x128xf32>
    %350 = arith.maximumf %348, %349 : vector<8x128xf32>
    %351 = vector.broadcast %345 : f32 to vector<8x128xf32>
    %352 = arith.mulf %351, %350 : vector<8x128xf32>
    %353 = arith.addf %342, %352 : vector<8x128xf32>
    %354 = vector.extract_strided_slice %0 {offsets = [0, 32], sizes = [8, 1], strides = [1, 1]} : vector<8x256xf32> to vector<8x1xf32>
    %c32 = arith.constant 32 : index
    %c0_98 = arith.constant 0 : index
    %355 = vector.load %arg3[%c32, %c0_98] : memref<256x128xf32, #tpu.memory_space<vmem>>, vector<1x128xf32>
    %c32_99 = arith.constant 32 : index
    %356 = memref.load %arg4[%c32_99] : memref<256xf32, #tpu.memory_space<smem>>
    %357 = vector.broadcast %354 : vector<8x1xf32> to vector<8x128xf32>
    %358 = vector.broadcast %355 : vector<1x128xf32> to vector<8x128xf32>
    %359 = arith.addf %357, %358 : vector<8x128xf32>
    %cst_100 = arith.constant 0.000000e+00 : f32
    %360 = vector.broadcast %cst_100 : f32 to vector<8x128xf32>
    %361 = arith.maximumf %359, %360 : vector<8x128xf32>
    %362 = vector.broadcast %356 : f32 to vector<8x128xf32>
    %363 = arith.mulf %362, %361 : vector<8x128xf32>
    %364 = arith.addf %353, %363 : vector<8x128xf32>
    %365 = vector.extract_strided_slice %0 {offsets = [0, 33], sizes = [8, 1], strides = [1, 1]} : vector<8x256xf32> to vector<8x1xf32>
    %c33 = arith.constant 33 : index
    %c0_101 = arith.constant 0 : index
    %366 = vector.load %arg3[%c33, %c0_101] : memref<256x128xf32, #tpu.memory_space<vmem>>, vector<1x128xf32>
    %c33_102 = arith.constant 33 : index
    %367 = memref.load %arg4[%c33_102] : memref<256xf32, #tpu.memory_space<smem>>
    %368 = vector.broadcast %365 : vector<8x1xf32> to vector<8x128xf32>
    %369 = vector.broadcast %366 : vector<1x128xf32> to vector<8x128xf32>
    %370 = arith.addf %368, %369 : vector<8x128xf32>
    %cst_103 = arith.constant 0.000000e+00 : f32
    %371 = vector.broadcast %cst_103 : f32 to vector<8x128xf32>
    %372 = arith.maximumf %370, %371 : vector<8x128xf32>
    %373 = vector.broadcast %367 : f32 to vector<8x128xf32>
    %374 = arith.mulf %373, %372 : vector<8x128xf32>
    %375 = arith.addf %364, %374 : vector<8x128xf32>
    %376 = vector.extract_strided_slice %0 {offsets = [0, 34], sizes = [8, 1], strides = [1, 1]} : vector<8x256xf32> to vector<8x1xf32>
    %c34 = arith.constant 34 : index
    %c0_104 = arith.constant 0 : index
    %377 = vector.load %arg3[%c34, %c0_104] : memref<256x128xf32, #tpu.memory_space<vmem>>, vector<1x128xf32>
    %c34_105 = arith.constant 34 : index
    %378 = memref.load %arg4[%c34_105] : memref<256xf32, #tpu.memory_space<smem>>
    %379 = vector.broadcast %376 : vector<8x1xf32> to vector<8x128xf32>
    %380 = vector.broadcast %377 : vector<1x128xf32> to vector<8x128xf32>
    %381 = arith.addf %379, %380 : vector<8x128xf32>
    %cst_106 = arith.constant 0.000000e+00 : f32
    %382 = vector.broadcast %cst_106 : f32 to vector<8x128xf32>
    %383 = arith.maximumf %381, %382 : vector<8x128xf32>
    %384 = vector.broadcast %378 : f32 to vector<8x128xf32>
    %385 = arith.mulf %384, %383 : vector<8x128xf32>
    %386 = arith.addf %375, %385 : vector<8x128xf32>
    %387 = vector.extract_strided_slice %0 {offsets = [0, 35], sizes = [8, 1], strides = [1, 1]} : vector<8x256xf32> to vector<8x1xf32>
    %c35 = arith.constant 35 : index
    %c0_107 = arith.constant 0 : index
    %388 = vector.load %arg3[%c35, %c0_107] : memref<256x128xf32, #tpu.memory_space<vmem>>, vector<1x128xf32>
    %c35_108 = arith.constant 35 : index
    %389 = memref.load %arg4[%c35_108] : memref<256xf32, #tpu.memory_space<smem>>
    %390 = vector.broadcast %387 : vector<8x1xf32> to vector<8x128xf32>
    %391 = vector.broadcast %388 : vector<1x128xf32> to vector<8x128xf32>
    %392 = arith.addf %390, %391 : vector<8x128xf32>
    %cst_109 = arith.constant 0.000000e+00 : f32
    %393 = vector.broadcast %cst_109 : f32 to vector<8x128xf32>
    %394 = arith.maximumf %392, %393 : vector<8x128xf32>
    %395 = vector.broadcast %389 : f32 to vector<8x128xf32>
    %396 = arith.mulf %395, %394 : vector<8x128xf32>
    %397 = arith.addf %386, %396 : vector<8x128xf32>
    %398 = vector.extract_strided_slice %0 {offsets = [0, 36], sizes = [8, 1], strides = [1, 1]} : vector<8x256xf32> to vector<8x1xf32>
    %c36 = arith.constant 36 : index
    %c0_110 = arith.constant 0 : index
    %399 = vector.load %arg3[%c36, %c0_110] : memref<256x128xf32, #tpu.memory_space<vmem>>, vector<1x128xf32>
    %c36_111 = arith.constant 36 : index
    %400 = memref.load %arg4[%c36_111] : memref<256xf32, #tpu.memory_space<smem>>
    %401 = vector.broadcast %398 : vector<8x1xf32> to vector<8x128xf32>
    %402 = vector.broadcast %399 : vector<1x128xf32> to vector<8x128xf32>
    %403 = arith.addf %401, %402 : vector<8x128xf32>
    %cst_112 = arith.constant 0.000000e+00 : f32
    %404 = vector.broadcast %cst_112 : f32 to vector<8x128xf32>
    %405 = arith.maximumf %403, %404 : vector<8x128xf32>
    %406 = vector.broadcast %400 : f32 to vector<8x128xf32>
    %407 = arith.mulf %406, %405 : vector<8x128xf32>
    %408 = arith.addf %397, %407 : vector<8x128xf32>
    %409 = vector.extract_strided_slice %0 {offsets = [0, 37], sizes = [8, 1], strides = [1, 1]} : vector<8x256xf32> to vector<8x1xf32>
    %c37 = arith.constant 37 : index
    %c0_113 = arith.constant 0 : index
    %410 = vector.load %arg3[%c37, %c0_113] : memref<256x128xf32, #tpu.memory_space<vmem>>, vector<1x128xf32>
    %c37_114 = arith.constant 37 : index
    %411 = memref.load %arg4[%c37_114] : memref<256xf32, #tpu.memory_space<smem>>
    %412 = vector.broadcast %409 : vector<8x1xf32> to vector<8x128xf32>
    %413 = vector.broadcast %410 : vector<1x128xf32> to vector<8x128xf32>
    %414 = arith.addf %412, %413 : vector<8x128xf32>
    %cst_115 = arith.constant 0.000000e+00 : f32
    %415 = vector.broadcast %cst_115 : f32 to vector<8x128xf32>
    %416 = arith.maximumf %414, %415 : vector<8x128xf32>
    %417 = vector.broadcast %411 : f32 to vector<8x128xf32>
    %418 = arith.mulf %417, %416 : vector<8x128xf32>
    %419 = arith.addf %408, %418 : vector<8x128xf32>
    %420 = vector.extract_strided_slice %0 {offsets = [0, 38], sizes = [8, 1], strides = [1, 1]} : vector<8x256xf32> to vector<8x1xf32>
    %c38 = arith.constant 38 : index
    %c0_116 = arith.constant 0 : index
    %421 = vector.load %arg3[%c38, %c0_116] : memref<256x128xf32, #tpu.memory_space<vmem>>, vector<1x128xf32>
    %c38_117 = arith.constant 38 : index
    %422 = memref.load %arg4[%c38_117] : memref<256xf32, #tpu.memory_space<smem>>
    %423 = vector.broadcast %420 : vector<8x1xf32> to vector<8x128xf32>
    %424 = vector.broadcast %421 : vector<1x128xf32> to vector<8x128xf32>
    %425 = arith.addf %423, %424 : vector<8x128xf32>
    %cst_118 = arith.constant 0.000000e+00 : f32
    %426 = vector.broadcast %cst_118 : f32 to vector<8x128xf32>
    %427 = arith.maximumf %425, %426 : vector<8x128xf32>
    %428 = vector.broadcast %422 : f32 to vector<8x128xf32>
    %429 = arith.mulf %428, %427 : vector<8x128xf32>
    %430 = arith.addf %419, %429 : vector<8x128xf32>
    %431 = vector.extract_strided_slice %0 {offsets = [0, 39], sizes = [8, 1], strides = [1, 1]} : vector<8x256xf32> to vector<8x1xf32>
    %c39 = arith.constant 39 : index
    %c0_119 = arith.constant 0 : index
    %432 = vector.load %arg3[%c39, %c0_119] : memref<256x128xf32, #tpu.memory_space<vmem>>, vector<1x128xf32>
    %c39_120 = arith.constant 39 : index
    %433 = memref.load %arg4[%c39_120] : memref<256xf32, #tpu.memory_space<smem>>
    %434 = vector.broadcast %431 : vector<8x1xf32> to vector<8x128xf32>
    %435 = vector.broadcast %432 : vector<1x128xf32> to vector<8x128xf32>
    %436 = arith.addf %434, %435 : vector<8x128xf32>
    %cst_121 = arith.constant 0.000000e+00 : f32
    %437 = vector.broadcast %cst_121 : f32 to vector<8x128xf32>
    %438 = arith.maximumf %436, %437 : vector<8x128xf32>
    %439 = vector.broadcast %433 : f32 to vector<8x128xf32>
    %440 = arith.mulf %439, %438 : vector<8x128xf32>
    %441 = arith.addf %430, %440 : vector<8x128xf32>
    %442 = vector.extract_strided_slice %0 {offsets = [0, 40], sizes = [8, 1], strides = [1, 1]} : vector<8x256xf32> to vector<8x1xf32>
    %c40 = arith.constant 40 : index
    %c0_122 = arith.constant 0 : index
    %443 = vector.load %arg3[%c40, %c0_122] : memref<256x128xf32, #tpu.memory_space<vmem>>, vector<1x128xf32>
    %c40_123 = arith.constant 40 : index
    %444 = memref.load %arg4[%c40_123] : memref<256xf32, #tpu.memory_space<smem>>
    %445 = vector.broadcast %442 : vector<8x1xf32> to vector<8x128xf32>
    %446 = vector.broadcast %443 : vector<1x128xf32> to vector<8x128xf32>
    %447 = arith.addf %445, %446 : vector<8x128xf32>
    %cst_124 = arith.constant 0.000000e+00 : f32
    %448 = vector.broadcast %cst_124 : f32 to vector<8x128xf32>
    %449 = arith.maximumf %447, %448 : vector<8x128xf32>
    %450 = vector.broadcast %444 : f32 to vector<8x128xf32>
    %451 = arith.mulf %450, %449 : vector<8x128xf32>
    %452 = arith.addf %441, %451 : vector<8x128xf32>
    %453 = vector.extract_strided_slice %0 {offsets = [0, 41], sizes = [8, 1], strides = [1, 1]} : vector<8x256xf32> to vector<8x1xf32>
    %c41 = arith.constant 41 : index
    %c0_125 = arith.constant 0 : index
    %454 = vector.load %arg3[%c41, %c0_125] : memref<256x128xf32, #tpu.memory_space<vmem>>, vector<1x128xf32>
    %c41_126 = arith.constant 41 : index
    %455 = memref.load %arg4[%c41_126] : memref<256xf32, #tpu.memory_space<smem>>
    %456 = vector.broadcast %453 : vector<8x1xf32> to vector<8x128xf32>
    %457 = vector.broadcast %454 : vector<1x128xf32> to vector<8x128xf32>
    %458 = arith.addf %456, %457 : vector<8x128xf32>
    %cst_127 = arith.constant 0.000000e+00 : f32
    %459 = vector.broadcast %cst_127 : f32 to vector<8x128xf32>
    %460 = arith.maximumf %458, %459 : vector<8x128xf32>
    %461 = vector.broadcast %455 : f32 to vector<8x128xf32>
    %462 = arith.mulf %461, %460 : vector<8x128xf32>
    %463 = arith.addf %452, %462 : vector<8x128xf32>
    %464 = vector.extract_strided_slice %0 {offsets = [0, 42], sizes = [8, 1], strides = [1, 1]} : vector<8x256xf32> to vector<8x1xf32>
    %c42 = arith.constant 42 : index
    %c0_128 = arith.constant 0 : index
    %465 = vector.load %arg3[%c42, %c0_128] : memref<256x128xf32, #tpu.memory_space<vmem>>, vector<1x128xf32>
    %c42_129 = arith.constant 42 : index
    %466 = memref.load %arg4[%c42_129] : memref<256xf32, #tpu.memory_space<smem>>
    %467 = vector.broadcast %464 : vector<8x1xf32> to vector<8x128xf32>
    %468 = vector.broadcast %465 : vector<1x128xf32> to vector<8x128xf32>
    %469 = arith.addf %467, %468 : vector<8x128xf32>
    %cst_130 = arith.constant 0.000000e+00 : f32
    %470 = vector.broadcast %cst_130 : f32 to vector<8x128xf32>
    %471 = arith.maximumf %469, %470 : vector<8x128xf32>
    %472 = vector.broadcast %466 : f32 to vector<8x128xf32>
    %473 = arith.mulf %472, %471 : vector<8x128xf32>
    %474 = arith.addf %463, %473 : vector<8x128xf32>
    %475 = vector.extract_strided_slice %0 {offsets = [0, 43], sizes = [8, 1], strides = [1, 1]} : vector<8x256xf32> to vector<8x1xf32>
    %c43 = arith.constant 43 : index
    %c0_131 = arith.constant 0 : index
    %476 = vector.load %arg3[%c43, %c0_131] : memref<256x128xf32, #tpu.memory_space<vmem>>, vector<1x128xf32>
    %c43_132 = arith.constant 43 : index
    %477 = memref.load %arg4[%c43_132] : memref<256xf32, #tpu.memory_space<smem>>
    %478 = vector.broadcast %475 : vector<8x1xf32> to vector<8x128xf32>
    %479 = vector.broadcast %476 : vector<1x128xf32> to vector<8x128xf32>
    %480 = arith.addf %478, %479 : vector<8x128xf32>
    %cst_133 = arith.constant 0.000000e+00 : f32
    %481 = vector.broadcast %cst_133 : f32 to vector<8x128xf32>
    %482 = arith.maximumf %480, %481 : vector<8x128xf32>
    %483 = vector.broadcast %477 : f32 to vector<8x128xf32>
    %484 = arith.mulf %483, %482 : vector<8x128xf32>
    %485 = arith.addf %474, %484 : vector<8x128xf32>
    %486 = vector.extract_strided_slice %0 {offsets = [0, 44], sizes = [8, 1], strides = [1, 1]} : vector<8x256xf32> to vector<8x1xf32>
    %c44 = arith.constant 44 : index
    %c0_134 = arith.constant 0 : index
    %487 = vector.load %arg3[%c44, %c0_134] : memref<256x128xf32, #tpu.memory_space<vmem>>, vector<1x128xf32>
    %c44_135 = arith.constant 44 : index
    %488 = memref.load %arg4[%c44_135] : memref<256xf32, #tpu.memory_space<smem>>
    %489 = vector.broadcast %486 : vector<8x1xf32> to vector<8x128xf32>
    %490 = vector.broadcast %487 : vector<1x128xf32> to vector<8x128xf32>
    %491 = arith.addf %489, %490 : vector<8x128xf32>
    %cst_136 = arith.constant 0.000000e+00 : f32
    %492 = vector.broadcast %cst_136 : f32 to vector<8x128xf32>
    %493 = arith.maximumf %491, %492 : vector<8x128xf32>
    %494 = vector.broadcast %488 : f32 to vector<8x128xf32>
    %495 = arith.mulf %494, %493 : vector<8x128xf32>
    %496 = arith.addf %485, %495 : vector<8x128xf32>
    %497 = vector.extract_strided_slice %0 {offsets = [0, 45], sizes = [8, 1], strides = [1, 1]} : vector<8x256xf32> to vector<8x1xf32>
    %c45 = arith.constant 45 : index
    %c0_137 = arith.constant 0 : index
    %498 = vector.load %arg3[%c45, %c0_137] : memref<256x128xf32, #tpu.memory_space<vmem>>, vector<1x128xf32>
    %c45_138 = arith.constant 45 : index
    %499 = memref.load %arg4[%c45_138] : memref<256xf32, #tpu.memory_space<smem>>
    %500 = vector.broadcast %497 : vector<8x1xf32> to vector<8x128xf32>
    %501 = vector.broadcast %498 : vector<1x128xf32> to vector<8x128xf32>
    %502 = arith.addf %500, %501 : vector<8x128xf32>
    %cst_139 = arith.constant 0.000000e+00 : f32
    %503 = vector.broadcast %cst_139 : f32 to vector<8x128xf32>
    %504 = arith.maximumf %502, %503 : vector<8x128xf32>
    %505 = vector.broadcast %499 : f32 to vector<8x128xf32>
    %506 = arith.mulf %505, %504 : vector<8x128xf32>
    %507 = arith.addf %496, %506 : vector<8x128xf32>
    %508 = vector.extract_strided_slice %0 {offsets = [0, 46], sizes = [8, 1], strides = [1, 1]} : vector<8x256xf32> to vector<8x1xf32>
    %c46 = arith.constant 46 : index
    %c0_140 = arith.constant 0 : index
    %509 = vector.load %arg3[%c46, %c0_140] : memref<256x128xf32, #tpu.memory_space<vmem>>, vector<1x128xf32>
    %c46_141 = arith.constant 46 : index
    %510 = memref.load %arg4[%c46_141] : memref<256xf32, #tpu.memory_space<smem>>
    %511 = vector.broadcast %508 : vector<8x1xf32> to vector<8x128xf32>
    %512 = vector.broadcast %509 : vector<1x128xf32> to vector<8x128xf32>
    %513 = arith.addf %511, %512 : vector<8x128xf32>
    %cst_142 = arith.constant 0.000000e+00 : f32
    %514 = vector.broadcast %cst_142 : f32 to vector<8x128xf32>
    %515 = arith.maximumf %513, %514 : vector<8x128xf32>
    %516 = vector.broadcast %510 : f32 to vector<8x128xf32>
    %517 = arith.mulf %516, %515 : vector<8x128xf32>
    %518 = arith.addf %507, %517 : vector<8x128xf32>
    %519 = vector.extract_strided_slice %0 {offsets = [0, 47], sizes = [8, 1], strides = [1, 1]} : vector<8x256xf32> to vector<8x1xf32>
    %c47 = arith.constant 47 : index
    %c0_143 = arith.constant 0 : index
    %520 = vector.load %arg3[%c47, %c0_143] : memref<256x128xf32, #tpu.memory_space<vmem>>, vector<1x128xf32>
    %c47_144 = arith.constant 47 : index
    %521 = memref.load %arg4[%c47_144] : memref<256xf32, #tpu.memory_space<smem>>
    %522 = vector.broadcast %519 : vector<8x1xf32> to vector<8x128xf32>
    %523 = vector.broadcast %520 : vector<1x128xf32> to vector<8x128xf32>
    %524 = arith.addf %522, %523 : vector<8x128xf32>
    %cst_145 = arith.constant 0.000000e+00 : f32
    %525 = vector.broadcast %cst_145 : f32 to vector<8x128xf32>
    %526 = arith.maximumf %524, %525 : vector<8x128xf32>
    %527 = vector.broadcast %521 : f32 to vector<8x128xf32>
    %528 = arith.mulf %527, %526 : vector<8x128xf32>
    %529 = arith.addf %518, %528 : vector<8x128xf32>
    %530 = vector.extract_strided_slice %0 {offsets = [0, 48], sizes = [8, 1], strides = [1, 1]} : vector<8x256xf32> to vector<8x1xf32>
    %c48 = arith.constant 48 : index
    %c0_146 = arith.constant 0 : index
    %531 = vector.load %arg3[%c48, %c0_146] : memref<256x128xf32, #tpu.memory_space<vmem>>, vector<1x128xf32>
    %c48_147 = arith.constant 48 : index
    %532 = memref.load %arg4[%c48_147] : memref<256xf32, #tpu.memory_space<smem>>
    %533 = vector.broadcast %530 : vector<8x1xf32> to vector<8x128xf32>
    %534 = vector.broadcast %531 : vector<1x128xf32> to vector<8x128xf32>
    %535 = arith.addf %533, %534 : vector<8x128xf32>
    %cst_148 = arith.constant 0.000000e+00 : f32
    %536 = vector.broadcast %cst_148 : f32 to vector<8x128xf32>
    %537 = arith.maximumf %535, %536 : vector<8x128xf32>
    %538 = vector.broadcast %532 : f32 to vector<8x128xf32>
    %539 = arith.mulf %538, %537 : vector<8x128xf32>
    %540 = arith.addf %529, %539 : vector<8x128xf32>
    %541 = vector.extract_strided_slice %0 {offsets = [0, 49], sizes = [8, 1], strides = [1, 1]} : vector<8x256xf32> to vector<8x1xf32>
    %c49 = arith.constant 49 : index
    %c0_149 = arith.constant 0 : index
    %542 = vector.load %arg3[%c49, %c0_149] : memref<256x128xf32, #tpu.memory_space<vmem>>, vector<1x128xf32>
    %c49_150 = arith.constant 49 : index
    %543 = memref.load %arg4[%c49_150] : memref<256xf32, #tpu.memory_space<smem>>
    %544 = vector.broadcast %541 : vector<8x1xf32> to vector<8x128xf32>
    %545 = vector.broadcast %542 : vector<1x128xf32> to vector<8x128xf32>
    %546 = arith.addf %544, %545 : vector<8x128xf32>
    %cst_151 = arith.constant 0.000000e+00 : f32
    %547 = vector.broadcast %cst_151 : f32 to vector<8x128xf32>
    %548 = arith.maximumf %546, %547 : vector<8x128xf32>
    %549 = vector.broadcast %543 : f32 to vector<8x128xf32>
    %550 = arith.mulf %549, %548 : vector<8x128xf32>
    %551 = arith.addf %540, %550 : vector<8x128xf32>
    %552 = vector.extract_strided_slice %0 {offsets = [0, 50], sizes = [8, 1], strides = [1, 1]} : vector<8x256xf32> to vector<8x1xf32>
    %c50 = arith.constant 50 : index
    %c0_152 = arith.constant 0 : index
    %553 = vector.load %arg3[%c50, %c0_152] : memref<256x128xf32, #tpu.memory_space<vmem>>, vector<1x128xf32>
    %c50_153 = arith.constant 50 : index
    %554 = memref.load %arg4[%c50_153] : memref<256xf32, #tpu.memory_space<smem>>
    %555 = vector.broadcast %552 : vector<8x1xf32> to vector<8x128xf32>
    %556 = vector.broadcast %553 : vector<1x128xf32> to vector<8x128xf32>
    %557 = arith.addf %555, %556 : vector<8x128xf32>
    %cst_154 = arith.constant 0.000000e+00 : f32
    %558 = vector.broadcast %cst_154 : f32 to vector<8x128xf32>
    %559 = arith.maximumf %557, %558 : vector<8x128xf32>
    %560 = vector.broadcast %554 : f32 to vector<8x128xf32>
    %561 = arith.mulf %560, %559 : vector<8x128xf32>
    %562 = arith.addf %551, %561 : vector<8x128xf32>
    %563 = vector.extract_strided_slice %0 {offsets = [0, 51], sizes = [8, 1], strides = [1, 1]} : vector<8x256xf32> to vector<8x1xf32>
    %c51 = arith.constant 51 : index
    %c0_155 = arith.constant 0 : index
    %564 = vector.load %arg3[%c51, %c0_155] : memref<256x128xf32, #tpu.memory_space<vmem>>, vector<1x128xf32>
    %c51_156 = arith.constant 51 : index
    %565 = memref.load %arg4[%c51_156] : memref<256xf32, #tpu.memory_space<smem>>
    %566 = vector.broadcast %563 : vector<8x1xf32> to vector<8x128xf32>
    %567 = vector.broadcast %564 : vector<1x128xf32> to vector<8x128xf32>
    %568 = arith.addf %566, %567 : vector<8x128xf32>
    %cst_157 = arith.constant 0.000000e+00 : f32
    %569 = vector.broadcast %cst_157 : f32 to vector<8x128xf32>
    %570 = arith.maximumf %568, %569 : vector<8x128xf32>
    %571 = vector.broadcast %565 : f32 to vector<8x128xf32>
    %572 = arith.mulf %571, %570 : vector<8x128xf32>
    %573 = arith.addf %562, %572 : vector<8x128xf32>
    %574 = vector.extract_strided_slice %0 {offsets = [0, 52], sizes = [8, 1], strides = [1, 1]} : vector<8x256xf32> to vector<8x1xf32>
    %c52 = arith.constant 52 : index
    %c0_158 = arith.constant 0 : index
    %575 = vector.load %arg3[%c52, %c0_158] : memref<256x128xf32, #tpu.memory_space<vmem>>, vector<1x128xf32>
    %c52_159 = arith.constant 52 : index
    %576 = memref.load %arg4[%c52_159] : memref<256xf32, #tpu.memory_space<smem>>
    %577 = vector.broadcast %574 : vector<8x1xf32> to vector<8x128xf32>
    %578 = vector.broadcast %575 : vector<1x128xf32> to vector<8x128xf32>
    %579 = arith.addf %577, %578 : vector<8x128xf32>
    %cst_160 = arith.constant 0.000000e+00 : f32
    %580 = vector.broadcast %cst_160 : f32 to vector<8x128xf32>
    %581 = arith.maximumf %579, %580 : vector<8x128xf32>
    %582 = vector.broadcast %576 : f32 to vector<8x128xf32>
    %583 = arith.mulf %582, %581 : vector<8x128xf32>
    %584 = arith.addf %573, %583 : vector<8x128xf32>
    %585 = vector.extract_strided_slice %0 {offsets = [0, 53], sizes = [8, 1], strides = [1, 1]} : vector<8x256xf32> to vector<8x1xf32>
    %c53 = arith.constant 53 : index
    %c0_161 = arith.constant 0 : index
    %586 = vector.load %arg3[%c53, %c0_161] : memref<256x128xf32, #tpu.memory_space<vmem>>, vector<1x128xf32>
    %c53_162 = arith.constant 53 : index
    %587 = memref.load %arg4[%c53_162] : memref<256xf32, #tpu.memory_space<smem>>
    %588 = vector.broadcast %585 : vector<8x1xf32> to vector<8x128xf32>
    %589 = vector.broadcast %586 : vector<1x128xf32> to vector<8x128xf32>
    %590 = arith.addf %588, %589 : vector<8x128xf32>
    %cst_163 = arith.constant 0.000000e+00 : f32
    %591 = vector.broadcast %cst_163 : f32 to vector<8x128xf32>
    %592 = arith.maximumf %590, %591 : vector<8x128xf32>
    %593 = vector.broadcast %587 : f32 to vector<8x128xf32>
    %594 = arith.mulf %593, %592 : vector<8x128xf32>
    %595 = arith.addf %584, %594 : vector<8x128xf32>
    %596 = vector.extract_strided_slice %0 {offsets = [0, 54], sizes = [8, 1], strides = [1, 1]} : vector<8x256xf32> to vector<8x1xf32>
    %c54 = arith.constant 54 : index
    %c0_164 = arith.constant 0 : index
    %597 = vector.load %arg3[%c54, %c0_164] : memref<256x128xf32, #tpu.memory_space<vmem>>, vector<1x128xf32>
    %c54_165 = arith.constant 54 : index
    %598 = memref.load %arg4[%c54_165] : memref<256xf32, #tpu.memory_space<smem>>
    %599 = vector.broadcast %596 : vector<8x1xf32> to vector<8x128xf32>
    %600 = vector.broadcast %597 : vector<1x128xf32> to vector<8x128xf32>
    %601 = arith.addf %599, %600 : vector<8x128xf32>
    %cst_166 = arith.constant 0.000000e+00 : f32
    %602 = vector.broadcast %cst_166 : f32 to vector<8x128xf32>
    %603 = arith.maximumf %601, %602 : vector<8x128xf32>
    %604 = vector.broadcast %598 : f32 to vector<8x128xf32>
    %605 = arith.mulf %604, %603 : vector<8x128xf32>
    %606 = arith.addf %595, %605 : vector<8x128xf32>
    %607 = vector.extract_strided_slice %0 {offsets = [0, 55], sizes = [8, 1], strides = [1, 1]} : vector<8x256xf32> to vector<8x1xf32>
    %c55 = arith.constant 55 : index
    %c0_167 = arith.constant 0 : index
    %608 = vector.load %arg3[%c55, %c0_167] : memref<256x128xf32, #tpu.memory_space<vmem>>, vector<1x128xf32>
    %c55_168 = arith.constant 55 : index
    %609 = memref.load %arg4[%c55_168] : memref<256xf32, #tpu.memory_space<smem>>
    %610 = vector.broadcast %607 : vector<8x1xf32> to vector<8x128xf32>
    %611 = vector.broadcast %608 : vector<1x128xf32> to vector<8x128xf32>
    %612 = arith.addf %610, %611 : vector<8x128xf32>
    %cst_169 = arith.constant 0.000000e+00 : f32
    %613 = vector.broadcast %cst_169 : f32 to vector<8x128xf32>
    %614 = arith.maximumf %612, %613 : vector<8x128xf32>
    %615 = vector.broadcast %609 : f32 to vector<8x128xf32>
    %616 = arith.mulf %615, %614 : vector<8x128xf32>
    %617 = arith.addf %606, %616 : vector<8x128xf32>
    %618 = vector.extract_strided_slice %0 {offsets = [0, 56], sizes = [8, 1], strides = [1, 1]} : vector<8x256xf32> to vector<8x1xf32>
    %c56 = arith.constant 56 : index
    %c0_170 = arith.constant 0 : index
    %619 = vector.load %arg3[%c56, %c0_170] : memref<256x128xf32, #tpu.memory_space<vmem>>, vector<1x128xf32>
    %c56_171 = arith.constant 56 : index
    %620 = memref.load %arg4[%c56_171] : memref<256xf32, #tpu.memory_space<smem>>
    %621 = vector.broadcast %618 : vector<8x1xf32> to vector<8x128xf32>
    %622 = vector.broadcast %619 : vector<1x128xf32> to vector<8x128xf32>
    %623 = arith.addf %621, %622 : vector<8x128xf32>
    %cst_172 = arith.constant 0.000000e+00 : f32
    %624 = vector.broadcast %cst_172 : f32 to vector<8x128xf32>
    %625 = arith.maximumf %623, %624 : vector<8x128xf32>
    %626 = vector.broadcast %620 : f32 to vector<8x128xf32>
    %627 = arith.mulf %626, %625 : vector<8x128xf32>
    %628 = arith.addf %617, %627 : vector<8x128xf32>
    %629 = vector.extract_strided_slice %0 {offsets = [0, 57], sizes = [8, 1], strides = [1, 1]} : vector<8x256xf32> to vector<8x1xf32>
    %c57 = arith.constant 57 : index
    %c0_173 = arith.constant 0 : index
    %630 = vector.load %arg3[%c57, %c0_173] : memref<256x128xf32, #tpu.memory_space<vmem>>, vector<1x128xf32>
    %c57_174 = arith.constant 57 : index
    %631 = memref.load %arg4[%c57_174] : memref<256xf32, #tpu.memory_space<smem>>
    %632 = vector.broadcast %629 : vector<8x1xf32> to vector<8x128xf32>
    %633 = vector.broadcast %630 : vector<1x128xf32> to vector<8x128xf32>
    %634 = arith.addf %632, %633 : vector<8x128xf32>
    %cst_175 = arith.constant 0.000000e+00 : f32
    %635 = vector.broadcast %cst_175 : f32 to vector<8x128xf32>
    %636 = arith.maximumf %634, %635 : vector<8x128xf32>
    %637 = vector.broadcast %631 : f32 to vector<8x128xf32>
    %638 = arith.mulf %637, %636 : vector<8x128xf32>
    %639 = arith.addf %628, %638 : vector<8x128xf32>
    %640 = vector.extract_strided_slice %0 {offsets = [0, 58], sizes = [8, 1], strides = [1, 1]} : vector<8x256xf32> to vector<8x1xf32>
    %c58 = arith.constant 58 : index
    %c0_176 = arith.constant 0 : index
    %641 = vector.load %arg3[%c58, %c0_176] : memref<256x128xf32, #tpu.memory_space<vmem>>, vector<1x128xf32>
    %c58_177 = arith.constant 58 : index
    %642 = memref.load %arg4[%c58_177] : memref<256xf32, #tpu.memory_space<smem>>
    %643 = vector.broadcast %640 : vector<8x1xf32> to vector<8x128xf32>
    %644 = vector.broadcast %641 : vector<1x128xf32> to vector<8x128xf32>
    %645 = arith.addf %643, %644 : vector<8x128xf32>
    %cst_178 = arith.constant 0.000000e+00 : f32
    %646 = vector.broadcast %cst_178 : f32 to vector<8x128xf32>
    %647 = arith.maximumf %645, %646 : vector<8x128xf32>
    %648 = vector.broadcast %642 : f32 to vector<8x128xf32>
    %649 = arith.mulf %648, %647 : vector<8x128xf32>
    %650 = arith.addf %639, %649 : vector<8x128xf32>
    %651 = vector.extract_strided_slice %0 {offsets = [0, 59], sizes = [8, 1], strides = [1, 1]} : vector<8x256xf32> to vector<8x1xf32>
    %c59 = arith.constant 59 : index
    %c0_179 = arith.constant 0 : index
    %652 = vector.load %arg3[%c59, %c0_179] : memref<256x128xf32, #tpu.memory_space<vmem>>, vector<1x128xf32>
    %c59_180 = arith.constant 59 : index
    %653 = memref.load %arg4[%c59_180] : memref<256xf32, #tpu.memory_space<smem>>
    %654 = vector.broadcast %651 : vector<8x1xf32> to vector<8x128xf32>
    %655 = vector.broadcast %652 : vector<1x128xf32> to vector<8x128xf32>
    %656 = arith.addf %654, %655 : vector<8x128xf32>
    %cst_181 = arith.constant 0.000000e+00 : f32
    %657 = vector.broadcast %cst_181 : f32 to vector<8x128xf32>
    %658 = arith.maximumf %656, %657 : vector<8x128xf32>
    %659 = vector.broadcast %653 : f32 to vector<8x128xf32>
    %660 = arith.mulf %659, %658 : vector<8x128xf32>
    %661 = arith.addf %650, %660 : vector<8x128xf32>
    %662 = vector.extract_strided_slice %0 {offsets = [0, 60], sizes = [8, 1], strides = [1, 1]} : vector<8x256xf32> to vector<8x1xf32>
    %c60 = arith.constant 60 : index
    %c0_182 = arith.constant 0 : index
    %663 = vector.load %arg3[%c60, %c0_182] : memref<256x128xf32, #tpu.memory_space<vmem>>, vector<1x128xf32>
    %c60_183 = arith.constant 60 : index
    %664 = memref.load %arg4[%c60_183] : memref<256xf32, #tpu.memory_space<smem>>
    %665 = vector.broadcast %662 : vector<8x1xf32> to vector<8x128xf32>
    %666 = vector.broadcast %663 : vector<1x128xf32> to vector<8x128xf32>
    %667 = arith.addf %665, %666 : vector<8x128xf32>
    %cst_184 = arith.constant 0.000000e+00 : f32
    %668 = vector.broadcast %cst_184 : f32 to vector<8x128xf32>
    %669 = arith.maximumf %667, %668 : vector<8x128xf32>
    %670 = vector.broadcast %664 : f32 to vector<8x128xf32>
    %671 = arith.mulf %670, %669 : vector<8x128xf32>
    %672 = arith.addf %661, %671 : vector<8x128xf32>
    %673 = vector.extract_strided_slice %0 {offsets = [0, 61], sizes = [8, 1], strides = [1, 1]} : vector<8x256xf32> to vector<8x1xf32>
    %c61 = arith.constant 61 : index
    %c0_185 = arith.constant 0 : index
    %674 = vector.load %arg3[%c61, %c0_185] : memref<256x128xf32, #tpu.memory_space<vmem>>, vector<1x128xf32>
    %c61_186 = arith.constant 61 : index
    %675 = memref.load %arg4[%c61_186] : memref<256xf32, #tpu.memory_space<smem>>
    %676 = vector.broadcast %673 : vector<8x1xf32> to vector<8x128xf32>
    %677 = vector.broadcast %674 : vector<1x128xf32> to vector<8x128xf32>
    %678 = arith.addf %676, %677 : vector<8x128xf32>
    %cst_187 = arith.constant 0.000000e+00 : f32
    %679 = vector.broadcast %cst_187 : f32 to vector<8x128xf32>
    %680 = arith.maximumf %678, %679 : vector<8x128xf32>
    %681 = vector.broadcast %675 : f32 to vector<8x128xf32>
    %682 = arith.mulf %681, %680 : vector<8x128xf32>
    %683 = arith.addf %672, %682 : vector<8x128xf32>
    %684 = vector.extract_strided_slice %0 {offsets = [0, 62], sizes = [8, 1], strides = [1, 1]} : vector<8x256xf32> to vector<8x1xf32>
    %c62 = arith.constant 62 : index
    %c0_188 = arith.constant 0 : index
    %685 = vector.load %arg3[%c62, %c0_188] : memref<256x128xf32, #tpu.memory_space<vmem>>, vector<1x128xf32>
    %c62_189 = arith.constant 62 : index
    %686 = memref.load %arg4[%c62_189] : memref<256xf32, #tpu.memory_space<smem>>
    %687 = vector.broadcast %684 : vector<8x1xf32> to vector<8x128xf32>
    %688 = vector.broadcast %685 : vector<1x128xf32> to vector<8x128xf32>
    %689 = arith.addf %687, %688 : vector<8x128xf32>
    %cst_190 = arith.constant 0.000000e+00 : f32
    %690 = vector.broadcast %cst_190 : f32 to vector<8x128xf32>
    %691 = arith.maximumf %689, %690 : vector<8x128xf32>
    %692 = vector.broadcast %686 : f32 to vector<8x128xf32>
    %693 = arith.mulf %692, %691 : vector<8x128xf32>
    %694 = arith.addf %683, %693 : vector<8x128xf32>
    %695 = vector.extract_strided_slice %0 {offsets = [0, 63], sizes = [8, 1], strides = [1, 1]} : vector<8x256xf32> to vector<8x1xf32>
    %c63 = arith.constant 63 : index
    %c0_191 = arith.constant 0 : index
    %696 = vector.load %arg3[%c63, %c0_191] : memref<256x128xf32, #tpu.memory_space<vmem>>, vector<1x128xf32>
    %c63_192 = arith.constant 63 : index
    %697 = memref.load %arg4[%c63_192] : memref<256xf32, #tpu.memory_space<smem>>
    %698 = vector.broadcast %695 : vector<8x1xf32> to vector<8x128xf32>
    %699 = vector.broadcast %696 : vector<1x128xf32> to vector<8x128xf32>
    %700 = arith.addf %698, %699 : vector<8x128xf32>
    %cst_193 = arith.constant 0.000000e+00 : f32
    %701 = vector.broadcast %cst_193 : f32 to vector<8x128xf32>
    %702 = arith.maximumf %700, %701 : vector<8x128xf32>
    %703 = vector.broadcast %697 : f32 to vector<8x128xf32>
    %704 = arith.mulf %703, %702 : vector<8x128xf32>
    %705 = arith.addf %694, %704 : vector<8x128xf32>
    %706 = vector.extract_strided_slice %0 {offsets = [0, 64], sizes = [8, 1], strides = [1, 1]} : vector<8x256xf32> to vector<8x1xf32>
    %c64 = arith.constant 64 : index
    %c0_194 = arith.constant 0 : index
    %707 = vector.load %arg3[%c64, %c0_194] : memref<256x128xf32, #tpu.memory_space<vmem>>, vector<1x128xf32>
    %c64_195 = arith.constant 64 : index
    %708 = memref.load %arg4[%c64_195] : memref<256xf32, #tpu.memory_space<smem>>
    %709 = vector.broadcast %706 : vector<8x1xf32> to vector<8x128xf32>
    %710 = vector.broadcast %707 : vector<1x128xf32> to vector<8x128xf32>
    %711 = arith.addf %709, %710 : vector<8x128xf32>
    %cst_196 = arith.constant 0.000000e+00 : f32
    %712 = vector.broadcast %cst_196 : f32 to vector<8x128xf32>
    %713 = arith.maximumf %711, %712 : vector<8x128xf32>
    %714 = vector.broadcast %708 : f32 to vector<8x128xf32>
    %715 = arith.mulf %714, %713 : vector<8x128xf32>
    %716 = arith.addf %705, %715 : vector<8x128xf32>
    %717 = vector.extract_strided_slice %0 {offsets = [0, 65], sizes = [8, 1], strides = [1, 1]} : vector<8x256xf32> to vector<8x1xf32>
    %c65 = arith.constant 65 : index
    %c0_197 = arith.constant 0 : index
    %718 = vector.load %arg3[%c65, %c0_197] : memref<256x128xf32, #tpu.memory_space<vmem>>, vector<1x128xf32>
    %c65_198 = arith.constant 65 : index
    %719 = memref.load %arg4[%c65_198] : memref<256xf32, #tpu.memory_space<smem>>
    %720 = vector.broadcast %717 : vector<8x1xf32> to vector<8x128xf32>
    %721 = vector.broadcast %718 : vector<1x128xf32> to vector<8x128xf32>
    %722 = arith.addf %720, %721 : vector<8x128xf32>
    %cst_199 = arith.constant 0.000000e+00 : f32
    %723 = vector.broadcast %cst_199 : f32 to vector<8x128xf32>
    %724 = arith.maximumf %722, %723 : vector<8x128xf32>
    %725 = vector.broadcast %719 : f32 to vector<8x128xf32>
    %726 = arith.mulf %725, %724 : vector<8x128xf32>
    %727 = arith.addf %716, %726 : vector<8x128xf32>
    %728 = vector.extract_strided_slice %0 {offsets = [0, 66], sizes = [8, 1], strides = [1, 1]} : vector<8x256xf32> to vector<8x1xf32>
    %c66 = arith.constant 66 : index
    %c0_200 = arith.constant 0 : index
    %729 = vector.load %arg3[%c66, %c0_200] : memref<256x128xf32, #tpu.memory_space<vmem>>, vector<1x128xf32>
    %c66_201 = arith.constant 66 : index
    %730 = memref.load %arg4[%c66_201] : memref<256xf32, #tpu.memory_space<smem>>
    %731 = vector.broadcast %728 : vector<8x1xf32> to vector<8x128xf32>
    %732 = vector.broadcast %729 : vector<1x128xf32> to vector<8x128xf32>
    %733 = arith.addf %731, %732 : vector<8x128xf32>
    %cst_202 = arith.constant 0.000000e+00 : f32
    %734 = vector.broadcast %cst_202 : f32 to vector<8x128xf32>
    %735 = arith.maximumf %733, %734 : vector<8x128xf32>
    %736 = vector.broadcast %730 : f32 to vector<8x128xf32>
    %737 = arith.mulf %736, %735 : vector<8x128xf32>
    %738 = arith.addf %727, %737 : vector<8x128xf32>
    %739 = vector.extract_strided_slice %0 {offsets = [0, 67], sizes = [8, 1], strides = [1, 1]} : vector<8x256xf32> to vector<8x1xf32>
    %c67 = arith.constant 67 : index
    %c0_203 = arith.constant 0 : index
    %740 = vector.load %arg3[%c67, %c0_203] : memref<256x128xf32, #tpu.memory_space<vmem>>, vector<1x128xf32>
    %c67_204 = arith.constant 67 : index
    %741 = memref.load %arg4[%c67_204] : memref<256xf32, #tpu.memory_space<smem>>
    %742 = vector.broadcast %739 : vector<8x1xf32> to vector<8x128xf32>
    %743 = vector.broadcast %740 : vector<1x128xf32> to vector<8x128xf32>
    %744 = arith.addf %742, %743 : vector<8x128xf32>
    %cst_205 = arith.constant 0.000000e+00 : f32
    %745 = vector.broadcast %cst_205 : f32 to vector<8x128xf32>
    %746 = arith.maximumf %744, %745 : vector<8x128xf32>
    %747 = vector.broadcast %741 : f32 to vector<8x128xf32>
    %748 = arith.mulf %747, %746 : vector<8x128xf32>
    %749 = arith.addf %738, %748 : vector<8x128xf32>
    %750 = vector.extract_strided_slice %0 {offsets = [0, 68], sizes = [8, 1], strides = [1, 1]} : vector<8x256xf32> to vector<8x1xf32>
    %c68 = arith.constant 68 : index
    %c0_206 = arith.constant 0 : index
    %751 = vector.load %arg3[%c68, %c0_206] : memref<256x128xf32, #tpu.memory_space<vmem>>, vector<1x128xf32>
    %c68_207 = arith.constant 68 : index
    %752 = memref.load %arg4[%c68_207] : memref<256xf32, #tpu.memory_space<smem>>
    %753 = vector.broadcast %750 : vector<8x1xf32> to vector<8x128xf32>
    %754 = vector.broadcast %751 : vector<1x128xf32> to vector<8x128xf32>
    %755 = arith.addf %753, %754 : vector<8x128xf32>
    %cst_208 = arith.constant 0.000000e+00 : f32
    %756 = vector.broadcast %cst_208 : f32 to vector<8x128xf32>
    %757 = arith.maximumf %755, %756 : vector<8x128xf32>
    %758 = vector.broadcast %752 : f32 to vector<8x128xf32>
    %759 = arith.mulf %758, %757 : vector<8x128xf32>
    %760 = arith.addf %749, %759 : vector<8x128xf32>
    %761 = vector.extract_strided_slice %0 {offsets = [0, 69], sizes = [8, 1], strides = [1, 1]} : vector<8x256xf32> to vector<8x1xf32>
    %c69 = arith.constant 69 : index
    %c0_209 = arith.constant 0 : index
    %762 = vector.load %arg3[%c69, %c0_209] : memref<256x128xf32, #tpu.memory_space<vmem>>, vector<1x128xf32>
    %c69_210 = arith.constant 69 : index
    %763 = memref.load %arg4[%c69_210] : memref<256xf32, #tpu.memory_space<smem>>
    %764 = vector.broadcast %761 : vector<8x1xf32> to vector<8x128xf32>
    %765 = vector.broadcast %762 : vector<1x128xf32> to vector<8x128xf32>
    %766 = arith.addf %764, %765 : vector<8x128xf32>
    %cst_211 = arith.constant 0.000000e+00 : f32
    %767 = vector.broadcast %cst_211 : f32 to vector<8x128xf32>
    %768 = arith.maximumf %766, %767 : vector<8x128xf32>
    %769 = vector.broadcast %763 : f32 to vector<8x128xf32>
    %770 = arith.mulf %769, %768 : vector<8x128xf32>
    %771 = arith.addf %760, %770 : vector<8x128xf32>
    %772 = vector.extract_strided_slice %0 {offsets = [0, 70], sizes = [8, 1], strides = [1, 1]} : vector<8x256xf32> to vector<8x1xf32>
    %c70 = arith.constant 70 : index
    %c0_212 = arith.constant 0 : index
    %773 = vector.load %arg3[%c70, %c0_212] : memref<256x128xf32, #tpu.memory_space<vmem>>, vector<1x128xf32>
    %c70_213 = arith.constant 70 : index
    %774 = memref.load %arg4[%c70_213] : memref<256xf32, #tpu.memory_space<smem>>
    %775 = vector.broadcast %772 : vector<8x1xf32> to vector<8x128xf32>
    %776 = vector.broadcast %773 : vector<1x128xf32> to vector<8x128xf32>
    %777 = arith.addf %775, %776 : vector<8x128xf32>
    %cst_214 = arith.constant 0.000000e+00 : f32
    %778 = vector.broadcast %cst_214 : f32 to vector<8x128xf32>
    %779 = arith.maximumf %777, %778 : vector<8x128xf32>
    %780 = vector.broadcast %774 : f32 to vector<8x128xf32>
    %781 = arith.mulf %780, %779 : vector<8x128xf32>
    %782 = arith.addf %771, %781 : vector<8x128xf32>
    %783 = vector.extract_strided_slice %0 {offsets = [0, 71], sizes = [8, 1], strides = [1, 1]} : vector<8x256xf32> to vector<8x1xf32>
    %c71 = arith.constant 71 : index
    %c0_215 = arith.constant 0 : index
    %784 = vector.load %arg3[%c71, %c0_215] : memref<256x128xf32, #tpu.memory_space<vmem>>, vector<1x128xf32>
    %c71_216 = arith.constant 71 : index
    %785 = memref.load %arg4[%c71_216] : memref<256xf32, #tpu.memory_space<smem>>
    %786 = vector.broadcast %783 : vector<8x1xf32> to vector<8x128xf32>
    %787 = vector.broadcast %784 : vector<1x128xf32> to vector<8x128xf32>
    %788 = arith.addf %786, %787 : vector<8x128xf32>
    %cst_217 = arith.constant 0.000000e+00 : f32
    %789 = vector.broadcast %cst_217 : f32 to vector<8x128xf32>
    %790 = arith.maximumf %788, %789 : vector<8x128xf32>
    %791 = vector.broadcast %785 : f32 to vector<8x128xf32>
    %792 = arith.mulf %791, %790 : vector<8x128xf32>
    %793 = arith.addf %782, %792 : vector<8x128xf32>
    %794 = vector.extract_strided_slice %0 {offsets = [0, 72], sizes = [8, 1], strides = [1, 1]} : vector<8x256xf32> to vector<8x1xf32>
    %c72 = arith.constant 72 : index
    %c0_218 = arith.constant 0 : index
    %795 = vector.load %arg3[%c72, %c0_218] : memref<256x128xf32, #tpu.memory_space<vmem>>, vector<1x128xf32>
    %c72_219 = arith.constant 72 : index
    %796 = memref.load %arg4[%c72_219] : memref<256xf32, #tpu.memory_space<smem>>
    %797 = vector.broadcast %794 : vector<8x1xf32> to vector<8x128xf32>
    %798 = vector.broadcast %795 : vector<1x128xf32> to vector<8x128xf32>
    %799 = arith.addf %797, %798 : vector<8x128xf32>
    %cst_220 = arith.constant 0.000000e+00 : f32
    %800 = vector.broadcast %cst_220 : f32 to vector<8x128xf32>
    %801 = arith.maximumf %799, %800 : vector<8x128xf32>
    %802 = vector.broadcast %796 : f32 to vector<8x128xf32>
    %803 = arith.mulf %802, %801 : vector<8x128xf32>
    %804 = arith.addf %793, %803 : vector<8x128xf32>
    %805 = vector.extract_strided_slice %0 {offsets = [0, 73], sizes = [8, 1], strides = [1, 1]} : vector<8x256xf32> to vector<8x1xf32>
    %c73 = arith.constant 73 : index
    %c0_221 = arith.constant 0 : index
    %806 = vector.load %arg3[%c73, %c0_221] : memref<256x128xf32, #tpu.memory_space<vmem>>, vector<1x128xf32>
    %c73_222 = arith.constant 73 : index
    %807 = memref.load %arg4[%c73_222] : memref<256xf32, #tpu.memory_space<smem>>
    %808 = vector.broadcast %805 : vector<8x1xf32> to vector<8x128xf32>
    %809 = vector.broadcast %806 : vector<1x128xf32> to vector<8x128xf32>
    %810 = arith.addf %808, %809 : vector<8x128xf32>
    %cst_223 = arith.constant 0.000000e+00 : f32
    %811 = vector.broadcast %cst_223 : f32 to vector<8x128xf32>
    %812 = arith.maximumf %810, %811 : vector<8x128xf32>
    %813 = vector.broadcast %807 : f32 to vector<8x128xf32>
    %814 = arith.mulf %813, %812 : vector<8x128xf32>
    %815 = arith.addf %804, %814 : vector<8x128xf32>
    %816 = vector.extract_strided_slice %0 {offsets = [0, 74], sizes = [8, 1], strides = [1, 1]} : vector<8x256xf32> to vector<8x1xf32>
    %c74 = arith.constant 74 : index
    %c0_224 = arith.constant 0 : index
    %817 = vector.load %arg3[%c74, %c0_224] : memref<256x128xf32, #tpu.memory_space<vmem>>, vector<1x128xf32>
    %c74_225 = arith.constant 74 : index
    %818 = memref.load %arg4[%c74_225] : memref<256xf32, #tpu.memory_space<smem>>
    %819 = vector.broadcast %816 : vector<8x1xf32> to vector<8x128xf32>
    %820 = vector.broadcast %817 : vector<1x128xf32> to vector<8x128xf32>
    %821 = arith.addf %819, %820 : vector<8x128xf32>
    %cst_226 = arith.constant 0.000000e+00 : f32
    %822 = vector.broadcast %cst_226 : f32 to vector<8x128xf32>
    %823 = arith.maximumf %821, %822 : vector<8x128xf32>
    %824 = vector.broadcast %818 : f32 to vector<8x128xf32>
    %825 = arith.mulf %824, %823 : vector<8x128xf32>
    %826 = arith.addf %815, %825 : vector<8x128xf32>
    %827 = vector.extract_strided_slice %0 {offsets = [0, 75], sizes = [8, 1], strides = [1, 1]} : vector<8x256xf32> to vector<8x1xf32>
    %c75 = arith.constant 75 : index
    %c0_227 = arith.constant 0 : index
    %828 = vector.load %arg3[%c75, %c0_227] : memref<256x128xf32, #tpu.memory_space<vmem>>, vector<1x128xf32>
    %c75_228 = arith.constant 75 : index
    %829 = memref.load %arg4[%c75_228] : memref<256xf32, #tpu.memory_space<smem>>
    %830 = vector.broadcast %827 : vector<8x1xf32> to vector<8x128xf32>
    %831 = vector.broadcast %828 : vector<1x128xf32> to vector<8x128xf32>
    %832 = arith.addf %830, %831 : vector<8x128xf32>
    %cst_229 = arith.constant 0.000000e+00 : f32
    %833 = vector.broadcast %cst_229 : f32 to vector<8x128xf32>
    %834 = arith.maximumf %832, %833 : vector<8x128xf32>
    %835 = vector.broadcast %829 : f32 to vector<8x128xf32>
    %836 = arith.mulf %835, %834 : vector<8x128xf32>
    %837 = arith.addf %826, %836 : vector<8x128xf32>
    %838 = vector.extract_strided_slice %0 {offsets = [0, 76], sizes = [8, 1], strides = [1, 1]} : vector<8x256xf32> to vector<8x1xf32>
    %c76 = arith.constant 76 : index
    %c0_230 = arith.constant 0 : index
    %839 = vector.load %arg3[%c76, %c0_230] : memref<256x128xf32, #tpu.memory_space<vmem>>, vector<1x128xf32>
    %c76_231 = arith.constant 76 : index
    %840 = memref.load %arg4[%c76_231] : memref<256xf32, #tpu.memory_space<smem>>
    %841 = vector.broadcast %838 : vector<8x1xf32> to vector<8x128xf32>
    %842 = vector.broadcast %839 : vector<1x128xf32> to vector<8x128xf32>
    %843 = arith.addf %841, %842 : vector<8x128xf32>
    %cst_232 = arith.constant 0.000000e+00 : f32
    %844 = vector.broadcast %cst_232 : f32 to vector<8x128xf32>
    %845 = arith.maximumf %843, %844 : vector<8x128xf32>
    %846 = vector.broadcast %840 : f32 to vector<8x128xf32>
    %847 = arith.mulf %846, %845 : vector<8x128xf32>
    %848 = arith.addf %837, %847 : vector<8x128xf32>
    %849 = vector.extract_strided_slice %0 {offsets = [0, 77], sizes = [8, 1], strides = [1, 1]} : vector<8x256xf32> to vector<8x1xf32>
    %c77 = arith.constant 77 : index
    %c0_233 = arith.constant 0 : index
    %850 = vector.load %arg3[%c77, %c0_233] : memref<256x128xf32, #tpu.memory_space<vmem>>, vector<1x128xf32>
    %c77_234 = arith.constant 77 : index
    %851 = memref.load %arg4[%c77_234] : memref<256xf32, #tpu.memory_space<smem>>
    %852 = vector.broadcast %849 : vector<8x1xf32> to vector<8x128xf32>
    %853 = vector.broadcast %850 : vector<1x128xf32> to vector<8x128xf32>
    %854 = arith.addf %852, %853 : vector<8x128xf32>
    %cst_235 = arith.constant 0.000000e+00 : f32
    %855 = vector.broadcast %cst_235 : f32 to vector<8x128xf32>
    %856 = arith.maximumf %854, %855 : vector<8x128xf32>
    %857 = vector.broadcast %851 : f32 to vector<8x128xf32>
    %858 = arith.mulf %857, %856 : vector<8x128xf32>
    %859 = arith.addf %848, %858 : vector<8x128xf32>
    %860 = vector.extract_strided_slice %0 {offsets = [0, 78], sizes = [8, 1], strides = [1, 1]} : vector<8x256xf32> to vector<8x1xf32>
    %c78 = arith.constant 78 : index
    %c0_236 = arith.constant 0 : index
    %861 = vector.load %arg3[%c78, %c0_236] : memref<256x128xf32, #tpu.memory_space<vmem>>, vector<1x128xf32>
    %c78_237 = arith.constant 78 : index
    %862 = memref.load %arg4[%c78_237] : memref<256xf32, #tpu.memory_space<smem>>
    %863 = vector.broadcast %860 : vector<8x1xf32> to vector<8x128xf32>
    %864 = vector.broadcast %861 : vector<1x128xf32> to vector<8x128xf32>
    %865 = arith.addf %863, %864 : vector<8x128xf32>
    %cst_238 = arith.constant 0.000000e+00 : f32
    %866 = vector.broadcast %cst_238 : f32 to vector<8x128xf32>
    %867 = arith.maximumf %865, %866 : vector<8x128xf32>
    %868 = vector.broadcast %862 : f32 to vector<8x128xf32>
    %869 = arith.mulf %868, %867 : vector<8x128xf32>
    %870 = arith.addf %859, %869 : vector<8x128xf32>
    %871 = vector.extract_strided_slice %0 {offsets = [0, 79], sizes = [8, 1], strides = [1, 1]} : vector<8x256xf32> to vector<8x1xf32>
    %c79 = arith.constant 79 : index
    %c0_239 = arith.constant 0 : index
    %872 = vector.load %arg3[%c79, %c0_239] : memref<256x128xf32, #tpu.memory_space<vmem>>, vector<1x128xf32>
    %c79_240 = arith.constant 79 : index
    %873 = memref.load %arg4[%c79_240] : memref<256xf32, #tpu.memory_space<smem>>
    %874 = vector.broadcast %871 : vector<8x1xf32> to vector<8x128xf32>
    %875 = vector.broadcast %872 : vector<1x128xf32> to vector<8x128xf32>
    %876 = arith.addf %874, %875 : vector<8x128xf32>
    %cst_241 = arith.constant 0.000000e+00 : f32
    %877 = vector.broadcast %cst_241 : f32 to vector<8x128xf32>
    %878 = arith.maximumf %876, %877 : vector<8x128xf32>
    %879 = vector.broadcast %873 : f32 to vector<8x128xf32>
    %880 = arith.mulf %879, %878 : vector<8x128xf32>
    %881 = arith.addf %870, %880 : vector<8x128xf32>
    %882 = vector.extract_strided_slice %0 {offsets = [0, 80], sizes = [8, 1], strides = [1, 1]} : vector<8x256xf32> to vector<8x1xf32>
    %c80 = arith.constant 80 : index
    %c0_242 = arith.constant 0 : index
    %883 = vector.load %arg3[%c80, %c0_242] : memref<256x128xf32, #tpu.memory_space<vmem>>, vector<1x128xf32>
    %c80_243 = arith.constant 80 : index
    %884 = memref.load %arg4[%c80_243] : memref<256xf32, #tpu.memory_space<smem>>
    %885 = vector.broadcast %882 : vector<8x1xf32> to vector<8x128xf32>
    %886 = vector.broadcast %883 : vector<1x128xf32> to vector<8x128xf32>
    %887 = arith.addf %885, %886 : vector<8x128xf32>
    %cst_244 = arith.constant 0.000000e+00 : f32
    %888 = vector.broadcast %cst_244 : f32 to vector<8x128xf32>
    %889 = arith.maximumf %887, %888 : vector<8x128xf32>
    %890 = vector.broadcast %884 : f32 to vector<8x128xf32>
    %891 = arith.mulf %890, %889 : vector<8x128xf32>
    %892 = arith.addf %881, %891 : vector<8x128xf32>
    %893 = vector.extract_strided_slice %0 {offsets = [0, 81], sizes = [8, 1], strides = [1, 1]} : vector<8x256xf32> to vector<8x1xf32>
    %c81 = arith.constant 81 : index
    %c0_245 = arith.constant 0 : index
    %894 = vector.load %arg3[%c81, %c0_245] : memref<256x128xf32, #tpu.memory_space<vmem>>, vector<1x128xf32>
    %c81_246 = arith.constant 81 : index
    %895 = memref.load %arg4[%c81_246] : memref<256xf32, #tpu.memory_space<smem>>
    %896 = vector.broadcast %893 : vector<8x1xf32> to vector<8x128xf32>
    %897 = vector.broadcast %894 : vector<1x128xf32> to vector<8x128xf32>
    %898 = arith.addf %896, %897 : vector<8x128xf32>
    %cst_247 = arith.constant 0.000000e+00 : f32
    %899 = vector.broadcast %cst_247 : f32 to vector<8x128xf32>
    %900 = arith.maximumf %898, %899 : vector<8x128xf32>
    %901 = vector.broadcast %895 : f32 to vector<8x128xf32>
    %902 = arith.mulf %901, %900 : vector<8x128xf32>
    %903 = arith.addf %892, %902 : vector<8x128xf32>
    %904 = vector.extract_strided_slice %0 {offsets = [0, 82], sizes = [8, 1], strides = [1, 1]} : vector<8x256xf32> to vector<8x1xf32>
    %c82 = arith.constant 82 : index
    %c0_248 = arith.constant 0 : index
    %905 = vector.load %arg3[%c82, %c0_248] : memref<256x128xf32, #tpu.memory_space<vmem>>, vector<1x128xf32>
    %c82_249 = arith.constant 82 : index
    %906 = memref.load %arg4[%c82_249] : memref<256xf32, #tpu.memory_space<smem>>
    %907 = vector.broadcast %904 : vector<8x1xf32> to vector<8x128xf32>
    %908 = vector.broadcast %905 : vector<1x128xf32> to vector<8x128xf32>
    %909 = arith.addf %907, %908 : vector<8x128xf32>
    %cst_250 = arith.constant 0.000000e+00 : f32
    %910 = vector.broadcast %cst_250 : f32 to vector<8x128xf32>
    %911 = arith.maximumf %909, %910 : vector<8x128xf32>
    %912 = vector.broadcast %906 : f32 to vector<8x128xf32>
    %913 = arith.mulf %912, %911 : vector<8x128xf32>
    %914 = arith.addf %903, %913 : vector<8x128xf32>
    %915 = vector.extract_strided_slice %0 {offsets = [0, 83], sizes = [8, 1], strides = [1, 1]} : vector<8x256xf32> to vector<8x1xf32>
    %c83 = arith.constant 83 : index
    %c0_251 = arith.constant 0 : index
    %916 = vector.load %arg3[%c83, %c0_251] : memref<256x128xf32, #tpu.memory_space<vmem>>, vector<1x128xf32>
    %c83_252 = arith.constant 83 : index
    %917 = memref.load %arg4[%c83_252] : memref<256xf32, #tpu.memory_space<smem>>
    %918 = vector.broadcast %915 : vector<8x1xf32> to vector<8x128xf32>
    %919 = vector.broadcast %916 : vector<1x128xf32> to vector<8x128xf32>
    %920 = arith.addf %918, %919 : vector<8x128xf32>
    %cst_253 = arith.constant 0.000000e+00 : f32
    %921 = vector.broadcast %cst_253 : f32 to vector<8x128xf32>
    %922 = arith.maximumf %920, %921 : vector<8x128xf32>
    %923 = vector.broadcast %917 : f32 to vector<8x128xf32>
    %924 = arith.mulf %923, %922 : vector<8x128xf32>
    %925 = arith.addf %914, %924 : vector<8x128xf32>
    %926 = vector.extract_strided_slice %0 {offsets = [0, 84], sizes = [8, 1], strides = [1, 1]} : vector<8x256xf32> to vector<8x1xf32>
    %c84 = arith.constant 84 : index
    %c0_254 = arith.constant 0 : index
    %927 = vector.load %arg3[%c84, %c0_254] : memref<256x128xf32, #tpu.memory_space<vmem>>, vector<1x128xf32>
    %c84_255 = arith.constant 84 : index
    %928 = memref.load %arg4[%c84_255] : memref<256xf32, #tpu.memory_space<smem>>
    %929 = vector.broadcast %926 : vector<8x1xf32> to vector<8x128xf32>
    %930 = vector.broadcast %927 : vector<1x128xf32> to vector<8x128xf32>
    %931 = arith.addf %929, %930 : vector<8x128xf32>
    %cst_256 = arith.constant 0.000000e+00 : f32
    %932 = vector.broadcast %cst_256 : f32 to vector<8x128xf32>
    %933 = arith.maximumf %931, %932 : vector<8x128xf32>
    %934 = vector.broadcast %928 : f32 to vector<8x128xf32>
    %935 = arith.mulf %934, %933 : vector<8x128xf32>
    %936 = arith.addf %925, %935 : vector<8x128xf32>
    %937 = vector.extract_strided_slice %0 {offsets = [0, 85], sizes = [8, 1], strides = [1, 1]} : vector<8x256xf32> to vector<8x1xf32>
    %c85 = arith.constant 85 : index
    %c0_257 = arith.constant 0 : index
    %938 = vector.load %arg3[%c85, %c0_257] : memref<256x128xf32, #tpu.memory_space<vmem>>, vector<1x128xf32>
    %c85_258 = arith.constant 85 : index
    %939 = memref.load %arg4[%c85_258] : memref<256xf32, #tpu.memory_space<smem>>
    %940 = vector.broadcast %937 : vector<8x1xf32> to vector<8x128xf32>
    %941 = vector.broadcast %938 : vector<1x128xf32> to vector<8x128xf32>
    %942 = arith.addf %940, %941 : vector<8x128xf32>
    %cst_259 = arith.constant 0.000000e+00 : f32
    %943 = vector.broadcast %cst_259 : f32 to vector<8x128xf32>
    %944 = arith.maximumf %942, %943 : vector<8x128xf32>
    %945 = vector.broadcast %939 : f32 to vector<8x128xf32>
    %946 = arith.mulf %945, %944 : vector<8x128xf32>
    %947 = arith.addf %936, %946 : vector<8x128xf32>
    %948 = vector.extract_strided_slice %0 {offsets = [0, 86], sizes = [8, 1], strides = [1, 1]} : vector<8x256xf32> to vector<8x1xf32>
    %c86 = arith.constant 86 : index
    %c0_260 = arith.constant 0 : index
    %949 = vector.load %arg3[%c86, %c0_260] : memref<256x128xf32, #tpu.memory_space<vmem>>, vector<1x128xf32>
    %c86_261 = arith.constant 86 : index
    %950 = memref.load %arg4[%c86_261] : memref<256xf32, #tpu.memory_space<smem>>
    %951 = vector.broadcast %948 : vector<8x1xf32> to vector<8x128xf32>
    %952 = vector.broadcast %949 : vector<1x128xf32> to vector<8x128xf32>
    %953 = arith.addf %951, %952 : vector<8x128xf32>
    %cst_262 = arith.constant 0.000000e+00 : f32
    %954 = vector.broadcast %cst_262 : f32 to vector<8x128xf32>
    %955 = arith.maximumf %953, %954 : vector<8x128xf32>
    %956 = vector.broadcast %950 : f32 to vector<8x128xf32>
    %957 = arith.mulf %956, %955 : vector<8x128xf32>
    %958 = arith.addf %947, %957 : vector<8x128xf32>
    %959 = vector.extract_strided_slice %0 {offsets = [0, 87], sizes = [8, 1], strides = [1, 1]} : vector<8x256xf32> to vector<8x1xf32>
    %c87 = arith.constant 87 : index
    %c0_263 = arith.constant 0 : index
    %960 = vector.load %arg3[%c87, %c0_263] : memref<256x128xf32, #tpu.memory_space<vmem>>, vector<1x128xf32>
    %c87_264 = arith.constant 87 : index
    %961 = memref.load %arg4[%c87_264] : memref<256xf32, #tpu.memory_space<smem>>
    %962 = vector.broadcast %959 : vector<8x1xf32> to vector<8x128xf32>
    %963 = vector.broadcast %960 : vector<1x128xf32> to vector<8x128xf32>
    %964 = arith.addf %962, %963 : vector<8x128xf32>
    %cst_265 = arith.constant 0.000000e+00 : f32
    %965 = vector.broadcast %cst_265 : f32 to vector<8x128xf32>
    %966 = arith.maximumf %964, %965 : vector<8x128xf32>
    %967 = vector.broadcast %961 : f32 to vector<8x128xf32>
    %968 = arith.mulf %967, %966 : vector<8x128xf32>
    %969 = arith.addf %958, %968 : vector<8x128xf32>
    %970 = vector.extract_strided_slice %0 {offsets = [0, 88], sizes = [8, 1], strides = [1, 1]} : vector<8x256xf32> to vector<8x1xf32>
    %c88 = arith.constant 88 : index
    %c0_266 = arith.constant 0 : index
    %971 = vector.load %arg3[%c88, %c0_266] : memref<256x128xf32, #tpu.memory_space<vmem>>, vector<1x128xf32>
    %c88_267 = arith.constant 88 : index
    %972 = memref.load %arg4[%c88_267] : memref<256xf32, #tpu.memory_space<smem>>
    %973 = vector.broadcast %970 : vector<8x1xf32> to vector<8x128xf32>
    %974 = vector.broadcast %971 : vector<1x128xf32> to vector<8x128xf32>
    %975 = arith.addf %973, %974 : vector<8x128xf32>
    %cst_268 = arith.constant 0.000000e+00 : f32
    %976 = vector.broadcast %cst_268 : f32 to vector<8x128xf32>
    %977 = arith.maximumf %975, %976 : vector<8x128xf32>
    %978 = vector.broadcast %972 : f32 to vector<8x128xf32>
    %979 = arith.mulf %978, %977 : vector<8x128xf32>
    %980 = arith.addf %969, %979 : vector<8x128xf32>
    %981 = vector.extract_strided_slice %0 {offsets = [0, 89], sizes = [8, 1], strides = [1, 1]} : vector<8x256xf32> to vector<8x1xf32>
    %c89 = arith.constant 89 : index
    %c0_269 = arith.constant 0 : index
    %982 = vector.load %arg3[%c89, %c0_269] : memref<256x128xf32, #tpu.memory_space<vmem>>, vector<1x128xf32>
    %c89_270 = arith.constant 89 : index
    %983 = memref.load %arg4[%c89_270] : memref<256xf32, #tpu.memory_space<smem>>
    %984 = vector.broadcast %981 : vector<8x1xf32> to vector<8x128xf32>
    %985 = vector.broadcast %982 : vector<1x128xf32> to vector<8x128xf32>
    %986 = arith.addf %984, %985 : vector<8x128xf32>
    %cst_271 = arith.constant 0.000000e+00 : f32
    %987 = vector.broadcast %cst_271 : f32 to vector<8x128xf32>
    %988 = arith.maximumf %986, %987 : vector<8x128xf32>
    %989 = vector.broadcast %983 : f32 to vector<8x128xf32>
    %990 = arith.mulf %989, %988 : vector<8x128xf32>
    %991 = arith.addf %980, %990 : vector<8x128xf32>
    %992 = vector.extract_strided_slice %0 {offsets = [0, 90], sizes = [8, 1], strides = [1, 1]} : vector<8x256xf32> to vector<8x1xf32>
    %c90 = arith.constant 90 : index
    %c0_272 = arith.constant 0 : index
    %993 = vector.load %arg3[%c90, %c0_272] : memref<256x128xf32, #tpu.memory_space<vmem>>, vector<1x128xf32>
    %c90_273 = arith.constant 90 : index
    %994 = memref.load %arg4[%c90_273] : memref<256xf32, #tpu.memory_space<smem>>
    %995 = vector.broadcast %992 : vector<8x1xf32> to vector<8x128xf32>
    %996 = vector.broadcast %993 : vector<1x128xf32> to vector<8x128xf32>
    %997 = arith.addf %995, %996 : vector<8x128xf32>
    %cst_274 = arith.constant 0.000000e+00 : f32
    %998 = vector.broadcast %cst_274 : f32 to vector<8x128xf32>
    %999 = arith.maximumf %997, %998 : vector<8x128xf32>
    %1000 = vector.broadcast %994 : f32 to vector<8x128xf32>
    %1001 = arith.mulf %1000, %999 : vector<8x128xf32>
    %1002 = arith.addf %991, %1001 : vector<8x128xf32>
    %1003 = vector.extract_strided_slice %0 {offsets = [0, 91], sizes = [8, 1], strides = [1, 1]} : vector<8x256xf32> to vector<8x1xf32>
    %c91 = arith.constant 91 : index
    %c0_275 = arith.constant 0 : index
    %1004 = vector.load %arg3[%c91, %c0_275] : memref<256x128xf32, #tpu.memory_space<vmem>>, vector<1x128xf32>
    %c91_276 = arith.constant 91 : index
    %1005 = memref.load %arg4[%c91_276] : memref<256xf32, #tpu.memory_space<smem>>
    %1006 = vector.broadcast %1003 : vector<8x1xf32> to vector<8x128xf32>
    %1007 = vector.broadcast %1004 : vector<1x128xf32> to vector<8x128xf32>
    %1008 = arith.addf %1006, %1007 : vector<8x128xf32>
    %cst_277 = arith.constant 0.000000e+00 : f32
    %1009 = vector.broadcast %cst_277 : f32 to vector<8x128xf32>
    %1010 = arith.maximumf %1008, %1009 : vector<8x128xf32>
    %1011 = vector.broadcast %1005 : f32 to vector<8x128xf32>
    %1012 = arith.mulf %1011, %1010 : vector<8x128xf32>
    %1013 = arith.addf %1002, %1012 : vector<8x128xf32>
    %1014 = vector.extract_strided_slice %0 {offsets = [0, 92], sizes = [8, 1], strides = [1, 1]} : vector<8x256xf32> to vector<8x1xf32>
    %c92 = arith.constant 92 : index
    %c0_278 = arith.constant 0 : index
    %1015 = vector.load %arg3[%c92, %c0_278] : memref<256x128xf32, #tpu.memory_space<vmem>>, vector<1x128xf32>
    %c92_279 = arith.constant 92 : index
    %1016 = memref.load %arg4[%c92_279] : memref<256xf32, #tpu.memory_space<smem>>
    %1017 = vector.broadcast %1014 : vector<8x1xf32> to vector<8x128xf32>
    %1018 = vector.broadcast %1015 : vector<1x128xf32> to vector<8x128xf32>
    %1019 = arith.addf %1017, %1018 : vector<8x128xf32>
    %cst_280 = arith.constant 0.000000e+00 : f32
    %1020 = vector.broadcast %cst_280 : f32 to vector<8x128xf32>
    %1021 = arith.maximumf %1019, %1020 : vector<8x128xf32>
    %1022 = vector.broadcast %1016 : f32 to vector<8x128xf32>
    %1023 = arith.mulf %1022, %1021 : vector<8x128xf32>
    %1024 = arith.addf %1013, %1023 : vector<8x128xf32>
    %1025 = vector.extract_strided_slice %0 {offsets = [0, 93], sizes = [8, 1], strides = [1, 1]} : vector<8x256xf32> to vector<8x1xf32>
    %c93 = arith.constant 93 : index
    %c0_281 = arith.constant 0 : index
    %1026 = vector.load %arg3[%c93, %c0_281] : memref<256x128xf32, #tpu.memory_space<vmem>>, vector<1x128xf32>
    %c93_282 = arith.constant 93 : index
    %1027 = memref.load %arg4[%c93_282] : memref<256xf32, #tpu.memory_space<smem>>
    %1028 = vector.broadcast %1025 : vector<8x1xf32> to vector<8x128xf32>
    %1029 = vector.broadcast %1026 : vector<1x128xf32> to vector<8x128xf32>
    %1030 = arith.addf %1028, %1029 : vector<8x128xf32>
    %cst_283 = arith.constant 0.000000e+00 : f32
    %1031 = vector.broadcast %cst_283 : f32 to vector<8x128xf32>
    %1032 = arith.maximumf %1030, %1031 : vector<8x128xf32>
    %1033 = vector.broadcast %1027 : f32 to vector<8x128xf32>
    %1034 = arith.mulf %1033, %1032 : vector<8x128xf32>
    %1035 = arith.addf %1024, %1034 : vector<8x128xf32>
    %1036 = vector.extract_strided_slice %0 {offsets = [0, 94], sizes = [8, 1], strides = [1, 1]} : vector<8x256xf32> to vector<8x1xf32>
    %c94 = arith.constant 94 : index
    %c0_284 = arith.constant 0 : index
    %1037 = vector.load %arg3[%c94, %c0_284] : memref<256x128xf32, #tpu.memory_space<vmem>>, vector<1x128xf32>
    %c94_285 = arith.constant 94 : index
    %1038 = memref.load %arg4[%c94_285] : memref<256xf32, #tpu.memory_space<smem>>
    %1039 = vector.broadcast %1036 : vector<8x1xf32> to vector<8x128xf32>
    %1040 = vector.broadcast %1037 : vector<1x128xf32> to vector<8x128xf32>
    %1041 = arith.addf %1039, %1040 : vector<8x128xf32>
    %cst_286 = arith.constant 0.000000e+00 : f32
    %1042 = vector.broadcast %cst_286 : f32 to vector<8x128xf32>
    %1043 = arith.maximumf %1041, %1042 : vector<8x128xf32>
    %1044 = vector.broadcast %1038 : f32 to vector<8x128xf32>
    %1045 = arith.mulf %1044, %1043 : vector<8x128xf32>
    %1046 = arith.addf %1035, %1045 : vector<8x128xf32>
    %1047 = vector.extract_strided_slice %0 {offsets = [0, 95], sizes = [8, 1], strides = [1, 1]} : vector<8x256xf32> to vector<8x1xf32>
    %c95 = arith.constant 95 : index
    %c0_287 = arith.constant 0 : index
    %1048 = vector.load %arg3[%c95, %c0_287] : memref<256x128xf32, #tpu.memory_space<vmem>>, vector<1x128xf32>
    %c95_288 = arith.constant 95 : index
    %1049 = memref.load %arg4[%c95_288] : memref<256xf32, #tpu.memory_space<smem>>
    %1050 = vector.broadcast %1047 : vector<8x1xf32> to vector<8x128xf32>
    %1051 = vector.broadcast %1048 : vector<1x128xf32> to vector<8x128xf32>
    %1052 = arith.addf %1050, %1051 : vector<8x128xf32>
    %cst_289 = arith.constant 0.000000e+00 : f32
    %1053 = vector.broadcast %cst_289 : f32 to vector<8x128xf32>
    %1054 = arith.maximumf %1052, %1053 : vector<8x128xf32>
    %1055 = vector.broadcast %1049 : f32 to vector<8x128xf32>
    %1056 = arith.mulf %1055, %1054 : vector<8x128xf32>
    %1057 = arith.addf %1046, %1056 : vector<8x128xf32>
    %1058 = vector.extract_strided_slice %0 {offsets = [0, 96], sizes = [8, 1], strides = [1, 1]} : vector<8x256xf32> to vector<8x1xf32>
    %c96 = arith.constant 96 : index
    %c0_290 = arith.constant 0 : index
    %1059 = vector.load %arg3[%c96, %c0_290] : memref<256x128xf32, #tpu.memory_space<vmem>>, vector<1x128xf32>
    %c96_291 = arith.constant 96 : index
    %1060 = memref.load %arg4[%c96_291] : memref<256xf32, #tpu.memory_space<smem>>
    %1061 = vector.broadcast %1058 : vector<8x1xf32> to vector<8x128xf32>
    %1062 = vector.broadcast %1059 : vector<1x128xf32> to vector<8x128xf32>
    %1063 = arith.addf %1061, %1062 : vector<8x128xf32>
    %cst_292 = arith.constant 0.000000e+00 : f32
    %1064 = vector.broadcast %cst_292 : f32 to vector<8x128xf32>
    %1065 = arith.maximumf %1063, %1064 : vector<8x128xf32>
    %1066 = vector.broadcast %1060 : f32 to vector<8x128xf32>
    %1067 = arith.mulf %1066, %1065 : vector<8x128xf32>
    %1068 = arith.addf %1057, %1067 : vector<8x128xf32>
    %1069 = vector.extract_strided_slice %0 {offsets = [0, 97], sizes = [8, 1], strides = [1, 1]} : vector<8x256xf32> to vector<8x1xf32>
    %c97 = arith.constant 97 : index
    %c0_293 = arith.constant 0 : index
    %1070 = vector.load %arg3[%c97, %c0_293] : memref<256x128xf32, #tpu.memory_space<vmem>>, vector<1x128xf32>
    %c97_294 = arith.constant 97 : index
    %1071 = memref.load %arg4[%c97_294] : memref<256xf32, #tpu.memory_space<smem>>
    %1072 = vector.broadcast %1069 : vector<8x1xf32> to vector<8x128xf32>
    %1073 = vector.broadcast %1070 : vector<1x128xf32> to vector<8x128xf32>
    %1074 = arith.addf %1072, %1073 : vector<8x128xf32>
    %cst_295 = arith.constant 0.000000e+00 : f32
    %1075 = vector.broadcast %cst_295 : f32 to vector<8x128xf32>
    %1076 = arith.maximumf %1074, %1075 : vector<8x128xf32>
    %1077 = vector.broadcast %1071 : f32 to vector<8x128xf32>
    %1078 = arith.mulf %1077, %1076 : vector<8x128xf32>
    %1079 = arith.addf %1068, %1078 : vector<8x128xf32>
    %1080 = vector.extract_strided_slice %0 {offsets = [0, 98], sizes = [8, 1], strides = [1, 1]} : vector<8x256xf32> to vector<8x1xf32>
    %c98 = arith.constant 98 : index
    %c0_296 = arith.constant 0 : index
    %1081 = vector.load %arg3[%c98, %c0_296] : memref<256x128xf32, #tpu.memory_space<vmem>>, vector<1x128xf32>
    %c98_297 = arith.constant 98 : index
    %1082 = memref.load %arg4[%c98_297] : memref<256xf32, #tpu.memory_space<smem>>
    %1083 = vector.broadcast %1080 : vector<8x1xf32> to vector<8x128xf32>
    %1084 = vector.broadcast %1081 : vector<1x128xf32> to vector<8x128xf32>
    %1085 = arith.addf %1083, %1084 : vector<8x128xf32>
    %cst_298 = arith.constant 0.000000e+00 : f32
    %1086 = vector.broadcast %cst_298 : f32 to vector<8x128xf32>
    %1087 = arith.maximumf %1085, %1086 : vector<8x128xf32>
    %1088 = vector.broadcast %1082 : f32 to vector<8x128xf32>
    %1089 = arith.mulf %1088, %1087 : vector<8x128xf32>
    %1090 = arith.addf %1079, %1089 : vector<8x128xf32>
    %1091 = vector.extract_strided_slice %0 {offsets = [0, 99], sizes = [8, 1], strides = [1, 1]} : vector<8x256xf32> to vector<8x1xf32>
    %c99 = arith.constant 99 : index
    %c0_299 = arith.constant 0 : index
    %1092 = vector.load %arg3[%c99, %c0_299] : memref<256x128xf32, #tpu.memory_space<vmem>>, vector<1x128xf32>
    %c99_300 = arith.constant 99 : index
    %1093 = memref.load %arg4[%c99_300] : memref<256xf32, #tpu.memory_space<smem>>
    %1094 = vector.broadcast %1091 : vector<8x1xf32> to vector<8x128xf32>
    %1095 = vector.broadcast %1092 : vector<1x128xf32> to vector<8x128xf32>
    %1096 = arith.addf %1094, %1095 : vector<8x128xf32>
    %cst_301 = arith.constant 0.000000e+00 : f32
    %1097 = vector.broadcast %cst_301 : f32 to vector<8x128xf32>
    %1098 = arith.maximumf %1096, %1097 : vector<8x128xf32>
    %1099 = vector.broadcast %1093 : f32 to vector<8x128xf32>
    %1100 = arith.mulf %1099, %1098 : vector<8x128xf32>
    %1101 = arith.addf %1090, %1100 : vector<8x128xf32>
    %1102 = vector.extract_strided_slice %0 {offsets = [0, 100], sizes = [8, 1], strides = [1, 1]} : vector<8x256xf32> to vector<8x1xf32>
    %c100 = arith.constant 100 : index
    %c0_302 = arith.constant 0 : index
    %1103 = vector.load %arg3[%c100, %c0_302] : memref<256x128xf32, #tpu.memory_space<vmem>>, vector<1x128xf32>
    %c100_303 = arith.constant 100 : index
    %1104 = memref.load %arg4[%c100_303] : memref<256xf32, #tpu.memory_space<smem>>
    %1105 = vector.broadcast %1102 : vector<8x1xf32> to vector<8x128xf32>
    %1106 = vector.broadcast %1103 : vector<1x128xf32> to vector<8x128xf32>
    %1107 = arith.addf %1105, %1106 : vector<8x128xf32>
    %cst_304 = arith.constant 0.000000e+00 : f32
    %1108 = vector.broadcast %cst_304 : f32 to vector<8x128xf32>
    %1109 = arith.maximumf %1107, %1108 : vector<8x128xf32>
    %1110 = vector.broadcast %1104 : f32 to vector<8x128xf32>
    %1111 = arith.mulf %1110, %1109 : vector<8x128xf32>
    %1112 = arith.addf %1101, %1111 : vector<8x128xf32>
    %1113 = vector.extract_strided_slice %0 {offsets = [0, 101], sizes = [8, 1], strides = [1, 1]} : vector<8x256xf32> to vector<8x1xf32>
    %c101 = arith.constant 101 : index
    %c0_305 = arith.constant 0 : index
    %1114 = vector.load %arg3[%c101, %c0_305] : memref<256x128xf32, #tpu.memory_space<vmem>>, vector<1x128xf32>
    %c101_306 = arith.constant 101 : index
    %1115 = memref.load %arg4[%c101_306] : memref<256xf32, #tpu.memory_space<smem>>
    %1116 = vector.broadcast %1113 : vector<8x1xf32> to vector<8x128xf32>
    %1117 = vector.broadcast %1114 : vector<1x128xf32> to vector<8x128xf32>
    %1118 = arith.addf %1116, %1117 : vector<8x128xf32>
    %cst_307 = arith.constant 0.000000e+00 : f32
    %1119 = vector.broadcast %cst_307 : f32 to vector<8x128xf32>
    %1120 = arith.maximumf %1118, %1119 : vector<8x128xf32>
    %1121 = vector.broadcast %1115 : f32 to vector<8x128xf32>
    %1122 = arith.mulf %1121, %1120 : vector<8x128xf32>
    %1123 = arith.addf %1112, %1122 : vector<8x128xf32>
    %1124 = vector.extract_strided_slice %0 {offsets = [0, 102], sizes = [8, 1], strides = [1, 1]} : vector<8x256xf32> to vector<8x1xf32>
    %c102 = arith.constant 102 : index
    %c0_308 = arith.constant 0 : index
    %1125 = vector.load %arg3[%c102, %c0_308] : memref<256x128xf32, #tpu.memory_space<vmem>>, vector<1x128xf32>
    %c102_309 = arith.constant 102 : index
    %1126 = memref.load %arg4[%c102_309] : memref<256xf32, #tpu.memory_space<smem>>
    %1127 = vector.broadcast %1124 : vector<8x1xf32> to vector<8x128xf32>
    %1128 = vector.broadcast %1125 : vector<1x128xf32> to vector<8x128xf32>
    %1129 = arith.addf %1127, %1128 : vector<8x128xf32>
    %cst_310 = arith.constant 0.000000e+00 : f32
    %1130 = vector.broadcast %cst_310 : f32 to vector<8x128xf32>
    %1131 = arith.maximumf %1129, %1130 : vector<8x128xf32>
    %1132 = vector.broadcast %1126 : f32 to vector<8x128xf32>
    %1133 = arith.mulf %1132, %1131 : vector<8x128xf32>
    %1134 = arith.addf %1123, %1133 : vector<8x128xf32>
    %1135 = vector.extract_strided_slice %0 {offsets = [0, 103], sizes = [8, 1], strides = [1, 1]} : vector<8x256xf32> to vector<8x1xf32>
    %c103 = arith.constant 103 : index
    %c0_311 = arith.constant 0 : index
    %1136 = vector.load %arg3[%c103, %c0_311] : memref<256x128xf32, #tpu.memory_space<vmem>>, vector<1x128xf32>
    %c103_312 = arith.constant 103 : index
    %1137 = memref.load %arg4[%c103_312] : memref<256xf32, #tpu.memory_space<smem>>
    %1138 = vector.broadcast %1135 : vector<8x1xf32> to vector<8x128xf32>
    %1139 = vector.broadcast %1136 : vector<1x128xf32> to vector<8x128xf32>
    %1140 = arith.addf %1138, %1139 : vector<8x128xf32>
    %cst_313 = arith.constant 0.000000e+00 : f32
    %1141 = vector.broadcast %cst_313 : f32 to vector<8x128xf32>
    %1142 = arith.maximumf %1140, %1141 : vector<8x128xf32>
    %1143 = vector.broadcast %1137 : f32 to vector<8x128xf32>
    %1144 = arith.mulf %1143, %1142 : vector<8x128xf32>
    %1145 = arith.addf %1134, %1144 : vector<8x128xf32>
    %1146 = vector.extract_strided_slice %0 {offsets = [0, 104], sizes = [8, 1], strides = [1, 1]} : vector<8x256xf32> to vector<8x1xf32>
    %c104 = arith.constant 104 : index
    %c0_314 = arith.constant 0 : index
    %1147 = vector.load %arg3[%c104, %c0_314] : memref<256x128xf32, #tpu.memory_space<vmem>>, vector<1x128xf32>
    %c104_315 = arith.constant 104 : index
    %1148 = memref.load %arg4[%c104_315] : memref<256xf32, #tpu.memory_space<smem>>
    %1149 = vector.broadcast %1146 : vector<8x1xf32> to vector<8x128xf32>
    %1150 = vector.broadcast %1147 : vector<1x128xf32> to vector<8x128xf32>
    %1151 = arith.addf %1149, %1150 : vector<8x128xf32>
    %cst_316 = arith.constant 0.000000e+00 : f32
    %1152 = vector.broadcast %cst_316 : f32 to vector<8x128xf32>
    %1153 = arith.maximumf %1151, %1152 : vector<8x128xf32>
    %1154 = vector.broadcast %1148 : f32 to vector<8x128xf32>
    %1155 = arith.mulf %1154, %1153 : vector<8x128xf32>
    %1156 = arith.addf %1145, %1155 : vector<8x128xf32>
    %1157 = vector.extract_strided_slice %0 {offsets = [0, 105], sizes = [8, 1], strides = [1, 1]} : vector<8x256xf32> to vector<8x1xf32>
    %c105 = arith.constant 105 : index
    %c0_317 = arith.constant 0 : index
    %1158 = vector.load %arg3[%c105, %c0_317] : memref<256x128xf32, #tpu.memory_space<vmem>>, vector<1x128xf32>
    %c105_318 = arith.constant 105 : index
    %1159 = memref.load %arg4[%c105_318] : memref<256xf32, #tpu.memory_space<smem>>
    %1160 = vector.broadcast %1157 : vector<8x1xf32> to vector<8x128xf32>
    %1161 = vector.broadcast %1158 : vector<1x128xf32> to vector<8x128xf32>
    %1162 = arith.addf %1160, %1161 : vector<8x128xf32>
    %cst_319 = arith.constant 0.000000e+00 : f32
    %1163 = vector.broadcast %cst_319 : f32 to vector<8x128xf32>
    %1164 = arith.maximumf %1162, %1163 : vector<8x128xf32>
    %1165 = vector.broadcast %1159 : f32 to vector<8x128xf32>
    %1166 = arith.mulf %1165, %1164 : vector<8x128xf32>
    %1167 = arith.addf %1156, %1166 : vector<8x128xf32>
    %1168 = vector.extract_strided_slice %0 {offsets = [0, 106], sizes = [8, 1], strides = [1, 1]} : vector<8x256xf32> to vector<8x1xf32>
    %c106 = arith.constant 106 : index
    %c0_320 = arith.constant 0 : index
    %1169 = vector.load %arg3[%c106, %c0_320] : memref<256x128xf32, #tpu.memory_space<vmem>>, vector<1x128xf32>
    %c106_321 = arith.constant 106 : index
    %1170 = memref.load %arg4[%c106_321] : memref<256xf32, #tpu.memory_space<smem>>
    %1171 = vector.broadcast %1168 : vector<8x1xf32> to vector<8x128xf32>
    %1172 = vector.broadcast %1169 : vector<1x128xf32> to vector<8x128xf32>
    %1173 = arith.addf %1171, %1172 : vector<8x128xf32>
    %cst_322 = arith.constant 0.000000e+00 : f32
    %1174 = vector.broadcast %cst_322 : f32 to vector<8x128xf32>
    %1175 = arith.maximumf %1173, %1174 : vector<8x128xf32>
    %1176 = vector.broadcast %1170 : f32 to vector<8x128xf32>
    %1177 = arith.mulf %1176, %1175 : vector<8x128xf32>
    %1178 = arith.addf %1167, %1177 : vector<8x128xf32>
    %1179 = vector.extract_strided_slice %0 {offsets = [0, 107], sizes = [8, 1], strides = [1, 1]} : vector<8x256xf32> to vector<8x1xf32>
    %c107 = arith.constant 107 : index
    %c0_323 = arith.constant 0 : index
    %1180 = vector.load %arg3[%c107, %c0_323] : memref<256x128xf32, #tpu.memory_space<vmem>>, vector<1x128xf32>
    %c107_324 = arith.constant 107 : index
    %1181 = memref.load %arg4[%c107_324] : memref<256xf32, #tpu.memory_space<smem>>
    %1182 = vector.broadcast %1179 : vector<8x1xf32> to vector<8x128xf32>
    %1183 = vector.broadcast %1180 : vector<1x128xf32> to vector<8x128xf32>
    %1184 = arith.addf %1182, %1183 : vector<8x128xf32>
    %cst_325 = arith.constant 0.000000e+00 : f32
    %1185 = vector.broadcast %cst_325 : f32 to vector<8x128xf32>
    %1186 = arith.maximumf %1184, %1185 : vector<8x128xf32>
    %1187 = vector.broadcast %1181 : f32 to vector<8x128xf32>
    %1188 = arith.mulf %1187, %1186 : vector<8x128xf32>
    %1189 = arith.addf %1178, %1188 : vector<8x128xf32>
    %1190 = vector.extract_strided_slice %0 {offsets = [0, 108], sizes = [8, 1], strides = [1, 1]} : vector<8x256xf32> to vector<8x1xf32>
    %c108 = arith.constant 108 : index
    %c0_326 = arith.constant 0 : index
    %1191 = vector.load %arg3[%c108, %c0_326] : memref<256x128xf32, #tpu.memory_space<vmem>>, vector<1x128xf32>
    %c108_327 = arith.constant 108 : index
    %1192 = memref.load %arg4[%c108_327] : memref<256xf32, #tpu.memory_space<smem>>
    %1193 = vector.broadcast %1190 : vector<8x1xf32> to vector<8x128xf32>
    %1194 = vector.broadcast %1191 : vector<1x128xf32> to vector<8x128xf32>
    %1195 = arith.addf %1193, %1194 : vector<8x128xf32>
    %cst_328 = arith.constant 0.000000e+00 : f32
    %1196 = vector.broadcast %cst_328 : f32 to vector<8x128xf32>
    %1197 = arith.maximumf %1195, %1196 : vector<8x128xf32>
    %1198 = vector.broadcast %1192 : f32 to vector<8x128xf32>
    %1199 = arith.mulf %1198, %1197 : vector<8x128xf32>
    %1200 = arith.addf %1189, %1199 : vector<8x128xf32>
    %1201 = vector.extract_strided_slice %0 {offsets = [0, 109], sizes = [8, 1], strides = [1, 1]} : vector<8x256xf32> to vector<8x1xf32>
    %c109 = arith.constant 109 : index
    %c0_329 = arith.constant 0 : index
    %1202 = vector.load %arg3[%c109, %c0_329] : memref<256x128xf32, #tpu.memory_space<vmem>>, vector<1x128xf32>
    %c109_330 = arith.constant 109 : index
    %1203 = memref.load %arg4[%c109_330] : memref<256xf32, #tpu.memory_space<smem>>
    %1204 = vector.broadcast %1201 : vector<8x1xf32> to vector<8x128xf32>
    %1205 = vector.broadcast %1202 : vector<1x128xf32> to vector<8x128xf32>
    %1206 = arith.addf %1204, %1205 : vector<8x128xf32>
    %cst_331 = arith.constant 0.000000e+00 : f32
    %1207 = vector.broadcast %cst_331 : f32 to vector<8x128xf32>
    %1208 = arith.maximumf %1206, %1207 : vector<8x128xf32>
    %1209 = vector.broadcast %1203 : f32 to vector<8x128xf32>
    %1210 = arith.mulf %1209, %1208 : vector<8x128xf32>
    %1211 = arith.addf %1200, %1210 : vector<8x128xf32>
    %1212 = vector.extract_strided_slice %0 {offsets = [0, 110], sizes = [8, 1], strides = [1, 1]} : vector<8x256xf32> to vector<8x1xf32>
    %c110 = arith.constant 110 : index
    %c0_332 = arith.constant 0 : index
    %1213 = vector.load %arg3[%c110, %c0_332] : memref<256x128xf32, #tpu.memory_space<vmem>>, vector<1x128xf32>
    %c110_333 = arith.constant 110 : index
    %1214 = memref.load %arg4[%c110_333] : memref<256xf32, #tpu.memory_space<smem>>
    %1215 = vector.broadcast %1212 : vector<8x1xf32> to vector<8x128xf32>
    %1216 = vector.broadcast %1213 : vector<1x128xf32> to vector<8x128xf32>
    %1217 = arith.addf %1215, %1216 : vector<8x128xf32>
    %cst_334 = arith.constant 0.000000e+00 : f32
    %1218 = vector.broadcast %cst_334 : f32 to vector<8x128xf32>
    %1219 = arith.maximumf %1217, %1218 : vector<8x128xf32>
    %1220 = vector.broadcast %1214 : f32 to vector<8x128xf32>
    %1221 = arith.mulf %1220, %1219 : vector<8x128xf32>
    %1222 = arith.addf %1211, %1221 : vector<8x128xf32>
    %1223 = vector.extract_strided_slice %0 {offsets = [0, 111], sizes = [8, 1], strides = [1, 1]} : vector<8x256xf32> to vector<8x1xf32>
    %c111 = arith.constant 111 : index
    %c0_335 = arith.constant 0 : index
    %1224 = vector.load %arg3[%c111, %c0_335] : memref<256x128xf32, #tpu.memory_space<vmem>>, vector<1x128xf32>
    %c111_336 = arith.constant 111 : index
    %1225 = memref.load %arg4[%c111_336] : memref<256xf32, #tpu.memory_space<smem>>
    %1226 = vector.broadcast %1223 : vector<8x1xf32> to vector<8x128xf32>
    %1227 = vector.broadcast %1224 : vector<1x128xf32> to vector<8x128xf32>
    %1228 = arith.addf %1226, %1227 : vector<8x128xf32>
    %cst_337 = arith.constant 0.000000e+00 : f32
    %1229 = vector.broadcast %cst_337 : f32 to vector<8x128xf32>
    %1230 = arith.maximumf %1228, %1229 : vector<8x128xf32>
    %1231 = vector.broadcast %1225 : f32 to vector<8x128xf32>
    %1232 = arith.mulf %1231, %1230 : vector<8x128xf32>
    %1233 = arith.addf %1222, %1232 : vector<8x128xf32>
    %1234 = vector.extract_strided_slice %0 {offsets = [0, 112], sizes = [8, 1], strides = [1, 1]} : vector<8x256xf32> to vector<8x1xf32>
    %c112 = arith.constant 112 : index
    %c0_338 = arith.constant 0 : index
    %1235 = vector.load %arg3[%c112, %c0_338] : memref<256x128xf32, #tpu.memory_space<vmem>>, vector<1x128xf32>
    %c112_339 = arith.constant 112 : index
    %1236 = memref.load %arg4[%c112_339] : memref<256xf32, #tpu.memory_space<smem>>
    %1237 = vector.broadcast %1234 : vector<8x1xf32> to vector<8x128xf32>
    %1238 = vector.broadcast %1235 : vector<1x128xf32> to vector<8x128xf32>
    %1239 = arith.addf %1237, %1238 : vector<8x128xf32>
    %cst_340 = arith.constant 0.000000e+00 : f32
    %1240 = vector.broadcast %cst_340 : f32 to vector<8x128xf32>
    %1241 = arith.maximumf %1239, %1240 : vector<8x128xf32>
    %1242 = vector.broadcast %1236 : f32 to vector<8x128xf32>
    %1243 = arith.mulf %1242, %1241 : vector<8x128xf32>
    %1244 = arith.addf %1233, %1243 : vector<8x128xf32>
    %1245 = vector.extract_strided_slice %0 {offsets = [0, 113], sizes = [8, 1], strides = [1, 1]} : vector<8x256xf32> to vector<8x1xf32>
    %c113 = arith.constant 113 : index
    %c0_341 = arith.constant 0 : index
    %1246 = vector.load %arg3[%c113, %c0_341] : memref<256x128xf32, #tpu.memory_space<vmem>>, vector<1x128xf32>
    %c113_342 = arith.constant 113 : index
    %1247 = memref.load %arg4[%c113_342] : memref<256xf32, #tpu.memory_space<smem>>
    %1248 = vector.broadcast %1245 : vector<8x1xf32> to vector<8x128xf32>
    %1249 = vector.broadcast %1246 : vector<1x128xf32> to vector<8x128xf32>
    %1250 = arith.addf %1248, %1249 : vector<8x128xf32>
    %cst_343 = arith.constant 0.000000e+00 : f32
    %1251 = vector.broadcast %cst_343 : f32 to vector<8x128xf32>
    %1252 = arith.maximumf %1250, %1251 : vector<8x128xf32>
    %1253 = vector.broadcast %1247 : f32 to vector<8x128xf32>
    %1254 = arith.mulf %1253, %1252 : vector<8x128xf32>
    %1255 = arith.addf %1244, %1254 : vector<8x128xf32>
    %1256 = vector.extract_strided_slice %0 {offsets = [0, 114], sizes = [8, 1], strides = [1, 1]} : vector<8x256xf32> to vector<8x1xf32>
    %c114 = arith.constant 114 : index
    %c0_344 = arith.constant 0 : index
    %1257 = vector.load %arg3[%c114, %c0_344] : memref<256x128xf32, #tpu.memory_space<vmem>>, vector<1x128xf32>
    %c114_345 = arith.constant 114 : index
    %1258 = memref.load %arg4[%c114_345] : memref<256xf32, #tpu.memory_space<smem>>
    %1259 = vector.broadcast %1256 : vector<8x1xf32> to vector<8x128xf32>
    %1260 = vector.broadcast %1257 : vector<1x128xf32> to vector<8x128xf32>
    %1261 = arith.addf %1259, %1260 : vector<8x128xf32>
    %cst_346 = arith.constant 0.000000e+00 : f32
    %1262 = vector.broadcast %cst_346 : f32 to vector<8x128xf32>
    %1263 = arith.maximumf %1261, %1262 : vector<8x128xf32>
    %1264 = vector.broadcast %1258 : f32 to vector<8x128xf32>
    %1265 = arith.mulf %1264, %1263 : vector<8x128xf32>
    %1266 = arith.addf %1255, %1265 : vector<8x128xf32>
    %1267 = vector.extract_strided_slice %0 {offsets = [0, 115], sizes = [8, 1], strides = [1, 1]} : vector<8x256xf32> to vector<8x1xf32>
    %c115 = arith.constant 115 : index
    %c0_347 = arith.constant 0 : index
    %1268 = vector.load %arg3[%c115, %c0_347] : memref<256x128xf32, #tpu.memory_space<vmem>>, vector<1x128xf32>
    %c115_348 = arith.constant 115 : index
    %1269 = memref.load %arg4[%c115_348] : memref<256xf32, #tpu.memory_space<smem>>
    %1270 = vector.broadcast %1267 : vector<8x1xf32> to vector<8x128xf32>
    %1271 = vector.broadcast %1268 : vector<1x128xf32> to vector<8x128xf32>
    %1272 = arith.addf %1270, %1271 : vector<8x128xf32>
    %cst_349 = arith.constant 0.000000e+00 : f32
    %1273 = vector.broadcast %cst_349 : f32 to vector<8x128xf32>
    %1274 = arith.maximumf %1272, %1273 : vector<8x128xf32>
    %1275 = vector.broadcast %1269 : f32 to vector<8x128xf32>
    %1276 = arith.mulf %1275, %1274 : vector<8x128xf32>
    %1277 = arith.addf %1266, %1276 : vector<8x128xf32>
    %1278 = vector.extract_strided_slice %0 {offsets = [0, 116], sizes = [8, 1], strides = [1, 1]} : vector<8x256xf32> to vector<8x1xf32>
    %c116 = arith.constant 116 : index
    %c0_350 = arith.constant 0 : index
    %1279 = vector.load %arg3[%c116, %c0_350] : memref<256x128xf32, #tpu.memory_space<vmem>>, vector<1x128xf32>
    %c116_351 = arith.constant 116 : index
    %1280 = memref.load %arg4[%c116_351] : memref<256xf32, #tpu.memory_space<smem>>
    %1281 = vector.broadcast %1278 : vector<8x1xf32> to vector<8x128xf32>
    %1282 = vector.broadcast %1279 : vector<1x128xf32> to vector<8x128xf32>
    %1283 = arith.addf %1281, %1282 : vector<8x128xf32>
    %cst_352 = arith.constant 0.000000e+00 : f32
    %1284 = vector.broadcast %cst_352 : f32 to vector<8x128xf32>
    %1285 = arith.maximumf %1283, %1284 : vector<8x128xf32>
    %1286 = vector.broadcast %1280 : f32 to vector<8x128xf32>
    %1287 = arith.mulf %1286, %1285 : vector<8x128xf32>
    %1288 = arith.addf %1277, %1287 : vector<8x128xf32>
    %1289 = vector.extract_strided_slice %0 {offsets = [0, 117], sizes = [8, 1], strides = [1, 1]} : vector<8x256xf32> to vector<8x1xf32>
    %c117 = arith.constant 117 : index
    %c0_353 = arith.constant 0 : index
    %1290 = vector.load %arg3[%c117, %c0_353] : memref<256x128xf32, #tpu.memory_space<vmem>>, vector<1x128xf32>
    %c117_354 = arith.constant 117 : index
    %1291 = memref.load %arg4[%c117_354] : memref<256xf32, #tpu.memory_space<smem>>
    %1292 = vector.broadcast %1289 : vector<8x1xf32> to vector<8x128xf32>
    %1293 = vector.broadcast %1290 : vector<1x128xf32> to vector<8x128xf32>
    %1294 = arith.addf %1292, %1293 : vector<8x128xf32>
    %cst_355 = arith.constant 0.000000e+00 : f32
    %1295 = vector.broadcast %cst_355 : f32 to vector<8x128xf32>
    %1296 = arith.maximumf %1294, %1295 : vector<8x128xf32>
    %1297 = vector.broadcast %1291 : f32 to vector<8x128xf32>
    %1298 = arith.mulf %1297, %1296 : vector<8x128xf32>
    %1299 = arith.addf %1288, %1298 : vector<8x128xf32>
    %1300 = vector.extract_strided_slice %0 {offsets = [0, 118], sizes = [8, 1], strides = [1, 1]} : vector<8x256xf32> to vector<8x1xf32>
    %c118 = arith.constant 118 : index
    %c0_356 = arith.constant 0 : index
    %1301 = vector.load %arg3[%c118, %c0_356] : memref<256x128xf32, #tpu.memory_space<vmem>>, vector<1x128xf32>
    %c118_357 = arith.constant 118 : index
    %1302 = memref.load %arg4[%c118_357] : memref<256xf32, #tpu.memory_space<smem>>
    %1303 = vector.broadcast %1300 : vector<8x1xf32> to vector<8x128xf32>
    %1304 = vector.broadcast %1301 : vector<1x128xf32> to vector<8x128xf32>
    %1305 = arith.addf %1303, %1304 : vector<8x128xf32>
    %cst_358 = arith.constant 0.000000e+00 : f32
    %1306 = vector.broadcast %cst_358 : f32 to vector<8x128xf32>
    %1307 = arith.maximumf %1305, %1306 : vector<8x128xf32>
    %1308 = vector.broadcast %1302 : f32 to vector<8x128xf32>
    %1309 = arith.mulf %1308, %1307 : vector<8x128xf32>
    %1310 = arith.addf %1299, %1309 : vector<8x128xf32>
    %1311 = vector.extract_strided_slice %0 {offsets = [0, 119], sizes = [8, 1], strides = [1, 1]} : vector<8x256xf32> to vector<8x1xf32>
    %c119 = arith.constant 119 : index
    %c0_359 = arith.constant 0 : index
    %1312 = vector.load %arg3[%c119, %c0_359] : memref<256x128xf32, #tpu.memory_space<vmem>>, vector<1x128xf32>
    %c119_360 = arith.constant 119 : index
    %1313 = memref.load %arg4[%c119_360] : memref<256xf32, #tpu.memory_space<smem>>
    %1314 = vector.broadcast %1311 : vector<8x1xf32> to vector<8x128xf32>
    %1315 = vector.broadcast %1312 : vector<1x128xf32> to vector<8x128xf32>
    %1316 = arith.addf %1314, %1315 : vector<8x128xf32>
    %cst_361 = arith.constant 0.000000e+00 : f32
    %1317 = vector.broadcast %cst_361 : f32 to vector<8x128xf32>
    %1318 = arith.maximumf %1316, %1317 : vector<8x128xf32>
    %1319 = vector.broadcast %1313 : f32 to vector<8x128xf32>
    %1320 = arith.mulf %1319, %1318 : vector<8x128xf32>
    %1321 = arith.addf %1310, %1320 : vector<8x128xf32>
    %1322 = vector.extract_strided_slice %0 {offsets = [0, 120], sizes = [8, 1], strides = [1, 1]} : vector<8x256xf32> to vector<8x1xf32>
    %c120 = arith.constant 120 : index
    %c0_362 = arith.constant 0 : index
    %1323 = vector.load %arg3[%c120, %c0_362] : memref<256x128xf32, #tpu.memory_space<vmem>>, vector<1x128xf32>
    %c120_363 = arith.constant 120 : index
    %1324 = memref.load %arg4[%c120_363] : memref<256xf32, #tpu.memory_space<smem>>
    %1325 = vector.broadcast %1322 : vector<8x1xf32> to vector<8x128xf32>
    %1326 = vector.broadcast %1323 : vector<1x128xf32> to vector<8x128xf32>
    %1327 = arith.addf %1325, %1326 : vector<8x128xf32>
    %cst_364 = arith.constant 0.000000e+00 : f32
    %1328 = vector.broadcast %cst_364 : f32 to vector<8x128xf32>
    %1329 = arith.maximumf %1327, %1328 : vector<8x128xf32>
    %1330 = vector.broadcast %1324 : f32 to vector<8x128xf32>
    %1331 = arith.mulf %1330, %1329 : vector<8x128xf32>
    %1332 = arith.addf %1321, %1331 : vector<8x128xf32>
    %1333 = vector.extract_strided_slice %0 {offsets = [0, 121], sizes = [8, 1], strides = [1, 1]} : vector<8x256xf32> to vector<8x1xf32>
    %c121 = arith.constant 121 : index
    %c0_365 = arith.constant 0 : index
    %1334 = vector.load %arg3[%c121, %c0_365] : memref<256x128xf32, #tpu.memory_space<vmem>>, vector<1x128xf32>
    %c121_366 = arith.constant 121 : index
    %1335 = memref.load %arg4[%c121_366] : memref<256xf32, #tpu.memory_space<smem>>
    %1336 = vector.broadcast %1333 : vector<8x1xf32> to vector<8x128xf32>
    %1337 = vector.broadcast %1334 : vector<1x128xf32> to vector<8x128xf32>
    %1338 = arith.addf %1336, %1337 : vector<8x128xf32>
    %cst_367 = arith.constant 0.000000e+00 : f32
    %1339 = vector.broadcast %cst_367 : f32 to vector<8x128xf32>
    %1340 = arith.maximumf %1338, %1339 : vector<8x128xf32>
    %1341 = vector.broadcast %1335 : f32 to vector<8x128xf32>
    %1342 = arith.mulf %1341, %1340 : vector<8x128xf32>
    %1343 = arith.addf %1332, %1342 : vector<8x128xf32>
    %1344 = vector.extract_strided_slice %0 {offsets = [0, 122], sizes = [8, 1], strides = [1, 1]} : vector<8x256xf32> to vector<8x1xf32>
    %c122 = arith.constant 122 : index
    %c0_368 = arith.constant 0 : index
    %1345 = vector.load %arg3[%c122, %c0_368] : memref<256x128xf32, #tpu.memory_space<vmem>>, vector<1x128xf32>
    %c122_369 = arith.constant 122 : index
    %1346 = memref.load %arg4[%c122_369] : memref<256xf32, #tpu.memory_space<smem>>
    %1347 = vector.broadcast %1344 : vector<8x1xf32> to vector<8x128xf32>
    %1348 = vector.broadcast %1345 : vector<1x128xf32> to vector<8x128xf32>
    %1349 = arith.addf %1347, %1348 : vector<8x128xf32>
    %cst_370 = arith.constant 0.000000e+00 : f32
    %1350 = vector.broadcast %cst_370 : f32 to vector<8x128xf32>
    %1351 = arith.maximumf %1349, %1350 : vector<8x128xf32>
    %1352 = vector.broadcast %1346 : f32 to vector<8x128xf32>
    %1353 = arith.mulf %1352, %1351 : vector<8x128xf32>
    %1354 = arith.addf %1343, %1353 : vector<8x128xf32>
    %1355 = vector.extract_strided_slice %0 {offsets = [0, 123], sizes = [8, 1], strides = [1, 1]} : vector<8x256xf32> to vector<8x1xf32>
    %c123 = arith.constant 123 : index
    %c0_371 = arith.constant 0 : index
    %1356 = vector.load %arg3[%c123, %c0_371] : memref<256x128xf32, #tpu.memory_space<vmem>>, vector<1x128xf32>
    %c123_372 = arith.constant 123 : index
    %1357 = memref.load %arg4[%c123_372] : memref<256xf32, #tpu.memory_space<smem>>
    %1358 = vector.broadcast %1355 : vector<8x1xf32> to vector<8x128xf32>
    %1359 = vector.broadcast %1356 : vector<1x128xf32> to vector<8x128xf32>
    %1360 = arith.addf %1358, %1359 : vector<8x128xf32>
    %cst_373 = arith.constant 0.000000e+00 : f32
    %1361 = vector.broadcast %cst_373 : f32 to vector<8x128xf32>
    %1362 = arith.maximumf %1360, %1361 : vector<8x128xf32>
    %1363 = vector.broadcast %1357 : f32 to vector<8x128xf32>
    %1364 = arith.mulf %1363, %1362 : vector<8x128xf32>
    %1365 = arith.addf %1354, %1364 : vector<8x128xf32>
    %1366 = vector.extract_strided_slice %0 {offsets = [0, 124], sizes = [8, 1], strides = [1, 1]} : vector<8x256xf32> to vector<8x1xf32>
    %c124 = arith.constant 124 : index
    %c0_374 = arith.constant 0 : index
    %1367 = vector.load %arg3[%c124, %c0_374] : memref<256x128xf32, #tpu.memory_space<vmem>>, vector<1x128xf32>
    %c124_375 = arith.constant 124 : index
    %1368 = memref.load %arg4[%c124_375] : memref<256xf32, #tpu.memory_space<smem>>
    %1369 = vector.broadcast %1366 : vector<8x1xf32> to vector<8x128xf32>
    %1370 = vector.broadcast %1367 : vector<1x128xf32> to vector<8x128xf32>
    %1371 = arith.addf %1369, %1370 : vector<8x128xf32>
    %cst_376 = arith.constant 0.000000e+00 : f32
    %1372 = vector.broadcast %cst_376 : f32 to vector<8x128xf32>
    %1373 = arith.maximumf %1371, %1372 : vector<8x128xf32>
    %1374 = vector.broadcast %1368 : f32 to vector<8x128xf32>
    %1375 = arith.mulf %1374, %1373 : vector<8x128xf32>
    %1376 = arith.addf %1365, %1375 : vector<8x128xf32>
    %1377 = vector.extract_strided_slice %0 {offsets = [0, 125], sizes = [8, 1], strides = [1, 1]} : vector<8x256xf32> to vector<8x1xf32>
    %c125 = arith.constant 125 : index
    %c0_377 = arith.constant 0 : index
    %1378 = vector.load %arg3[%c125, %c0_377] : memref<256x128xf32, #tpu.memory_space<vmem>>, vector<1x128xf32>
    %c125_378 = arith.constant 125 : index
    %1379 = memref.load %arg4[%c125_378] : memref<256xf32, #tpu.memory_space<smem>>
    %1380 = vector.broadcast %1377 : vector<8x1xf32> to vector<8x128xf32>
    %1381 = vector.broadcast %1378 : vector<1x128xf32> to vector<8x128xf32>
    %1382 = arith.addf %1380, %1381 : vector<8x128xf32>
    %cst_379 = arith.constant 0.000000e+00 : f32
    %1383 = vector.broadcast %cst_379 : f32 to vector<8x128xf32>
    %1384 = arith.maximumf %1382, %1383 : vector<8x128xf32>
    %1385 = vector.broadcast %1379 : f32 to vector<8x128xf32>
    %1386 = arith.mulf %1385, %1384 : vector<8x128xf32>
    %1387 = arith.addf %1376, %1386 : vector<8x128xf32>
    %1388 = vector.extract_strided_slice %0 {offsets = [0, 126], sizes = [8, 1], strides = [1, 1]} : vector<8x256xf32> to vector<8x1xf32>
    %c126 = arith.constant 126 : index
    %c0_380 = arith.constant 0 : index
    %1389 = vector.load %arg3[%c126, %c0_380] : memref<256x128xf32, #tpu.memory_space<vmem>>, vector<1x128xf32>
    %c126_381 = arith.constant 126 : index
    %1390 = memref.load %arg4[%c126_381] : memref<256xf32, #tpu.memory_space<smem>>
    %1391 = vector.broadcast %1388 : vector<8x1xf32> to vector<8x128xf32>
    %1392 = vector.broadcast %1389 : vector<1x128xf32> to vector<8x128xf32>
    %1393 = arith.addf %1391, %1392 : vector<8x128xf32>
    %cst_382 = arith.constant 0.000000e+00 : f32
    %1394 = vector.broadcast %cst_382 : f32 to vector<8x128xf32>
    %1395 = arith.maximumf %1393, %1394 : vector<8x128xf32>
    %1396 = vector.broadcast %1390 : f32 to vector<8x128xf32>
    %1397 = arith.mulf %1396, %1395 : vector<8x128xf32>
    %1398 = arith.addf %1387, %1397 : vector<8x128xf32>
    %1399 = vector.extract_strided_slice %0 {offsets = [0, 127], sizes = [8, 1], strides = [1, 1]} : vector<8x256xf32> to vector<8x1xf32>
    %c127 = arith.constant 127 : index
    %c0_383 = arith.constant 0 : index
    %1400 = vector.load %arg3[%c127, %c0_383] : memref<256x128xf32, #tpu.memory_space<vmem>>, vector<1x128xf32>
    %c127_384 = arith.constant 127 : index
    %1401 = memref.load %arg4[%c127_384] : memref<256xf32, #tpu.memory_space<smem>>
    %1402 = vector.broadcast %1399 : vector<8x1xf32> to vector<8x128xf32>
    %1403 = vector.broadcast %1400 : vector<1x128xf32> to vector<8x128xf32>
    %1404 = arith.addf %1402, %1403 : vector<8x128xf32>
    %cst_385 = arith.constant 0.000000e+00 : f32
    %1405 = vector.broadcast %cst_385 : f32 to vector<8x128xf32>
    %1406 = arith.maximumf %1404, %1405 : vector<8x128xf32>
    %1407 = vector.broadcast %1401 : f32 to vector<8x128xf32>
    %1408 = arith.mulf %1407, %1406 : vector<8x128xf32>
    %1409 = arith.addf %1398, %1408 : vector<8x128xf32>
    %1410 = vector.extract_strided_slice %0 {offsets = [0, 128], sizes = [8, 1], strides = [1, 1]} : vector<8x256xf32> to vector<8x1xf32>
    %c128 = arith.constant 128 : index
    %c0_386 = arith.constant 0 : index
    %1411 = vector.load %arg3[%c128, %c0_386] : memref<256x128xf32, #tpu.memory_space<vmem>>, vector<1x128xf32>
    %c128_387 = arith.constant 128 : index
    %1412 = memref.load %arg4[%c128_387] : memref<256xf32, #tpu.memory_space<smem>>
    %1413 = vector.broadcast %1410 : vector<8x1xf32> to vector<8x128xf32>
    %1414 = vector.broadcast %1411 : vector<1x128xf32> to vector<8x128xf32>
    %1415 = arith.addf %1413, %1414 : vector<8x128xf32>
    %cst_388 = arith.constant 0.000000e+00 : f32
    %1416 = vector.broadcast %cst_388 : f32 to vector<8x128xf32>
    %1417 = arith.maximumf %1415, %1416 : vector<8x128xf32>
    %1418 = vector.broadcast %1412 : f32 to vector<8x128xf32>
    %1419 = arith.mulf %1418, %1417 : vector<8x128xf32>
    %1420 = arith.addf %1409, %1419 : vector<8x128xf32>
    %1421 = vector.extract_strided_slice %0 {offsets = [0, 129], sizes = [8, 1], strides = [1, 1]} : vector<8x256xf32> to vector<8x1xf32>
    %c129 = arith.constant 129 : index
    %c0_389 = arith.constant 0 : index
    %1422 = vector.load %arg3[%c129, %c0_389] : memref<256x128xf32, #tpu.memory_space<vmem>>, vector<1x128xf32>
    %c129_390 = arith.constant 129 : index
    %1423 = memref.load %arg4[%c129_390] : memref<256xf32, #tpu.memory_space<smem>>
    %1424 = vector.broadcast %1421 : vector<8x1xf32> to vector<8x128xf32>
    %1425 = vector.broadcast %1422 : vector<1x128xf32> to vector<8x128xf32>
    %1426 = arith.addf %1424, %1425 : vector<8x128xf32>
    %cst_391 = arith.constant 0.000000e+00 : f32
    %1427 = vector.broadcast %cst_391 : f32 to vector<8x128xf32>
    %1428 = arith.maximumf %1426, %1427 : vector<8x128xf32>
    %1429 = vector.broadcast %1423 : f32 to vector<8x128xf32>
    %1430 = arith.mulf %1429, %1428 : vector<8x128xf32>
    %1431 = arith.addf %1420, %1430 : vector<8x128xf32>
    %1432 = vector.extract_strided_slice %0 {offsets = [0, 130], sizes = [8, 1], strides = [1, 1]} : vector<8x256xf32> to vector<8x1xf32>
    %c130 = arith.constant 130 : index
    %c0_392 = arith.constant 0 : index
    %1433 = vector.load %arg3[%c130, %c0_392] : memref<256x128xf32, #tpu.memory_space<vmem>>, vector<1x128xf32>
    %c130_393 = arith.constant 130 : index
    %1434 = memref.load %arg4[%c130_393] : memref<256xf32, #tpu.memory_space<smem>>
    %1435 = vector.broadcast %1432 : vector<8x1xf32> to vector<8x128xf32>
    %1436 = vector.broadcast %1433 : vector<1x128xf32> to vector<8x128xf32>
    %1437 = arith.addf %1435, %1436 : vector<8x128xf32>
    %cst_394 = arith.constant 0.000000e+00 : f32
    %1438 = vector.broadcast %cst_394 : f32 to vector<8x128xf32>
    %1439 = arith.maximumf %1437, %1438 : vector<8x128xf32>
    %1440 = vector.broadcast %1434 : f32 to vector<8x128xf32>
    %1441 = arith.mulf %1440, %1439 : vector<8x128xf32>
    %1442 = arith.addf %1431, %1441 : vector<8x128xf32>
    %1443 = vector.extract_strided_slice %0 {offsets = [0, 131], sizes = [8, 1], strides = [1, 1]} : vector<8x256xf32> to vector<8x1xf32>
    %c131 = arith.constant 131 : index
    %c0_395 = arith.constant 0 : index
    %1444 = vector.load %arg3[%c131, %c0_395] : memref<256x128xf32, #tpu.memory_space<vmem>>, vector<1x128xf32>
    %c131_396 = arith.constant 131 : index
    %1445 = memref.load %arg4[%c131_396] : memref<256xf32, #tpu.memory_space<smem>>
    %1446 = vector.broadcast %1443 : vector<8x1xf32> to vector<8x128xf32>
    %1447 = vector.broadcast %1444 : vector<1x128xf32> to vector<8x128xf32>
    %1448 = arith.addf %1446, %1447 : vector<8x128xf32>
    %cst_397 = arith.constant 0.000000e+00 : f32
    %1449 = vector.broadcast %cst_397 : f32 to vector<8x128xf32>
    %1450 = arith.maximumf %1448, %1449 : vector<8x128xf32>
    %1451 = vector.broadcast %1445 : f32 to vector<8x128xf32>
    %1452 = arith.mulf %1451, %1450 : vector<8x128xf32>
    %1453 = arith.addf %1442, %1452 : vector<8x128xf32>
    %1454 = vector.extract_strided_slice %0 {offsets = [0, 132], sizes = [8, 1], strides = [1, 1]} : vector<8x256xf32> to vector<8x1xf32>
    %c132 = arith.constant 132 : index
    %c0_398 = arith.constant 0 : index
    %1455 = vector.load %arg3[%c132, %c0_398] : memref<256x128xf32, #tpu.memory_space<vmem>>, vector<1x128xf32>
    %c132_399 = arith.constant 132 : index
    %1456 = memref.load %arg4[%c132_399] : memref<256xf32, #tpu.memory_space<smem>>
    %1457 = vector.broadcast %1454 : vector<8x1xf32> to vector<8x128xf32>
    %1458 = vector.broadcast %1455 : vector<1x128xf32> to vector<8x128xf32>
    %1459 = arith.addf %1457, %1458 : vector<8x128xf32>
    %cst_400 = arith.constant 0.000000e+00 : f32
    %1460 = vector.broadcast %cst_400 : f32 to vector<8x128xf32>
    %1461 = arith.maximumf %1459, %1460 : vector<8x128xf32>
    %1462 = vector.broadcast %1456 : f32 to vector<8x128xf32>
    %1463 = arith.mulf %1462, %1461 : vector<8x128xf32>
    %1464 = arith.addf %1453, %1463 : vector<8x128xf32>
    %1465 = vector.extract_strided_slice %0 {offsets = [0, 133], sizes = [8, 1], strides = [1, 1]} : vector<8x256xf32> to vector<8x1xf32>
    %c133 = arith.constant 133 : index
    %c0_401 = arith.constant 0 : index
    %1466 = vector.load %arg3[%c133, %c0_401] : memref<256x128xf32, #tpu.memory_space<vmem>>, vector<1x128xf32>
    %c133_402 = arith.constant 133 : index
    %1467 = memref.load %arg4[%c133_402] : memref<256xf32, #tpu.memory_space<smem>>
    %1468 = vector.broadcast %1465 : vector<8x1xf32> to vector<8x128xf32>
    %1469 = vector.broadcast %1466 : vector<1x128xf32> to vector<8x128xf32>
    %1470 = arith.addf %1468, %1469 : vector<8x128xf32>
    %cst_403 = arith.constant 0.000000e+00 : f32
    %1471 = vector.broadcast %cst_403 : f32 to vector<8x128xf32>
    %1472 = arith.maximumf %1470, %1471 : vector<8x128xf32>
    %1473 = vector.broadcast %1467 : f32 to vector<8x128xf32>
    %1474 = arith.mulf %1473, %1472 : vector<8x128xf32>
    %1475 = arith.addf %1464, %1474 : vector<8x128xf32>
    %1476 = vector.extract_strided_slice %0 {offsets = [0, 134], sizes = [8, 1], strides = [1, 1]} : vector<8x256xf32> to vector<8x1xf32>
    %c134 = arith.constant 134 : index
    %c0_404 = arith.constant 0 : index
    %1477 = vector.load %arg3[%c134, %c0_404] : memref<256x128xf32, #tpu.memory_space<vmem>>, vector<1x128xf32>
    %c134_405 = arith.constant 134 : index
    %1478 = memref.load %arg4[%c134_405] : memref<256xf32, #tpu.memory_space<smem>>
    %1479 = vector.broadcast %1476 : vector<8x1xf32> to vector<8x128xf32>
    %1480 = vector.broadcast %1477 : vector<1x128xf32> to vector<8x128xf32>
    %1481 = arith.addf %1479, %1480 : vector<8x128xf32>
    %cst_406 = arith.constant 0.000000e+00 : f32
    %1482 = vector.broadcast %cst_406 : f32 to vector<8x128xf32>
    %1483 = arith.maximumf %1481, %1482 : vector<8x128xf32>
    %1484 = vector.broadcast %1478 : f32 to vector<8x128xf32>
    %1485 = arith.mulf %1484, %1483 : vector<8x128xf32>
    %1486 = arith.addf %1475, %1485 : vector<8x128xf32>
    %1487 = vector.extract_strided_slice %0 {offsets = [0, 135], sizes = [8, 1], strides = [1, 1]} : vector<8x256xf32> to vector<8x1xf32>
    %c135 = arith.constant 135 : index
    %c0_407 = arith.constant 0 : index
    %1488 = vector.load %arg3[%c135, %c0_407] : memref<256x128xf32, #tpu.memory_space<vmem>>, vector<1x128xf32>
    %c135_408 = arith.constant 135 : index
    %1489 = memref.load %arg4[%c135_408] : memref<256xf32, #tpu.memory_space<smem>>
    %1490 = vector.broadcast %1487 : vector<8x1xf32> to vector<8x128xf32>
    %1491 = vector.broadcast %1488 : vector<1x128xf32> to vector<8x128xf32>
    %1492 = arith.addf %1490, %1491 : vector<8x128xf32>
    %cst_409 = arith.constant 0.000000e+00 : f32
    %1493 = vector.broadcast %cst_409 : f32 to vector<8x128xf32>
    %1494 = arith.maximumf %1492, %1493 : vector<8x128xf32>
    %1495 = vector.broadcast %1489 : f32 to vector<8x128xf32>
    %1496 = arith.mulf %1495, %1494 : vector<8x128xf32>
    %1497 = arith.addf %1486, %1496 : vector<8x128xf32>
    %1498 = vector.extract_strided_slice %0 {offsets = [0, 136], sizes = [8, 1], strides = [1, 1]} : vector<8x256xf32> to vector<8x1xf32>
    %c136 = arith.constant 136 : index
    %c0_410 = arith.constant 0 : index
    %1499 = vector.load %arg3[%c136, %c0_410] : memref<256x128xf32, #tpu.memory_space<vmem>>, vector<1x128xf32>
    %c136_411 = arith.constant 136 : index
    %1500 = memref.load %arg4[%c136_411] : memref<256xf32, #tpu.memory_space<smem>>
    %1501 = vector.broadcast %1498 : vector<8x1xf32> to vector<8x128xf32>
    %1502 = vector.broadcast %1499 : vector<1x128xf32> to vector<8x128xf32>
    %1503 = arith.addf %1501, %1502 : vector<8x128xf32>
    %cst_412 = arith.constant 0.000000e+00 : f32
    %1504 = vector.broadcast %cst_412 : f32 to vector<8x128xf32>
    %1505 = arith.maximumf %1503, %1504 : vector<8x128xf32>
    %1506 = vector.broadcast %1500 : f32 to vector<8x128xf32>
    %1507 = arith.mulf %1506, %1505 : vector<8x128xf32>
    %1508 = arith.addf %1497, %1507 : vector<8x128xf32>
    %1509 = vector.extract_strided_slice %0 {offsets = [0, 137], sizes = [8, 1], strides = [1, 1]} : vector<8x256xf32> to vector<8x1xf32>
    %c137 = arith.constant 137 : index
    %c0_413 = arith.constant 0 : index
    %1510 = vector.load %arg3[%c137, %c0_413] : memref<256x128xf32, #tpu.memory_space<vmem>>, vector<1x128xf32>
    %c137_414 = arith.constant 137 : index
    %1511 = memref.load %arg4[%c137_414] : memref<256xf32, #tpu.memory_space<smem>>
    %1512 = vector.broadcast %1509 : vector<8x1xf32> to vector<8x128xf32>
    %1513 = vector.broadcast %1510 : vector<1x128xf32> to vector<8x128xf32>
    %1514 = arith.addf %1512, %1513 : vector<8x128xf32>
    %cst_415 = arith.constant 0.000000e+00 : f32
    %1515 = vector.broadcast %cst_415 : f32 to vector<8x128xf32>
    %1516 = arith.maximumf %1514, %1515 : vector<8x128xf32>
    %1517 = vector.broadcast %1511 : f32 to vector<8x128xf32>
    %1518 = arith.mulf %1517, %1516 : vector<8x128xf32>
    %1519 = arith.addf %1508, %1518 : vector<8x128xf32>
    %1520 = vector.extract_strided_slice %0 {offsets = [0, 138], sizes = [8, 1], strides = [1, 1]} : vector<8x256xf32> to vector<8x1xf32>
    %c138 = arith.constant 138 : index
    %c0_416 = arith.constant 0 : index
    %1521 = vector.load %arg3[%c138, %c0_416] : memref<256x128xf32, #tpu.memory_space<vmem>>, vector<1x128xf32>
    %c138_417 = arith.constant 138 : index
    %1522 = memref.load %arg4[%c138_417] : memref<256xf32, #tpu.memory_space<smem>>
    %1523 = vector.broadcast %1520 : vector<8x1xf32> to vector<8x128xf32>
    %1524 = vector.broadcast %1521 : vector<1x128xf32> to vector<8x128xf32>
    %1525 = arith.addf %1523, %1524 : vector<8x128xf32>
    %cst_418 = arith.constant 0.000000e+00 : f32
    %1526 = vector.broadcast %cst_418 : f32 to vector<8x128xf32>
    %1527 = arith.maximumf %1525, %1526 : vector<8x128xf32>
    %1528 = vector.broadcast %1522 : f32 to vector<8x128xf32>
    %1529 = arith.mulf %1528, %1527 : vector<8x128xf32>
    %1530 = arith.addf %1519, %1529 : vector<8x128xf32>
    %1531 = vector.extract_strided_slice %0 {offsets = [0, 139], sizes = [8, 1], strides = [1, 1]} : vector<8x256xf32> to vector<8x1xf32>
    %c139 = arith.constant 139 : index
    %c0_419 = arith.constant 0 : index
    %1532 = vector.load %arg3[%c139, %c0_419] : memref<256x128xf32, #tpu.memory_space<vmem>>, vector<1x128xf32>
    %c139_420 = arith.constant 139 : index
    %1533 = memref.load %arg4[%c139_420] : memref<256xf32, #tpu.memory_space<smem>>
    %1534 = vector.broadcast %1531 : vector<8x1xf32> to vector<8x128xf32>
    %1535 = vector.broadcast %1532 : vector<1x128xf32> to vector<8x128xf32>
    %1536 = arith.addf %1534, %1535 : vector<8x128xf32>
    %cst_421 = arith.constant 0.000000e+00 : f32
    %1537 = vector.broadcast %cst_421 : f32 to vector<8x128xf32>
    %1538 = arith.maximumf %1536, %1537 : vector<8x128xf32>
    %1539 = vector.broadcast %1533 : f32 to vector<8x128xf32>
    %1540 = arith.mulf %1539, %1538 : vector<8x128xf32>
    %1541 = arith.addf %1530, %1540 : vector<8x128xf32>
    %1542 = vector.extract_strided_slice %0 {offsets = [0, 140], sizes = [8, 1], strides = [1, 1]} : vector<8x256xf32> to vector<8x1xf32>
    %c140 = arith.constant 140 : index
    %c0_422 = arith.constant 0 : index
    %1543 = vector.load %arg3[%c140, %c0_422] : memref<256x128xf32, #tpu.memory_space<vmem>>, vector<1x128xf32>
    %c140_423 = arith.constant 140 : index
    %1544 = memref.load %arg4[%c140_423] : memref<256xf32, #tpu.memory_space<smem>>
    %1545 = vector.broadcast %1542 : vector<8x1xf32> to vector<8x128xf32>
    %1546 = vector.broadcast %1543 : vector<1x128xf32> to vector<8x128xf32>
    %1547 = arith.addf %1545, %1546 : vector<8x128xf32>
    %cst_424 = arith.constant 0.000000e+00 : f32
    %1548 = vector.broadcast %cst_424 : f32 to vector<8x128xf32>
    %1549 = arith.maximumf %1547, %1548 : vector<8x128xf32>
    %1550 = vector.broadcast %1544 : f32 to vector<8x128xf32>
    %1551 = arith.mulf %1550, %1549 : vector<8x128xf32>
    %1552 = arith.addf %1541, %1551 : vector<8x128xf32>
    %1553 = vector.extract_strided_slice %0 {offsets = [0, 141], sizes = [8, 1], strides = [1, 1]} : vector<8x256xf32> to vector<8x1xf32>
    %c141 = arith.constant 141 : index
    %c0_425 = arith.constant 0 : index
    %1554 = vector.load %arg3[%c141, %c0_425] : memref<256x128xf32, #tpu.memory_space<vmem>>, vector<1x128xf32>
    %c141_426 = arith.constant 141 : index
    %1555 = memref.load %arg4[%c141_426] : memref<256xf32, #tpu.memory_space<smem>>
    %1556 = vector.broadcast %1553 : vector<8x1xf32> to vector<8x128xf32>
    %1557 = vector.broadcast %1554 : vector<1x128xf32> to vector<8x128xf32>
    %1558 = arith.addf %1556, %1557 : vector<8x128xf32>
    %cst_427 = arith.constant 0.000000e+00 : f32
    %1559 = vector.broadcast %cst_427 : f32 to vector<8x128xf32>
    %1560 = arith.maximumf %1558, %1559 : vector<8x128xf32>
    %1561 = vector.broadcast %1555 : f32 to vector<8x128xf32>
    %1562 = arith.mulf %1561, %1560 : vector<8x128xf32>
    %1563 = arith.addf %1552, %1562 : vector<8x128xf32>
    %1564 = vector.extract_strided_slice %0 {offsets = [0, 142], sizes = [8, 1], strides = [1, 1]} : vector<8x256xf32> to vector<8x1xf32>
    %c142 = arith.constant 142 : index
    %c0_428 = arith.constant 0 : index
    %1565 = vector.load %arg3[%c142, %c0_428] : memref<256x128xf32, #tpu.memory_space<vmem>>, vector<1x128xf32>
    %c142_429 = arith.constant 142 : index
    %1566 = memref.load %arg4[%c142_429] : memref<256xf32, #tpu.memory_space<smem>>
    %1567 = vector.broadcast %1564 : vector<8x1xf32> to vector<8x128xf32>
    %1568 = vector.broadcast %1565 : vector<1x128xf32> to vector<8x128xf32>
    %1569 = arith.addf %1567, %1568 : vector<8x128xf32>
    %cst_430 = arith.constant 0.000000e+00 : f32
    %1570 = vector.broadcast %cst_430 : f32 to vector<8x128xf32>
    %1571 = arith.maximumf %1569, %1570 : vector<8x128xf32>
    %1572 = vector.broadcast %1566 : f32 to vector<8x128xf32>
    %1573 = arith.mulf %1572, %1571 : vector<8x128xf32>
    %1574 = arith.addf %1563, %1573 : vector<8x128xf32>
    %1575 = vector.extract_strided_slice %0 {offsets = [0, 143], sizes = [8, 1], strides = [1, 1]} : vector<8x256xf32> to vector<8x1xf32>
    %c143 = arith.constant 143 : index
    %c0_431 = arith.constant 0 : index
    %1576 = vector.load %arg3[%c143, %c0_431] : memref<256x128xf32, #tpu.memory_space<vmem>>, vector<1x128xf32>
    %c143_432 = arith.constant 143 : index
    %1577 = memref.load %arg4[%c143_432] : memref<256xf32, #tpu.memory_space<smem>>
    %1578 = vector.broadcast %1575 : vector<8x1xf32> to vector<8x128xf32>
    %1579 = vector.broadcast %1576 : vector<1x128xf32> to vector<8x128xf32>
    %1580 = arith.addf %1578, %1579 : vector<8x128xf32>
    %cst_433 = arith.constant 0.000000e+00 : f32
    %1581 = vector.broadcast %cst_433 : f32 to vector<8x128xf32>
    %1582 = arith.maximumf %1580, %1581 : vector<8x128xf32>
    %1583 = vector.broadcast %1577 : f32 to vector<8x128xf32>
    %1584 = arith.mulf %1583, %1582 : vector<8x128xf32>
    %1585 = arith.addf %1574, %1584 : vector<8x128xf32>
    %1586 = vector.extract_strided_slice %0 {offsets = [0, 144], sizes = [8, 1], strides = [1, 1]} : vector<8x256xf32> to vector<8x1xf32>
    %c144 = arith.constant 144 : index
    %c0_434 = arith.constant 0 : index
    %1587 = vector.load %arg3[%c144, %c0_434] : memref<256x128xf32, #tpu.memory_space<vmem>>, vector<1x128xf32>
    %c144_435 = arith.constant 144 : index
    %1588 = memref.load %arg4[%c144_435] : memref<256xf32, #tpu.memory_space<smem>>
    %1589 = vector.broadcast %1586 : vector<8x1xf32> to vector<8x128xf32>
    %1590 = vector.broadcast %1587 : vector<1x128xf32> to vector<8x128xf32>
    %1591 = arith.addf %1589, %1590 : vector<8x128xf32>
    %cst_436 = arith.constant 0.000000e+00 : f32
    %1592 = vector.broadcast %cst_436 : f32 to vector<8x128xf32>
    %1593 = arith.maximumf %1591, %1592 : vector<8x128xf32>
    %1594 = vector.broadcast %1588 : f32 to vector<8x128xf32>
    %1595 = arith.mulf %1594, %1593 : vector<8x128xf32>
    %1596 = arith.addf %1585, %1595 : vector<8x128xf32>
    %1597 = vector.extract_strided_slice %0 {offsets = [0, 145], sizes = [8, 1], strides = [1, 1]} : vector<8x256xf32> to vector<8x1xf32>
    %c145 = arith.constant 145 : index
    %c0_437 = arith.constant 0 : index
    %1598 = vector.load %arg3[%c145, %c0_437] : memref<256x128xf32, #tpu.memory_space<vmem>>, vector<1x128xf32>
    %c145_438 = arith.constant 145 : index
    %1599 = memref.load %arg4[%c145_438] : memref<256xf32, #tpu.memory_space<smem>>
    %1600 = vector.broadcast %1597 : vector<8x1xf32> to vector<8x128xf32>
    %1601 = vector.broadcast %1598 : vector<1x128xf32> to vector<8x128xf32>
    %1602 = arith.addf %1600, %1601 : vector<8x128xf32>
    %cst_439 = arith.constant 0.000000e+00 : f32
    %1603 = vector.broadcast %cst_439 : f32 to vector<8x128xf32>
    %1604 = arith.maximumf %1602, %1603 : vector<8x128xf32>
    %1605 = vector.broadcast %1599 : f32 to vector<8x128xf32>
    %1606 = arith.mulf %1605, %1604 : vector<8x128xf32>
    %1607 = arith.addf %1596, %1606 : vector<8x128xf32>
    %1608 = vector.extract_strided_slice %0 {offsets = [0, 146], sizes = [8, 1], strides = [1, 1]} : vector<8x256xf32> to vector<8x1xf32>
    %c146 = arith.constant 146 : index
    %c0_440 = arith.constant 0 : index
    %1609 = vector.load %arg3[%c146, %c0_440] : memref<256x128xf32, #tpu.memory_space<vmem>>, vector<1x128xf32>
    %c146_441 = arith.constant 146 : index
    %1610 = memref.load %arg4[%c146_441] : memref<256xf32, #tpu.memory_space<smem>>
    %1611 = vector.broadcast %1608 : vector<8x1xf32> to vector<8x128xf32>
    %1612 = vector.broadcast %1609 : vector<1x128xf32> to vector<8x128xf32>
    %1613 = arith.addf %1611, %1612 : vector<8x128xf32>
    %cst_442 = arith.constant 0.000000e+00 : f32
    %1614 = vector.broadcast %cst_442 : f32 to vector<8x128xf32>
    %1615 = arith.maximumf %1613, %1614 : vector<8x128xf32>
    %1616 = vector.broadcast %1610 : f32 to vector<8x128xf32>
    %1617 = arith.mulf %1616, %1615 : vector<8x128xf32>
    %1618 = arith.addf %1607, %1617 : vector<8x128xf32>
    %1619 = vector.extract_strided_slice %0 {offsets = [0, 147], sizes = [8, 1], strides = [1, 1]} : vector<8x256xf32> to vector<8x1xf32>
    %c147 = arith.constant 147 : index
    %c0_443 = arith.constant 0 : index
    %1620 = vector.load %arg3[%c147, %c0_443] : memref<256x128xf32, #tpu.memory_space<vmem>>, vector<1x128xf32>
    %c147_444 = arith.constant 147 : index
    %1621 = memref.load %arg4[%c147_444] : memref<256xf32, #tpu.memory_space<smem>>
    %1622 = vector.broadcast %1619 : vector<8x1xf32> to vector<8x128xf32>
    %1623 = vector.broadcast %1620 : vector<1x128xf32> to vector<8x128xf32>
    %1624 = arith.addf %1622, %1623 : vector<8x128xf32>
    %cst_445 = arith.constant 0.000000e+00 : f32
    %1625 = vector.broadcast %cst_445 : f32 to vector<8x128xf32>
    %1626 = arith.maximumf %1624, %1625 : vector<8x128xf32>
    %1627 = vector.broadcast %1621 : f32 to vector<8x128xf32>
    %1628 = arith.mulf %1627, %1626 : vector<8x128xf32>
    %1629 = arith.addf %1618, %1628 : vector<8x128xf32>
    %1630 = vector.extract_strided_slice %0 {offsets = [0, 148], sizes = [8, 1], strides = [1, 1]} : vector<8x256xf32> to vector<8x1xf32>
    %c148 = arith.constant 148 : index
    %c0_446 = arith.constant 0 : index
    %1631 = vector.load %arg3[%c148, %c0_446] : memref<256x128xf32, #tpu.memory_space<vmem>>, vector<1x128xf32>
    %c148_447 = arith.constant 148 : index
    %1632 = memref.load %arg4[%c148_447] : memref<256xf32, #tpu.memory_space<smem>>
    %1633 = vector.broadcast %1630 : vector<8x1xf32> to vector<8x128xf32>
    %1634 = vector.broadcast %1631 : vector<1x128xf32> to vector<8x128xf32>
    %1635 = arith.addf %1633, %1634 : vector<8x128xf32>
    %cst_448 = arith.constant 0.000000e+00 : f32
    %1636 = vector.broadcast %cst_448 : f32 to vector<8x128xf32>
    %1637 = arith.maximumf %1635, %1636 : vector<8x128xf32>
    %1638 = vector.broadcast %1632 : f32 to vector<8x128xf32>
    %1639 = arith.mulf %1638, %1637 : vector<8x128xf32>
    %1640 = arith.addf %1629, %1639 : vector<8x128xf32>
    %1641 = vector.extract_strided_slice %0 {offsets = [0, 149], sizes = [8, 1], strides = [1, 1]} : vector<8x256xf32> to vector<8x1xf32>
    %c149 = arith.constant 149 : index
    %c0_449 = arith.constant 0 : index
    %1642 = vector.load %arg3[%c149, %c0_449] : memref<256x128xf32, #tpu.memory_space<vmem>>, vector<1x128xf32>
    %c149_450 = arith.constant 149 : index
    %1643 = memref.load %arg4[%c149_450] : memref<256xf32, #tpu.memory_space<smem>>
    %1644 = vector.broadcast %1641 : vector<8x1xf32> to vector<8x128xf32>
    %1645 = vector.broadcast %1642 : vector<1x128xf32> to vector<8x128xf32>
    %1646 = arith.addf %1644, %1645 : vector<8x128xf32>
    %cst_451 = arith.constant 0.000000e+00 : f32
    %1647 = vector.broadcast %cst_451 : f32 to vector<8x128xf32>
    %1648 = arith.maximumf %1646, %1647 : vector<8x128xf32>
    %1649 = vector.broadcast %1643 : f32 to vector<8x128xf32>
    %1650 = arith.mulf %1649, %1648 : vector<8x128xf32>
    %1651 = arith.addf %1640, %1650 : vector<8x128xf32>
    %1652 = vector.extract_strided_slice %0 {offsets = [0, 150], sizes = [8, 1], strides = [1, 1]} : vector<8x256xf32> to vector<8x1xf32>
    %c150 = arith.constant 150 : index
    %c0_452 = arith.constant 0 : index
    %1653 = vector.load %arg3[%c150, %c0_452] : memref<256x128xf32, #tpu.memory_space<vmem>>, vector<1x128xf32>
    %c150_453 = arith.constant 150 : index
    %1654 = memref.load %arg4[%c150_453] : memref<256xf32, #tpu.memory_space<smem>>
    %1655 = vector.broadcast %1652 : vector<8x1xf32> to vector<8x128xf32>
    %1656 = vector.broadcast %1653 : vector<1x128xf32> to vector<8x128xf32>
    %1657 = arith.addf %1655, %1656 : vector<8x128xf32>
    %cst_454 = arith.constant 0.000000e+00 : f32
    %1658 = vector.broadcast %cst_454 : f32 to vector<8x128xf32>
    %1659 = arith.maximumf %1657, %1658 : vector<8x128xf32>
    %1660 = vector.broadcast %1654 : f32 to vector<8x128xf32>
    %1661 = arith.mulf %1660, %1659 : vector<8x128xf32>
    %1662 = arith.addf %1651, %1661 : vector<8x128xf32>
    %1663 = vector.extract_strided_slice %0 {offsets = [0, 151], sizes = [8, 1], strides = [1, 1]} : vector<8x256xf32> to vector<8x1xf32>
    %c151 = arith.constant 151 : index
    %c0_455 = arith.constant 0 : index
    %1664 = vector.load %arg3[%c151, %c0_455] : memref<256x128xf32, #tpu.memory_space<vmem>>, vector<1x128xf32>
    %c151_456 = arith.constant 151 : index
    %1665 = memref.load %arg4[%c151_456] : memref<256xf32, #tpu.memory_space<smem>>
    %1666 = vector.broadcast %1663 : vector<8x1xf32> to vector<8x128xf32>
    %1667 = vector.broadcast %1664 : vector<1x128xf32> to vector<8x128xf32>
    %1668 = arith.addf %1666, %1667 : vector<8x128xf32>
    %cst_457 = arith.constant 0.000000e+00 : f32
    %1669 = vector.broadcast %cst_457 : f32 to vector<8x128xf32>
    %1670 = arith.maximumf %1668, %1669 : vector<8x128xf32>
    %1671 = vector.broadcast %1665 : f32 to vector<8x128xf32>
    %1672 = arith.mulf %1671, %1670 : vector<8x128xf32>
    %1673 = arith.addf %1662, %1672 : vector<8x128xf32>
    %1674 = vector.extract_strided_slice %0 {offsets = [0, 152], sizes = [8, 1], strides = [1, 1]} : vector<8x256xf32> to vector<8x1xf32>
    %c152 = arith.constant 152 : index
    %c0_458 = arith.constant 0 : index
    %1675 = vector.load %arg3[%c152, %c0_458] : memref<256x128xf32, #tpu.memory_space<vmem>>, vector<1x128xf32>
    %c152_459 = arith.constant 152 : index
    %1676 = memref.load %arg4[%c152_459] : memref<256xf32, #tpu.memory_space<smem>>
    %1677 = vector.broadcast %1674 : vector<8x1xf32> to vector<8x128xf32>
    %1678 = vector.broadcast %1675 : vector<1x128xf32> to vector<8x128xf32>
    %1679 = arith.addf %1677, %1678 : vector<8x128xf32>
    %cst_460 = arith.constant 0.000000e+00 : f32
    %1680 = vector.broadcast %cst_460 : f32 to vector<8x128xf32>
    %1681 = arith.maximumf %1679, %1680 : vector<8x128xf32>
    %1682 = vector.broadcast %1676 : f32 to vector<8x128xf32>
    %1683 = arith.mulf %1682, %1681 : vector<8x128xf32>
    %1684 = arith.addf %1673, %1683 : vector<8x128xf32>
    %1685 = vector.extract_strided_slice %0 {offsets = [0, 153], sizes = [8, 1], strides = [1, 1]} : vector<8x256xf32> to vector<8x1xf32>
    %c153 = arith.constant 153 : index
    %c0_461 = arith.constant 0 : index
    %1686 = vector.load %arg3[%c153, %c0_461] : memref<256x128xf32, #tpu.memory_space<vmem>>, vector<1x128xf32>
    %c153_462 = arith.constant 153 : index
    %1687 = memref.load %arg4[%c153_462] : memref<256xf32, #tpu.memory_space<smem>>
    %1688 = vector.broadcast %1685 : vector<8x1xf32> to vector<8x128xf32>
    %1689 = vector.broadcast %1686 : vector<1x128xf32> to vector<8x128xf32>
    %1690 = arith.addf %1688, %1689 : vector<8x128xf32>
    %cst_463 = arith.constant 0.000000e+00 : f32
    %1691 = vector.broadcast %cst_463 : f32 to vector<8x128xf32>
    %1692 = arith.maximumf %1690, %1691 : vector<8x128xf32>
    %1693 = vector.broadcast %1687 : f32 to vector<8x128xf32>
    %1694 = arith.mulf %1693, %1692 : vector<8x128xf32>
    %1695 = arith.addf %1684, %1694 : vector<8x128xf32>
    %1696 = vector.extract_strided_slice %0 {offsets = [0, 154], sizes = [8, 1], strides = [1, 1]} : vector<8x256xf32> to vector<8x1xf32>
    %c154 = arith.constant 154 : index
    %c0_464 = arith.constant 0 : index
    %1697 = vector.load %arg3[%c154, %c0_464] : memref<256x128xf32, #tpu.memory_space<vmem>>, vector<1x128xf32>
    %c154_465 = arith.constant 154 : index
    %1698 = memref.load %arg4[%c154_465] : memref<256xf32, #tpu.memory_space<smem>>
    %1699 = vector.broadcast %1696 : vector<8x1xf32> to vector<8x128xf32>
    %1700 = vector.broadcast %1697 : vector<1x128xf32> to vector<8x128xf32>
    %1701 = arith.addf %1699, %1700 : vector<8x128xf32>
    %cst_466 = arith.constant 0.000000e+00 : f32
    %1702 = vector.broadcast %cst_466 : f32 to vector<8x128xf32>
    %1703 = arith.maximumf %1701, %1702 : vector<8x128xf32>
    %1704 = vector.broadcast %1698 : f32 to vector<8x128xf32>
    %1705 = arith.mulf %1704, %1703 : vector<8x128xf32>
    %1706 = arith.addf %1695, %1705 : vector<8x128xf32>
    %1707 = vector.extract_strided_slice %0 {offsets = [0, 155], sizes = [8, 1], strides = [1, 1]} : vector<8x256xf32> to vector<8x1xf32>
    %c155 = arith.constant 155 : index
    %c0_467 = arith.constant 0 : index
    %1708 = vector.load %arg3[%c155, %c0_467] : memref<256x128xf32, #tpu.memory_space<vmem>>, vector<1x128xf32>
    %c155_468 = arith.constant 155 : index
    %1709 = memref.load %arg4[%c155_468] : memref<256xf32, #tpu.memory_space<smem>>
    %1710 = vector.broadcast %1707 : vector<8x1xf32> to vector<8x128xf32>
    %1711 = vector.broadcast %1708 : vector<1x128xf32> to vector<8x128xf32>
    %1712 = arith.addf %1710, %1711 : vector<8x128xf32>
    %cst_469 = arith.constant 0.000000e+00 : f32
    %1713 = vector.broadcast %cst_469 : f32 to vector<8x128xf32>
    %1714 = arith.maximumf %1712, %1713 : vector<8x128xf32>
    %1715 = vector.broadcast %1709 : f32 to vector<8x128xf32>
    %1716 = arith.mulf %1715, %1714 : vector<8x128xf32>
    %1717 = arith.addf %1706, %1716 : vector<8x128xf32>
    %1718 = vector.extract_strided_slice %0 {offsets = [0, 156], sizes = [8, 1], strides = [1, 1]} : vector<8x256xf32> to vector<8x1xf32>
    %c156 = arith.constant 156 : index
    %c0_470 = arith.constant 0 : index
    %1719 = vector.load %arg3[%c156, %c0_470] : memref<256x128xf32, #tpu.memory_space<vmem>>, vector<1x128xf32>
    %c156_471 = arith.constant 156 : index
    %1720 = memref.load %arg4[%c156_471] : memref<256xf32, #tpu.memory_space<smem>>
    %1721 = vector.broadcast %1718 : vector<8x1xf32> to vector<8x128xf32>
    %1722 = vector.broadcast %1719 : vector<1x128xf32> to vector<8x128xf32>
    %1723 = arith.addf %1721, %1722 : vector<8x128xf32>
    %cst_472 = arith.constant 0.000000e+00 : f32
    %1724 = vector.broadcast %cst_472 : f32 to vector<8x128xf32>
    %1725 = arith.maximumf %1723, %1724 : vector<8x128xf32>
    %1726 = vector.broadcast %1720 : f32 to vector<8x128xf32>
    %1727 = arith.mulf %1726, %1725 : vector<8x128xf32>
    %1728 = arith.addf %1717, %1727 : vector<8x128xf32>
    %1729 = vector.extract_strided_slice %0 {offsets = [0, 157], sizes = [8, 1], strides = [1, 1]} : vector<8x256xf32> to vector<8x1xf32>
    %c157 = arith.constant 157 : index
    %c0_473 = arith.constant 0 : index
    %1730 = vector.load %arg3[%c157, %c0_473] : memref<256x128xf32, #tpu.memory_space<vmem>>, vector<1x128xf32>
    %c157_474 = arith.constant 157 : index
    %1731 = memref.load %arg4[%c157_474] : memref<256xf32, #tpu.memory_space<smem>>
    %1732 = vector.broadcast %1729 : vector<8x1xf32> to vector<8x128xf32>
    %1733 = vector.broadcast %1730 : vector<1x128xf32> to vector<8x128xf32>
    %1734 = arith.addf %1732, %1733 : vector<8x128xf32>
    %cst_475 = arith.constant 0.000000e+00 : f32
    %1735 = vector.broadcast %cst_475 : f32 to vector<8x128xf32>
    %1736 = arith.maximumf %1734, %1735 : vector<8x128xf32>
    %1737 = vector.broadcast %1731 : f32 to vector<8x128xf32>
    %1738 = arith.mulf %1737, %1736 : vector<8x128xf32>
    %1739 = arith.addf %1728, %1738 : vector<8x128xf32>
    %1740 = vector.extract_strided_slice %0 {offsets = [0, 158], sizes = [8, 1], strides = [1, 1]} : vector<8x256xf32> to vector<8x1xf32>
    %c158 = arith.constant 158 : index
    %c0_476 = arith.constant 0 : index
    %1741 = vector.load %arg3[%c158, %c0_476] : memref<256x128xf32, #tpu.memory_space<vmem>>, vector<1x128xf32>
    %c158_477 = arith.constant 158 : index
    %1742 = memref.load %arg4[%c158_477] : memref<256xf32, #tpu.memory_space<smem>>
    %1743 = vector.broadcast %1740 : vector<8x1xf32> to vector<8x128xf32>
    %1744 = vector.broadcast %1741 : vector<1x128xf32> to vector<8x128xf32>
    %1745 = arith.addf %1743, %1744 : vector<8x128xf32>
    %cst_478 = arith.constant 0.000000e+00 : f32
    %1746 = vector.broadcast %cst_478 : f32 to vector<8x128xf32>
    %1747 = arith.maximumf %1745, %1746 : vector<8x128xf32>
    %1748 = vector.broadcast %1742 : f32 to vector<8x128xf32>
    %1749 = arith.mulf %1748, %1747 : vector<8x128xf32>
    %1750 = arith.addf %1739, %1749 : vector<8x128xf32>
    %1751 = vector.extract_strided_slice %0 {offsets = [0, 159], sizes = [8, 1], strides = [1, 1]} : vector<8x256xf32> to vector<8x1xf32>
    %c159 = arith.constant 159 : index
    %c0_479 = arith.constant 0 : index
    %1752 = vector.load %arg3[%c159, %c0_479] : memref<256x128xf32, #tpu.memory_space<vmem>>, vector<1x128xf32>
    %c159_480 = arith.constant 159 : index
    %1753 = memref.load %arg4[%c159_480] : memref<256xf32, #tpu.memory_space<smem>>
    %1754 = vector.broadcast %1751 : vector<8x1xf32> to vector<8x128xf32>
    %1755 = vector.broadcast %1752 : vector<1x128xf32> to vector<8x128xf32>
    %1756 = arith.addf %1754, %1755 : vector<8x128xf32>
    %cst_481 = arith.constant 0.000000e+00 : f32
    %1757 = vector.broadcast %cst_481 : f32 to vector<8x128xf32>
    %1758 = arith.maximumf %1756, %1757 : vector<8x128xf32>
    %1759 = vector.broadcast %1753 : f32 to vector<8x128xf32>
    %1760 = arith.mulf %1759, %1758 : vector<8x128xf32>
    %1761 = arith.addf %1750, %1760 : vector<8x128xf32>
    %1762 = vector.extract_strided_slice %0 {offsets = [0, 160], sizes = [8, 1], strides = [1, 1]} : vector<8x256xf32> to vector<8x1xf32>
    %c160 = arith.constant 160 : index
    %c0_482 = arith.constant 0 : index
    %1763 = vector.load %arg3[%c160, %c0_482] : memref<256x128xf32, #tpu.memory_space<vmem>>, vector<1x128xf32>
    %c160_483 = arith.constant 160 : index
    %1764 = memref.load %arg4[%c160_483] : memref<256xf32, #tpu.memory_space<smem>>
    %1765 = vector.broadcast %1762 : vector<8x1xf32> to vector<8x128xf32>
    %1766 = vector.broadcast %1763 : vector<1x128xf32> to vector<8x128xf32>
    %1767 = arith.addf %1765, %1766 : vector<8x128xf32>
    %cst_484 = arith.constant 0.000000e+00 : f32
    %1768 = vector.broadcast %cst_484 : f32 to vector<8x128xf32>
    %1769 = arith.maximumf %1767, %1768 : vector<8x128xf32>
    %1770 = vector.broadcast %1764 : f32 to vector<8x128xf32>
    %1771 = arith.mulf %1770, %1769 : vector<8x128xf32>
    %1772 = arith.addf %1761, %1771 : vector<8x128xf32>
    %1773 = vector.extract_strided_slice %0 {offsets = [0, 161], sizes = [8, 1], strides = [1, 1]} : vector<8x256xf32> to vector<8x1xf32>
    %c161 = arith.constant 161 : index
    %c0_485 = arith.constant 0 : index
    %1774 = vector.load %arg3[%c161, %c0_485] : memref<256x128xf32, #tpu.memory_space<vmem>>, vector<1x128xf32>
    %c161_486 = arith.constant 161 : index
    %1775 = memref.load %arg4[%c161_486] : memref<256xf32, #tpu.memory_space<smem>>
    %1776 = vector.broadcast %1773 : vector<8x1xf32> to vector<8x128xf32>
    %1777 = vector.broadcast %1774 : vector<1x128xf32> to vector<8x128xf32>
    %1778 = arith.addf %1776, %1777 : vector<8x128xf32>
    %cst_487 = arith.constant 0.000000e+00 : f32
    %1779 = vector.broadcast %cst_487 : f32 to vector<8x128xf32>
    %1780 = arith.maximumf %1778, %1779 : vector<8x128xf32>
    %1781 = vector.broadcast %1775 : f32 to vector<8x128xf32>
    %1782 = arith.mulf %1781, %1780 : vector<8x128xf32>
    %1783 = arith.addf %1772, %1782 : vector<8x128xf32>
    %1784 = vector.extract_strided_slice %0 {offsets = [0, 162], sizes = [8, 1], strides = [1, 1]} : vector<8x256xf32> to vector<8x1xf32>
    %c162 = arith.constant 162 : index
    %c0_488 = arith.constant 0 : index
    %1785 = vector.load %arg3[%c162, %c0_488] : memref<256x128xf32, #tpu.memory_space<vmem>>, vector<1x128xf32>
    %c162_489 = arith.constant 162 : index
    %1786 = memref.load %arg4[%c162_489] : memref<256xf32, #tpu.memory_space<smem>>
    %1787 = vector.broadcast %1784 : vector<8x1xf32> to vector<8x128xf32>
    %1788 = vector.broadcast %1785 : vector<1x128xf32> to vector<8x128xf32>
    %1789 = arith.addf %1787, %1788 : vector<8x128xf32>
    %cst_490 = arith.constant 0.000000e+00 : f32
    %1790 = vector.broadcast %cst_490 : f32 to vector<8x128xf32>
    %1791 = arith.maximumf %1789, %1790 : vector<8x128xf32>
    %1792 = vector.broadcast %1786 : f32 to vector<8x128xf32>
    %1793 = arith.mulf %1792, %1791 : vector<8x128xf32>
    %1794 = arith.addf %1783, %1793 : vector<8x128xf32>
    %1795 = vector.extract_strided_slice %0 {offsets = [0, 163], sizes = [8, 1], strides = [1, 1]} : vector<8x256xf32> to vector<8x1xf32>
    %c163 = arith.constant 163 : index
    %c0_491 = arith.constant 0 : index
    %1796 = vector.load %arg3[%c163, %c0_491] : memref<256x128xf32, #tpu.memory_space<vmem>>, vector<1x128xf32>
    %c163_492 = arith.constant 163 : index
    %1797 = memref.load %arg4[%c163_492] : memref<256xf32, #tpu.memory_space<smem>>
    %1798 = vector.broadcast %1795 : vector<8x1xf32> to vector<8x128xf32>
    %1799 = vector.broadcast %1796 : vector<1x128xf32> to vector<8x128xf32>
    %1800 = arith.addf %1798, %1799 : vector<8x128xf32>
    %cst_493 = arith.constant 0.000000e+00 : f32
    %1801 = vector.broadcast %cst_493 : f32 to vector<8x128xf32>
    %1802 = arith.maximumf %1800, %1801 : vector<8x128xf32>
    %1803 = vector.broadcast %1797 : f32 to vector<8x128xf32>
    %1804 = arith.mulf %1803, %1802 : vector<8x128xf32>
    %1805 = arith.addf %1794, %1804 : vector<8x128xf32>
    %1806 = vector.extract_strided_slice %0 {offsets = [0, 164], sizes = [8, 1], strides = [1, 1]} : vector<8x256xf32> to vector<8x1xf32>
    %c164 = arith.constant 164 : index
    %c0_494 = arith.constant 0 : index
    %1807 = vector.load %arg3[%c164, %c0_494] : memref<256x128xf32, #tpu.memory_space<vmem>>, vector<1x128xf32>
    %c164_495 = arith.constant 164 : index
    %1808 = memref.load %arg4[%c164_495] : memref<256xf32, #tpu.memory_space<smem>>
    %1809 = vector.broadcast %1806 : vector<8x1xf32> to vector<8x128xf32>
    %1810 = vector.broadcast %1807 : vector<1x128xf32> to vector<8x128xf32>
    %1811 = arith.addf %1809, %1810 : vector<8x128xf32>
    %cst_496 = arith.constant 0.000000e+00 : f32
    %1812 = vector.broadcast %cst_496 : f32 to vector<8x128xf32>
    %1813 = arith.maximumf %1811, %1812 : vector<8x128xf32>
    %1814 = vector.broadcast %1808 : f32 to vector<8x128xf32>
    %1815 = arith.mulf %1814, %1813 : vector<8x128xf32>
    %1816 = arith.addf %1805, %1815 : vector<8x128xf32>
    %1817 = vector.extract_strided_slice %0 {offsets = [0, 165], sizes = [8, 1], strides = [1, 1]} : vector<8x256xf32> to vector<8x1xf32>
    %c165 = arith.constant 165 : index
    %c0_497 = arith.constant 0 : index
    %1818 = vector.load %arg3[%c165, %c0_497] : memref<256x128xf32, #tpu.memory_space<vmem>>, vector<1x128xf32>
    %c165_498 = arith.constant 165 : index
    %1819 = memref.load %arg4[%c165_498] : memref<256xf32, #tpu.memory_space<smem>>
    %1820 = vector.broadcast %1817 : vector<8x1xf32> to vector<8x128xf32>
    %1821 = vector.broadcast %1818 : vector<1x128xf32> to vector<8x128xf32>
    %1822 = arith.addf %1820, %1821 : vector<8x128xf32>
    %cst_499 = arith.constant 0.000000e+00 : f32
    %1823 = vector.broadcast %cst_499 : f32 to vector<8x128xf32>
    %1824 = arith.maximumf %1822, %1823 : vector<8x128xf32>
    %1825 = vector.broadcast %1819 : f32 to vector<8x128xf32>
    %1826 = arith.mulf %1825, %1824 : vector<8x128xf32>
    %1827 = arith.addf %1816, %1826 : vector<8x128xf32>
    %1828 = vector.extract_strided_slice %0 {offsets = [0, 166], sizes = [8, 1], strides = [1, 1]} : vector<8x256xf32> to vector<8x1xf32>
    %c166 = arith.constant 166 : index
    %c0_500 = arith.constant 0 : index
    %1829 = vector.load %arg3[%c166, %c0_500] : memref<256x128xf32, #tpu.memory_space<vmem>>, vector<1x128xf32>
    %c166_501 = arith.constant 166 : index
    %1830 = memref.load %arg4[%c166_501] : memref<256xf32, #tpu.memory_space<smem>>
    %1831 = vector.broadcast %1828 : vector<8x1xf32> to vector<8x128xf32>
    %1832 = vector.broadcast %1829 : vector<1x128xf32> to vector<8x128xf32>
    %1833 = arith.addf %1831, %1832 : vector<8x128xf32>
    %cst_502 = arith.constant 0.000000e+00 : f32
    %1834 = vector.broadcast %cst_502 : f32 to vector<8x128xf32>
    %1835 = arith.maximumf %1833, %1834 : vector<8x128xf32>
    %1836 = vector.broadcast %1830 : f32 to vector<8x128xf32>
    %1837 = arith.mulf %1836, %1835 : vector<8x128xf32>
    %1838 = arith.addf %1827, %1837 : vector<8x128xf32>
    %1839 = vector.extract_strided_slice %0 {offsets = [0, 167], sizes = [8, 1], strides = [1, 1]} : vector<8x256xf32> to vector<8x1xf32>
    %c167 = arith.constant 167 : index
    %c0_503 = arith.constant 0 : index
    %1840 = vector.load %arg3[%c167, %c0_503] : memref<256x128xf32, #tpu.memory_space<vmem>>, vector<1x128xf32>
    %c167_504 = arith.constant 167 : index
    %1841 = memref.load %arg4[%c167_504] : memref<256xf32, #tpu.memory_space<smem>>
    %1842 = vector.broadcast %1839 : vector<8x1xf32> to vector<8x128xf32>
    %1843 = vector.broadcast %1840 : vector<1x128xf32> to vector<8x128xf32>
    %1844 = arith.addf %1842, %1843 : vector<8x128xf32>
    %cst_505 = arith.constant 0.000000e+00 : f32
    %1845 = vector.broadcast %cst_505 : f32 to vector<8x128xf32>
    %1846 = arith.maximumf %1844, %1845 : vector<8x128xf32>
    %1847 = vector.broadcast %1841 : f32 to vector<8x128xf32>
    %1848 = arith.mulf %1847, %1846 : vector<8x128xf32>
    %1849 = arith.addf %1838, %1848 : vector<8x128xf32>
    %1850 = vector.extract_strided_slice %0 {offsets = [0, 168], sizes = [8, 1], strides = [1, 1]} : vector<8x256xf32> to vector<8x1xf32>
    %c168 = arith.constant 168 : index
    %c0_506 = arith.constant 0 : index
    %1851 = vector.load %arg3[%c168, %c0_506] : memref<256x128xf32, #tpu.memory_space<vmem>>, vector<1x128xf32>
    %c168_507 = arith.constant 168 : index
    %1852 = memref.load %arg4[%c168_507] : memref<256xf32, #tpu.memory_space<smem>>
    %1853 = vector.broadcast %1850 : vector<8x1xf32> to vector<8x128xf32>
    %1854 = vector.broadcast %1851 : vector<1x128xf32> to vector<8x128xf32>
    %1855 = arith.addf %1853, %1854 : vector<8x128xf32>
    %cst_508 = arith.constant 0.000000e+00 : f32
    %1856 = vector.broadcast %cst_508 : f32 to vector<8x128xf32>
    %1857 = arith.maximumf %1855, %1856 : vector<8x128xf32>
    %1858 = vector.broadcast %1852 : f32 to vector<8x128xf32>
    %1859 = arith.mulf %1858, %1857 : vector<8x128xf32>
    %1860 = arith.addf %1849, %1859 : vector<8x128xf32>
    %1861 = vector.extract_strided_slice %0 {offsets = [0, 169], sizes = [8, 1], strides = [1, 1]} : vector<8x256xf32> to vector<8x1xf32>
    %c169 = arith.constant 169 : index
    %c0_509 = arith.constant 0 : index
    %1862 = vector.load %arg3[%c169, %c0_509] : memref<256x128xf32, #tpu.memory_space<vmem>>, vector<1x128xf32>
    %c169_510 = arith.constant 169 : index
    %1863 = memref.load %arg4[%c169_510] : memref<256xf32, #tpu.memory_space<smem>>
    %1864 = vector.broadcast %1861 : vector<8x1xf32> to vector<8x128xf32>
    %1865 = vector.broadcast %1862 : vector<1x128xf32> to vector<8x128xf32>
    %1866 = arith.addf %1864, %1865 : vector<8x128xf32>
    %cst_511 = arith.constant 0.000000e+00 : f32
    %1867 = vector.broadcast %cst_511 : f32 to vector<8x128xf32>
    %1868 = arith.maximumf %1866, %1867 : vector<8x128xf32>
    %1869 = vector.broadcast %1863 : f32 to vector<8x128xf32>
    %1870 = arith.mulf %1869, %1868 : vector<8x128xf32>
    %1871 = arith.addf %1860, %1870 : vector<8x128xf32>
    %1872 = vector.extract_strided_slice %0 {offsets = [0, 170], sizes = [8, 1], strides = [1, 1]} : vector<8x256xf32> to vector<8x1xf32>
    %c170 = arith.constant 170 : index
    %c0_512 = arith.constant 0 : index
    %1873 = vector.load %arg3[%c170, %c0_512] : memref<256x128xf32, #tpu.memory_space<vmem>>, vector<1x128xf32>
    %c170_513 = arith.constant 170 : index
    %1874 = memref.load %arg4[%c170_513] : memref<256xf32, #tpu.memory_space<smem>>
    %1875 = vector.broadcast %1872 : vector<8x1xf32> to vector<8x128xf32>
    %1876 = vector.broadcast %1873 : vector<1x128xf32> to vector<8x128xf32>
    %1877 = arith.addf %1875, %1876 : vector<8x128xf32>
    %cst_514 = arith.constant 0.000000e+00 : f32
    %1878 = vector.broadcast %cst_514 : f32 to vector<8x128xf32>
    %1879 = arith.maximumf %1877, %1878 : vector<8x128xf32>
    %1880 = vector.broadcast %1874 : f32 to vector<8x128xf32>
    %1881 = arith.mulf %1880, %1879 : vector<8x128xf32>
    %1882 = arith.addf %1871, %1881 : vector<8x128xf32>
    %1883 = vector.extract_strided_slice %0 {offsets = [0, 171], sizes = [8, 1], strides = [1, 1]} : vector<8x256xf32> to vector<8x1xf32>
    %c171 = arith.constant 171 : index
    %c0_515 = arith.constant 0 : index
    %1884 = vector.load %arg3[%c171, %c0_515] : memref<256x128xf32, #tpu.memory_space<vmem>>, vector<1x128xf32>
    %c171_516 = arith.constant 171 : index
    %1885 = memref.load %arg4[%c171_516] : memref<256xf32, #tpu.memory_space<smem>>
    %1886 = vector.broadcast %1883 : vector<8x1xf32> to vector<8x128xf32>
    %1887 = vector.broadcast %1884 : vector<1x128xf32> to vector<8x128xf32>
    %1888 = arith.addf %1886, %1887 : vector<8x128xf32>
    %cst_517 = arith.constant 0.000000e+00 : f32
    %1889 = vector.broadcast %cst_517 : f32 to vector<8x128xf32>
    %1890 = arith.maximumf %1888, %1889 : vector<8x128xf32>
    %1891 = vector.broadcast %1885 : f32 to vector<8x128xf32>
    %1892 = arith.mulf %1891, %1890 : vector<8x128xf32>
    %1893 = arith.addf %1882, %1892 : vector<8x128xf32>
    %1894 = vector.extract_strided_slice %0 {offsets = [0, 172], sizes = [8, 1], strides = [1, 1]} : vector<8x256xf32> to vector<8x1xf32>
    %c172 = arith.constant 172 : index
    %c0_518 = arith.constant 0 : index
    %1895 = vector.load %arg3[%c172, %c0_518] : memref<256x128xf32, #tpu.memory_space<vmem>>, vector<1x128xf32>
    %c172_519 = arith.constant 172 : index
    %1896 = memref.load %arg4[%c172_519] : memref<256xf32, #tpu.memory_space<smem>>
    %1897 = vector.broadcast %1894 : vector<8x1xf32> to vector<8x128xf32>
    %1898 = vector.broadcast %1895 : vector<1x128xf32> to vector<8x128xf32>
    %1899 = arith.addf %1897, %1898 : vector<8x128xf32>
    %cst_520 = arith.constant 0.000000e+00 : f32
    %1900 = vector.broadcast %cst_520 : f32 to vector<8x128xf32>
    %1901 = arith.maximumf %1899, %1900 : vector<8x128xf32>
    %1902 = vector.broadcast %1896 : f32 to vector<8x128xf32>
    %1903 = arith.mulf %1902, %1901 : vector<8x128xf32>
    %1904 = arith.addf %1893, %1903 : vector<8x128xf32>
    %1905 = vector.extract_strided_slice %0 {offsets = [0, 173], sizes = [8, 1], strides = [1, 1]} : vector<8x256xf32> to vector<8x1xf32>
    %c173 = arith.constant 173 : index
    %c0_521 = arith.constant 0 : index
    %1906 = vector.load %arg3[%c173, %c0_521] : memref<256x128xf32, #tpu.memory_space<vmem>>, vector<1x128xf32>
    %c173_522 = arith.constant 173 : index
    %1907 = memref.load %arg4[%c173_522] : memref<256xf32, #tpu.memory_space<smem>>
    %1908 = vector.broadcast %1905 : vector<8x1xf32> to vector<8x128xf32>
    %1909 = vector.broadcast %1906 : vector<1x128xf32> to vector<8x128xf32>
    %1910 = arith.addf %1908, %1909 : vector<8x128xf32>
    %cst_523 = arith.constant 0.000000e+00 : f32
    %1911 = vector.broadcast %cst_523 : f32 to vector<8x128xf32>
    %1912 = arith.maximumf %1910, %1911 : vector<8x128xf32>
    %1913 = vector.broadcast %1907 : f32 to vector<8x128xf32>
    %1914 = arith.mulf %1913, %1912 : vector<8x128xf32>
    %1915 = arith.addf %1904, %1914 : vector<8x128xf32>
    %1916 = vector.extract_strided_slice %0 {offsets = [0, 174], sizes = [8, 1], strides = [1, 1]} : vector<8x256xf32> to vector<8x1xf32>
    %c174 = arith.constant 174 : index
    %c0_524 = arith.constant 0 : index
    %1917 = vector.load %arg3[%c174, %c0_524] : memref<256x128xf32, #tpu.memory_space<vmem>>, vector<1x128xf32>
    %c174_525 = arith.constant 174 : index
    %1918 = memref.load %arg4[%c174_525] : memref<256xf32, #tpu.memory_space<smem>>
    %1919 = vector.broadcast %1916 : vector<8x1xf32> to vector<8x128xf32>
    %1920 = vector.broadcast %1917 : vector<1x128xf32> to vector<8x128xf32>
    %1921 = arith.addf %1919, %1920 : vector<8x128xf32>
    %cst_526 = arith.constant 0.000000e+00 : f32
    %1922 = vector.broadcast %cst_526 : f32 to vector<8x128xf32>
    %1923 = arith.maximumf %1921, %1922 : vector<8x128xf32>
    %1924 = vector.broadcast %1918 : f32 to vector<8x128xf32>
    %1925 = arith.mulf %1924, %1923 : vector<8x128xf32>
    %1926 = arith.addf %1915, %1925 : vector<8x128xf32>
    %1927 = vector.extract_strided_slice %0 {offsets = [0, 175], sizes = [8, 1], strides = [1, 1]} : vector<8x256xf32> to vector<8x1xf32>
    %c175 = arith.constant 175 : index
    %c0_527 = arith.constant 0 : index
    %1928 = vector.load %arg3[%c175, %c0_527] : memref<256x128xf32, #tpu.memory_space<vmem>>, vector<1x128xf32>
    %c175_528 = arith.constant 175 : index
    %1929 = memref.load %arg4[%c175_528] : memref<256xf32, #tpu.memory_space<smem>>
    %1930 = vector.broadcast %1927 : vector<8x1xf32> to vector<8x128xf32>
    %1931 = vector.broadcast %1928 : vector<1x128xf32> to vector<8x128xf32>
    %1932 = arith.addf %1930, %1931 : vector<8x128xf32>
    %cst_529 = arith.constant 0.000000e+00 : f32
    %1933 = vector.broadcast %cst_529 : f32 to vector<8x128xf32>
    %1934 = arith.maximumf %1932, %1933 : vector<8x128xf32>
    %1935 = vector.broadcast %1929 : f32 to vector<8x128xf32>
    %1936 = arith.mulf %1935, %1934 : vector<8x128xf32>
    %1937 = arith.addf %1926, %1936 : vector<8x128xf32>
    %1938 = vector.extract_strided_slice %0 {offsets = [0, 176], sizes = [8, 1], strides = [1, 1]} : vector<8x256xf32> to vector<8x1xf32>
    %c176 = arith.constant 176 : index
    %c0_530 = arith.constant 0 : index
    %1939 = vector.load %arg3[%c176, %c0_530] : memref<256x128xf32, #tpu.memory_space<vmem>>, vector<1x128xf32>
    %c176_531 = arith.constant 176 : index
    %1940 = memref.load %arg4[%c176_531] : memref<256xf32, #tpu.memory_space<smem>>
    %1941 = vector.broadcast %1938 : vector<8x1xf32> to vector<8x128xf32>
    %1942 = vector.broadcast %1939 : vector<1x128xf32> to vector<8x128xf32>
    %1943 = arith.addf %1941, %1942 : vector<8x128xf32>
    %cst_532 = arith.constant 0.000000e+00 : f32
    %1944 = vector.broadcast %cst_532 : f32 to vector<8x128xf32>
    %1945 = arith.maximumf %1943, %1944 : vector<8x128xf32>
    %1946 = vector.broadcast %1940 : f32 to vector<8x128xf32>
    %1947 = arith.mulf %1946, %1945 : vector<8x128xf32>
    %1948 = arith.addf %1937, %1947 : vector<8x128xf32>
    %1949 = vector.extract_strided_slice %0 {offsets = [0, 177], sizes = [8, 1], strides = [1, 1]} : vector<8x256xf32> to vector<8x1xf32>
    %c177 = arith.constant 177 : index
    %c0_533 = arith.constant 0 : index
    %1950 = vector.load %arg3[%c177, %c0_533] : memref<256x128xf32, #tpu.memory_space<vmem>>, vector<1x128xf32>
    %c177_534 = arith.constant 177 : index
    %1951 = memref.load %arg4[%c177_534] : memref<256xf32, #tpu.memory_space<smem>>
    %1952 = vector.broadcast %1949 : vector<8x1xf32> to vector<8x128xf32>
    %1953 = vector.broadcast %1950 : vector<1x128xf32> to vector<8x128xf32>
    %1954 = arith.addf %1952, %1953 : vector<8x128xf32>
    %cst_535 = arith.constant 0.000000e+00 : f32
    %1955 = vector.broadcast %cst_535 : f32 to vector<8x128xf32>
    %1956 = arith.maximumf %1954, %1955 : vector<8x128xf32>
    %1957 = vector.broadcast %1951 : f32 to vector<8x128xf32>
    %1958 = arith.mulf %1957, %1956 : vector<8x128xf32>
    %1959 = arith.addf %1948, %1958 : vector<8x128xf32>
    %1960 = vector.extract_strided_slice %0 {offsets = [0, 178], sizes = [8, 1], strides = [1, 1]} : vector<8x256xf32> to vector<8x1xf32>
    %c178 = arith.constant 178 : index
    %c0_536 = arith.constant 0 : index
    %1961 = vector.load %arg3[%c178, %c0_536] : memref<256x128xf32, #tpu.memory_space<vmem>>, vector<1x128xf32>
    %c178_537 = arith.constant 178 : index
    %1962 = memref.load %arg4[%c178_537] : memref<256xf32, #tpu.memory_space<smem>>
    %1963 = vector.broadcast %1960 : vector<8x1xf32> to vector<8x128xf32>
    %1964 = vector.broadcast %1961 : vector<1x128xf32> to vector<8x128xf32>
    %1965 = arith.addf %1963, %1964 : vector<8x128xf32>
    %cst_538 = arith.constant 0.000000e+00 : f32
    %1966 = vector.broadcast %cst_538 : f32 to vector<8x128xf32>
    %1967 = arith.maximumf %1965, %1966 : vector<8x128xf32>
    %1968 = vector.broadcast %1962 : f32 to vector<8x128xf32>
    %1969 = arith.mulf %1968, %1967 : vector<8x128xf32>
    %1970 = arith.addf %1959, %1969 : vector<8x128xf32>
    %1971 = vector.extract_strided_slice %0 {offsets = [0, 179], sizes = [8, 1], strides = [1, 1]} : vector<8x256xf32> to vector<8x1xf32>
    %c179 = arith.constant 179 : index
    %c0_539 = arith.constant 0 : index
    %1972 = vector.load %arg3[%c179, %c0_539] : memref<256x128xf32, #tpu.memory_space<vmem>>, vector<1x128xf32>
    %c179_540 = arith.constant 179 : index
    %1973 = memref.load %arg4[%c179_540] : memref<256xf32, #tpu.memory_space<smem>>
    %1974 = vector.broadcast %1971 : vector<8x1xf32> to vector<8x128xf32>
    %1975 = vector.broadcast %1972 : vector<1x128xf32> to vector<8x128xf32>
    %1976 = arith.addf %1974, %1975 : vector<8x128xf32>
    %cst_541 = arith.constant 0.000000e+00 : f32
    %1977 = vector.broadcast %cst_541 : f32 to vector<8x128xf32>
    %1978 = arith.maximumf %1976, %1977 : vector<8x128xf32>
    %1979 = vector.broadcast %1973 : f32 to vector<8x128xf32>
    %1980 = arith.mulf %1979, %1978 : vector<8x128xf32>
    %1981 = arith.addf %1970, %1980 : vector<8x128xf32>
    %1982 = vector.extract_strided_slice %0 {offsets = [0, 180], sizes = [8, 1], strides = [1, 1]} : vector<8x256xf32> to vector<8x1xf32>
    %c180 = arith.constant 180 : index
    %c0_542 = arith.constant 0 : index
    %1983 = vector.load %arg3[%c180, %c0_542] : memref<256x128xf32, #tpu.memory_space<vmem>>, vector<1x128xf32>
    %c180_543 = arith.constant 180 : index
    %1984 = memref.load %arg4[%c180_543] : memref<256xf32, #tpu.memory_space<smem>>
    %1985 = vector.broadcast %1982 : vector<8x1xf32> to vector<8x128xf32>
    %1986 = vector.broadcast %1983 : vector<1x128xf32> to vector<8x128xf32>
    %1987 = arith.addf %1985, %1986 : vector<8x128xf32>
    %cst_544 = arith.constant 0.000000e+00 : f32
    %1988 = vector.broadcast %cst_544 : f32 to vector<8x128xf32>
    %1989 = arith.maximumf %1987, %1988 : vector<8x128xf32>
    %1990 = vector.broadcast %1984 : f32 to vector<8x128xf32>
    %1991 = arith.mulf %1990, %1989 : vector<8x128xf32>
    %1992 = arith.addf %1981, %1991 : vector<8x128xf32>
    %1993 = vector.extract_strided_slice %0 {offsets = [0, 181], sizes = [8, 1], strides = [1, 1]} : vector<8x256xf32> to vector<8x1xf32>
    %c181 = arith.constant 181 : index
    %c0_545 = arith.constant 0 : index
    %1994 = vector.load %arg3[%c181, %c0_545] : memref<256x128xf32, #tpu.memory_space<vmem>>, vector<1x128xf32>
    %c181_546 = arith.constant 181 : index
    %1995 = memref.load %arg4[%c181_546] : memref<256xf32, #tpu.memory_space<smem>>
    %1996 = vector.broadcast %1993 : vector<8x1xf32> to vector<8x128xf32>
    %1997 = vector.broadcast %1994 : vector<1x128xf32> to vector<8x128xf32>
    %1998 = arith.addf %1996, %1997 : vector<8x128xf32>
    %cst_547 = arith.constant 0.000000e+00 : f32
    %1999 = vector.broadcast %cst_547 : f32 to vector<8x128xf32>
    %2000 = arith.maximumf %1998, %1999 : vector<8x128xf32>
    %2001 = vector.broadcast %1995 : f32 to vector<8x128xf32>
    %2002 = arith.mulf %2001, %2000 : vector<8x128xf32>
    %2003 = arith.addf %1992, %2002 : vector<8x128xf32>
    %2004 = vector.extract_strided_slice %0 {offsets = [0, 182], sizes = [8, 1], strides = [1, 1]} : vector<8x256xf32> to vector<8x1xf32>
    %c182 = arith.constant 182 : index
    %c0_548 = arith.constant 0 : index
    %2005 = vector.load %arg3[%c182, %c0_548] : memref<256x128xf32, #tpu.memory_space<vmem>>, vector<1x128xf32>
    %c182_549 = arith.constant 182 : index
    %2006 = memref.load %arg4[%c182_549] : memref<256xf32, #tpu.memory_space<smem>>
    %2007 = vector.broadcast %2004 : vector<8x1xf32> to vector<8x128xf32>
    %2008 = vector.broadcast %2005 : vector<1x128xf32> to vector<8x128xf32>
    %2009 = arith.addf %2007, %2008 : vector<8x128xf32>
    %cst_550 = arith.constant 0.000000e+00 : f32
    %2010 = vector.broadcast %cst_550 : f32 to vector<8x128xf32>
    %2011 = arith.maximumf %2009, %2010 : vector<8x128xf32>
    %2012 = vector.broadcast %2006 : f32 to vector<8x128xf32>
    %2013 = arith.mulf %2012, %2011 : vector<8x128xf32>
    %2014 = arith.addf %2003, %2013 : vector<8x128xf32>
    %2015 = vector.extract_strided_slice %0 {offsets = [0, 183], sizes = [8, 1], strides = [1, 1]} : vector<8x256xf32> to vector<8x1xf32>
    %c183 = arith.constant 183 : index
    %c0_551 = arith.constant 0 : index
    %2016 = vector.load %arg3[%c183, %c0_551] : memref<256x128xf32, #tpu.memory_space<vmem>>, vector<1x128xf32>
    %c183_552 = arith.constant 183 : index
    %2017 = memref.load %arg4[%c183_552] : memref<256xf32, #tpu.memory_space<smem>>
    %2018 = vector.broadcast %2015 : vector<8x1xf32> to vector<8x128xf32>
    %2019 = vector.broadcast %2016 : vector<1x128xf32> to vector<8x128xf32>
    %2020 = arith.addf %2018, %2019 : vector<8x128xf32>
    %cst_553 = arith.constant 0.000000e+00 : f32
    %2021 = vector.broadcast %cst_553 : f32 to vector<8x128xf32>
    %2022 = arith.maximumf %2020, %2021 : vector<8x128xf32>
    %2023 = vector.broadcast %2017 : f32 to vector<8x128xf32>
    %2024 = arith.mulf %2023, %2022 : vector<8x128xf32>
    %2025 = arith.addf %2014, %2024 : vector<8x128xf32>
    %2026 = vector.extract_strided_slice %0 {offsets = [0, 184], sizes = [8, 1], strides = [1, 1]} : vector<8x256xf32> to vector<8x1xf32>
    %c184 = arith.constant 184 : index
    %c0_554 = arith.constant 0 : index
    %2027 = vector.load %arg3[%c184, %c0_554] : memref<256x128xf32, #tpu.memory_space<vmem>>, vector<1x128xf32>
    %c184_555 = arith.constant 184 : index
    %2028 = memref.load %arg4[%c184_555] : memref<256xf32, #tpu.memory_space<smem>>
    %2029 = vector.broadcast %2026 : vector<8x1xf32> to vector<8x128xf32>
    %2030 = vector.broadcast %2027 : vector<1x128xf32> to vector<8x128xf32>
    %2031 = arith.addf %2029, %2030 : vector<8x128xf32>
    %cst_556 = arith.constant 0.000000e+00 : f32
    %2032 = vector.broadcast %cst_556 : f32 to vector<8x128xf32>
    %2033 = arith.maximumf %2031, %2032 : vector<8x128xf32>
    %2034 = vector.broadcast %2028 : f32 to vector<8x128xf32>
    %2035 = arith.mulf %2034, %2033 : vector<8x128xf32>
    %2036 = arith.addf %2025, %2035 : vector<8x128xf32>
    %2037 = vector.extract_strided_slice %0 {offsets = [0, 185], sizes = [8, 1], strides = [1, 1]} : vector<8x256xf32> to vector<8x1xf32>
    %c185 = arith.constant 185 : index
    %c0_557 = arith.constant 0 : index
    %2038 = vector.load %arg3[%c185, %c0_557] : memref<256x128xf32, #tpu.memory_space<vmem>>, vector<1x128xf32>
    %c185_558 = arith.constant 185 : index
    %2039 = memref.load %arg4[%c185_558] : memref<256xf32, #tpu.memory_space<smem>>
    %2040 = vector.broadcast %2037 : vector<8x1xf32> to vector<8x128xf32>
    %2041 = vector.broadcast %2038 : vector<1x128xf32> to vector<8x128xf32>
    %2042 = arith.addf %2040, %2041 : vector<8x128xf32>
    %cst_559 = arith.constant 0.000000e+00 : f32
    %2043 = vector.broadcast %cst_559 : f32 to vector<8x128xf32>
    %2044 = arith.maximumf %2042, %2043 : vector<8x128xf32>
    %2045 = vector.broadcast %2039 : f32 to vector<8x128xf32>
    %2046 = arith.mulf %2045, %2044 : vector<8x128xf32>
    %2047 = arith.addf %2036, %2046 : vector<8x128xf32>
    %2048 = vector.extract_strided_slice %0 {offsets = [0, 186], sizes = [8, 1], strides = [1, 1]} : vector<8x256xf32> to vector<8x1xf32>
    %c186 = arith.constant 186 : index
    %c0_560 = arith.constant 0 : index
    %2049 = vector.load %arg3[%c186, %c0_560] : memref<256x128xf32, #tpu.memory_space<vmem>>, vector<1x128xf32>
    %c186_561 = arith.constant 186 : index
    %2050 = memref.load %arg4[%c186_561] : memref<256xf32, #tpu.memory_space<smem>>
    %2051 = vector.broadcast %2048 : vector<8x1xf32> to vector<8x128xf32>
    %2052 = vector.broadcast %2049 : vector<1x128xf32> to vector<8x128xf32>
    %2053 = arith.addf %2051, %2052 : vector<8x128xf32>
    %cst_562 = arith.constant 0.000000e+00 : f32
    %2054 = vector.broadcast %cst_562 : f32 to vector<8x128xf32>
    %2055 = arith.maximumf %2053, %2054 : vector<8x128xf32>
    %2056 = vector.broadcast %2050 : f32 to vector<8x128xf32>
    %2057 = arith.mulf %2056, %2055 : vector<8x128xf32>
    %2058 = arith.addf %2047, %2057 : vector<8x128xf32>
    %2059 = vector.extract_strided_slice %0 {offsets = [0, 187], sizes = [8, 1], strides = [1, 1]} : vector<8x256xf32> to vector<8x1xf32>
    %c187 = arith.constant 187 : index
    %c0_563 = arith.constant 0 : index
    %2060 = vector.load %arg3[%c187, %c0_563] : memref<256x128xf32, #tpu.memory_space<vmem>>, vector<1x128xf32>
    %c187_564 = arith.constant 187 : index
    %2061 = memref.load %arg4[%c187_564] : memref<256xf32, #tpu.memory_space<smem>>
    %2062 = vector.broadcast %2059 : vector<8x1xf32> to vector<8x128xf32>
    %2063 = vector.broadcast %2060 : vector<1x128xf32> to vector<8x128xf32>
    %2064 = arith.addf %2062, %2063 : vector<8x128xf32>
    %cst_565 = arith.constant 0.000000e+00 : f32
    %2065 = vector.broadcast %cst_565 : f32 to vector<8x128xf32>
    %2066 = arith.maximumf %2064, %2065 : vector<8x128xf32>
    %2067 = vector.broadcast %2061 : f32 to vector<8x128xf32>
    %2068 = arith.mulf %2067, %2066 : vector<8x128xf32>
    %2069 = arith.addf %2058, %2068 : vector<8x128xf32>
    %2070 = vector.extract_strided_slice %0 {offsets = [0, 188], sizes = [8, 1], strides = [1, 1]} : vector<8x256xf32> to vector<8x1xf32>
    %c188 = arith.constant 188 : index
    %c0_566 = arith.constant 0 : index
    %2071 = vector.load %arg3[%c188, %c0_566] : memref<256x128xf32, #tpu.memory_space<vmem>>, vector<1x128xf32>
    %c188_567 = arith.constant 188 : index
    %2072 = memref.load %arg4[%c188_567] : memref<256xf32, #tpu.memory_space<smem>>
    %2073 = vector.broadcast %2070 : vector<8x1xf32> to vector<8x128xf32>
    %2074 = vector.broadcast %2071 : vector<1x128xf32> to vector<8x128xf32>
    %2075 = arith.addf %2073, %2074 : vector<8x128xf32>
    %cst_568 = arith.constant 0.000000e+00 : f32
    %2076 = vector.broadcast %cst_568 : f32 to vector<8x128xf32>
    %2077 = arith.maximumf %2075, %2076 : vector<8x128xf32>
    %2078 = vector.broadcast %2072 : f32 to vector<8x128xf32>
    %2079 = arith.mulf %2078, %2077 : vector<8x128xf32>
    %2080 = arith.addf %2069, %2079 : vector<8x128xf32>
    %2081 = vector.extract_strided_slice %0 {offsets = [0, 189], sizes = [8, 1], strides = [1, 1]} : vector<8x256xf32> to vector<8x1xf32>
    %c189 = arith.constant 189 : index
    %c0_569 = arith.constant 0 : index
    %2082 = vector.load %arg3[%c189, %c0_569] : memref<256x128xf32, #tpu.memory_space<vmem>>, vector<1x128xf32>
    %c189_570 = arith.constant 189 : index
    %2083 = memref.load %arg4[%c189_570] : memref<256xf32, #tpu.memory_space<smem>>
    %2084 = vector.broadcast %2081 : vector<8x1xf32> to vector<8x128xf32>
    %2085 = vector.broadcast %2082 : vector<1x128xf32> to vector<8x128xf32>
    %2086 = arith.addf %2084, %2085 : vector<8x128xf32>
    %cst_571 = arith.constant 0.000000e+00 : f32
    %2087 = vector.broadcast %cst_571 : f32 to vector<8x128xf32>
    %2088 = arith.maximumf %2086, %2087 : vector<8x128xf32>
    %2089 = vector.broadcast %2083 : f32 to vector<8x128xf32>
    %2090 = arith.mulf %2089, %2088 : vector<8x128xf32>
    %2091 = arith.addf %2080, %2090 : vector<8x128xf32>
    %2092 = vector.extract_strided_slice %0 {offsets = [0, 190], sizes = [8, 1], strides = [1, 1]} : vector<8x256xf32> to vector<8x1xf32>
    %c190 = arith.constant 190 : index
    %c0_572 = arith.constant 0 : index
    %2093 = vector.load %arg3[%c190, %c0_572] : memref<256x128xf32, #tpu.memory_space<vmem>>, vector<1x128xf32>
    %c190_573 = arith.constant 190 : index
    %2094 = memref.load %arg4[%c190_573] : memref<256xf32, #tpu.memory_space<smem>>
    %2095 = vector.broadcast %2092 : vector<8x1xf32> to vector<8x128xf32>
    %2096 = vector.broadcast %2093 : vector<1x128xf32> to vector<8x128xf32>
    %2097 = arith.addf %2095, %2096 : vector<8x128xf32>
    %cst_574 = arith.constant 0.000000e+00 : f32
    %2098 = vector.broadcast %cst_574 : f32 to vector<8x128xf32>
    %2099 = arith.maximumf %2097, %2098 : vector<8x128xf32>
    %2100 = vector.broadcast %2094 : f32 to vector<8x128xf32>
    %2101 = arith.mulf %2100, %2099 : vector<8x128xf32>
    %2102 = arith.addf %2091, %2101 : vector<8x128xf32>
    %2103 = vector.extract_strided_slice %0 {offsets = [0, 191], sizes = [8, 1], strides = [1, 1]} : vector<8x256xf32> to vector<8x1xf32>
    %c191 = arith.constant 191 : index
    %c0_575 = arith.constant 0 : index
    %2104 = vector.load %arg3[%c191, %c0_575] : memref<256x128xf32, #tpu.memory_space<vmem>>, vector<1x128xf32>
    %c191_576 = arith.constant 191 : index
    %2105 = memref.load %arg4[%c191_576] : memref<256xf32, #tpu.memory_space<smem>>
    %2106 = vector.broadcast %2103 : vector<8x1xf32> to vector<8x128xf32>
    %2107 = vector.broadcast %2104 : vector<1x128xf32> to vector<8x128xf32>
    %2108 = arith.addf %2106, %2107 : vector<8x128xf32>
    %cst_577 = arith.constant 0.000000e+00 : f32
    %2109 = vector.broadcast %cst_577 : f32 to vector<8x128xf32>
    %2110 = arith.maximumf %2108, %2109 : vector<8x128xf32>
    %2111 = vector.broadcast %2105 : f32 to vector<8x128xf32>
    %2112 = arith.mulf %2111, %2110 : vector<8x128xf32>
    %2113 = arith.addf %2102, %2112 : vector<8x128xf32>
    %2114 = vector.extract_strided_slice %0 {offsets = [0, 192], sizes = [8, 1], strides = [1, 1]} : vector<8x256xf32> to vector<8x1xf32>
    %c192 = arith.constant 192 : index
    %c0_578 = arith.constant 0 : index
    %2115 = vector.load %arg3[%c192, %c0_578] : memref<256x128xf32, #tpu.memory_space<vmem>>, vector<1x128xf32>
    %c192_579 = arith.constant 192 : index
    %2116 = memref.load %arg4[%c192_579] : memref<256xf32, #tpu.memory_space<smem>>
    %2117 = vector.broadcast %2114 : vector<8x1xf32> to vector<8x128xf32>
    %2118 = vector.broadcast %2115 : vector<1x128xf32> to vector<8x128xf32>
    %2119 = arith.addf %2117, %2118 : vector<8x128xf32>
    %cst_580 = arith.constant 0.000000e+00 : f32
    %2120 = vector.broadcast %cst_580 : f32 to vector<8x128xf32>
    %2121 = arith.maximumf %2119, %2120 : vector<8x128xf32>
    %2122 = vector.broadcast %2116 : f32 to vector<8x128xf32>
    %2123 = arith.mulf %2122, %2121 : vector<8x128xf32>
    %2124 = arith.addf %2113, %2123 : vector<8x128xf32>
    %2125 = vector.extract_strided_slice %0 {offsets = [0, 193], sizes = [8, 1], strides = [1, 1]} : vector<8x256xf32> to vector<8x1xf32>
    %c193 = arith.constant 193 : index
    %c0_581 = arith.constant 0 : index
    %2126 = vector.load %arg3[%c193, %c0_581] : memref<256x128xf32, #tpu.memory_space<vmem>>, vector<1x128xf32>
    %c193_582 = arith.constant 193 : index
    %2127 = memref.load %arg4[%c193_582] : memref<256xf32, #tpu.memory_space<smem>>
    %2128 = vector.broadcast %2125 : vector<8x1xf32> to vector<8x128xf32>
    %2129 = vector.broadcast %2126 : vector<1x128xf32> to vector<8x128xf32>
    %2130 = arith.addf %2128, %2129 : vector<8x128xf32>
    %cst_583 = arith.constant 0.000000e+00 : f32
    %2131 = vector.broadcast %cst_583 : f32 to vector<8x128xf32>
    %2132 = arith.maximumf %2130, %2131 : vector<8x128xf32>
    %2133 = vector.broadcast %2127 : f32 to vector<8x128xf32>
    %2134 = arith.mulf %2133, %2132 : vector<8x128xf32>
    %2135 = arith.addf %2124, %2134 : vector<8x128xf32>
    %2136 = vector.extract_strided_slice %0 {offsets = [0, 194], sizes = [8, 1], strides = [1, 1]} : vector<8x256xf32> to vector<8x1xf32>
    %c194 = arith.constant 194 : index
    %c0_584 = arith.constant 0 : index
    %2137 = vector.load %arg3[%c194, %c0_584] : memref<256x128xf32, #tpu.memory_space<vmem>>, vector<1x128xf32>
    %c194_585 = arith.constant 194 : index
    %2138 = memref.load %arg4[%c194_585] : memref<256xf32, #tpu.memory_space<smem>>
    %2139 = vector.broadcast %2136 : vector<8x1xf32> to vector<8x128xf32>
    %2140 = vector.broadcast %2137 : vector<1x128xf32> to vector<8x128xf32>
    %2141 = arith.addf %2139, %2140 : vector<8x128xf32>
    %cst_586 = arith.constant 0.000000e+00 : f32
    %2142 = vector.broadcast %cst_586 : f32 to vector<8x128xf32>
    %2143 = arith.maximumf %2141, %2142 : vector<8x128xf32>
    %2144 = vector.broadcast %2138 : f32 to vector<8x128xf32>
    %2145 = arith.mulf %2144, %2143 : vector<8x128xf32>
    %2146 = arith.addf %2135, %2145 : vector<8x128xf32>
    %2147 = vector.extract_strided_slice %0 {offsets = [0, 195], sizes = [8, 1], strides = [1, 1]} : vector<8x256xf32> to vector<8x1xf32>
    %c195 = arith.constant 195 : index
    %c0_587 = arith.constant 0 : index
    %2148 = vector.load %arg3[%c195, %c0_587] : memref<256x128xf32, #tpu.memory_space<vmem>>, vector<1x128xf32>
    %c195_588 = arith.constant 195 : index
    %2149 = memref.load %arg4[%c195_588] : memref<256xf32, #tpu.memory_space<smem>>
    %2150 = vector.broadcast %2147 : vector<8x1xf32> to vector<8x128xf32>
    %2151 = vector.broadcast %2148 : vector<1x128xf32> to vector<8x128xf32>
    %2152 = arith.addf %2150, %2151 : vector<8x128xf32>
    %cst_589 = arith.constant 0.000000e+00 : f32
    %2153 = vector.broadcast %cst_589 : f32 to vector<8x128xf32>
    %2154 = arith.maximumf %2152, %2153 : vector<8x128xf32>
    %2155 = vector.broadcast %2149 : f32 to vector<8x128xf32>
    %2156 = arith.mulf %2155, %2154 : vector<8x128xf32>
    %2157 = arith.addf %2146, %2156 : vector<8x128xf32>
    %2158 = vector.extract_strided_slice %0 {offsets = [0, 196], sizes = [8, 1], strides = [1, 1]} : vector<8x256xf32> to vector<8x1xf32>
    %c196 = arith.constant 196 : index
    %c0_590 = arith.constant 0 : index
    %2159 = vector.load %arg3[%c196, %c0_590] : memref<256x128xf32, #tpu.memory_space<vmem>>, vector<1x128xf32>
    %c196_591 = arith.constant 196 : index
    %2160 = memref.load %arg4[%c196_591] : memref<256xf32, #tpu.memory_space<smem>>
    %2161 = vector.broadcast %2158 : vector<8x1xf32> to vector<8x128xf32>
    %2162 = vector.broadcast %2159 : vector<1x128xf32> to vector<8x128xf32>
    %2163 = arith.addf %2161, %2162 : vector<8x128xf32>
    %cst_592 = arith.constant 0.000000e+00 : f32
    %2164 = vector.broadcast %cst_592 : f32 to vector<8x128xf32>
    %2165 = arith.maximumf %2163, %2164 : vector<8x128xf32>
    %2166 = vector.broadcast %2160 : f32 to vector<8x128xf32>
    %2167 = arith.mulf %2166, %2165 : vector<8x128xf32>
    %2168 = arith.addf %2157, %2167 : vector<8x128xf32>
    %2169 = vector.extract_strided_slice %0 {offsets = [0, 197], sizes = [8, 1], strides = [1, 1]} : vector<8x256xf32> to vector<8x1xf32>
    %c197 = arith.constant 197 : index
    %c0_593 = arith.constant 0 : index
    %2170 = vector.load %arg3[%c197, %c0_593] : memref<256x128xf32, #tpu.memory_space<vmem>>, vector<1x128xf32>
    %c197_594 = arith.constant 197 : index
    %2171 = memref.load %arg4[%c197_594] : memref<256xf32, #tpu.memory_space<smem>>
    %2172 = vector.broadcast %2169 : vector<8x1xf32> to vector<8x128xf32>
    %2173 = vector.broadcast %2170 : vector<1x128xf32> to vector<8x128xf32>
    %2174 = arith.addf %2172, %2173 : vector<8x128xf32>
    %cst_595 = arith.constant 0.000000e+00 : f32
    %2175 = vector.broadcast %cst_595 : f32 to vector<8x128xf32>
    %2176 = arith.maximumf %2174, %2175 : vector<8x128xf32>
    %2177 = vector.broadcast %2171 : f32 to vector<8x128xf32>
    %2178 = arith.mulf %2177, %2176 : vector<8x128xf32>
    %2179 = arith.addf %2168, %2178 : vector<8x128xf32>
    %2180 = vector.extract_strided_slice %0 {offsets = [0, 198], sizes = [8, 1], strides = [1, 1]} : vector<8x256xf32> to vector<8x1xf32>
    %c198 = arith.constant 198 : index
    %c0_596 = arith.constant 0 : index
    %2181 = vector.load %arg3[%c198, %c0_596] : memref<256x128xf32, #tpu.memory_space<vmem>>, vector<1x128xf32>
    %c198_597 = arith.constant 198 : index
    %2182 = memref.load %arg4[%c198_597] : memref<256xf32, #tpu.memory_space<smem>>
    %2183 = vector.broadcast %2180 : vector<8x1xf32> to vector<8x128xf32>
    %2184 = vector.broadcast %2181 : vector<1x128xf32> to vector<8x128xf32>
    %2185 = arith.addf %2183, %2184 : vector<8x128xf32>
    %cst_598 = arith.constant 0.000000e+00 : f32
    %2186 = vector.broadcast %cst_598 : f32 to vector<8x128xf32>
    %2187 = arith.maximumf %2185, %2186 : vector<8x128xf32>
    %2188 = vector.broadcast %2182 : f32 to vector<8x128xf32>
    %2189 = arith.mulf %2188, %2187 : vector<8x128xf32>
    %2190 = arith.addf %2179, %2189 : vector<8x128xf32>
    %2191 = vector.extract_strided_slice %0 {offsets = [0, 199], sizes = [8, 1], strides = [1, 1]} : vector<8x256xf32> to vector<8x1xf32>
    %c199 = arith.constant 199 : index
    %c0_599 = arith.constant 0 : index
    %2192 = vector.load %arg3[%c199, %c0_599] : memref<256x128xf32, #tpu.memory_space<vmem>>, vector<1x128xf32>
    %c199_600 = arith.constant 199 : index
    %2193 = memref.load %arg4[%c199_600] : memref<256xf32, #tpu.memory_space<smem>>
    %2194 = vector.broadcast %2191 : vector<8x1xf32> to vector<8x128xf32>
    %2195 = vector.broadcast %2192 : vector<1x128xf32> to vector<8x128xf32>
    %2196 = arith.addf %2194, %2195 : vector<8x128xf32>
    %cst_601 = arith.constant 0.000000e+00 : f32
    %2197 = vector.broadcast %cst_601 : f32 to vector<8x128xf32>
    %2198 = arith.maximumf %2196, %2197 : vector<8x128xf32>
    %2199 = vector.broadcast %2193 : f32 to vector<8x128xf32>
    %2200 = arith.mulf %2199, %2198 : vector<8x128xf32>
    %2201 = arith.addf %2190, %2200 : vector<8x128xf32>
    %2202 = vector.extract_strided_slice %0 {offsets = [0, 200], sizes = [8, 1], strides = [1, 1]} : vector<8x256xf32> to vector<8x1xf32>
    %c200 = arith.constant 200 : index
    %c0_602 = arith.constant 0 : index
    %2203 = vector.load %arg3[%c200, %c0_602] : memref<256x128xf32, #tpu.memory_space<vmem>>, vector<1x128xf32>
    %c200_603 = arith.constant 200 : index
    %2204 = memref.load %arg4[%c200_603] : memref<256xf32, #tpu.memory_space<smem>>
    %2205 = vector.broadcast %2202 : vector<8x1xf32> to vector<8x128xf32>
    %2206 = vector.broadcast %2203 : vector<1x128xf32> to vector<8x128xf32>
    %2207 = arith.addf %2205, %2206 : vector<8x128xf32>
    %cst_604 = arith.constant 0.000000e+00 : f32
    %2208 = vector.broadcast %cst_604 : f32 to vector<8x128xf32>
    %2209 = arith.maximumf %2207, %2208 : vector<8x128xf32>
    %2210 = vector.broadcast %2204 : f32 to vector<8x128xf32>
    %2211 = arith.mulf %2210, %2209 : vector<8x128xf32>
    %2212 = arith.addf %2201, %2211 : vector<8x128xf32>
    %2213 = vector.extract_strided_slice %0 {offsets = [0, 201], sizes = [8, 1], strides = [1, 1]} : vector<8x256xf32> to vector<8x1xf32>
    %c201 = arith.constant 201 : index
    %c0_605 = arith.constant 0 : index
    %2214 = vector.load %arg3[%c201, %c0_605] : memref<256x128xf32, #tpu.memory_space<vmem>>, vector<1x128xf32>
    %c201_606 = arith.constant 201 : index
    %2215 = memref.load %arg4[%c201_606] : memref<256xf32, #tpu.memory_space<smem>>
    %2216 = vector.broadcast %2213 : vector<8x1xf32> to vector<8x128xf32>
    %2217 = vector.broadcast %2214 : vector<1x128xf32> to vector<8x128xf32>
    %2218 = arith.addf %2216, %2217 : vector<8x128xf32>
    %cst_607 = arith.constant 0.000000e+00 : f32
    %2219 = vector.broadcast %cst_607 : f32 to vector<8x128xf32>
    %2220 = arith.maximumf %2218, %2219 : vector<8x128xf32>
    %2221 = vector.broadcast %2215 : f32 to vector<8x128xf32>
    %2222 = arith.mulf %2221, %2220 : vector<8x128xf32>
    %2223 = arith.addf %2212, %2222 : vector<8x128xf32>
    %2224 = vector.extract_strided_slice %0 {offsets = [0, 202], sizes = [8, 1], strides = [1, 1]} : vector<8x256xf32> to vector<8x1xf32>
    %c202 = arith.constant 202 : index
    %c0_608 = arith.constant 0 : index
    %2225 = vector.load %arg3[%c202, %c0_608] : memref<256x128xf32, #tpu.memory_space<vmem>>, vector<1x128xf32>
    %c202_609 = arith.constant 202 : index
    %2226 = memref.load %arg4[%c202_609] : memref<256xf32, #tpu.memory_space<smem>>
    %2227 = vector.broadcast %2224 : vector<8x1xf32> to vector<8x128xf32>
    %2228 = vector.broadcast %2225 : vector<1x128xf32> to vector<8x128xf32>
    %2229 = arith.addf %2227, %2228 : vector<8x128xf32>
    %cst_610 = arith.constant 0.000000e+00 : f32
    %2230 = vector.broadcast %cst_610 : f32 to vector<8x128xf32>
    %2231 = arith.maximumf %2229, %2230 : vector<8x128xf32>
    %2232 = vector.broadcast %2226 : f32 to vector<8x128xf32>
    %2233 = arith.mulf %2232, %2231 : vector<8x128xf32>
    %2234 = arith.addf %2223, %2233 : vector<8x128xf32>
    %2235 = vector.extract_strided_slice %0 {offsets = [0, 203], sizes = [8, 1], strides = [1, 1]} : vector<8x256xf32> to vector<8x1xf32>
    %c203 = arith.constant 203 : index
    %c0_611 = arith.constant 0 : index
    %2236 = vector.load %arg3[%c203, %c0_611] : memref<256x128xf32, #tpu.memory_space<vmem>>, vector<1x128xf32>
    %c203_612 = arith.constant 203 : index
    %2237 = memref.load %arg4[%c203_612] : memref<256xf32, #tpu.memory_space<smem>>
    %2238 = vector.broadcast %2235 : vector<8x1xf32> to vector<8x128xf32>
    %2239 = vector.broadcast %2236 : vector<1x128xf32> to vector<8x128xf32>
    %2240 = arith.addf %2238, %2239 : vector<8x128xf32>
    %cst_613 = arith.constant 0.000000e+00 : f32
    %2241 = vector.broadcast %cst_613 : f32 to vector<8x128xf32>
    %2242 = arith.maximumf %2240, %2241 : vector<8x128xf32>
    %2243 = vector.broadcast %2237 : f32 to vector<8x128xf32>
    %2244 = arith.mulf %2243, %2242 : vector<8x128xf32>
    %2245 = arith.addf %2234, %2244 : vector<8x128xf32>
    %2246 = vector.extract_strided_slice %0 {offsets = [0, 204], sizes = [8, 1], strides = [1, 1]} : vector<8x256xf32> to vector<8x1xf32>
    %c204 = arith.constant 204 : index
    %c0_614 = arith.constant 0 : index
    %2247 = vector.load %arg3[%c204, %c0_614] : memref<256x128xf32, #tpu.memory_space<vmem>>, vector<1x128xf32>
    %c204_615 = arith.constant 204 : index
    %2248 = memref.load %arg4[%c204_615] : memref<256xf32, #tpu.memory_space<smem>>
    %2249 = vector.broadcast %2246 : vector<8x1xf32> to vector<8x128xf32>
    %2250 = vector.broadcast %2247 : vector<1x128xf32> to vector<8x128xf32>
    %2251 = arith.addf %2249, %2250 : vector<8x128xf32>
    %cst_616 = arith.constant 0.000000e+00 : f32
    %2252 = vector.broadcast %cst_616 : f32 to vector<8x128xf32>
    %2253 = arith.maximumf %2251, %2252 : vector<8x128xf32>
    %2254 = vector.broadcast %2248 : f32 to vector<8x128xf32>
    %2255 = arith.mulf %2254, %2253 : vector<8x128xf32>
    %2256 = arith.addf %2245, %2255 : vector<8x128xf32>
    %2257 = vector.extract_strided_slice %0 {offsets = [0, 205], sizes = [8, 1], strides = [1, 1]} : vector<8x256xf32> to vector<8x1xf32>
    %c205 = arith.constant 205 : index
    %c0_617 = arith.constant 0 : index
    %2258 = vector.load %arg3[%c205, %c0_617] : memref<256x128xf32, #tpu.memory_space<vmem>>, vector<1x128xf32>
    %c205_618 = arith.constant 205 : index
    %2259 = memref.load %arg4[%c205_618] : memref<256xf32, #tpu.memory_space<smem>>
    %2260 = vector.broadcast %2257 : vector<8x1xf32> to vector<8x128xf32>
    %2261 = vector.broadcast %2258 : vector<1x128xf32> to vector<8x128xf32>
    %2262 = arith.addf %2260, %2261 : vector<8x128xf32>
    %cst_619 = arith.constant 0.000000e+00 : f32
    %2263 = vector.broadcast %cst_619 : f32 to vector<8x128xf32>
    %2264 = arith.maximumf %2262, %2263 : vector<8x128xf32>
    %2265 = vector.broadcast %2259 : f32 to vector<8x128xf32>
    %2266 = arith.mulf %2265, %2264 : vector<8x128xf32>
    %2267 = arith.addf %2256, %2266 : vector<8x128xf32>
    %2268 = vector.extract_strided_slice %0 {offsets = [0, 206], sizes = [8, 1], strides = [1, 1]} : vector<8x256xf32> to vector<8x1xf32>
    %c206 = arith.constant 206 : index
    %c0_620 = arith.constant 0 : index
    %2269 = vector.load %arg3[%c206, %c0_620] : memref<256x128xf32, #tpu.memory_space<vmem>>, vector<1x128xf32>
    %c206_621 = arith.constant 206 : index
    %2270 = memref.load %arg4[%c206_621] : memref<256xf32, #tpu.memory_space<smem>>
    %2271 = vector.broadcast %2268 : vector<8x1xf32> to vector<8x128xf32>
    %2272 = vector.broadcast %2269 : vector<1x128xf32> to vector<8x128xf32>
    %2273 = arith.addf %2271, %2272 : vector<8x128xf32>
    %cst_622 = arith.constant 0.000000e+00 : f32
    %2274 = vector.broadcast %cst_622 : f32 to vector<8x128xf32>
    %2275 = arith.maximumf %2273, %2274 : vector<8x128xf32>
    %2276 = vector.broadcast %2270 : f32 to vector<8x128xf32>
    %2277 = arith.mulf %2276, %2275 : vector<8x128xf32>
    %2278 = arith.addf %2267, %2277 : vector<8x128xf32>
    %2279 = vector.extract_strided_slice %0 {offsets = [0, 207], sizes = [8, 1], strides = [1, 1]} : vector<8x256xf32> to vector<8x1xf32>
    %c207 = arith.constant 207 : index
    %c0_623 = arith.constant 0 : index
    %2280 = vector.load %arg3[%c207, %c0_623] : memref<256x128xf32, #tpu.memory_space<vmem>>, vector<1x128xf32>
    %c207_624 = arith.constant 207 : index
    %2281 = memref.load %arg4[%c207_624] : memref<256xf32, #tpu.memory_space<smem>>
    %2282 = vector.broadcast %2279 : vector<8x1xf32> to vector<8x128xf32>
    %2283 = vector.broadcast %2280 : vector<1x128xf32> to vector<8x128xf32>
    %2284 = arith.addf %2282, %2283 : vector<8x128xf32>
    %cst_625 = arith.constant 0.000000e+00 : f32
    %2285 = vector.broadcast %cst_625 : f32 to vector<8x128xf32>
    %2286 = arith.maximumf %2284, %2285 : vector<8x128xf32>
    %2287 = vector.broadcast %2281 : f32 to vector<8x128xf32>
    %2288 = arith.mulf %2287, %2286 : vector<8x128xf32>
    %2289 = arith.addf %2278, %2288 : vector<8x128xf32>
    %2290 = vector.extract_strided_slice %0 {offsets = [0, 208], sizes = [8, 1], strides = [1, 1]} : vector<8x256xf32> to vector<8x1xf32>
    %c208 = arith.constant 208 : index
    %c0_626 = arith.constant 0 : index
    %2291 = vector.load %arg3[%c208, %c0_626] : memref<256x128xf32, #tpu.memory_space<vmem>>, vector<1x128xf32>
    %c208_627 = arith.constant 208 : index
    %2292 = memref.load %arg4[%c208_627] : memref<256xf32, #tpu.memory_space<smem>>
    %2293 = vector.broadcast %2290 : vector<8x1xf32> to vector<8x128xf32>
    %2294 = vector.broadcast %2291 : vector<1x128xf32> to vector<8x128xf32>
    %2295 = arith.addf %2293, %2294 : vector<8x128xf32>
    %cst_628 = arith.constant 0.000000e+00 : f32
    %2296 = vector.broadcast %cst_628 : f32 to vector<8x128xf32>
    %2297 = arith.maximumf %2295, %2296 : vector<8x128xf32>
    %2298 = vector.broadcast %2292 : f32 to vector<8x128xf32>
    %2299 = arith.mulf %2298, %2297 : vector<8x128xf32>
    %2300 = arith.addf %2289, %2299 : vector<8x128xf32>
    %2301 = vector.extract_strided_slice %0 {offsets = [0, 209], sizes = [8, 1], strides = [1, 1]} : vector<8x256xf32> to vector<8x1xf32>
    %c209 = arith.constant 209 : index
    %c0_629 = arith.constant 0 : index
    %2302 = vector.load %arg3[%c209, %c0_629] : memref<256x128xf32, #tpu.memory_space<vmem>>, vector<1x128xf32>
    %c209_630 = arith.constant 209 : index
    %2303 = memref.load %arg4[%c209_630] : memref<256xf32, #tpu.memory_space<smem>>
    %2304 = vector.broadcast %2301 : vector<8x1xf32> to vector<8x128xf32>
    %2305 = vector.broadcast %2302 : vector<1x128xf32> to vector<8x128xf32>
    %2306 = arith.addf %2304, %2305 : vector<8x128xf32>
    %cst_631 = arith.constant 0.000000e+00 : f32
    %2307 = vector.broadcast %cst_631 : f32 to vector<8x128xf32>
    %2308 = arith.maximumf %2306, %2307 : vector<8x128xf32>
    %2309 = vector.broadcast %2303 : f32 to vector<8x128xf32>
    %2310 = arith.mulf %2309, %2308 : vector<8x128xf32>
    %2311 = arith.addf %2300, %2310 : vector<8x128xf32>
    %2312 = vector.extract_strided_slice %0 {offsets = [0, 210], sizes = [8, 1], strides = [1, 1]} : vector<8x256xf32> to vector<8x1xf32>
    %c210 = arith.constant 210 : index
    %c0_632 = arith.constant 0 : index
    %2313 = vector.load %arg3[%c210, %c0_632] : memref<256x128xf32, #tpu.memory_space<vmem>>, vector<1x128xf32>
    %c210_633 = arith.constant 210 : index
    %2314 = memref.load %arg4[%c210_633] : memref<256xf32, #tpu.memory_space<smem>>
    %2315 = vector.broadcast %2312 : vector<8x1xf32> to vector<8x128xf32>
    %2316 = vector.broadcast %2313 : vector<1x128xf32> to vector<8x128xf32>
    %2317 = arith.addf %2315, %2316 : vector<8x128xf32>
    %cst_634 = arith.constant 0.000000e+00 : f32
    %2318 = vector.broadcast %cst_634 : f32 to vector<8x128xf32>
    %2319 = arith.maximumf %2317, %2318 : vector<8x128xf32>
    %2320 = vector.broadcast %2314 : f32 to vector<8x128xf32>
    %2321 = arith.mulf %2320, %2319 : vector<8x128xf32>
    %2322 = arith.addf %2311, %2321 : vector<8x128xf32>
    %2323 = vector.extract_strided_slice %0 {offsets = [0, 211], sizes = [8, 1], strides = [1, 1]} : vector<8x256xf32> to vector<8x1xf32>
    %c211 = arith.constant 211 : index
    %c0_635 = arith.constant 0 : index
    %2324 = vector.load %arg3[%c211, %c0_635] : memref<256x128xf32, #tpu.memory_space<vmem>>, vector<1x128xf32>
    %c211_636 = arith.constant 211 : index
    %2325 = memref.load %arg4[%c211_636] : memref<256xf32, #tpu.memory_space<smem>>
    %2326 = vector.broadcast %2323 : vector<8x1xf32> to vector<8x128xf32>
    %2327 = vector.broadcast %2324 : vector<1x128xf32> to vector<8x128xf32>
    %2328 = arith.addf %2326, %2327 : vector<8x128xf32>
    %cst_637 = arith.constant 0.000000e+00 : f32
    %2329 = vector.broadcast %cst_637 : f32 to vector<8x128xf32>
    %2330 = arith.maximumf %2328, %2329 : vector<8x128xf32>
    %2331 = vector.broadcast %2325 : f32 to vector<8x128xf32>
    %2332 = arith.mulf %2331, %2330 : vector<8x128xf32>
    %2333 = arith.addf %2322, %2332 : vector<8x128xf32>
    %2334 = vector.extract_strided_slice %0 {offsets = [0, 212], sizes = [8, 1], strides = [1, 1]} : vector<8x256xf32> to vector<8x1xf32>
    %c212 = arith.constant 212 : index
    %c0_638 = arith.constant 0 : index
    %2335 = vector.load %arg3[%c212, %c0_638] : memref<256x128xf32, #tpu.memory_space<vmem>>, vector<1x128xf32>
    %c212_639 = arith.constant 212 : index
    %2336 = memref.load %arg4[%c212_639] : memref<256xf32, #tpu.memory_space<smem>>
    %2337 = vector.broadcast %2334 : vector<8x1xf32> to vector<8x128xf32>
    %2338 = vector.broadcast %2335 : vector<1x128xf32> to vector<8x128xf32>
    %2339 = arith.addf %2337, %2338 : vector<8x128xf32>
    %cst_640 = arith.constant 0.000000e+00 : f32
    %2340 = vector.broadcast %cst_640 : f32 to vector<8x128xf32>
    %2341 = arith.maximumf %2339, %2340 : vector<8x128xf32>
    %2342 = vector.broadcast %2336 : f32 to vector<8x128xf32>
    %2343 = arith.mulf %2342, %2341 : vector<8x128xf32>
    %2344 = arith.addf %2333, %2343 : vector<8x128xf32>
    %2345 = vector.extract_strided_slice %0 {offsets = [0, 213], sizes = [8, 1], strides = [1, 1]} : vector<8x256xf32> to vector<8x1xf32>
    %c213 = arith.constant 213 : index
    %c0_641 = arith.constant 0 : index
    %2346 = vector.load %arg3[%c213, %c0_641] : memref<256x128xf32, #tpu.memory_space<vmem>>, vector<1x128xf32>
    %c213_642 = arith.constant 213 : index
    %2347 = memref.load %arg4[%c213_642] : memref<256xf32, #tpu.memory_space<smem>>
    %2348 = vector.broadcast %2345 : vector<8x1xf32> to vector<8x128xf32>
    %2349 = vector.broadcast %2346 : vector<1x128xf32> to vector<8x128xf32>
    %2350 = arith.addf %2348, %2349 : vector<8x128xf32>
    %cst_643 = arith.constant 0.000000e+00 : f32
    %2351 = vector.broadcast %cst_643 : f32 to vector<8x128xf32>
    %2352 = arith.maximumf %2350, %2351 : vector<8x128xf32>
    %2353 = vector.broadcast %2347 : f32 to vector<8x128xf32>
    %2354 = arith.mulf %2353, %2352 : vector<8x128xf32>
    %2355 = arith.addf %2344, %2354 : vector<8x128xf32>
    %2356 = vector.extract_strided_slice %0 {offsets = [0, 214], sizes = [8, 1], strides = [1, 1]} : vector<8x256xf32> to vector<8x1xf32>
    %c214 = arith.constant 214 : index
    %c0_644 = arith.constant 0 : index
    %2357 = vector.load %arg3[%c214, %c0_644] : memref<256x128xf32, #tpu.memory_space<vmem>>, vector<1x128xf32>
    %c214_645 = arith.constant 214 : index
    %2358 = memref.load %arg4[%c214_645] : memref<256xf32, #tpu.memory_space<smem>>
    %2359 = vector.broadcast %2356 : vector<8x1xf32> to vector<8x128xf32>
    %2360 = vector.broadcast %2357 : vector<1x128xf32> to vector<8x128xf32>
    %2361 = arith.addf %2359, %2360 : vector<8x128xf32>
    %cst_646 = arith.constant 0.000000e+00 : f32
    %2362 = vector.broadcast %cst_646 : f32 to vector<8x128xf32>
    %2363 = arith.maximumf %2361, %2362 : vector<8x128xf32>
    %2364 = vector.broadcast %2358 : f32 to vector<8x128xf32>
    %2365 = arith.mulf %2364, %2363 : vector<8x128xf32>
    %2366 = arith.addf %2355, %2365 : vector<8x128xf32>
    %2367 = vector.extract_strided_slice %0 {offsets = [0, 215], sizes = [8, 1], strides = [1, 1]} : vector<8x256xf32> to vector<8x1xf32>
    %c215 = arith.constant 215 : index
    %c0_647 = arith.constant 0 : index
    %2368 = vector.load %arg3[%c215, %c0_647] : memref<256x128xf32, #tpu.memory_space<vmem>>, vector<1x128xf32>
    %c215_648 = arith.constant 215 : index
    %2369 = memref.load %arg4[%c215_648] : memref<256xf32, #tpu.memory_space<smem>>
    %2370 = vector.broadcast %2367 : vector<8x1xf32> to vector<8x128xf32>
    %2371 = vector.broadcast %2368 : vector<1x128xf32> to vector<8x128xf32>
    %2372 = arith.addf %2370, %2371 : vector<8x128xf32>
    %cst_649 = arith.constant 0.000000e+00 : f32
    %2373 = vector.broadcast %cst_649 : f32 to vector<8x128xf32>
    %2374 = arith.maximumf %2372, %2373 : vector<8x128xf32>
    %2375 = vector.broadcast %2369 : f32 to vector<8x128xf32>
    %2376 = arith.mulf %2375, %2374 : vector<8x128xf32>
    %2377 = arith.addf %2366, %2376 : vector<8x128xf32>
    %2378 = vector.extract_strided_slice %0 {offsets = [0, 216], sizes = [8, 1], strides = [1, 1]} : vector<8x256xf32> to vector<8x1xf32>
    %c216 = arith.constant 216 : index
    %c0_650 = arith.constant 0 : index
    %2379 = vector.load %arg3[%c216, %c0_650] : memref<256x128xf32, #tpu.memory_space<vmem>>, vector<1x128xf32>
    %c216_651 = arith.constant 216 : index
    %2380 = memref.load %arg4[%c216_651] : memref<256xf32, #tpu.memory_space<smem>>
    %2381 = vector.broadcast %2378 : vector<8x1xf32> to vector<8x128xf32>
    %2382 = vector.broadcast %2379 : vector<1x128xf32> to vector<8x128xf32>
    %2383 = arith.addf %2381, %2382 : vector<8x128xf32>
    %cst_652 = arith.constant 0.000000e+00 : f32
    %2384 = vector.broadcast %cst_652 : f32 to vector<8x128xf32>
    %2385 = arith.maximumf %2383, %2384 : vector<8x128xf32>
    %2386 = vector.broadcast %2380 : f32 to vector<8x128xf32>
    %2387 = arith.mulf %2386, %2385 : vector<8x128xf32>
    %2388 = arith.addf %2377, %2387 : vector<8x128xf32>
    %2389 = vector.extract_strided_slice %0 {offsets = [0, 217], sizes = [8, 1], strides = [1, 1]} : vector<8x256xf32> to vector<8x1xf32>
    %c217 = arith.constant 217 : index
    %c0_653 = arith.constant 0 : index
    %2390 = vector.load %arg3[%c217, %c0_653] : memref<256x128xf32, #tpu.memory_space<vmem>>, vector<1x128xf32>
    %c217_654 = arith.constant 217 : index
    %2391 = memref.load %arg4[%c217_654] : memref<256xf32, #tpu.memory_space<smem>>
    %2392 = vector.broadcast %2389 : vector<8x1xf32> to vector<8x128xf32>
    %2393 = vector.broadcast %2390 : vector<1x128xf32> to vector<8x128xf32>
    %2394 = arith.addf %2392, %2393 : vector<8x128xf32>
    %cst_655 = arith.constant 0.000000e+00 : f32
    %2395 = vector.broadcast %cst_655 : f32 to vector<8x128xf32>
    %2396 = arith.maximumf %2394, %2395 : vector<8x128xf32>
    %2397 = vector.broadcast %2391 : f32 to vector<8x128xf32>
    %2398 = arith.mulf %2397, %2396 : vector<8x128xf32>
    %2399 = arith.addf %2388, %2398 : vector<8x128xf32>
    %2400 = vector.extract_strided_slice %0 {offsets = [0, 218], sizes = [8, 1], strides = [1, 1]} : vector<8x256xf32> to vector<8x1xf32>
    %c218 = arith.constant 218 : index
    %c0_656 = arith.constant 0 : index
    %2401 = vector.load %arg3[%c218, %c0_656] : memref<256x128xf32, #tpu.memory_space<vmem>>, vector<1x128xf32>
    %c218_657 = arith.constant 218 : index
    %2402 = memref.load %arg4[%c218_657] : memref<256xf32, #tpu.memory_space<smem>>
    %2403 = vector.broadcast %2400 : vector<8x1xf32> to vector<8x128xf32>
    %2404 = vector.broadcast %2401 : vector<1x128xf32> to vector<8x128xf32>
    %2405 = arith.addf %2403, %2404 : vector<8x128xf32>
    %cst_658 = arith.constant 0.000000e+00 : f32
    %2406 = vector.broadcast %cst_658 : f32 to vector<8x128xf32>
    %2407 = arith.maximumf %2405, %2406 : vector<8x128xf32>
    %2408 = vector.broadcast %2402 : f32 to vector<8x128xf32>
    %2409 = arith.mulf %2408, %2407 : vector<8x128xf32>
    %2410 = arith.addf %2399, %2409 : vector<8x128xf32>
    %2411 = vector.extract_strided_slice %0 {offsets = [0, 219], sizes = [8, 1], strides = [1, 1]} : vector<8x256xf32> to vector<8x1xf32>
    %c219 = arith.constant 219 : index
    %c0_659 = arith.constant 0 : index
    %2412 = vector.load %arg3[%c219, %c0_659] : memref<256x128xf32, #tpu.memory_space<vmem>>, vector<1x128xf32>
    %c219_660 = arith.constant 219 : index
    %2413 = memref.load %arg4[%c219_660] : memref<256xf32, #tpu.memory_space<smem>>
    %2414 = vector.broadcast %2411 : vector<8x1xf32> to vector<8x128xf32>
    %2415 = vector.broadcast %2412 : vector<1x128xf32> to vector<8x128xf32>
    %2416 = arith.addf %2414, %2415 : vector<8x128xf32>
    %cst_661 = arith.constant 0.000000e+00 : f32
    %2417 = vector.broadcast %cst_661 : f32 to vector<8x128xf32>
    %2418 = arith.maximumf %2416, %2417 : vector<8x128xf32>
    %2419 = vector.broadcast %2413 : f32 to vector<8x128xf32>
    %2420 = arith.mulf %2419, %2418 : vector<8x128xf32>
    %2421 = arith.addf %2410, %2420 : vector<8x128xf32>
    %2422 = vector.extract_strided_slice %0 {offsets = [0, 220], sizes = [8, 1], strides = [1, 1]} : vector<8x256xf32> to vector<8x1xf32>
    %c220 = arith.constant 220 : index
    %c0_662 = arith.constant 0 : index
    %2423 = vector.load %arg3[%c220, %c0_662] : memref<256x128xf32, #tpu.memory_space<vmem>>, vector<1x128xf32>
    %c220_663 = arith.constant 220 : index
    %2424 = memref.load %arg4[%c220_663] : memref<256xf32, #tpu.memory_space<smem>>
    %2425 = vector.broadcast %2422 : vector<8x1xf32> to vector<8x128xf32>
    %2426 = vector.broadcast %2423 : vector<1x128xf32> to vector<8x128xf32>
    %2427 = arith.addf %2425, %2426 : vector<8x128xf32>
    %cst_664 = arith.constant 0.000000e+00 : f32
    %2428 = vector.broadcast %cst_664 : f32 to vector<8x128xf32>
    %2429 = arith.maximumf %2427, %2428 : vector<8x128xf32>
    %2430 = vector.broadcast %2424 : f32 to vector<8x128xf32>
    %2431 = arith.mulf %2430, %2429 : vector<8x128xf32>
    %2432 = arith.addf %2421, %2431 : vector<8x128xf32>
    %2433 = vector.extract_strided_slice %0 {offsets = [0, 221], sizes = [8, 1], strides = [1, 1]} : vector<8x256xf32> to vector<8x1xf32>
    %c221 = arith.constant 221 : index
    %c0_665 = arith.constant 0 : index
    %2434 = vector.load %arg3[%c221, %c0_665] : memref<256x128xf32, #tpu.memory_space<vmem>>, vector<1x128xf32>
    %c221_666 = arith.constant 221 : index
    %2435 = memref.load %arg4[%c221_666] : memref<256xf32, #tpu.memory_space<smem>>
    %2436 = vector.broadcast %2433 : vector<8x1xf32> to vector<8x128xf32>
    %2437 = vector.broadcast %2434 : vector<1x128xf32> to vector<8x128xf32>
    %2438 = arith.addf %2436, %2437 : vector<8x128xf32>
    %cst_667 = arith.constant 0.000000e+00 : f32
    %2439 = vector.broadcast %cst_667 : f32 to vector<8x128xf32>
    %2440 = arith.maximumf %2438, %2439 : vector<8x128xf32>
    %2441 = vector.broadcast %2435 : f32 to vector<8x128xf32>
    %2442 = arith.mulf %2441, %2440 : vector<8x128xf32>
    %2443 = arith.addf %2432, %2442 : vector<8x128xf32>
    %2444 = vector.extract_strided_slice %0 {offsets = [0, 222], sizes = [8, 1], strides = [1, 1]} : vector<8x256xf32> to vector<8x1xf32>
    %c222 = arith.constant 222 : index
    %c0_668 = arith.constant 0 : index
    %2445 = vector.load %arg3[%c222, %c0_668] : memref<256x128xf32, #tpu.memory_space<vmem>>, vector<1x128xf32>
    %c222_669 = arith.constant 222 : index
    %2446 = memref.load %arg4[%c222_669] : memref<256xf32, #tpu.memory_space<smem>>
    %2447 = vector.broadcast %2444 : vector<8x1xf32> to vector<8x128xf32>
    %2448 = vector.broadcast %2445 : vector<1x128xf32> to vector<8x128xf32>
    %2449 = arith.addf %2447, %2448 : vector<8x128xf32>
    %cst_670 = arith.constant 0.000000e+00 : f32
    %2450 = vector.broadcast %cst_670 : f32 to vector<8x128xf32>
    %2451 = arith.maximumf %2449, %2450 : vector<8x128xf32>
    %2452 = vector.broadcast %2446 : f32 to vector<8x128xf32>
    %2453 = arith.mulf %2452, %2451 : vector<8x128xf32>
    %2454 = arith.addf %2443, %2453 : vector<8x128xf32>
    %2455 = vector.extract_strided_slice %0 {offsets = [0, 223], sizes = [8, 1], strides = [1, 1]} : vector<8x256xf32> to vector<8x1xf32>
    %c223 = arith.constant 223 : index
    %c0_671 = arith.constant 0 : index
    %2456 = vector.load %arg3[%c223, %c0_671] : memref<256x128xf32, #tpu.memory_space<vmem>>, vector<1x128xf32>
    %c223_672 = arith.constant 223 : index
    %2457 = memref.load %arg4[%c223_672] : memref<256xf32, #tpu.memory_space<smem>>
    %2458 = vector.broadcast %2455 : vector<8x1xf32> to vector<8x128xf32>
    %2459 = vector.broadcast %2456 : vector<1x128xf32> to vector<8x128xf32>
    %2460 = arith.addf %2458, %2459 : vector<8x128xf32>
    %cst_673 = arith.constant 0.000000e+00 : f32
    %2461 = vector.broadcast %cst_673 : f32 to vector<8x128xf32>
    %2462 = arith.maximumf %2460, %2461 : vector<8x128xf32>
    %2463 = vector.broadcast %2457 : f32 to vector<8x128xf32>
    %2464 = arith.mulf %2463, %2462 : vector<8x128xf32>
    %2465 = arith.addf %2454, %2464 : vector<8x128xf32>
    %2466 = vector.extract_strided_slice %0 {offsets = [0, 224], sizes = [8, 1], strides = [1, 1]} : vector<8x256xf32> to vector<8x1xf32>
    %c224 = arith.constant 224 : index
    %c0_674 = arith.constant 0 : index
    %2467 = vector.load %arg3[%c224, %c0_674] : memref<256x128xf32, #tpu.memory_space<vmem>>, vector<1x128xf32>
    %c224_675 = arith.constant 224 : index
    %2468 = memref.load %arg4[%c224_675] : memref<256xf32, #tpu.memory_space<smem>>
    %2469 = vector.broadcast %2466 : vector<8x1xf32> to vector<8x128xf32>
    %2470 = vector.broadcast %2467 : vector<1x128xf32> to vector<8x128xf32>
    %2471 = arith.addf %2469, %2470 : vector<8x128xf32>
    %cst_676 = arith.constant 0.000000e+00 : f32
    %2472 = vector.broadcast %cst_676 : f32 to vector<8x128xf32>
    %2473 = arith.maximumf %2471, %2472 : vector<8x128xf32>
    %2474 = vector.broadcast %2468 : f32 to vector<8x128xf32>
    %2475 = arith.mulf %2474, %2473 : vector<8x128xf32>
    %2476 = arith.addf %2465, %2475 : vector<8x128xf32>
    %2477 = vector.extract_strided_slice %0 {offsets = [0, 225], sizes = [8, 1], strides = [1, 1]} : vector<8x256xf32> to vector<8x1xf32>
    %c225 = arith.constant 225 : index
    %c0_677 = arith.constant 0 : index
    %2478 = vector.load %arg3[%c225, %c0_677] : memref<256x128xf32, #tpu.memory_space<vmem>>, vector<1x128xf32>
    %c225_678 = arith.constant 225 : index
    %2479 = memref.load %arg4[%c225_678] : memref<256xf32, #tpu.memory_space<smem>>
    %2480 = vector.broadcast %2477 : vector<8x1xf32> to vector<8x128xf32>
    %2481 = vector.broadcast %2478 : vector<1x128xf32> to vector<8x128xf32>
    %2482 = arith.addf %2480, %2481 : vector<8x128xf32>
    %cst_679 = arith.constant 0.000000e+00 : f32
    %2483 = vector.broadcast %cst_679 : f32 to vector<8x128xf32>
    %2484 = arith.maximumf %2482, %2483 : vector<8x128xf32>
    %2485 = vector.broadcast %2479 : f32 to vector<8x128xf32>
    %2486 = arith.mulf %2485, %2484 : vector<8x128xf32>
    %2487 = arith.addf %2476, %2486 : vector<8x128xf32>
    %2488 = vector.extract_strided_slice %0 {offsets = [0, 226], sizes = [8, 1], strides = [1, 1]} : vector<8x256xf32> to vector<8x1xf32>
    %c226 = arith.constant 226 : index
    %c0_680 = arith.constant 0 : index
    %2489 = vector.load %arg3[%c226, %c0_680] : memref<256x128xf32, #tpu.memory_space<vmem>>, vector<1x128xf32>
    %c226_681 = arith.constant 226 : index
    %2490 = memref.load %arg4[%c226_681] : memref<256xf32, #tpu.memory_space<smem>>
    %2491 = vector.broadcast %2488 : vector<8x1xf32> to vector<8x128xf32>
    %2492 = vector.broadcast %2489 : vector<1x128xf32> to vector<8x128xf32>
    %2493 = arith.addf %2491, %2492 : vector<8x128xf32>
    %cst_682 = arith.constant 0.000000e+00 : f32
    %2494 = vector.broadcast %cst_682 : f32 to vector<8x128xf32>
    %2495 = arith.maximumf %2493, %2494 : vector<8x128xf32>
    %2496 = vector.broadcast %2490 : f32 to vector<8x128xf32>
    %2497 = arith.mulf %2496, %2495 : vector<8x128xf32>
    %2498 = arith.addf %2487, %2497 : vector<8x128xf32>
    %2499 = vector.extract_strided_slice %0 {offsets = [0, 227], sizes = [8, 1], strides = [1, 1]} : vector<8x256xf32> to vector<8x1xf32>
    %c227 = arith.constant 227 : index
    %c0_683 = arith.constant 0 : index
    %2500 = vector.load %arg3[%c227, %c0_683] : memref<256x128xf32, #tpu.memory_space<vmem>>, vector<1x128xf32>
    %c227_684 = arith.constant 227 : index
    %2501 = memref.load %arg4[%c227_684] : memref<256xf32, #tpu.memory_space<smem>>
    %2502 = vector.broadcast %2499 : vector<8x1xf32> to vector<8x128xf32>
    %2503 = vector.broadcast %2500 : vector<1x128xf32> to vector<8x128xf32>
    %2504 = arith.addf %2502, %2503 : vector<8x128xf32>
    %cst_685 = arith.constant 0.000000e+00 : f32
    %2505 = vector.broadcast %cst_685 : f32 to vector<8x128xf32>
    %2506 = arith.maximumf %2504, %2505 : vector<8x128xf32>
    %2507 = vector.broadcast %2501 : f32 to vector<8x128xf32>
    %2508 = arith.mulf %2507, %2506 : vector<8x128xf32>
    %2509 = arith.addf %2498, %2508 : vector<8x128xf32>
    %2510 = vector.extract_strided_slice %0 {offsets = [0, 228], sizes = [8, 1], strides = [1, 1]} : vector<8x256xf32> to vector<8x1xf32>
    %c228 = arith.constant 228 : index
    %c0_686 = arith.constant 0 : index
    %2511 = vector.load %arg3[%c228, %c0_686] : memref<256x128xf32, #tpu.memory_space<vmem>>, vector<1x128xf32>
    %c228_687 = arith.constant 228 : index
    %2512 = memref.load %arg4[%c228_687] : memref<256xf32, #tpu.memory_space<smem>>
    %2513 = vector.broadcast %2510 : vector<8x1xf32> to vector<8x128xf32>
    %2514 = vector.broadcast %2511 : vector<1x128xf32> to vector<8x128xf32>
    %2515 = arith.addf %2513, %2514 : vector<8x128xf32>
    %cst_688 = arith.constant 0.000000e+00 : f32
    %2516 = vector.broadcast %cst_688 : f32 to vector<8x128xf32>
    %2517 = arith.maximumf %2515, %2516 : vector<8x128xf32>
    %2518 = vector.broadcast %2512 : f32 to vector<8x128xf32>
    %2519 = arith.mulf %2518, %2517 : vector<8x128xf32>
    %2520 = arith.addf %2509, %2519 : vector<8x128xf32>
    %2521 = vector.extract_strided_slice %0 {offsets = [0, 229], sizes = [8, 1], strides = [1, 1]} : vector<8x256xf32> to vector<8x1xf32>
    %c229 = arith.constant 229 : index
    %c0_689 = arith.constant 0 : index
    %2522 = vector.load %arg3[%c229, %c0_689] : memref<256x128xf32, #tpu.memory_space<vmem>>, vector<1x128xf32>
    %c229_690 = arith.constant 229 : index
    %2523 = memref.load %arg4[%c229_690] : memref<256xf32, #tpu.memory_space<smem>>
    %2524 = vector.broadcast %2521 : vector<8x1xf32> to vector<8x128xf32>
    %2525 = vector.broadcast %2522 : vector<1x128xf32> to vector<8x128xf32>
    %2526 = arith.addf %2524, %2525 : vector<8x128xf32>
    %cst_691 = arith.constant 0.000000e+00 : f32
    %2527 = vector.broadcast %cst_691 : f32 to vector<8x128xf32>
    %2528 = arith.maximumf %2526, %2527 : vector<8x128xf32>
    %2529 = vector.broadcast %2523 : f32 to vector<8x128xf32>
    %2530 = arith.mulf %2529, %2528 : vector<8x128xf32>
    %2531 = arith.addf %2520, %2530 : vector<8x128xf32>
    %2532 = vector.extract_strided_slice %0 {offsets = [0, 230], sizes = [8, 1], strides = [1, 1]} : vector<8x256xf32> to vector<8x1xf32>
    %c230 = arith.constant 230 : index
    %c0_692 = arith.constant 0 : index
    %2533 = vector.load %arg3[%c230, %c0_692] : memref<256x128xf32, #tpu.memory_space<vmem>>, vector<1x128xf32>
    %c230_693 = arith.constant 230 : index
    %2534 = memref.load %arg4[%c230_693] : memref<256xf32, #tpu.memory_space<smem>>
    %2535 = vector.broadcast %2532 : vector<8x1xf32> to vector<8x128xf32>
    %2536 = vector.broadcast %2533 : vector<1x128xf32> to vector<8x128xf32>
    %2537 = arith.addf %2535, %2536 : vector<8x128xf32>
    %cst_694 = arith.constant 0.000000e+00 : f32
    %2538 = vector.broadcast %cst_694 : f32 to vector<8x128xf32>
    %2539 = arith.maximumf %2537, %2538 : vector<8x128xf32>
    %2540 = vector.broadcast %2534 : f32 to vector<8x128xf32>
    %2541 = arith.mulf %2540, %2539 : vector<8x128xf32>
    %2542 = arith.addf %2531, %2541 : vector<8x128xf32>
    %2543 = vector.extract_strided_slice %0 {offsets = [0, 231], sizes = [8, 1], strides = [1, 1]} : vector<8x256xf32> to vector<8x1xf32>
    %c231 = arith.constant 231 : index
    %c0_695 = arith.constant 0 : index
    %2544 = vector.load %arg3[%c231, %c0_695] : memref<256x128xf32, #tpu.memory_space<vmem>>, vector<1x128xf32>
    %c231_696 = arith.constant 231 : index
    %2545 = memref.load %arg4[%c231_696] : memref<256xf32, #tpu.memory_space<smem>>
    %2546 = vector.broadcast %2543 : vector<8x1xf32> to vector<8x128xf32>
    %2547 = vector.broadcast %2544 : vector<1x128xf32> to vector<8x128xf32>
    %2548 = arith.addf %2546, %2547 : vector<8x128xf32>
    %cst_697 = arith.constant 0.000000e+00 : f32
    %2549 = vector.broadcast %cst_697 : f32 to vector<8x128xf32>
    %2550 = arith.maximumf %2548, %2549 : vector<8x128xf32>
    %2551 = vector.broadcast %2545 : f32 to vector<8x128xf32>
    %2552 = arith.mulf %2551, %2550 : vector<8x128xf32>
    %2553 = arith.addf %2542, %2552 : vector<8x128xf32>
    %2554 = vector.extract_strided_slice %0 {offsets = [0, 232], sizes = [8, 1], strides = [1, 1]} : vector<8x256xf32> to vector<8x1xf32>
    %c232 = arith.constant 232 : index
    %c0_698 = arith.constant 0 : index
    %2555 = vector.load %arg3[%c232, %c0_698] : memref<256x128xf32, #tpu.memory_space<vmem>>, vector<1x128xf32>
    %c232_699 = arith.constant 232 : index
    %2556 = memref.load %arg4[%c232_699] : memref<256xf32, #tpu.memory_space<smem>>
    %2557 = vector.broadcast %2554 : vector<8x1xf32> to vector<8x128xf32>
    %2558 = vector.broadcast %2555 : vector<1x128xf32> to vector<8x128xf32>
    %2559 = arith.addf %2557, %2558 : vector<8x128xf32>
    %cst_700 = arith.constant 0.000000e+00 : f32
    %2560 = vector.broadcast %cst_700 : f32 to vector<8x128xf32>
    %2561 = arith.maximumf %2559, %2560 : vector<8x128xf32>
    %2562 = vector.broadcast %2556 : f32 to vector<8x128xf32>
    %2563 = arith.mulf %2562, %2561 : vector<8x128xf32>
    %2564 = arith.addf %2553, %2563 : vector<8x128xf32>
    %2565 = vector.extract_strided_slice %0 {offsets = [0, 233], sizes = [8, 1], strides = [1, 1]} : vector<8x256xf32> to vector<8x1xf32>
    %c233 = arith.constant 233 : index
    %c0_701 = arith.constant 0 : index
    %2566 = vector.load %arg3[%c233, %c0_701] : memref<256x128xf32, #tpu.memory_space<vmem>>, vector<1x128xf32>
    %c233_702 = arith.constant 233 : index
    %2567 = memref.load %arg4[%c233_702] : memref<256xf32, #tpu.memory_space<smem>>
    %2568 = vector.broadcast %2565 : vector<8x1xf32> to vector<8x128xf32>
    %2569 = vector.broadcast %2566 : vector<1x128xf32> to vector<8x128xf32>
    %2570 = arith.addf %2568, %2569 : vector<8x128xf32>
    %cst_703 = arith.constant 0.000000e+00 : f32
    %2571 = vector.broadcast %cst_703 : f32 to vector<8x128xf32>
    %2572 = arith.maximumf %2570, %2571 : vector<8x128xf32>
    %2573 = vector.broadcast %2567 : f32 to vector<8x128xf32>
    %2574 = arith.mulf %2573, %2572 : vector<8x128xf32>
    %2575 = arith.addf %2564, %2574 : vector<8x128xf32>
    %2576 = vector.extract_strided_slice %0 {offsets = [0, 234], sizes = [8, 1], strides = [1, 1]} : vector<8x256xf32> to vector<8x1xf32>
    %c234 = arith.constant 234 : index
    %c0_704 = arith.constant 0 : index
    %2577 = vector.load %arg3[%c234, %c0_704] : memref<256x128xf32, #tpu.memory_space<vmem>>, vector<1x128xf32>
    %c234_705 = arith.constant 234 : index
    %2578 = memref.load %arg4[%c234_705] : memref<256xf32, #tpu.memory_space<smem>>
    %2579 = vector.broadcast %2576 : vector<8x1xf32> to vector<8x128xf32>
    %2580 = vector.broadcast %2577 : vector<1x128xf32> to vector<8x128xf32>
    %2581 = arith.addf %2579, %2580 : vector<8x128xf32>
    %cst_706 = arith.constant 0.000000e+00 : f32
    %2582 = vector.broadcast %cst_706 : f32 to vector<8x128xf32>
    %2583 = arith.maximumf %2581, %2582 : vector<8x128xf32>
    %2584 = vector.broadcast %2578 : f32 to vector<8x128xf32>
    %2585 = arith.mulf %2584, %2583 : vector<8x128xf32>
    %2586 = arith.addf %2575, %2585 : vector<8x128xf32>
    %2587 = vector.extract_strided_slice %0 {offsets = [0, 235], sizes = [8, 1], strides = [1, 1]} : vector<8x256xf32> to vector<8x1xf32>
    %c235 = arith.constant 235 : index
    %c0_707 = arith.constant 0 : index
    %2588 = vector.load %arg3[%c235, %c0_707] : memref<256x128xf32, #tpu.memory_space<vmem>>, vector<1x128xf32>
    %c235_708 = arith.constant 235 : index
    %2589 = memref.load %arg4[%c235_708] : memref<256xf32, #tpu.memory_space<smem>>
    %2590 = vector.broadcast %2587 : vector<8x1xf32> to vector<8x128xf32>
    %2591 = vector.broadcast %2588 : vector<1x128xf32> to vector<8x128xf32>
    %2592 = arith.addf %2590, %2591 : vector<8x128xf32>
    %cst_709 = arith.constant 0.000000e+00 : f32
    %2593 = vector.broadcast %cst_709 : f32 to vector<8x128xf32>
    %2594 = arith.maximumf %2592, %2593 : vector<8x128xf32>
    %2595 = vector.broadcast %2589 : f32 to vector<8x128xf32>
    %2596 = arith.mulf %2595, %2594 : vector<8x128xf32>
    %2597 = arith.addf %2586, %2596 : vector<8x128xf32>
    %2598 = vector.extract_strided_slice %0 {offsets = [0, 236], sizes = [8, 1], strides = [1, 1]} : vector<8x256xf32> to vector<8x1xf32>
    %c236 = arith.constant 236 : index
    %c0_710 = arith.constant 0 : index
    %2599 = vector.load %arg3[%c236, %c0_710] : memref<256x128xf32, #tpu.memory_space<vmem>>, vector<1x128xf32>
    %c236_711 = arith.constant 236 : index
    %2600 = memref.load %arg4[%c236_711] : memref<256xf32, #tpu.memory_space<smem>>
    %2601 = vector.broadcast %2598 : vector<8x1xf32> to vector<8x128xf32>
    %2602 = vector.broadcast %2599 : vector<1x128xf32> to vector<8x128xf32>
    %2603 = arith.addf %2601, %2602 : vector<8x128xf32>
    %cst_712 = arith.constant 0.000000e+00 : f32
    %2604 = vector.broadcast %cst_712 : f32 to vector<8x128xf32>
    %2605 = arith.maximumf %2603, %2604 : vector<8x128xf32>
    %2606 = vector.broadcast %2600 : f32 to vector<8x128xf32>
    %2607 = arith.mulf %2606, %2605 : vector<8x128xf32>
    %2608 = arith.addf %2597, %2607 : vector<8x128xf32>
    %2609 = vector.extract_strided_slice %0 {offsets = [0, 237], sizes = [8, 1], strides = [1, 1]} : vector<8x256xf32> to vector<8x1xf32>
    %c237 = arith.constant 237 : index
    %c0_713 = arith.constant 0 : index
    %2610 = vector.load %arg3[%c237, %c0_713] : memref<256x128xf32, #tpu.memory_space<vmem>>, vector<1x128xf32>
    %c237_714 = arith.constant 237 : index
    %2611 = memref.load %arg4[%c237_714] : memref<256xf32, #tpu.memory_space<smem>>
    %2612 = vector.broadcast %2609 : vector<8x1xf32> to vector<8x128xf32>
    %2613 = vector.broadcast %2610 : vector<1x128xf32> to vector<8x128xf32>
    %2614 = arith.addf %2612, %2613 : vector<8x128xf32>
    %cst_715 = arith.constant 0.000000e+00 : f32
    %2615 = vector.broadcast %cst_715 : f32 to vector<8x128xf32>
    %2616 = arith.maximumf %2614, %2615 : vector<8x128xf32>
    %2617 = vector.broadcast %2611 : f32 to vector<8x128xf32>
    %2618 = arith.mulf %2617, %2616 : vector<8x128xf32>
    %2619 = arith.addf %2608, %2618 : vector<8x128xf32>
    %2620 = vector.extract_strided_slice %0 {offsets = [0, 238], sizes = [8, 1], strides = [1, 1]} : vector<8x256xf32> to vector<8x1xf32>
    %c238 = arith.constant 238 : index
    %c0_716 = arith.constant 0 : index
    %2621 = vector.load %arg3[%c238, %c0_716] : memref<256x128xf32, #tpu.memory_space<vmem>>, vector<1x128xf32>
    %c238_717 = arith.constant 238 : index
    %2622 = memref.load %arg4[%c238_717] : memref<256xf32, #tpu.memory_space<smem>>
    %2623 = vector.broadcast %2620 : vector<8x1xf32> to vector<8x128xf32>
    %2624 = vector.broadcast %2621 : vector<1x128xf32> to vector<8x128xf32>
    %2625 = arith.addf %2623, %2624 : vector<8x128xf32>
    %cst_718 = arith.constant 0.000000e+00 : f32
    %2626 = vector.broadcast %cst_718 : f32 to vector<8x128xf32>
    %2627 = arith.maximumf %2625, %2626 : vector<8x128xf32>
    %2628 = vector.broadcast %2622 : f32 to vector<8x128xf32>
    %2629 = arith.mulf %2628, %2627 : vector<8x128xf32>
    %2630 = arith.addf %2619, %2629 : vector<8x128xf32>
    %2631 = vector.extract_strided_slice %0 {offsets = [0, 239], sizes = [8, 1], strides = [1, 1]} : vector<8x256xf32> to vector<8x1xf32>
    %c239 = arith.constant 239 : index
    %c0_719 = arith.constant 0 : index
    %2632 = vector.load %arg3[%c239, %c0_719] : memref<256x128xf32, #tpu.memory_space<vmem>>, vector<1x128xf32>
    %c239_720 = arith.constant 239 : index
    %2633 = memref.load %arg4[%c239_720] : memref<256xf32, #tpu.memory_space<smem>>
    %2634 = vector.broadcast %2631 : vector<8x1xf32> to vector<8x128xf32>
    %2635 = vector.broadcast %2632 : vector<1x128xf32> to vector<8x128xf32>
    %2636 = arith.addf %2634, %2635 : vector<8x128xf32>
    %cst_721 = arith.constant 0.000000e+00 : f32
    %2637 = vector.broadcast %cst_721 : f32 to vector<8x128xf32>
    %2638 = arith.maximumf %2636, %2637 : vector<8x128xf32>
    %2639 = vector.broadcast %2633 : f32 to vector<8x128xf32>
    %2640 = arith.mulf %2639, %2638 : vector<8x128xf32>
    %2641 = arith.addf %2630, %2640 : vector<8x128xf32>
    %2642 = vector.extract_strided_slice %0 {offsets = [0, 240], sizes = [8, 1], strides = [1, 1]} : vector<8x256xf32> to vector<8x1xf32>
    %c240 = arith.constant 240 : index
    %c0_722 = arith.constant 0 : index
    %2643 = vector.load %arg3[%c240, %c0_722] : memref<256x128xf32, #tpu.memory_space<vmem>>, vector<1x128xf32>
    %c240_723 = arith.constant 240 : index
    %2644 = memref.load %arg4[%c240_723] : memref<256xf32, #tpu.memory_space<smem>>
    %2645 = vector.broadcast %2642 : vector<8x1xf32> to vector<8x128xf32>
    %2646 = vector.broadcast %2643 : vector<1x128xf32> to vector<8x128xf32>
    %2647 = arith.addf %2645, %2646 : vector<8x128xf32>
    %cst_724 = arith.constant 0.000000e+00 : f32
    %2648 = vector.broadcast %cst_724 : f32 to vector<8x128xf32>
    %2649 = arith.maximumf %2647, %2648 : vector<8x128xf32>
    %2650 = vector.broadcast %2644 : f32 to vector<8x128xf32>
    %2651 = arith.mulf %2650, %2649 : vector<8x128xf32>
    %2652 = arith.addf %2641, %2651 : vector<8x128xf32>
    %2653 = vector.extract_strided_slice %0 {offsets = [0, 241], sizes = [8, 1], strides = [1, 1]} : vector<8x256xf32> to vector<8x1xf32>
    %c241 = arith.constant 241 : index
    %c0_725 = arith.constant 0 : index
    %2654 = vector.load %arg3[%c241, %c0_725] : memref<256x128xf32, #tpu.memory_space<vmem>>, vector<1x128xf32>
    %c241_726 = arith.constant 241 : index
    %2655 = memref.load %arg4[%c241_726] : memref<256xf32, #tpu.memory_space<smem>>
    %2656 = vector.broadcast %2653 : vector<8x1xf32> to vector<8x128xf32>
    %2657 = vector.broadcast %2654 : vector<1x128xf32> to vector<8x128xf32>
    %2658 = arith.addf %2656, %2657 : vector<8x128xf32>
    %cst_727 = arith.constant 0.000000e+00 : f32
    %2659 = vector.broadcast %cst_727 : f32 to vector<8x128xf32>
    %2660 = arith.maximumf %2658, %2659 : vector<8x128xf32>
    %2661 = vector.broadcast %2655 : f32 to vector<8x128xf32>
    %2662 = arith.mulf %2661, %2660 : vector<8x128xf32>
    %2663 = arith.addf %2652, %2662 : vector<8x128xf32>
    %2664 = vector.extract_strided_slice %0 {offsets = [0, 242], sizes = [8, 1], strides = [1, 1]} : vector<8x256xf32> to vector<8x1xf32>
    %c242 = arith.constant 242 : index
    %c0_728 = arith.constant 0 : index
    %2665 = vector.load %arg3[%c242, %c0_728] : memref<256x128xf32, #tpu.memory_space<vmem>>, vector<1x128xf32>
    %c242_729 = arith.constant 242 : index
    %2666 = memref.load %arg4[%c242_729] : memref<256xf32, #tpu.memory_space<smem>>
    %2667 = vector.broadcast %2664 : vector<8x1xf32> to vector<8x128xf32>
    %2668 = vector.broadcast %2665 : vector<1x128xf32> to vector<8x128xf32>
    %2669 = arith.addf %2667, %2668 : vector<8x128xf32>
    %cst_730 = arith.constant 0.000000e+00 : f32
    %2670 = vector.broadcast %cst_730 : f32 to vector<8x128xf32>
    %2671 = arith.maximumf %2669, %2670 : vector<8x128xf32>
    %2672 = vector.broadcast %2666 : f32 to vector<8x128xf32>
    %2673 = arith.mulf %2672, %2671 : vector<8x128xf32>
    %2674 = arith.addf %2663, %2673 : vector<8x128xf32>
    %2675 = vector.extract_strided_slice %0 {offsets = [0, 243], sizes = [8, 1], strides = [1, 1]} : vector<8x256xf32> to vector<8x1xf32>
    %c243 = arith.constant 243 : index
    %c0_731 = arith.constant 0 : index
    %2676 = vector.load %arg3[%c243, %c0_731] : memref<256x128xf32, #tpu.memory_space<vmem>>, vector<1x128xf32>
    %c243_732 = arith.constant 243 : index
    %2677 = memref.load %arg4[%c243_732] : memref<256xf32, #tpu.memory_space<smem>>
    %2678 = vector.broadcast %2675 : vector<8x1xf32> to vector<8x128xf32>
    %2679 = vector.broadcast %2676 : vector<1x128xf32> to vector<8x128xf32>
    %2680 = arith.addf %2678, %2679 : vector<8x128xf32>
    %cst_733 = arith.constant 0.000000e+00 : f32
    %2681 = vector.broadcast %cst_733 : f32 to vector<8x128xf32>
    %2682 = arith.maximumf %2680, %2681 : vector<8x128xf32>
    %2683 = vector.broadcast %2677 : f32 to vector<8x128xf32>
    %2684 = arith.mulf %2683, %2682 : vector<8x128xf32>
    %2685 = arith.addf %2674, %2684 : vector<8x128xf32>
    %2686 = vector.extract_strided_slice %0 {offsets = [0, 244], sizes = [8, 1], strides = [1, 1]} : vector<8x256xf32> to vector<8x1xf32>
    %c244 = arith.constant 244 : index
    %c0_734 = arith.constant 0 : index
    %2687 = vector.load %arg3[%c244, %c0_734] : memref<256x128xf32, #tpu.memory_space<vmem>>, vector<1x128xf32>
    %c244_735 = arith.constant 244 : index
    %2688 = memref.load %arg4[%c244_735] : memref<256xf32, #tpu.memory_space<smem>>
    %2689 = vector.broadcast %2686 : vector<8x1xf32> to vector<8x128xf32>
    %2690 = vector.broadcast %2687 : vector<1x128xf32> to vector<8x128xf32>
    %2691 = arith.addf %2689, %2690 : vector<8x128xf32>
    %cst_736 = arith.constant 0.000000e+00 : f32
    %2692 = vector.broadcast %cst_736 : f32 to vector<8x128xf32>
    %2693 = arith.maximumf %2691, %2692 : vector<8x128xf32>
    %2694 = vector.broadcast %2688 : f32 to vector<8x128xf32>
    %2695 = arith.mulf %2694, %2693 : vector<8x128xf32>
    %2696 = arith.addf %2685, %2695 : vector<8x128xf32>
    %2697 = vector.extract_strided_slice %0 {offsets = [0, 245], sizes = [8, 1], strides = [1, 1]} : vector<8x256xf32> to vector<8x1xf32>
    %c245 = arith.constant 245 : index
    %c0_737 = arith.constant 0 : index
    %2698 = vector.load %arg3[%c245, %c0_737] : memref<256x128xf32, #tpu.memory_space<vmem>>, vector<1x128xf32>
    %c245_738 = arith.constant 245 : index
    %2699 = memref.load %arg4[%c245_738] : memref<256xf32, #tpu.memory_space<smem>>
    %2700 = vector.broadcast %2697 : vector<8x1xf32> to vector<8x128xf32>
    %2701 = vector.broadcast %2698 : vector<1x128xf32> to vector<8x128xf32>
    %2702 = arith.addf %2700, %2701 : vector<8x128xf32>
    %cst_739 = arith.constant 0.000000e+00 : f32
    %2703 = vector.broadcast %cst_739 : f32 to vector<8x128xf32>
    %2704 = arith.maximumf %2702, %2703 : vector<8x128xf32>
    %2705 = vector.broadcast %2699 : f32 to vector<8x128xf32>
    %2706 = arith.mulf %2705, %2704 : vector<8x128xf32>
    %2707 = arith.addf %2696, %2706 : vector<8x128xf32>
    %2708 = vector.extract_strided_slice %0 {offsets = [0, 246], sizes = [8, 1], strides = [1, 1]} : vector<8x256xf32> to vector<8x1xf32>
    %c246 = arith.constant 246 : index
    %c0_740 = arith.constant 0 : index
    %2709 = vector.load %arg3[%c246, %c0_740] : memref<256x128xf32, #tpu.memory_space<vmem>>, vector<1x128xf32>
    %c246_741 = arith.constant 246 : index
    %2710 = memref.load %arg4[%c246_741] : memref<256xf32, #tpu.memory_space<smem>>
    %2711 = vector.broadcast %2708 : vector<8x1xf32> to vector<8x128xf32>
    %2712 = vector.broadcast %2709 : vector<1x128xf32> to vector<8x128xf32>
    %2713 = arith.addf %2711, %2712 : vector<8x128xf32>
    %cst_742 = arith.constant 0.000000e+00 : f32
    %2714 = vector.broadcast %cst_742 : f32 to vector<8x128xf32>
    %2715 = arith.maximumf %2713, %2714 : vector<8x128xf32>
    %2716 = vector.broadcast %2710 : f32 to vector<8x128xf32>
    %2717 = arith.mulf %2716, %2715 : vector<8x128xf32>
    %2718 = arith.addf %2707, %2717 : vector<8x128xf32>
    %2719 = vector.extract_strided_slice %0 {offsets = [0, 247], sizes = [8, 1], strides = [1, 1]} : vector<8x256xf32> to vector<8x1xf32>
    %c247 = arith.constant 247 : index
    %c0_743 = arith.constant 0 : index
    %2720 = vector.load %arg3[%c247, %c0_743] : memref<256x128xf32, #tpu.memory_space<vmem>>, vector<1x128xf32>
    %c247_744 = arith.constant 247 : index
    %2721 = memref.load %arg4[%c247_744] : memref<256xf32, #tpu.memory_space<smem>>
    %2722 = vector.broadcast %2719 : vector<8x1xf32> to vector<8x128xf32>
    %2723 = vector.broadcast %2720 : vector<1x128xf32> to vector<8x128xf32>
    %2724 = arith.addf %2722, %2723 : vector<8x128xf32>
    %cst_745 = arith.constant 0.000000e+00 : f32
    %2725 = vector.broadcast %cst_745 : f32 to vector<8x128xf32>
    %2726 = arith.maximumf %2724, %2725 : vector<8x128xf32>
    %2727 = vector.broadcast %2721 : f32 to vector<8x128xf32>
    %2728 = arith.mulf %2727, %2726 : vector<8x128xf32>
    %2729 = arith.addf %2718, %2728 : vector<8x128xf32>
    %2730 = vector.extract_strided_slice %0 {offsets = [0, 248], sizes = [8, 1], strides = [1, 1]} : vector<8x256xf32> to vector<8x1xf32>
    %c248 = arith.constant 248 : index
    %c0_746 = arith.constant 0 : index
    %2731 = vector.load %arg3[%c248, %c0_746] : memref<256x128xf32, #tpu.memory_space<vmem>>, vector<1x128xf32>
    %c248_747 = arith.constant 248 : index
    %2732 = memref.load %arg4[%c248_747] : memref<256xf32, #tpu.memory_space<smem>>
    %2733 = vector.broadcast %2730 : vector<8x1xf32> to vector<8x128xf32>
    %2734 = vector.broadcast %2731 : vector<1x128xf32> to vector<8x128xf32>
    %2735 = arith.addf %2733, %2734 : vector<8x128xf32>
    %cst_748 = arith.constant 0.000000e+00 : f32
    %2736 = vector.broadcast %cst_748 : f32 to vector<8x128xf32>
    %2737 = arith.maximumf %2735, %2736 : vector<8x128xf32>
    %2738 = vector.broadcast %2732 : f32 to vector<8x128xf32>
    %2739 = arith.mulf %2738, %2737 : vector<8x128xf32>
    %2740 = arith.addf %2729, %2739 : vector<8x128xf32>
    %2741 = vector.extract_strided_slice %0 {offsets = [0, 249], sizes = [8, 1], strides = [1, 1]} : vector<8x256xf32> to vector<8x1xf32>
    %c249 = arith.constant 249 : index
    %c0_749 = arith.constant 0 : index
    %2742 = vector.load %arg3[%c249, %c0_749] : memref<256x128xf32, #tpu.memory_space<vmem>>, vector<1x128xf32>
    %c249_750 = arith.constant 249 : index
    %2743 = memref.load %arg4[%c249_750] : memref<256xf32, #tpu.memory_space<smem>>
    %2744 = vector.broadcast %2741 : vector<8x1xf32> to vector<8x128xf32>
    %2745 = vector.broadcast %2742 : vector<1x128xf32> to vector<8x128xf32>
    %2746 = arith.addf %2744, %2745 : vector<8x128xf32>
    %cst_751 = arith.constant 0.000000e+00 : f32
    %2747 = vector.broadcast %cst_751 : f32 to vector<8x128xf32>
    %2748 = arith.maximumf %2746, %2747 : vector<8x128xf32>
    %2749 = vector.broadcast %2743 : f32 to vector<8x128xf32>
    %2750 = arith.mulf %2749, %2748 : vector<8x128xf32>
    %2751 = arith.addf %2740, %2750 : vector<8x128xf32>
    %2752 = vector.extract_strided_slice %0 {offsets = [0, 250], sizes = [8, 1], strides = [1, 1]} : vector<8x256xf32> to vector<8x1xf32>
    %c250 = arith.constant 250 : index
    %c0_752 = arith.constant 0 : index
    %2753 = vector.load %arg3[%c250, %c0_752] : memref<256x128xf32, #tpu.memory_space<vmem>>, vector<1x128xf32>
    %c250_753 = arith.constant 250 : index
    %2754 = memref.load %arg4[%c250_753] : memref<256xf32, #tpu.memory_space<smem>>
    %2755 = vector.broadcast %2752 : vector<8x1xf32> to vector<8x128xf32>
    %2756 = vector.broadcast %2753 : vector<1x128xf32> to vector<8x128xf32>
    %2757 = arith.addf %2755, %2756 : vector<8x128xf32>
    %cst_754 = arith.constant 0.000000e+00 : f32
    %2758 = vector.broadcast %cst_754 : f32 to vector<8x128xf32>
    %2759 = arith.maximumf %2757, %2758 : vector<8x128xf32>
    %2760 = vector.broadcast %2754 : f32 to vector<8x128xf32>
    %2761 = arith.mulf %2760, %2759 : vector<8x128xf32>
    %2762 = arith.addf %2751, %2761 : vector<8x128xf32>
    %2763 = vector.extract_strided_slice %0 {offsets = [0, 251], sizes = [8, 1], strides = [1, 1]} : vector<8x256xf32> to vector<8x1xf32>
    %c251 = arith.constant 251 : index
    %c0_755 = arith.constant 0 : index
    %2764 = vector.load %arg3[%c251, %c0_755] : memref<256x128xf32, #tpu.memory_space<vmem>>, vector<1x128xf32>
    %c251_756 = arith.constant 251 : index
    %2765 = memref.load %arg4[%c251_756] : memref<256xf32, #tpu.memory_space<smem>>
    %2766 = vector.broadcast %2763 : vector<8x1xf32> to vector<8x128xf32>
    %2767 = vector.broadcast %2764 : vector<1x128xf32> to vector<8x128xf32>
    %2768 = arith.addf %2766, %2767 : vector<8x128xf32>
    %cst_757 = arith.constant 0.000000e+00 : f32
    %2769 = vector.broadcast %cst_757 : f32 to vector<8x128xf32>
    %2770 = arith.maximumf %2768, %2769 : vector<8x128xf32>
    %2771 = vector.broadcast %2765 : f32 to vector<8x128xf32>
    %2772 = arith.mulf %2771, %2770 : vector<8x128xf32>
    %2773 = arith.addf %2762, %2772 : vector<8x128xf32>
    %2774 = vector.extract_strided_slice %0 {offsets = [0, 252], sizes = [8, 1], strides = [1, 1]} : vector<8x256xf32> to vector<8x1xf32>
    %c252 = arith.constant 252 : index
    %c0_758 = arith.constant 0 : index
    %2775 = vector.load %arg3[%c252, %c0_758] : memref<256x128xf32, #tpu.memory_space<vmem>>, vector<1x128xf32>
    %c252_759 = arith.constant 252 : index
    %2776 = memref.load %arg4[%c252_759] : memref<256xf32, #tpu.memory_space<smem>>
    %2777 = vector.broadcast %2774 : vector<8x1xf32> to vector<8x128xf32>
    %2778 = vector.broadcast %2775 : vector<1x128xf32> to vector<8x128xf32>
    %2779 = arith.addf %2777, %2778 : vector<8x128xf32>
    %cst_760 = arith.constant 0.000000e+00 : f32
    %2780 = vector.broadcast %cst_760 : f32 to vector<8x128xf32>
    %2781 = arith.maximumf %2779, %2780 : vector<8x128xf32>
    %2782 = vector.broadcast %2776 : f32 to vector<8x128xf32>
    %2783 = arith.mulf %2782, %2781 : vector<8x128xf32>
    %2784 = arith.addf %2773, %2783 : vector<8x128xf32>
    %2785 = vector.extract_strided_slice %0 {offsets = [0, 253], sizes = [8, 1], strides = [1, 1]} : vector<8x256xf32> to vector<8x1xf32>
    %c253 = arith.constant 253 : index
    %c0_761 = arith.constant 0 : index
    %2786 = vector.load %arg3[%c253, %c0_761] : memref<256x128xf32, #tpu.memory_space<vmem>>, vector<1x128xf32>
    %c253_762 = arith.constant 253 : index
    %2787 = memref.load %arg4[%c253_762] : memref<256xf32, #tpu.memory_space<smem>>
    %2788 = vector.broadcast %2785 : vector<8x1xf32> to vector<8x128xf32>
    %2789 = vector.broadcast %2786 : vector<1x128xf32> to vector<8x128xf32>
    %2790 = arith.addf %2788, %2789 : vector<8x128xf32>
    %cst_763 = arith.constant 0.000000e+00 : f32
    %2791 = vector.broadcast %cst_763 : f32 to vector<8x128xf32>
    %2792 = arith.maximumf %2790, %2791 : vector<8x128xf32>
    %2793 = vector.broadcast %2787 : f32 to vector<8x128xf32>
    %2794 = arith.mulf %2793, %2792 : vector<8x128xf32>
    %2795 = arith.addf %2784, %2794 : vector<8x128xf32>
    %2796 = vector.extract_strided_slice %0 {offsets = [0, 254], sizes = [8, 1], strides = [1, 1]} : vector<8x256xf32> to vector<8x1xf32>
    %c254 = arith.constant 254 : index
    %c0_764 = arith.constant 0 : index
    %2797 = vector.load %arg3[%c254, %c0_764] : memref<256x128xf32, #tpu.memory_space<vmem>>, vector<1x128xf32>
    %c254_765 = arith.constant 254 : index
    %2798 = memref.load %arg4[%c254_765] : memref<256xf32, #tpu.memory_space<smem>>
    %2799 = vector.broadcast %2796 : vector<8x1xf32> to vector<8x128xf32>
    %2800 = vector.broadcast %2797 : vector<1x128xf32> to vector<8x128xf32>
    %2801 = arith.addf %2799, %2800 : vector<8x128xf32>
    %cst_766 = arith.constant 0.000000e+00 : f32
    %2802 = vector.broadcast %cst_766 : f32 to vector<8x128xf32>
    %2803 = arith.maximumf %2801, %2802 : vector<8x128xf32>
    %2804 = vector.broadcast %2798 : f32 to vector<8x128xf32>
    %2805 = arith.mulf %2804, %2803 : vector<8x128xf32>
    %2806 = arith.addf %2795, %2805 : vector<8x128xf32>
    %2807 = vector.extract_strided_slice %0 {offsets = [0, 255], sizes = [8, 1], strides = [1, 1]} : vector<8x256xf32> to vector<8x1xf32>
    %c255 = arith.constant 255 : index
    %c0_767 = arith.constant 0 : index
    %2808 = vector.load %arg3[%c255, %c0_767] : memref<256x128xf32, #tpu.memory_space<vmem>>, vector<1x128xf32>
    %c255_768 = arith.constant 255 : index
    %2809 = memref.load %arg4[%c255_768] : memref<256xf32, #tpu.memory_space<smem>>
    %2810 = vector.broadcast %2807 : vector<8x1xf32> to vector<8x128xf32>
    %2811 = vector.broadcast %2808 : vector<1x128xf32> to vector<8x128xf32>
    %2812 = arith.addf %2810, %2811 : vector<8x128xf32>
    %cst_769 = arith.constant 0.000000e+00 : f32
    %2813 = vector.broadcast %cst_769 : f32 to vector<8x128xf32>
    %2814 = arith.maximumf %2812, %2813 : vector<8x128xf32>
    %2815 = vector.broadcast %2809 : f32 to vector<8x128xf32>
    %2816 = arith.mulf %2815, %2814 : vector<8x128xf32>
    %2817 = arith.addf %2806, %2816 : vector<8x128xf32>
    %c0_770 = arith.constant 0 : index
    %2818 = memref.load %arg5[%c0_770] : memref<1xf32, #tpu.memory_space<smem>>
    %2819 = vector.broadcast %2818 : f32 to vector<8x128xf32>
    %2820 = arith.addf %2817, %2819 : vector<8x128xf32>
    %2821 = arith.negf %2820 : vector<8x128xf32>
    %2822 = math.exp %2821 : vector<8x128xf32>
    %cst_771 = arith.constant 1.000000e+00 : f32
    %2823 = vector.broadcast %cst_771 : f32 to vector<8x128xf32>
    %2824 = arith.addf %2823, %2822 : vector<8x128xf32>
    %2825 = arith.divf %2823, %2824 : vector<8x128xf32>
    %c0_772 = arith.constant 0 : index
    %c0_773 = arith.constant 0 : index
    %2826 = vector.load %arg6[%c0_772, %c0_773] : memref<8x128xf32, #tpu.memory_space<vmem>>, vector<8x128xf32>
    tpu.vector_store %arg6[%c0_772, %c0_773], %2825 {strides = array<i32>} : memref<8x128xf32, #tpu.memory_space<vmem>>, vector<8x128xf32>,
    return
  }
  func.func @transform_0(%arg0: i32, %arg1: i32) -> (i32, i32) {
    %c0_i32 = arith.constant 0 : i32
    %c0_i32_0 = arith.constant 0 : i32
    return %arg0, %c0_i32 : i32, i32
  }
  func.func @transform_1(%arg0: i32, %arg1: i32) -> (i32, i32) {
    %c0_i32 = arith.constant 0 : i32
    %c0_i32_0 = arith.constant 0 : i32
    return %c0_i32, %arg1 : i32, i32
  }
  func.func @transform_2(%arg0: i32, %arg1: i32) -> i32 {
    %c0_i32 = arith.constant 0 : i32
    %c0_i32_0 = arith.constant 0 : i32
    return %c0_i32 : i32
  }
  func.func @transform_3(%arg0: i32, %arg1: i32) -> i32 {
    %c0_i32 = arith.constant 0 : i32
    %c0_i32_0 = arith.constant 0 : i32
    return %c0_i32 : i32
  }
  func.func @transform_4(%arg0: i32, %arg1: i32) -> (i32, i32) {
    %c0_i32 = arith.constant 0 : i32
    return %arg0, %arg1 : i32, i32
  }
}

</mosaic_0001>

<bundles_post_ra>
// kernel: tpu_custom_call.1
= control target key start
LH: loop header
LB: loop body
LE: loop exit
PB: predicated region body
PF: predicated region fallthrough
CT: control target
= control target key end

     0   :  { %s6811_s0 = inlined_call_operand.hbm [shape: f32[16,256], index: 0, kind: input, shape index: {}]   ;;  %s6812_s1 = inlined_call_operand.hbm [shape: f32[256,128], index: 1, kind: input, shape index: {}]   ;;  %s6813_s2 = inlined_call_operand.vmem [shape: f32[256], index: 2, kind: input, shape index: {}]   ;;  %s6814_s3 = inlined_call_operand.<no memory space> [shape: f32[1], index: 3, kind: input, shape index: {}]   ;;  %s6815_s4 = inlined_call_operand.hbm [shape: f32[16,128], index: 4, kind: output, shape index: {}]  }
   0x1   :  { %9 = sst [smem:[#allocation2]] %s6814_s3 }
   0x2   :  { %10 = vsyncpa [#allocation4], 0 }
   0x3   :  { %12 = vsyncpa [#allocation4 + $0x1], 0 }
   0x4   :  { %13 = vsyncpa [#allocation8], 0 }
   0x5   :  { %14 = vsyncpa [#allocation6], 0 }
   0x6   :  { %15 = vsyncpa [#allocation5], 0 }
   0x7   :  { %17 = vsyncpa [#allocation5 + $0x1], 0  ;;  %s5574_s17 = smov 0   ;;  %s5576_s18 = smov 0  }
   0x8   :  { %s5578_s19 = smov 0   ;;  %s5580_s20 = smov 0  }
   0x9   :  { %s5582_s21 = smov 0   ;;  %s5584_s22 = smov 0  }
   0xa LB: > { %s4237_s3 = sadd.s32 4294967295, %s5410_s22   ;;  %s4238_s23 = sadd.s32 4294967294, %s5410_s22   ;;  %s5410_s22 = sphi %s5584_s22, %s23_s22   ;;  %s5406_s21 = sphi %s5582_s21, %s6954_s21   ;;  %s5402_s20 = sphi %s5580_s20, %s6953_s20   ;;  %s5398_s19 = sphi %s5578_s19, %s6952_s19   ;;  %s5394_s18 = sphi %s5576_s18, %s6951_s18   ;;  %s5390_s17 = sphi %s5574_s17, %s6950_s17  }
   0xb   : > { %p55_p0 = scmp.ne.s32.totalorder %s5394_s18, %s5390_s17  ;;  %p5608_p1 = scmp.eq.s32.totalorder %s4237_s3, 0 }
   0xc   : > { %p5612_p2 = scmp.eq.s32.totalorder %s4237_s3, 1  ;;  %p155_p3 = scmp.eq.s32.totalorder %s4238_s23, 1 }
   0xd   : > { %s6878_s24 = scalar_select %p5608_p1, 1, 0 }
   0xe   : > { %s6879_s25 = scalar_select %p5612_p2, 1, 0 }
   0xf   : > { %p5618_p4 = por %p5608_p1, %p55_p0  ;;  %p4239_p5 = scmp.ge.s32.totalorder %s5410_s22, 1 }
  0x10   : > { %p5623_p6 = por %p155_p3, %p55_p0  ;;  %p162_p7 = scmp.lt.s32.totalorder %s5410_s22, 3 }
  0x11   : > { %s6880_s26 = scalar_select %p5618_p4, 1, 0 }
  0x12   : > { %s6881_s27 = scalar_select %p5623_p6, 1, 0 }
  0x13   : > { %p5628_p8 = pnand %p4239_p5, %p162_p7  ;;  %s5412_s29 = smov [#allocation7]  }
  0x14   : > { %s176_s30 = sshll.u32 %s5412_s29, 4  ;;  %s190_s7 = sshll.u32 %s6813_s2, 4  ;;  %s177_s30 = int_to_ptr.vmem [resolvable:$true] %s176_s30  ;;  %s5644_s7 = int_to_ptr.vmem [resolvable:$true] %s190_s7 }
  0x15   : > { %s6882_s28 = scalar_select %p5628_p8, 1, 0 }
  0x16   : > { %p4780_p9 = pneg %p5628_p8  ;;  %s5247_s11 = scalar_lea.hbm %s6812_s1, 4096 }
  0x17   : > { %p5248_p12 = scmp.ne.s32.totalorder %s6812_s1, %s5247_s11  ;;  %p5254_p5 = scmp.lt.u32.totalorder %s5247_s11, %s6812_s1 }
  0x18   : > { %p5640_p11 = pnand %p4780_p9, %p5608_p1 }
  0x1a   : > { %p5249_p13 = pneg %p5640_p11 }
  0x1c   : > { %p5250_p0 = pnand %p5249_p13, %p5248_p12 }
  0x1e   : > { %p5251_p3 = pneg %p5250_p0 }
  0x20   : > { %p5256_p7 = pnand %p5254_p5, %p5251_p3 }
  0x22   : > { %5259 = shalt.err (!%p5256_p7)
}
  0x23   : > { %s5260_s16 = scalar_lea.vmem %s177_s30, 4096  ;;  %p5268_p1 = scmp.lt.s32.totalorder %s177_s30, %s177_s30 }
  0x24   : > { %p5261_p9 = scmp.ne.s32.totalorder %s177_s30, %s5260_s16  ;;  %p5269_p4 = scmp.lt.s32.totalorder %s5260_s16, %s5260_s16 }
  0x26   : > { %p5263_p10 = pnand %p5261_p9, %p5249_p13  ;;  %p5270_p8 = por %p5269_p4, %p5268_p1 }
  0x28   : > { %p5264_p6 = pneg %p5263_p10 }
  0x2a   : > { %p5271_p2 = pnand %p5270_p8, %p5264_p6 }
  0x2c   : > { %5274 = shalt.err (!%p5271_p2)
}
  0x2d   : > { %s5413_s3 = smov 128   ;;  %s5414_s23 = smov 8  }
  0x2e   : > { %4783 = dma.hbm_to_vmem [thread:$0]  (!%p5640_p11), %s6812_s1, 4096, %s177_s30, [#allocation8], %s5413_s3, %s5413_s3, %s5414_s23  }
  0x2f   : > { %s5275_s6 = scalar_lea.vmem %s5644_s7, 32  ;;  %p5283_p2 = scmp.lt.s32.totalorder %s5644_s7, %s5644_s7 }
  0x30   : > { %p5276_p12 = scmp.ne.s32.totalorder %s5644_s7, %s5275_s6  ;;  %p5284_p4 = scmp.lt.s32.totalorder %s5275_s6, %s5275_s6 }
  0x32   : > { %p5278_p10 = pnand %p5276_p12, %p5249_p13  ;;  %p5285_p6 = por %p5284_p4, %p5283_p2 }
  0x34   : > { %p5279_p1 = pneg %p5278_p10 }
  0x36   : > { %p5286_p8 = pnand %p5285_p6, %p5279_p1 }
  0x38   : > { %5289 = shalt.err (!%p5286_p8)
}
  0x39   : > { %s5415_s9 = smov [#allocation9]   ;;  %s35_s30 = sadd.s32 1, %s5406_s21 }
  0x3a   : > { %4786 = dma.vmem_to_smem (!%p5640_p11), %s5644_s7, 32, %s5415_s9, [#allocation6]  }
  0x3b   : > { %s42_s10 = sadd.s32 1, %s5398_s19  ;;  %p37_p13 = scmp.ge.s32.totalorder %s35_s30, 2 }
  0x3c   : > { %p49_p0 = scmp.ne.s32.totalorder %s5398_s19, %s5394_s18  ;;  %p50_p3 = scmp.eq.s32.totalorder %s5410_s22, 0 }
  0x3d   : > { %p4797_p5 = scmp.lt.s32.totalorder %s5410_s22, 2  ;;  %s6956_s30 = smov (%p37_p13, %s35_s30), 0 }
  0x3e   : > { %p51_p7 = por %p50_p3, %p49_p0  ;;  %p6884_p9 = scmp.ne.s32.totalorder %s6879_s25, 0 }
  0x3f   : > { %s39_s11 = ssub.s32 %s5406_s21, %s6956_s30  ;;  %s204_s12 = sand.u32 1, %s5398_s19  }
  0x40   : > { %p5688_p12 = por %p6884_p9, %p49_p0  ;;  %p40_p10 = scmp.eq.s32.totalorder %s39_s11, 0 }
  0x41   : > { %s4243_s7 = sshll.u32 %s204_s12, 4  ;;  %s4767_s13 = sshll.u32 %s5406_s21, 8 }
  0x42   : > { %s5697_s14 = scalar_select %p40_p10, %s5398_s19, %s42_s10  }
  0x43   : > { %s5702_s3 = scalar_lea.hbm %s6811_s0, %s4767_s13  ;;  %s208_s25 = scalar_lea.vmem [#allocation3], %s4243_s7 }
  0x44   : > { %s216_s23 = sshll.u32 %s208_s25, 4  ;;  %p5706_p11 = pnand %p4797_p5, %p51_p7  ;;  %s5710_s23 = int_to_ptr.vmem [resolvable:$true] %s216_s23 }
  0x45   : > { %s205_s5 = scalar_lea.sflag [#allocation4], %s204_s12  ;;  %s5290_s6 = scalar_lea.hbm %s5702_s3, 256 }
  0x46   : > { %p5291_p1 = scmp.ne.s32.totalorder %s5702_s3, %s5290_s6  ;;  %p5292_p2 = pneg %p5706_p11 }
  0x47   : > { %s5295_s11 = scalar_lea.hbm %s6811_s0, 512  ;;  %p5296_p8 = scmp.lt.u32.totalorder %s5702_s3, %s6811_s0 }
  0x48   : > { %p5293_p4 = pnand %p5292_p2, %p5291_p1  ;;  %p5297_p13 = scmp.lt.u32.totalorder %s5295_s11, %s5290_s6 }
  0x49   : > { %p5299_p3 = scmp.lt.u32.totalorder %s5290_s6, %s5702_s3 }
  0x4a   : > { %p5294_p6 = pneg %p5293_p4  ;;  %p5298_p0 = por %p5297_p13, %p5296_p8 }
  0x4c   : > { %p5300_p5 = por %p5299_p3, %p5298_p0 }
  0x4e   : > { %p5301_p7 = pnand %p5300_p5, %p5294_p6 }
  0x50   : > { %5304 = shalt.err (!%p5301_p7)
}
  0x51   : > { %s5305_s12 = scalar_lea.vmem %s5710_s23, 256  ;;  %s5416_s15 = smov [#allocation3]  }
  0x52   : > { %p5306_p9 = scmp.ne.s32.totalorder %s5710_s23, %s5305_s12  ;;  %s5310_s16 = sshll.u32 %s5416_s15, 4  ;;  %s5311_s16 = int_to_ptr.vmem [resolvable:$false] %s5310_s16 }
  0x53   : > { %s5312_s25 = scalar_lea.vmem %s5311_s16, 512  ;;  %p5313_p4 = scmp.lt.s32.totalorder %s5710_s23, %s5311_s16 }
  0x54   : > { %p5308_p10 = pnand %p5306_p9, %p5292_p2  ;;  %p5314_p8 = scmp.lt.s32.totalorder %s5312_s25, %s5305_s12 }
  0x56   : > { %p5309_p1 = pneg %p5308_p10  ;;  %p5315_p13 = por %p5314_p8, %p5313_p4 }
  0x58   : > { %p5316_p0 = pnand %p5315_p13, %p5309_p1 }
  0x5a   : > { %5319 = shalt.err (!%p5316_p0)
}
  0x5b   : > { %4790 = dma.hbm_to_vmem [thread:$0]  (!%p5706_p11), %s5702_s3, 256, %s5710_s23, %s205_s5  }
  0x5c   : > { %p6887_p6 = scmp.ne.s32.totalorder %s6882_s28, 0 }
  0x5d   : > { %s5740_s6 = sand.u32 (!%p6887_p6), 1, %s5394_s18   ;;  %p6888_p2 = scmp.ne.s32.totalorder (!%p6887_p6), %s6880_s26, 0 }
  0x5e   : > { %225 = sbr.rel (%p6887_p6) target bundleno = 1134 (0x46e), region = 36  ;;  %s4247_s9 = sshll.u32 (!%p6887_p6), %s5740_s6, 4 }
  0x5f   : > { %s228_s10 = scalar_lea.sflag (!%p6887_p6), [#allocation4], %s5740_s6  ;;  %s5744_s11 = scalar_lea.vmem (!%p6887_p6), [#allocation3], %s4247_s9 }
  0x65   : > { %5373 = dma.done.wait (%p6888_p2), %s228_s10, 256  }
  0x66   : > { %5375 = vsyncadd (%p6888_p2), %s228_s10, 4294967040  ;;  %p6889_p11 = scmp.ne.s32.totalorder %s6878_s24, 0 }
  0x68   : > { %5377 = dma.done.wait (%p6889_p11), [#allocation8], 4096  }
  0x69   : > { %5379 = vsyncadd (%p6889_p11), [#allocation8], 4294963200 }
  0x6a   : > { %5381 = dma.done.wait (%p6889_p11), [#allocation6], 32  }
  0x6b   : > { %5383 = vsyncadd (%p6889_p11), [#allocation6], 4294967264 }
  0x6c   : > { %244 = sfence }
  0x6d   : > { %v5759_v0 = vld [vmem:[%s5744_s11] sm:$0xff]  ;;  %v5417_v1 = vmov 2   ;;  %v5418_v2 = vmov 0   ;;  %v5419_v3 = vmov 3   ;;  %v5420_v4 = vmov 1   ;;  %s5862_s24 = sld [smem:[#allocation9]] }
  0x6e   : > { %4983 = vset.pattern.permute.xlu1 %v5417_v1  ;;  %4981 = vset.pattern.permute.xlu0 %v5418_v2  ;;  %v5421_v5 = vmov 4   ;;  %v5422_v6 = vmov 5   ;;  %v5423_v7 = vmov 6   ;;  %v5424_v8 = vmov 8   ;;  %v4251_v53 = vld [vmem:[#allocation7] ss:$0 sm:$0xff] }
  0x6f   : > { %301 = vperm.xlu1 %4983, %v5759_v0   ;;  %271 = vperm.xlu0 %4981, %v5759_v0   ;;  %v5425_v9 = vmov 7   ;;  %v5426_v10 = vmov 11   ;;  %v5427_v11 = vmov 9   ;;  %v5428_v12 = vmov 14   ;;  %s5867_s26 = sld [smem:[#allocation9 + $0x1]]  ;;  %s5869_s28 = sld [smem:[#allocation9 + $0x2]] }
  0x70   : > { %v5429_v13 = vmov 10   ;;  %v5430_v14 = vmov 17   ;;  %v5431_v15 = vmov 12   ;;  %v5432_v16 = vmov 20   ;;  %v4255_v56 = vld [vmem:[#allocation7 + $0x2] ss:$0 sm:$0xff] }
  0x71   : > { %v5433_v17 = vmov 13   ;;  %v6871_v18 = vmov 23   ;;  %v5435_v19 = vmov 15   ;;  %v6865_v20 = vmov 26   ;;  %v4257_v60 = vld [vmem:[#allocation7 + $0x3] ss:$0 sm:$0xff] }
  0x72   : > { %v5437_v21 = vmov 16   ;;  %v6861_v22 = vmov 29   ;;  %v5439_v23 = vmov 18   ;;  %v6853_v24 = vmov 32   ;;  %s5874_s3 = sld [smem:[#allocation9 + $0x3]]  ;;  %s5877_s23 = sld [smem:[#allocation9 + $0x4]] }
  0x73   : > { %4984 = vset.pattern.permute.xlu1 %v5419_v3  ;;  %4982 = vset.pattern.permute.xlu0 %v5420_v4  ;;  %v5441_v25 = vmov 19   ;;  %v6847_v26 = vmov 35   ;;  %v5443_v27 = vmov 21   ;;  %v6835_v28 = vmov 38   ;;  %v4253_v61 = vld [vmem:[#allocation7 + $0x1] ss:$0 sm:$0xff] }
  0x74   : > { %316 = vperm.xlu1 %4984, %v5759_v0   ;;  %286 = vperm.xlu0 %4982, %v5759_v0   ;;  %v6874_v29 = vmov 22   ;;  %v6833_v30 = vmov 41   ;;  %v5447_v31 = vmov 24   ;;  %v6832_v32 = vmov 44   ;;  %s5880_s29 = sld [smem:[#allocation9 + $0x5]]  ;;  %s5888_s5 = sld [smem:[#allocation9 + $0x6]] }
  0x75   : > { %v6868_v33 = vmov 25   ;;  %v6831_v34 = vmov 47   ;;  %v5451_v35 = vmov 27   ;;  %v6829_v36 = vmov 50   ;;  %s5895_s7 = sld [smem:[#allocation9 + $0x7]]  ;;  %s5897_s13 = sld [smem:[#allocation9 + $0x8]] }
  0x76   : > { %v6862_v37 = vmov 28   ;;  %v6828_v38 = vmov 53   ;;  %v5455_v39 = vmov 30   ;;  %v6827_v40 = vmov 56   ;;  %s5904_s12 = sld [smem:[#allocation9 + $0x9]]  ;;  %s5910_s15 = sld [smem:[#allocation9 + $0xa]] }
  0x77   : > { %v6856_v41 = vmov 31   ;;  %v6826_v42 = vmov 59   ;;  %v5459_v43 = vmov 33   ;;  %v6825_v44 = vmov 62   ;;  %s5912_s16 = sld [smem:[#allocation9 + $0xb]]  ;;  %s5919_s25 = sld [smem:[#allocation9 + $0xc]] }
  0x78   : > { %4985 = vset.pattern.permute.xlu1 %v5421_v5  ;;  %4986 = vset.pattern.permute.xlu0 %v5422_v6  ;;  %v6850_v45 = vmov 34   ;;  %v6824_v46 = vmov 65   ;;  %v5463_v47 = vmov 36   ;;  %v6822_v48 = vmov 68   ;;  %s5925_s9 = sld [smem:[#allocation9 + $0xd]]  ;;  %s5927_s10 = sld [smem:[#allocation9 + $0xe]] }
  0x79   : > { %331 = vperm.xlu1 %4985, %v5759_v0   ;;  %346 = vperm.xlu0 %4986, %v5759_v0   ;;  %v6844_v49 = vmov 37   ;;  %v6821_v50 = vmov 71   ;;  %v5467_v51 = vmov 39   ;;  %v6820_v52 = vmov 74  }
  0x7a   : > { %v6834_v58 = vmov 40   ;;  %v6823_v59 = vmov 77  }
  0x7d   : > { %4987 = vset.pattern.permute.xlu1 %v5423_v7  ;;  %4989 = vset.pattern.permute.xlu0 %v5424_v8 }
  0x7e   : > { %361 = vperm.xlu1 %4987, %v5759_v0   ;;  %391 = vperm.xlu0 %4989, %v5759_v0  }
  0x82   : > { %4988 = vset.pattern.permute.xlu1 %v5425_v9  ;;  %4992 = vset.pattern.permute.xlu0 %v5426_v10 }
  0x83   : > { %376 = vperm.xlu1 %4988, %v5759_v0   ;;  %436 = vperm.xlu0 %4992, %v5759_v0  }
  0x87   : > { %4990 = vset.pattern.permute.xlu1 %v5427_v11  ;;  %4995 = vset.pattern.permute.xlu0 %v5428_v12 }
  0x88   : > { %406 = vperm.xlu1 %4990, %v5759_v0   ;;  %481 = vperm.xlu0 %4995, %v5759_v0  }
  0x8c   : > { %4991 = vset.pattern.permute.xlu1 %v5429_v13  ;;  %4998 = vset.pattern.permute.xlu0 %v5430_v14 }
  0x8d   : > { %421 = vperm.xlu1 %4991, %v5759_v0   ;;  %526 = vperm.xlu0 %4998, %v5759_v0  }
  0x91   : > { %4993 = vset.pattern.permute.xlu1 %v5431_v15  ;;  %5001 = vset.pattern.permute.xlu0 %v5432_v16 }
  0x92   : > { %451 = vperm.xlu1 %4993, %v5759_v0   ;;  %571 = vperm.xlu0 %5001, %v5759_v0  }
  0x96   : > { %4994 = vset.pattern.permute.xlu1 %v5433_v17  ;;  %5004 = vset.pattern.permute.xlu0 %v6871_v18 }
  0x97   : > { %466 = vperm.xlu1 %4994, %v5759_v0   ;;  %616 = vperm.xlu0 %5004, %v5759_v0  }
  0x9b   : > { %4996 = vset.pattern.permute.xlu1 %v5435_v19  ;;  %5007 = vset.pattern.permute.xlu0 %v6865_v20 }
  0x9c   : > { %496 = vperm.xlu1 %4996, %v5759_v0   ;;  %661 = vperm.xlu0 %5007, %v5759_v0  }
  0xa0   : > { %4997 = vset.pattern.permute.xlu1 %v5437_v21  ;;  %5010 = vset.pattern.permute.xlu0 %v6861_v22 }
  0xa1   : > { %511 = vperm.xlu1 %4997, %v5759_v0   ;;  %706 = vperm.xlu0 %5010, %v5759_v0  }
  0xa5   : > { %4999 = vset.pattern.permute.xlu1 %v5439_v23  ;;  %5013 = vset.pattern.permute.xlu0 %v6853_v24 }
  0xa6   : > { %541 = vperm.xlu1 %4999, %v5759_v0   ;;  %751 = vperm.xlu0 %5013, %v5759_v0  }
  0xaa   : > { %5000 = vset.pattern.permute.xlu1 %v5441_v25  ;;  %5016 = vset.pattern.permute.xlu0 %v6847_v26 }
  0xab   : > { %556 = vperm.xlu1 %5000, %v5759_v0   ;;  %796 = vperm.xlu0 %5016, %v5759_v0  }
  0xaf   : > { %5002 = vset.pattern.permute.xlu1 %v5443_v27  ;;  %5019 = vset.pattern.permute.xlu0 %v6835_v28 }
  0xb0   : > { %586 = vperm.xlu1 %5002, %v5759_v0   ;;  %841 = vperm.xlu0 %5019, %v5759_v0  }
  0xb4   : > { %5003 = vset.pattern.permute.xlu1 %v6874_v29  ;;  %5022 = vset.pattern.permute.xlu0 %v6833_v30 }
  0xb5   : > { %601 = vperm.xlu1 %5003, %v5759_v0   ;;  %886 = vperm.xlu0 %5022, %v5759_v0  }
  0xb9   : > { %5005 = vset.pattern.permute.xlu1 %v5447_v31  ;;  %5025 = vset.pattern.permute.xlu0 %v6832_v32 }
  0xba   : > { %631 = vperm.xlu1 %5005, %v5759_v0   ;;  %931 = vperm.xlu0 %5025, %v5759_v0  }
  0xbe   : > { %5006 = vset.pattern.permute.xlu1 %v6868_v33  ;;  %5028 = vset.pattern.permute.xlu0 %v6831_v34  ;;  %v6841_v34 = vmov 43  }
  0xbf   : > { %646 = vperm.xlu1 %5006, %v5759_v0   ;;  %976 = vperm.xlu0 %5028, %v5759_v0  }
  0xc3   : > { %5008 = vset.pattern.permute.xlu1 %v5451_v35  ;;  %5031 = vset.pattern.permute.xlu0 %v6829_v36  ;;  %v325_v36 = vstv %s5874_s3  ;;  %s5949_s3 = sld [smem:[#allocation9 + $0x12]] }
  0xc4   : > { %676 = vperm.xlu1 %5008, %v5759_v0   ;;  %1021 = vperm.xlu0 %5031, %v5759_v0  }
  0xc8   : > { %5009 = vset.pattern.permute.xlu1 %v6862_v37  ;;  %5034 = vset.pattern.permute.xlu0 %v6828_v38 }
  0xc9   : > { %691 = vperm.xlu1 %5009, %v5759_v0   ;;  %1066 = vperm.xlu0 %5034, %v5759_v0  }
  0xcd   : > { %5011 = vset.pattern.permute.xlu1 %v5455_v39  ;;  %5037 = vset.pattern.permute.xlu0 %v6827_v40  ;;  %v4261_v40 = vld [vmem:[#allocation7 + $0x5] ss:$0 sm:$0xff] }
  0xce   : > { %721 = vperm.xlu1 %5011, %v5759_v0   ;;  %1111 = vperm.xlu0 %5037, %v5759_v0  }
  0xd2   : > { %5012 = vset.pattern.permute.xlu1 %v6856_v41  ;;  %5040 = vset.pattern.permute.xlu0 %v6826_v42  ;;  %v4259_v42 = vld [vmem:[#allocation7 + $0x4] ss:$0 sm:$0xff] }
  0xd3   : > { %736 = vperm.xlu1 %5012, %v5759_v0   ;;  %1156 = vperm.xlu0 %5040, %v5759_v0  }
  0xd7   : > { %5014 = vset.pattern.permute.xlu1 %v5459_v43  ;;  %5043 = vset.pattern.permute.xlu0 %v6825_v44  ;;  %v6830_v44 = vmov 80  }
  0xd8   : > { %766 = vperm.xlu1 %5014, %v5759_v0   ;;  %1201 = vperm.xlu0 %5043, %v5759_v0  }
  0xdc   : > { %5015 = vset.pattern.permute.xlu1 %v6850_v45  ;;  %5046 = vset.pattern.permute.xlu0 %v6824_v46  ;;  %v5471_v46 = vmov 42  }
  0xdd   : > { %781 = vperm.xlu1 %5015, %v5759_v0   ;;  %1246 = vperm.xlu0 %5046, %v5759_v0  }
  0xe1   : > { %5017 = vset.pattern.permute.xlu1 %v5463_v47  ;;  %5049 = vset.pattern.permute.xlu0 %v6822_v48 }
  0xe2   : > { %811 = vperm.xlu1 %5017, %v5759_v0   ;;  %1291 = vperm.xlu0 %5049, %v5759_v0  }
  0xe6   : > { %5018 = vset.pattern.permute.xlu1 %v6844_v49  ;;  %5052 = vset.pattern.permute.xlu0 %v6821_v50 }
  0xe7   : > { %826 = vperm.xlu1 %5018, %v5759_v0   ;;  %1336 = vperm.xlu0 %5052, %v5759_v0  }
  0xeb   : > { %5020 = vset.pattern.permute.xlu1 %v5467_v51  ;;  %5055 = vset.pattern.permute.xlu0 %v6820_v52 }
  0xec   : > { %856 = vperm.xlu1 %5020, %v5759_v0   ;;  %1381 = vperm.xlu0 %5055, %v5759_v0  }
  0xee   : > { %v302_v54 = vpop.permute.xlu1 %301  ;;  %v272_v55 = vpop.permute.xlu0 %271 }
  0xef   : > { %v278_v57 = vadd.f32 %v4251_v53, %v272_v55  ;;  %v308_v62 = vadd.f32 %v4255_v56, %v302_v54  ;;  %v280_v53 = vstv %s5862_s24  ;;  %s5934_s24 = sld [smem:[#allocation9 + $0xf]] }
  0xf0   : > { %5021 = vset.pattern.permute.xlu1 %v6834_v58  ;;  %5058 = vset.pattern.permute.xlu0 %v6823_v59  ;;  %v295_v59 = vstv %s5867_s26  ;;  %v355_v58 = vstv %s5880_s29  ;;  %s5940_s26 = sld [smem:[#allocation9 + $0x10]]  ;;  %s5957_s29 = sld [smem:[#allocation9 + $0x14]] }
  0xf1   : > { %871 = vperm.xlu1 %5021, %v5759_v0   ;;  %1426 = vperm.xlu0 %5058, %v5759_v0   ;;  %v279_v63 = vmax.f32 %v278_v57, 0.0  ;;  %v309_v54 = vmax.f32 %v308_v62, 0.0 }
  0xf3   : > { %v317_v55 = vpop.permute.xlu1 %316  ;;  %v287_v52 = vpop.permute.xlu0 %286  ;;  %v281_v56 = vmul.f32 %v280_v53, %v279_v63  ;;  %v340_v53 = vstv %s5877_s23  ;;  %s5955_s23 = sld [smem:[#allocation9 + $0x13]] }
  0xf4   : > { %v323_v50 = vadd.f32 %v4257_v60, %v317_v55  ;;  %v293_v48 = vadd.f32 %v4253_v61, %v287_v52  ;;  %v310_v52 = vstv %s5869_s28  ;;  %s5942_s28 = sld [smem:[#allocation9 + $0x11]] }
  0xf5   : > { %5023 = vset.pattern.permute.xlu1 %v5471_v46  ;;  %5061 = vset.pattern.permute.xlu0 %v6830_v44  ;;  %v311_v63 = vmul.f32 %v310_v52, %v309_v54  ;;  %v4267_v54 = vld [vmem:[#allocation7 + $0x8] ss:$0 sm:$0xff]  ;;  %v6837_v52 = vmov 83  }
  0xf6   : > { %v294_v57 = vmax.f32 %v293_v48, 0.0  ;;  %901 = vperm.xlu1 %5023, %v5759_v0   ;;  %1471 = vperm.xlu0 %5061, %v5759_v0   ;;  %v324_v60 = vmax.f32 %v323_v50, 0.0  ;;  %v4263_v50 = vld [vmem:[#allocation7 + $0x6] ss:$0 sm:$0xff] }
  0xf8   : > { %v296_v61 = vmul.f32 %v295_v59, %v294_v57  ;;  %v332_v55 = vpop.permute.xlu1 %331  ;;  %v347_v38 = vpop.permute.xlu0 %346  ;;  %v326_v59 = vmul.f32 %v325_v36, %v324_v60  ;;  %v370_v60 = vstv %s5888_s5  ;;  %s5964_s5 = sld [smem:[#allocation9 + $0x15]] }
  0xf9   : > { %v338_v44 = vadd.f32 %v4259_v42, %v332_v55  ;;  %v353_v62 = vadd.f32 %v4261_v40, %v347_v38  ;;  %v4265_v55 = vld [vmem:[#allocation7 + $0x7] ss:$0 sm:$0xff] }
  0xfa   : > { %v297_v48 = vadd.f32 %v296_v61, %v281_v56  ;;  %5024 = vset.pattern.permute.xlu1 %v6841_v34  ;;  %5064 = vset.pattern.permute.xlu0 %v6837_v52  ;;  %v5475_v61 = vmov 45  }
  0xfb   : > { %v339_v32 = vmax.f32 %v338_v44, 0.0  ;;  %916 = vperm.xlu1 %5024, %v5759_v0   ;;  %v354_v30 = vmax.f32 %v353_v62, 0.0  ;;  %1516 = vperm.xlu0 %5064, %v5759_v0  }
  0xfc   : > { %v312_v57 = vadd.f32 %v311_v63, %v297_v48 }
  0xfd   : > { %v341_v28 = vmul.f32 %v340_v53, %v339_v32  ;;  %v362_v42 = vpop.permute.xlu1 %361  ;;  %v392_v56 = vpop.permute.xlu0 %391  ;;  %v356_v44 = vmul.f32 %v355_v58, %v354_v30  ;;  %v385_v30 = vstv %s5895_s7  ;;  %v6838_v58 = vmov 46   ;;  %s5970_s7 = sld [smem:[#allocation9 + $0x16]] }
  0xfe   : > { %v327_v38 = vadd.f32 %v326_v59, %v312_v57  ;;  %v368_v40 = vadd.f32 %v4263_v50, %v362_v42  ;;  %v398_v62 = vadd.f32 %v4267_v54, %v392_v56  ;;  %v400_v42 = vstv %s5897_s13  ;;  %s5972_s13 = sld [smem:[#allocation9 + $0x17]] }
  0xff   : > { %5026 = vset.pattern.permute.xlu1 %v5475_v61 }
 0x100   : > { %v342_v36 = vadd.f32 %v341_v28, %v327_v38  ;;  %v369_v32 = vmax.f32 %v368_v40, 0.0  ;;  %946 = vperm.xlu1 %5026, %v5759_v0   ;;  %v399_v57 = vmax.f32 %v398_v62, 0.0  ;;  %v4269_v28 = vld [vmem:[#allocation7 + $0x9] ss:$0 sm:$0xff]  ;;  %v5478_v62 = vmov 48  }
 0x102   : > { %v377_v63 = vpop.permute.xlu1 %376  ;;  %v357_v48 = vadd.f32 %v356_v44, %v342_v36  ;;  %v371_v53 = vmul.f32 %v370_v60, %v369_v32  ;;  %v4273_v44 = vld [vmem:[#allocation7 + $0xb] ss:$0 sm:$0xff]  ;;  %v437_v36 = vpop.permute.xlu0 %436  ;;  %v6836_v60 = vmov 86  }
 0x103   : > { %v383_v50 = vadd.f32 %v4265_v55, %v377_v63  ;;  %5067 = vset.pattern.permute.xlu0 %v6836_v60  ;;  %v401_v55 = vmul.f32 %v400_v42, %v399_v57  ;;  %v415_v63 = vstv %s5904_s12  ;;  %v6840_v57 = vmov 49   ;;  %s5979_s12 = sld [smem:[#allocation9 + $0x18]] }
 0x104   : > { %5027 = vset.pattern.permute.xlu1 %v6838_v58  ;;  %v372_v38 = vadd.f32 %v371_v53, %v357_v48  ;;  %1561 = vperm.xlu0 %5067, %v5759_v0   ;;  %v4271_v53 = vld [vmem:[#allocation7 + $0xa] ss:$0 sm:$0xff]  ;;  %v445_v60 = vstv %s5912_s16  ;;  %s5987_s16 = sld [smem:[#allocation9 + $0x1a]] }
 0x105   : > { %v384_v59 = vmax.f32 %v383_v50, 0.0  ;;  %961 = vperm.xlu1 %5027, %v5759_v0   ;;  %v443_v50 = vadd.f32 %v4273_v44, %v437_v36 }
 0x107   : > { %v386_v40 = vmul.f32 %v385_v30, %v384_v59  ;;  %v407_v54 = vpop.permute.xlu1 %406 }
 0x108   : > { %v413_v56 = vadd.f32 %v4269_v28, %v407_v54 }
 0x109   : > { %v387_v32 = vadd.f32 %v386_v40, %v372_v38  ;;  %5029 = vset.pattern.permute.xlu1 %v5478_v62  ;;  %v430_v38 = vstv %s5910_s15  ;;  %v444_v40 = vmax.f32 %v443_v50, 0.0  ;;  %v5481_v50 = vmov 51   ;;  %s5985_s15 = sld [smem:[#allocation9 + $0x19]] }
 0x10a   : > { %v414_v48 = vmax.f32 %v413_v56, 0.0  ;;  %991 = vperm.xlu1 %5029, %v5759_v0   ;;  %v4275_v56 = vld [vmem:[#allocation7 + $0xc] ss:$0 sm:$0xff] }
 0x10b   : > { %v402_v59 = vadd.f32 %v401_v55, %v387_v32  ;;  %v4279_v32 = vld [vmem:[#allocation7 + $0xe] ss:$0 sm:$0xff]  ;;  %v482_v55 = vpop.permute.xlu0 %481 }
 0x10c   : > { %v422_v30 = vpop.permute.xlu1 %421  ;;  %v416_v28 = vmul.f32 %v415_v63, %v414_v48  ;;  %v6839_v63 = vmov 89  }
 0x10d   : > { %v428_v54 = vadd.f32 %v4271_v53, %v422_v30  ;;  %5070 = vset.pattern.permute.xlu0 %v6839_v63  ;;  %v446_v53 = vmul.f32 %v445_v60, %v444_v40  ;;  %v460_v30 = vstv %s5919_s25  ;;  %v6843_v60 = vmov 52   ;;  %s5994_s25 = sld [smem:[#allocation9 + $0x1b]] }
 0x10e   : > { %5030 = vset.pattern.permute.xlu1 %v6840_v57  ;;  %v417_v44 = vadd.f32 %v416_v28, %v402_v59  ;;  %1606 = vperm.xlu0 %5070, %v5759_v0   ;;  %v488_v28 = vadd.f32 %v4279_v32, %v482_v55  ;;  %v490_v63 = vstv %s5927_s10  ;;  %s6002_s10 = sld [smem:[#allocation9 + $0x1d]] }
 0x10f   : > { %v429_v42 = vmax.f32 %v428_v54, 0.0  ;;  %1006 = vperm.xlu1 %5030, %v5759_v0  }
 0x111   : > { %v431_v36 = vmul.f32 %v430_v38, %v429_v42  ;;  %v452_v52 = vpop.permute.xlu1 %451 }
 0x112   : > { %v458_v58 = vadd.f32 %v4275_v56, %v452_v52  ;;  %v4277_v52 = vld [vmem:[#allocation7 + $0xd] ss:$0 sm:$0xff] }
 0x113   : > { %v432_v48 = vadd.f32 %v431_v36, %v417_v44  ;;  %5032 = vset.pattern.permute.xlu1 %v5481_v50  ;;  %v475_v44 = vstv %s5925_s9  ;;  %v489_v36 = vmax.f32 %v488_v28, 0.0  ;;  %v5484_v28 = vmov 54   ;;  %s6000_s9 = sld [smem:[#allocation9 + $0x1c]] }
 0x114   : > { %v459_v59 = vmax.f32 %v458_v58, 0.0  ;;  %1036 = vperm.xlu1 %5032, %v5759_v0   ;;  %v4281_v58 = vld [vmem:[#allocation7 + $0xf] ss:$0 sm:$0xff] }
 0x115   : > { %v447_v38 = vadd.f32 %v446_v53, %v432_v48  ;;  %v4285_v48 = vld [vmem:[#allocation7 + $0x11] ss:$0 sm:$0xff]  ;;  %v527_v53 = vpop.permute.xlu0 %526 }
 0x116   : > { %v467_v54 = vpop.permute.xlu1 %466  ;;  %v461_v42 = vmul.f32 %v460_v30, %v459_v59  ;;  %v6842_v30 = vmov 92  }
 0x117   : > { %v473_v56 = vadd.f32 %v4277_v52, %v467_v54  ;;  %5073 = vset.pattern.permute.xlu0 %v6842_v30  ;;  %v491_v52 = vmul.f32 %v490_v63, %v489_v36  ;;  %v505_v54 = vstv %s5934_s24  ;;  %v6846_v63 = vmov 55   ;;  %s6009_s24 = sld [smem:[#allocation9 + $0x1e]] }
 0x118   : > { %5033 = vset.pattern.permute.xlu1 %v6843_v60  ;;  %v462_v32 = vadd.f32 %v461_v42, %v447_v38  ;;  %1651 = vperm.xlu0 %5073, %v5759_v0   ;;  %v533_v42 = vadd.f32 %v4285_v48, %v527_v53  ;;  %v535_v30 = vstv %s5942_s28  ;;  %s6017_s28 = sld [smem:[#allocation9 + $0x20]] }
 0x119   : > { %v474_v40 = vmax.f32 %v473_v56, 0.0  ;;  %1051 = vperm.xlu1 %5033, %v5759_v0  }
 0x11b   : > { %v476_v55 = vmul.f32 %v475_v44, %v474_v40  ;;  %v497_v57 = vpop.permute.xlu1 %496 }
 0x11c   : > { %v503_v34 = vadd.f32 %v4281_v58, %v497_v57  ;;  %v4283_v57 = vld [vmem:[#allocation7 + $0x10] ss:$0 sm:$0xff] }
 0x11d   : > { %v477_v59 = vadd.f32 %v476_v55, %v462_v32  ;;  %5035 = vset.pattern.permute.xlu1 %v5484_v28  ;;  %v520_v32 = vstv %s5940_s26  ;;  %v534_v55 = vmax.f32 %v533_v42, 0.0  ;;  %v5487_v42 = vmov 57   ;;  %s6015_s26 = sld [smem:[#allocation9 + $0x1f]] }
 0x11e   : > { %v504_v38 = vmax.f32 %v503_v34, 0.0  ;;  %1081 = vperm.xlu1 %5035, %v5759_v0   ;;  %v4287_v34 = vld [vmem:[#allocation7 + $0x12] ss:$0 sm:$0xff] }
 0x11f   : > { %v492_v44 = vadd.f32 %v491_v52, %v477_v59  ;;  %v4291_v59 = vld [vmem:[#allocation7 + $0x14] ss:$0 sm:$0xff]  ;;  %v572_v52 = vpop.permute.xlu0 %571 }
 0x120   : > { %v512_v56 = vpop.permute.xlu1 %511  ;;  %v506_v40 = vmul.f32 %v505_v54, %v504_v38  ;;  %v6845_v54 = vmov 95  }
 0x121   : > { %v518_v58 = vadd.f32 %v4283_v57, %v512_v56  ;;  %5076 = vset.pattern.permute.xlu0 %v6845_v54  ;;  %v536_v57 = vmul.f32 %v535_v30, %v534_v55  ;;  %v550_v56 = vstv %s5949_s3  ;;  %v6849_v30 = vmov 58   ;;  %s6024_s3 = sld [smem:[#allocation9 + $0x21]] }
 0x122   : > { %5036 = vset.pattern.permute.xlu1 %v6846_v63  ;;  %v507_v48 = vadd.f32 %v506_v40, %v492_v44  ;;  %1696 = vperm.xlu0 %5076, %v5759_v0   ;;  %v578_v40 = vadd.f32 %v4291_v59, %v572_v52  ;;  %v580_v54 = vstv %s5957_s29  ;;  %s6032_s29 = sld [smem:[#allocation9 + $0x23]] }
 0x123   : > { %v519_v36 = vmax.f32 %v518_v58, 0.0  ;;  %1096 = vperm.xlu1 %5036, %v5759_v0  }
 0x125   : > { %v521_v53 = vmul.f32 %v520_v32, %v519_v36  ;;  %v542_v60 = vpop.permute.xlu1 %541 }
 0x126   : > { %v548_v49 = vadd.f32 %v4287_v34, %v542_v60  ;;  %v4289_v60 = vld [vmem:[#allocation7 + $0x13] ss:$0 sm:$0xff] }
 0x127   : > { %v522_v38 = vadd.f32 %v521_v53, %v507_v48  ;;  %5038 = vset.pattern.permute.xlu1 %v5487_v42  ;;  %v565_v48 = vstv %s5955_s23  ;;  %v579_v53 = vmax.f32 %v578_v40, 0.0  ;;  %v5490_v40 = vmov 60   ;;  %s6030_s23 = sld [smem:[#allocation9 + $0x22]] }
 0x128   : > { %v549_v44 = vmax.f32 %v548_v49, 0.0  ;;  %1126 = vperm.xlu1 %5038, %v5759_v0   ;;  %v4293_v49 = vld [vmem:[#allocation7 + $0x15] ss:$0 sm:$0xff] }
 0x129   : > { %v537_v32 = vadd.f32 %v536_v57, %v522_v38  ;;  %v4297_v38 = vld [vmem:[#allocation7 + $0x17] ss:$0 sm:$0xff]  ;;  %v617_v57 = vpop.permute.xlu0 %616 }
 0x12a   : > { %v557_v58 = vpop.permute.xlu1 %556  ;;  %v551_v36 = vmul.f32 %v550_v56, %v549_v44  ;;  %v6848_v56 = vmov 98  }
 0x12b   : > { %v563_v34 = vadd.f32 %v4289_v60, %v557_v58  ;;  %5079 = vset.pattern.permute.xlu0 %v6848_v56  ;;  %v581_v60 = vmul.f32 %v580_v54, %v579_v53  ;;  %v595_v58 = vstv %s5964_s5  ;;  %v6852_v54 = vmov 61   ;;  %s6042_s5 = sld [smem:[#allocation9 + $0x24]] }
 0x12c   : > { %5039 = vset.pattern.permute.xlu1 %v6849_v30  ;;  %v552_v59 = vadd.f32 %v551_v36, %v537_v32  ;;  %1741 = vperm.xlu0 %5079, %v5759_v0   ;;  %v623_v36 = vadd.f32 %v4297_v38, %v617_v57  ;;  %v625_v56 = vstv %s5972_s13  ;;  %s6050_s13 = sld [smem:[#allocation9 + $0x26]] }
 0x12d   : > { %v564_v55 = vmax.f32 %v563_v34, 0.0  ;;  %1141 = vperm.xlu1 %5039, %v5759_v0  }
 0x12f   : > { %v566_v52 = vmul.f32 %v565_v48, %v564_v55  ;;  %v587_v63 = vpop.permute.xlu1 %586 }
 0x130   : > { %v593_v26 = vadd.f32 %v4293_v49, %v587_v63  ;;  %v4295_v63 = vld [vmem:[#allocation7 + $0x16] ss:$0 sm:$0xff] }
 0x131   : > { %v567_v44 = vadd.f32 %v566_v52, %v552_v59  ;;  %5041 = vset.pattern.permute.xlu1 %v5490_v40  ;;  %v610_v59 = vstv %s5970_s7  ;;  %v624_v52 = vmax.f32 %v623_v36, 0.0  ;;  %v5493_v36 = vmov 63   ;;  %s6048_s7 = sld [smem:[#allocation9 + $0x25]] }
 0x132   : > { %v594_v32 = vmax.f32 %v593_v26, 0.0  ;;  %1171 = vperm.xlu1 %5041, %v5759_v0   ;;  %v4299_v26 = vld [vmem:[#allocation7 + $0x18] ss:$0 sm:$0xff] }
 0x133   : > { %v582_v48 = vadd.f32 %v581_v60, %v567_v44  ;;  %v4303_v44 = vld [vmem:[#allocation7 + $0x1a] ss:$0 sm:$0xff]  ;;  %v662_v60 = vpop.permute.xlu0 %661 }
 0x134   : > { %v602_v34 = vpop.permute.xlu1 %601  ;;  %v596_v55 = vmul.f32 %v595_v58, %v594_v32  ;;  %v6851_v58 = vmov 101  }
 0x135   : > { %v608_v49 = vadd.f32 %v4295_v63, %v602_v34  ;;  %5082 = vset.pattern.permute.xlu0 %v6851_v58  ;;  %v626_v63 = vmul.f32 %v625_v56, %v624_v52  ;;  %v640_v34 = vstv %s5979_s12  ;;  %v6855_v56 = vmov 64   ;;  %s6057_s12 = sld [smem:[#allocation9 + $0x27]] }
 0x136   : > { %5042 = vset.pattern.permute.xlu1 %v6852_v54  ;;  %v597_v38 = vadd.f32 %v596_v55, %v582_v48  ;;  %1786 = vperm.xlu0 %5082, %v5759_v0   ;;  %v668_v55 = vadd.f32 %v4303_v44, %v662_v60  ;;  %v670_v58 = vstv %s5987_s16  ;;  %s6065_s16 = sld [smem:[#allocation9 + $0x29]] }
 0x137   : > { %v609_v53 = vmax.f32 %v608_v49, 0.0  ;;  %1186 = vperm.xlu1 %5042, %v5759_v0  }
 0x139   : > { %v611_v57 = vmul.f32 %v610_v59, %v609_v53  ;;  %v632_v30 = vpop.permute.xlu1 %631 }
 0x13a   : > { %v638_v45 = vadd.f32 %v4299_v26, %v632_v30  ;;  %v4301_v30 = vld [vmem:[#allocation7 + $0x19] ss:$0 sm:$0xff] }
 0x13b   : > { %v612_v32 = vadd.f32 %v611_v57, %v597_v38  ;;  %5044 = vset.pattern.permute.xlu1 %v5493_v36  ;;  %v655_v38 = vstv %s5985_s15  ;;  %v669_v57 = vmax.f32 %v668_v55, 0.0  ;;  %v5496_v55 = vmov 66   ;;  %s6063_s15 = sld [smem:[#allocation9 + $0x28]] }
 0x13c   : > { %v639_v48 = vmax.f32 %v638_v45, 0.0  ;;  %1216 = vperm.xlu1 %5044, %v5759_v0   ;;  %v4305_v45 = vld [vmem:[#allocation7 + $0x1b] ss:$0 sm:$0xff] }
 0x13d   : > { %v627_v59 = vadd.f32 %v626_v63, %v612_v32  ;;  %v4309_v32 = vld [vmem:[#allocation7 + $0x1d] ss:$0 sm:$0xff]  ;;  %v707_v63 = vpop.permute.xlu0 %706 }
 0x13e   : > { %v647_v49 = vpop.permute.xlu1 %646  ;;  %v641_v53 = vmul.f32 %v640_v34, %v639_v48  ;;  %v6854_v34 = vmov 104  }
 0x13f   : > { %v653_v26 = vadd.f32 %v4301_v30, %v647_v49  ;;  %5085 = vset.pattern.permute.xlu0 %v6854_v34  ;;  %v671_v30 = vmul.f32 %v670_v58, %v669_v57  ;;  %v685_v49 = vstv %s5994_s25  ;;  %v6858_v58 = vmov 67   ;;  %s6072_s25 = sld [smem:[#allocation9 + $0x2a]] }
 0x140   : > { %5045 = vset.pattern.permute.xlu1 %v6855_v56  ;;  %v642_v44 = vadd.f32 %v641_v53, %v627_v59  ;;  %1831 = vperm.xlu0 %5085, %v5759_v0   ;;  %v713_v53 = vadd.f32 %v4309_v32, %v707_v63  ;;  %v715_v34 = vstv %s6002_s10  ;;  %s6080_s10 = sld [smem:[#allocation9 + $0x2c]] }
 0x141   : > { %v654_v52 = vmax.f32 %v653_v26, 0.0  ;;  %1231 = vperm.xlu1 %5045, %v5759_v0  }
 0x143   : > { %v656_v60 = vmul.f32 %v655_v38, %v654_v52  ;;  %v677_v54 = vpop.permute.xlu1 %676 }
 0x144   : > { %v683_v24 = vadd.f32 %v4305_v45, %v677_v54  ;;  %v4307_v54 = vld [vmem:[#allocation7 + $0x1c] ss:$0 sm:$0xff] }
 0x145   : > { %v657_v48 = vadd.f32 %v656_v60, %v642_v44  ;;  %5047 = vset.pattern.permute.xlu1 %v5496_v55  ;;  %v700_v44 = vstv %s6000_s9  ;;  %v714_v60 = vmax.f32 %v713_v53, 0.0  ;;  %v5499_v53 = vmov 69   ;;  %s6078_s9 = sld [smem:[#allocation9 + $0x2b]] }
 0x146   : > { %v684_v59 = vmax.f32 %v683_v24, 0.0  ;;  %1261 = vperm.xlu1 %5047, %v5759_v0   ;;  %v4311_v24 = vld [vmem:[#allocation7 + $0x1e] ss:$0 sm:$0xff] }
 0x147   : > { %v672_v38 = vadd.f32 %v671_v30, %v657_v48  ;;  %v4315_v48 = vld [vmem:[#allocation7 + $0x20] ss:$0 sm:$0xff]  ;;  %v752_v30 = vpop.permute.xlu0 %751 }
 0x148   : > { %v692_v26 = vpop.permute.xlu1 %691  ;;  %v686_v52 = vmul.f32 %v685_v49, %v684_v59  ;;  %v6857_v49 = vmov 107  }
 0x149   : > { %v698_v45 = vadd.f32 %v4307_v54, %v692_v26  ;;  %5088 = vset.pattern.permute.xlu0 %v6857_v49  ;;  %v716_v54 = vmul.f32 %v715_v34, %v714_v60  ;;  %v730_v26 = vstv %s6009_s24  ;;  %v6860_v34 = vmov 70   ;;  %s6087_s24 = sld [smem:[#allocation9 + $0x2d]] }
 0x14a   : > { %5048 = vset.pattern.permute.xlu1 %v6858_v58  ;;  %v687_v32 = vadd.f32 %v686_v52, %v672_v38  ;;  %1876 = vperm.xlu0 %5088, %v5759_v0   ;;  %v758_v52 = vadd.f32 %v4315_v48, %v752_v30  ;;  %v760_v49 = vstv %s6017_s28  ;;  %s6095_s28 = sld [smem:[#allocation9 + $0x2f]] }
 0x14b   : > { %v699_v57 = vmax.f32 %v698_v45, 0.0  ;;  %1276 = vperm.xlu1 %5048, %v5759_v0  }
 0x14d   : > { %v701_v63 = vmul.f32 %v700_v44, %v699_v57  ;;  %v722_v56 = vpop.permute.xlu1 %721 }
 0x14e   : > { %v728_v41 = vadd.f32 %v4311_v24, %v722_v56  ;;  %v4313_v56 = vld [vmem:[#allocation7 + $0x1f] ss:$0 sm:$0xff] }
 0x14f   : > { %v702_v59 = vadd.f32 %v701_v63, %v687_v32  ;;  %5050 = vset.pattern.permute.xlu1 %v5499_v53  ;;  %v745_v32 = vstv %s6015_s26  ;;  %v759_v63 = vmax.f32 %v758_v52, 0.0  ;;  %v5502_v52 = vmov 72   ;;  %s6093_s26 = sld [smem:[#allocation9 + $0x2e]] }
 0x150   : > { %v729_v38 = vmax.f32 %v728_v41, 0.0  ;;  %1306 = vperm.xlu1 %5050, %v5759_v0   ;;  %v4317_v41 = vld [vmem:[#allocation7 + $0x21] ss:$0 sm:$0xff] }
 0x151   : > { %v717_v44 = vadd.f32 %v716_v54, %v702_v59  ;;  %v4321_v54 = vld [vmem:[#allocation7 + $0x23] ss:$0 sm:$0xff] }
 0x152   : > { %v737_v45 = vpop.permute.xlu1 %736  ;;  %v731_v57 = vmul.f32 %v730_v26, %v729_v38  ;;  %v797_v26 = vpop.permute.xlu0 %796  ;;  %v6859_v38 = vmov 110  }
 0x153   : > { %v743_v24 = vadd.f32 %v4313_v56, %v737_v45  ;;  %5091 = vset.pattern.permute.xlu0 %v6859_v38  ;;  %v6037_v45 = vld [vmem:[%s5744_s11] sm:$0xff] }
 0x154   : > { %5051 = vset.pattern.permute.xlu1 %v6860_v34  ;;  %v732_v48 = vadd.f32 %v731_v57, %v717_v44  ;;  %1921 = vperm.xlu0 %5091, %v6037_v45   ;;  %v775_v44 = vstv %s6024_s3  ;;  %v805_v34 = vstv %s6032_s29  ;;  %s6102_s3 = sld [smem:[#allocation9 + $0x30]]  ;;  %s6110_s29 = sld [smem:[#allocation9 + $0x32]] }
 0x155   : > { %v744_v60 = vmax.f32 %v743_v24, 0.0  ;;  %1321 = vperm.xlu1 %5051, %v5759_v0   ;;  %v761_v0 = vmul.f32 %v760_v49, %v759_v63  ;;  %v803_v24 = vadd.f32 %v4321_v54, %v797_v26  ;;  %v790_v63 = vstv %s6030_s23  ;;  %s6108_s23 = sld [smem:[#allocation9 + $0x31]] }
 0x157   : > { %v746_v30 = vmul.f32 %v745_v32, %v744_v60  ;;  %v767_v58 = vpop.permute.xlu1 %766  ;;  %v804_v38 = vmax.f32 %v803_v24, 0.0  ;;  %v5505_v24 = vmov 75  }
 0x158   : > { %v773_v59 = vadd.f32 %v4317_v41, %v767_v58  ;;  %v4319_v58 = vld [vmem:[#allocation7 + $0x22] ss:$0 sm:$0xff] }
 0x159   : > { %v747_v56 = vadd.f32 %v746_v30, %v732_v48  ;;  %5053 = vset.pattern.permute.xlu1 %v5502_v52  ;;  %v6864_v48 = vmov 73  }
 0x15a   : > { %v774_v57 = vmax.f32 %v773_v59, 0.0  ;;  %1351 = vperm.xlu1 %5053, %v6037_v45   ;;  %v4323_v59 = vld [vmem:[#allocation7 + $0x24] ss:$0 sm:$0xff] }
 0x15b   : > { %v762_v60 = vadd.f32 %v761_v0, %v747_v56  ;;  %v4327_v56 = vld [vmem:[#allocation7 + $0x26] ss:$0 sm:$0xff]  ;;  %v842_v0 = vpop.permute.xlu0 %841 }
 0x15c   : > { %v782_v32 = vpop.permute.xlu1 %781  ;;  %v776_v41 = vmul.f32 %v775_v44, %v774_v57  ;;  %v6863_v44 = vmov 113  }
 0x15d   : > { %v788_v49 = vadd.f32 %v4319_v58, %v782_v32  ;;  %5094 = vset.pattern.permute.xlu0 %v6863_v44  ;;  %v806_v58 = vmul.f32 %v805_v34, %v804_v38  ;;  %v820_v32 = vstv %s6042_s5  ;;  %v6867_v34 = vmov 76   ;;  %s6117_s5 = sld [smem:[#allocation9 + $0x33]] }
 0x15e   : > { %5054 = vset.pattern.permute.xlu1 %v6864_v48  ;;  %v777_v54 = vadd.f32 %v776_v41, %v762_v60  ;;  %1966 = vperm.xlu0 %5094, %v6037_v45   ;;  %v848_v41 = vadd.f32 %v4327_v56, %v842_v0  ;;  %v850_v44 = vstv %s6050_s13  ;;  %s6126_s13 = sld [smem:[#allocation9 + $0x35]] }
 0x15f   : > { %v789_v30 = vmax.f32 %v788_v49, 0.0  ;;  %1366 = vperm.xlu1 %5054, %v6037_v45  }
 0x161   : > { %v791_v26 = vmul.f32 %v790_v63, %v789_v30  ;;  %v812_v22 = vpop.permute.xlu1 %811 }
 0x162   : > { %v818_v37 = vadd.f32 %v4323_v59, %v812_v22  ;;  %v4325_v22 = vld [vmem:[#allocation7 + $0x25] ss:$0 sm:$0xff] }
 0x163   : > { %v792_v57 = vadd.f32 %v791_v26, %v777_v54  ;;  %5056 = vset.pattern.permute.xlu1 %v5505_v24  ;;  %v835_v54 = vstv %s6048_s7  ;;  %v849_v26 = vmax.f32 %v848_v41, 0.0  ;;  %v5508_v41 = vmov 78   ;;  %s6124_s7 = sld [smem:[#allocation9 + $0x34]] }
 0x164   : > { %v819_v60 = vmax.f32 %v818_v37, 0.0  ;;  %1396 = vperm.xlu1 %5056, %v6037_v45   ;;  %v4329_v37 = vld [vmem:[#allocation7 + $0x27] ss:$0 sm:$0xff] }
 0x165   : > { %v807_v63 = vadd.f32 %v806_v58, %v792_v57  ;;  %v4333_v57 = vld [vmem:[#allocation7 + $0x29] ss:$0 sm:$0xff]  ;;  %v887_v58 = vpop.permute.xlu0 %886 }
 0x166   : > { %v827_v49 = vpop.permute.xlu1 %826  ;;  %v821_v30 = vmul.f32 %v820_v32, %v819_v60  ;;  %v6866_v32 = vmov 116  }
 0x167   : > { %v833_v59 = vadd.f32 %v4325_v22, %v827_v49  ;;  %5097 = vset.pattern.permute.xlu0 %v6866_v32  ;;  %v851_v22 = vmul.f32 %v850_v44, %v849_v26  ;;  %v865_v49 = vstv %s6057_s12  ;;  %v6870_v44 = vmov 79   ;;  %s6135_s12 = sld [smem:[#allocation9 + $0x36]] }
 0x168   : > { %5057 = vset.pattern.permute.xlu1 %v6867_v34  ;;  %v822_v56 = vadd.f32 %v821_v30, %v807_v63  ;;  %2011 = vperm.xlu0 %5097, %v6037_v45   ;;  %v893_v30 = vadd.f32 %v4333_v57, %v887_v58  ;;  %v895_v32 = vstv %s6065_s16  ;;  %s6145_s16 = sld [smem:[#allocation9 + $0x38]] }
 0x169   : > { %v834_v38 = vmax.f32 %v833_v59, 0.0  ;;  %1411 = vperm.xlu1 %5057, %v6037_v45  }
 0x16b   : > { %v836_v0 = vmul.f32 %v835_v54, %v834_v38  ;;  %v857_v48 = vpop.permute.xlu1 %856 }
 0x16c   : > { %v863_v20 = vadd.f32 %v4329_v37, %v857_v48  ;;  %v4331_v48 = vld [vmem:[#allocation7 + $0x28] ss:$0 sm:$0xff] }
 0x16d   : > { %v837_v60 = vadd.f32 %v836_v0, %v822_v56  ;;  %5059 = vset.pattern.permute.xlu1 %v5508_v41  ;;  %v880_v56 = vstv %s6063_s15  ;;  %v894_v0 = vmax.f32 %v893_v30, 0.0  ;;  %v5511_v30 = vmov 81   ;;  %s6143_s15 = sld [smem:[#allocation9 + $0x37]] }
 0x16e   : > { %v864_v63 = vmax.f32 %v863_v20, 0.0  ;;  %1441 = vperm.xlu1 %5059, %v6037_v45   ;;  %v4335_v20 = vld [vmem:[#allocation7 + $0x2a] ss:$0 sm:$0xff] }
 0x16f   : > { %v852_v54 = vadd.f32 %v851_v22, %v837_v60  ;;  %v4339_v60 = vld [vmem:[#allocation7 + $0x2c] ss:$0 sm:$0xff]  ;;  %v932_v22 = vpop.permute.xlu0 %931 }
 0x170   : > { %v872_v59 = vpop.permute.xlu1 %871  ;;  %v866_v38 = vmul.f32 %v865_v49, %v864_v63  ;;  %v6869_v49 = vmov 119  }
 0x171   : > { %v878_v37 = vadd.f32 %v4331_v48, %v872_v59  ;;  %5100 = vset.pattern.permute.xlu0 %v6869_v49  ;;  %v896_v48 = vmul.f32 %v895_v32, %v894_v0  ;;  %v910_v59 = vstv %s6072_s25  ;;  %v6873_v32 = vmov 82   ;;  %s6152_s25 = sld [smem:[#allocation9 + $0x39]] }
 0x172   : > { %5060 = vset.pattern.permute.xlu1 %v6870_v44  ;;  %v867_v57 = vadd.f32 %v866_v38, %v852_v54  ;;  %2056 = vperm.xlu0 %5100, %v6037_v45   ;;  %v938_v38 = vadd.f32 %v4339_v60, %v932_v22  ;;  %v940_v49 = vstv %s6080_s10  ;;  %s6162_s10 = sld [smem:[#allocation9 + $0x3b]] }
 0x173   : > { %v879_v26 = vmax.f32 %v878_v37, 0.0  ;;  %1456 = vperm.xlu1 %5060, %v6037_v45  }
 0x175   : > { %v881_v58 = vmul.f32 %v880_v56, %v879_v26  ;;  %v902_v34 = vpop.permute.xlu1 %901 }
 0x176   : > { %v908_v33 = vadd.f32 %v4335_v20, %v902_v34  ;;  %v4337_v34 = vld [vmem:[#allocation7 + $0x2b] ss:$0 sm:$0xff] }
 0x177   : > { %v882_v63 = vadd.f32 %v881_v58, %v867_v57  ;;  %5062 = vset.pattern.permute.xlu1 %v5511_v30  ;;  %v925_v57 = vstv %s6078_s9  ;;  %v939_v58 = vmax.f32 %v938_v38, 0.0  ;;  %v5514_v38 = vmov 84   ;;  %s6160_s9 = sld [smem:[#allocation9 + $0x3a]] }
 0x178   : > { %v909_v54 = vmax.f32 %v908_v33, 0.0  ;;  %1486 = vperm.xlu1 %5062, %v6037_v45   ;;  %v4341_v33 = vld [vmem:[#allocation7 + $0x2d] ss:$0 sm:$0xff] }
 0x179   : > { %v897_v56 = vadd.f32 %v896_v48, %v882_v63  ;;  %v4345_v63 = vld [vmem:[#allocation7 + $0x2f] ss:$0 sm:$0xff]  ;;  %v977_v48 = vpop.permute.xlu0 %976 }
 0x17a   : > { %v917_v37 = vpop.permute.xlu1 %916  ;;  %v911_v26 = vmul.f32 %v910_v59, %v909_v54  ;;  %v6872_v59 = vmov 122  }
 0x17b   : > { %v923_v20 = vadd.f32 %v4337_v34, %v917_v37  ;;  %5103 = vset.pattern.permute.xlu0 %v6872_v59  ;;  %v941_v34 = vmul.f32 %v940_v49, %v939_v58  ;;  %v955_v37 = vstv %s6087_s24  ;;  %v5515_v49 = vmov 85   ;;  %s6169_s24 = sld [smem:[#allocation9 + $0x3c]] }
 0x17c   : > { %5063 = vset.pattern.permute.xlu1 %v6873_v32  ;;  %v912_v60 = vadd.f32 %v911_v26, %v897_v56  ;;  %2101 = vperm.xlu0 %5103, %v6037_v45   ;;  %v983_v26 = vadd.f32 %v4345_v63, %v977_v48  ;;  %v985_v59 = vstv %s6095_s28  ;;  %s6179_s28 = sld [smem:[#allocation9 + $0x3e]] }
 0x17d   : > { %v924_v0 = vmax.f32 %v923_v20, 0.0  ;;  %1501 = vperm.xlu1 %5063, %v6037_v45  }
 0x17f   : > { %v926_v22 = vmul.f32 %v925_v57, %v924_v0  ;;  %v947_v44 = vpop.permute.xlu1 %946 }
 0x180   : > { %v953_v18 = vadd.f32 %v4341_v33, %v947_v44  ;;  %v4343_v44 = vld [vmem:[#allocation7 + $0x2e] ss:$0 sm:$0xff] }
 0x181   : > { %v927_v54 = vadd.f32 %v926_v22, %v912_v60  ;;  %5065 = vset.pattern.permute.xlu1 %v5514_v38  ;;  %v970_v60 = vstv %s6093_s26  ;;  %v984_v22 = vmax.f32 %v983_v26, 0.0  ;;  %v5517_v26 = vmov 87   ;;  %s6177_s26 = sld [smem:[#allocation9 + $0x3d]] }
 0x182   : > { %v954_v56 = vmax.f32 %v953_v18, 0.0  ;;  %1531 = vperm.xlu1 %5065, %v6037_v45   ;;  %v4347_v18 = vld [vmem:[#allocation7 + $0x30] ss:$0 sm:$0xff] }
 0x183   : > { %v942_v57 = vadd.f32 %v941_v34, %v927_v54  ;;  %v4351_v54 = vld [vmem:[#allocation7 + $0x32] ss:$0 sm:$0xff]  ;;  %v1022_v34 = vpop.permute.xlu0 %1021 }
 0x184   : > { %v962_v20 = vpop.permute.xlu1 %961  ;;  %v956_v0 = vmul.f32 %v955_v37, %v954_v56  ;;  %v6875_v37 = vmov 125  }
 0x185   : > { %v968_v33 = vadd.f32 %v4343_v44, %v962_v20  ;;  %5106 = vset.pattern.permute.xlu0 %v6875_v37  ;;  %v986_v44 = vmul.f32 %v985_v59, %v984_v22  ;;  %v1000_v20 = vstv %s6102_s3  ;;  %v1015_v59 = vstv %s6108_s23  ;;  %s6186_s3 = sld [smem:[#allocation9 + $0x3f]]  ;;  %s6194_s23 = sld [smem:[#allocation9 + $0x40]] }
 0x186   : > { %5066 = vset.pattern.permute.xlu1 %v5515_v49  ;;  %v957_v63 = vadd.f32 %v956_v0, %v942_v57  ;;  %2146 = vperm.xlu0 %5106, %v6037_v45   ;;  %v1028_v0 = vadd.f32 %v4351_v54, %v1022_v34  ;;  %v6876_v22 = vmov 88   ;;  %v1030_v54 = vstv %s6110_s29  ;;  %s6196_s29 = sld [smem:[#allocation9 + $0x41]] }
 0x187   : > { %v969_v58 = vmax.f32 %v968_v33, 0.0  ;;  %1546 = vperm.xlu1 %5066, %v6037_v45   ;;  %v1045_v37 = vstv %s6117_s5  ;;  %s6203_s5 = sld [smem:[#allocation9 + $0x42]] }
 0x189   : > { %v971_v48 = vmul.f32 %v970_v60, %v969_v58  ;;  %v992_v32 = vpop.permute.xlu1 %991 }
 0x18a   : > { %v998_v29 = vadd.f32 %v4347_v18, %v992_v32  ;;  %v4349_v32 = vld [vmem:[#allocation7 + $0x31] ss:$0 sm:$0xff]  ;;  %5109 = vset.pattern.permute.xlu0 %v5418_v2  ;;  %v1067_v2 = vpop.permute.xlu0 %1066 }
 0x18b   : > { %v972_v56 = vadd.f32 %v971_v48, %v957_v63  ;;  %5068 = vset.pattern.permute.xlu1 %v5517_v26  ;;  %v4353_v48 = vld [vmem:[#allocation7 + $0x33] ss:$0 sm:$0xff] }
 0x18c   : > { %v999_v57 = vmax.f32 %v998_v29, 0.0  ;;  %1576 = vperm.xlu1 %5068, %v6037_v45   ;;  %v1029_v29 = vmax.f32 %v1028_v0, 0.0 }
 0x18d   : > { %v987_v60 = vadd.f32 %v986_v44, %v972_v56 }
 0x18e   : > { %v1007_v33 = vpop.permute.xlu1 %1006  ;;  %v1001_v58 = vmul.f32 %v1000_v20, %v999_v57  ;;  %v4357_v57 = vld [vmem:[#allocation7 + $0x35] ss:$0 sm:$0xff]  ;;  %v1031_v0 = vmul.f32 %v1030_v54, %v1029_v29  ;;  %v1060_v29 = vstv %s6124_s7  ;;  %v6877_v54 = vmov 91   ;;  %s6211_s7 = sld [smem:[#allocation9 + $0x43]] }
 0x18f   : > { %v1013_v18 = vadd.f32 %v4349_v32, %v1007_v33  ;;  %v6129_v32 = vld [vmem:[%s5744_s11 + $0x8] sm:$0xff] }
 0x190   : > { %5069 = vset.pattern.permute.xlu1 %v6876_v22  ;;  %v1002_v34 = vadd.f32 %v1001_v58, %v987_v60  ;;  %2192 = vperm.xlu0 %5109, %v6129_v32   ;;  %v4355_v60 = vld [vmem:[#allocation7 + $0x34] ss:$0 sm:$0xff]  ;;  %v1073_v58 = vadd.f32 %v4357_v57, %v1067_v2  ;;  %v1075_v57 = vstv %s6126_s13  ;;  %s6213_s13 = sld [smem:[#allocation9 + $0x44]] }
 0x191   : > { %v1014_v63 = vmax.f32 %v1013_v18, 0.0  ;;  %1591 = vperm.xlu1 %5069, %v6037_v45   ;;  %v5519_v18 = vmov 90  }
 0x193   : > { %v1016_v56 = vmul.f32 %v1015_v59, %v1014_v63  ;;  %v1037_v44 = vpop.permute.xlu1 %1036 }
 0x194   : > { %v1043_v20 = vadd.f32 %v4353_v48, %v1037_v44  ;;  %5112 = vset.pattern.permute.xlu0 %v5419_v3  ;;  %v1074_v44 = vmax.f32 %v1073_v58, 0.0  ;;  %v4363_v3 = vld [vmem:[#allocation7 + $0x38] ss:$0 sm:$0xff] }
 0x195   : > { %v1017_v33 = vadd.f32 %v1016_v56, %v1002_v34  ;;  %5071 = vset.pattern.permute.xlu1 %v5519_v18  ;;  %2237 = vperm.xlu0 %5112, %v6129_v32  }
 0x196   : > { %v1044_v22 = vmax.f32 %v1043_v20, 0.0  ;;  %1621 = vperm.xlu1 %5071, %v6037_v45   ;;  %v4359_v20 = vld [vmem:[#allocation7 + $0x36] ss:$0 sm:$0xff]  ;;  %v1076_v58 = vmul.f32 %v1075_v57, %v1074_v44  ;;  %v1105_v44 = vstv %s6143_s15  ;;  %v5522_v57 = vmov 94   ;;  %s6228_s15 = sld [smem:[#allocation9 + $0x46]] }
 0x197   : > { %v1032_v63 = vadd.f32 %v1031_v0, %v1017_v33  ;;  %v1112_v0 = vpop.permute.xlu0 %1111 }
 0x198   : > { %v1052_v59 = vpop.permute.xlu1 %1051  ;;  %v1046_v48 = vmul.f32 %v1045_v37, %v1044_v22 }
 0x199   : > { %v1058_v34 = vadd.f32 %v4355_v60, %v1052_v59  ;;  %5115 = vset.pattern.permute.xlu0 %v5423_v7  ;;  %v5521_v59 = vmov 93  }
 0x19a   : > { %5072 = vset.pattern.permute.xlu1 %v6877_v54  ;;  %v1047_v2 = vadd.f32 %v1046_v48, %v1032_v63  ;;  %2282 = vperm.xlu0 %5115, %v6129_v32   ;;  %v4361_v63 = vld [vmem:[#allocation7 + $0x37] ss:$0 sm:$0xff]  ;;  %v1118_v48 = vadd.f32 %v4363_v3, %v1112_v0 }
 0x19b   : > { %v1059_v56 = vmax.f32 %v1058_v34, 0.0  ;;  %1636 = vperm.xlu1 %5072, %v6037_v45   ;;  %v1090_v34 = vstv %s6135_s12  ;;  %s6220_s12 = sld [smem:[#allocation9 + $0x45]] }
 0x19d   : > { %v1061_v37 = vmul.f32 %v1060_v29, %v1059_v56  ;;  %v1082_v22 = vpop.permute.xlu1 %1081 }
 0x19e   : > { %v1088_v33 = vadd.f32 %v4359_v20, %v1082_v22  ;;  %5118 = vset.pattern.permute.xlu0 %v5427_v11  ;;  %v4365_v22 = vld [vmem:[#allocation7 + $0x39] ss:$0 sm:$0xff]  ;;  %v4369_v11 = vld [vmem:[#allocation7 + $0x3b] ss:$0 sm:$0xff] }
 0x19f   : > { %v1062_v60 = vadd.f32 %v1061_v37, %v1047_v2  ;;  %5074 = vset.pattern.permute.xlu1 %v5521_v59  ;;  %2327 = vperm.xlu0 %5118, %v6129_v32   ;;  %v1119_v37 = vmax.f32 %v1118_v48, 0.0  ;;  %v5523_v48 = vmov 96  }
 0x1a0   : > { %v1089_v54 = vmax.f32 %v1088_v33, 0.0  ;;  %1666 = vperm.xlu1 %5074, %v6037_v45   ;;  %v1120_v33 = vstv %s6145_s16  ;;  %s6230_s16 = sld [smem:[#allocation9 + $0x47]] }
 0x1a1   : > { %v1077_v56 = vadd.f32 %v1076_v58, %v1062_v60  ;;  %v1157_v58 = vpop.permute.xlu0 %1156 }
 0x1a2   : > { %v1097_v29 = vpop.permute.xlu1 %1096  ;;  %v1091_v7 = vmul.f32 %v1090_v34, %v1089_v54 }
 0x1a3   : > { %v1103_v20 = vadd.f32 %v4361_v63, %v1097_v29  ;;  %5121 = vset.pattern.permute.xlu0 %v5431_v15  ;;  %v1121_v63 = vmul.f32 %v1120_v33, %v1119_v37  ;;  %v1135_v29 = vstv %s6152_s25  ;;  %v1150_v37 = vstv %s6160_s9  ;;  %s6237_s25 = sld [smem:[#allocation9 + $0x48]]  ;;  %s6245_s9 = sld [smem:[#allocation9 + $0x49]] }
 0x1a4   : > { %5075 = vset.pattern.permute.xlu1 %v5522_v57  ;;  %v1092_v3 = vadd.f32 %v1091_v7, %v1077_v56  ;;  %2372 = vperm.xlu0 %5121, %v6129_v32   ;;  %v4367_v56 = vld [vmem:[#allocation7 + $0x3a] ss:$0 sm:$0xff]  ;;  %v1163_v7 = vadd.f32 %v4369_v11, %v1157_v58  ;;  %v5524_v33 = vmov 97  }
 0x1a5   : > { %v1104_v2 = vmax.f32 %v1103_v20, 0.0  ;;  %1681 = vperm.xlu1 %5075, %v6037_v45  }
 0x1a7   : > { %v1106_v54 = vmul.f32 %v1105_v44, %v1104_v2  ;;  %v1127_v0 = vpop.permute.xlu1 %1126 }
 0x1a8   : > { %v1133_v60 = vadd.f32 %v4365_v22, %v1127_v0  ;;  %5124 = vset.pattern.permute.xlu0 %v5435_v19  ;;  %v4371_v0 = vld [vmem:[#allocation7 + $0x3c] ss:$0 sm:$0xff]  ;;  %v4375_v19 = vld [vmem:[#allocation7 + $0x3e] ss:$0 sm:$0xff] }
 0x1a9   : > { %v1107_v34 = vadd.f32 %v1106_v54, %v1092_v3  ;;  %5077 = vset.pattern.permute.xlu1 %v5523_v48  ;;  %2417 = vperm.xlu0 %5124, %v6129_v32   ;;  %v1164_v54 = vmax.f32 %v1163_v7, 0.0  ;;  %v5525_v7 = vmov 99  }
 0x1aa   : > { %v1134_v20 = vmax.f32 %v1133_v60, 0.0  ;;  %1711 = vperm.xlu1 %5077, %v6037_v45   ;;  %v1165_v60 = vstv %s6162_s10  ;;  %s6247_s10 = sld [smem:[#allocation9 + $0x4a]] }
 0x1ab   : > { %v1122_v2 = vadd.f32 %v1121_v63, %v1107_v34 }
 0x1ac   : > { %v1142_v44 = vpop.permute.xlu1 %1141  ;;  %v1136_v15 = vmul.f32 %v1135_v29, %v1134_v20  ;;  %v1202_v29 = vpop.permute.xlu0 %1201 }
 0x1ad   : > { %v1148_v22 = vadd.f32 %v4367_v56, %v1142_v44  ;;  %5127 = vset.pattern.permute.xlu0 %v5439_v23  ;;  %v1166_v56 = vmul.f32 %v1165_v60, %v1164_v54  ;;  %v1180_v44 = vstv %s6169_s24  ;;  %v1195_v54 = vstv %s6177_s26  ;;  %s6254_s24 = sld [smem:[#allocation9 + $0x4b]]  ;;  %s6262_s26 = sld [smem:[#allocation9 + $0x4c]] }
 0x1ae   : > { %5078 = vset.pattern.permute.xlu1 %v5524_v33  ;;  %v1137_v11 = vadd.f32 %v1136_v15, %v1122_v2  ;;  %2462 = vperm.xlu0 %5127, %v6129_v32   ;;  %v4373_v2 = vld [vmem:[#allocation7 + $0x3d] ss:$0 sm:$0xff]  ;;  %v1208_v15 = vadd.f32 %v4375_v19, %v1202_v29  ;;  %v5526_v60 = vmov 100  }
 0x1af   : > { %v1149_v3 = vmax.f32 %v1148_v22, 0.0  ;;  %1726 = vperm.xlu1 %5078, %v6037_v45  }
 0x1b1   : > { %v1151_v58 = vmul.f32 %v1150_v37, %v1149_v3  ;;  %v1172_v34 = vpop.permute.xlu1 %1171 }
 0x1b2   : > { %v1178_v63 = vadd.f32 %v4371_v0, %v1172_v34  ;;  %5130 = vset.pattern.permute.xlu0 %v5443_v27  ;;  %v4377_v34 = vld [vmem:[#allocation7 + $0x3f] ss:$0 sm:$0xff]  ;;  %v4381_v27 = vld [vmem:[#allocation7 + $0x41] ss:$0 sm:$0xff] }
 0x1b3   : > { %v1152_v20 = vadd.f32 %v1151_v58, %v1137_v11  ;;  %5080 = vset.pattern.permute.xlu1 %v5525_v7  ;;  %2507 = vperm.xlu0 %5130, %v6129_v32   ;;  %v1209_v58 = vmax.f32 %v1208_v15, 0.0  ;;  %v5527_v15 = vmov 102  }
 0x1b4   : > { %v1179_v22 = vmax.f32 %v1178_v63, 0.0  ;;  %1756 = vperm.xlu1 %5080, %v6037_v45   ;;  %v1210_v63 = vstv %s6179_s28  ;;  %s6264_s28 = sld [smem:[#allocation9 + $0x4d]] }
 0x1b5   : > { %v1167_v3 = vadd.f32 %v1166_v56, %v1152_v20 }
 0x1b6   : > { %v1187_v37 = vpop.permute.xlu1 %1186  ;;  %v1181_v23 = vmul.f32 %v1180_v44, %v1179_v22  ;;  %v1247_v44 = vpop.permute.xlu0 %1246 }
 0x1b7   : > { %v1193_v0 = vadd.f32 %v4373_v2, %v1187_v37  ;;  %5133 = vset.pattern.permute.xlu0 %v5447_v31  ;;  %v1211_v2 = vmul.f32 %v1210_v63, %v1209_v58  ;;  %v1225_v37 = vstv %s6186_s3  ;;  %v1240_v58 = vstv %s6194_s23  ;;  %s6271_s3 = sld [smem:[#allocation9 + $0x4e]]  ;;  %s6279_s23 = sld [smem:[#allocation9 + $0x4f]] }
 0x1b8   : > { %5081 = vset.pattern.permute.xlu1 %v5526_v60  ;;  %v1182_v19 = vadd.f32 %v1181_v23, %v1167_v3  ;;  %2552 = vperm.xlu0 %5133, %v6129_v32   ;;  %v4379_v3 = vld [vmem:[#allocation7 + $0x40] ss:$0 sm:$0xff]  ;;  %v1253_v23 = vadd.f32 %v4381_v27, %v1247_v44  ;;  %v5528_v63 = vmov 103  }
 0x1b9   : > { %v1194_v11 = vmax.f32 %v1193_v0, 0.0  ;;  %1771 = vperm.xlu1 %5081, %v6037_v45  }
 0x1bb   : > { %v1196_v29 = vmul.f32 %v1195_v54, %v1194_v11  ;;  %v1217_v20 = vpop.permute.xlu1 %1216 }
 0x1bc   : > { %v1223_v56 = vadd.f32 %v4377_v34, %v1217_v20  ;;  %5136 = vset.pattern.permute.xlu0 %v5451_v35  ;;  %v4383_v20 = vld [vmem:[#allocation7 + $0x42] ss:$0 sm:$0xff]  ;;  %v4387_v35 = vld [vmem:[#allocation7 + $0x44] ss:$0 sm:$0xff] }
 0x1bd   : > { %v1197_v22 = vadd.f32 %v1196_v29, %v1182_v19  ;;  %5083 = vset.pattern.permute.xlu1 %v5527_v15  ;;  %2597 = vperm.xlu0 %5136, %v6129_v32   ;;  %v1254_v29 = vmax.f32 %v1253_v23, 0.0  ;;  %v5529_v23 = vmov 105  }
 0x1be   : > { %v1224_v0 = vmax.f32 %v1223_v56, 0.0  ;;  %1801 = vperm.xlu1 %5083, %v6037_v45   ;;  %v1255_v56 = vstv %s6196_s29  ;;  %s6281_s29 = sld [smem:[#allocation9 + $0x50]] }
 0x1bf   : > { %v1212_v11 = vadd.f32 %v1211_v2, %v1197_v22 }
 0x1c0   : > { %v1232_v54 = vpop.permute.xlu1 %1231  ;;  %v1226_v31 = vmul.f32 %v1225_v37, %v1224_v0  ;;  %v1292_v37 = vpop.permute.xlu0 %1291 }
 0x1c1   : > { %v1238_v34 = vadd.f32 %v4379_v3, %v1232_v54  ;;  %5139 = vset.pattern.permute.xlu0 %v5455_v39  ;;  %v1256_v3 = vmul.f32 %v1255_v56, %v1254_v29  ;;  %v1270_v54 = vstv %s6203_s5  ;;  %v1285_v29 = vstv %s6211_s7  ;;  %s6288_s5 = sld [smem:[#allocation9 + $0x51]]  ;;  %s6299_s7 = sld [smem:[#allocation9 + $0x52]] }
 0x1c2   : > { %5084 = vset.pattern.permute.xlu1 %v5528_v63  ;;  %v1227_v27 = vadd.f32 %v1226_v31, %v1212_v11  ;;  %2642 = vperm.xlu0 %5139, %v6129_v32   ;;  %v4385_v11 = vld [vmem:[#allocation7 + $0x43] ss:$0 sm:$0xff]  ;;  %v1298_v31 = vadd.f32 %v4387_v35, %v1292_v37  ;;  %v5530_v56 = vmov 106  }
 0x1c3   : > { %v1239_v19 = vmax.f32 %v1238_v34, 0.0  ;;  %1816 = vperm.xlu1 %5084, %v6037_v45  }
 0x1c5   : > { %v1241_v44 = vmul.f32 %v1240_v58, %v1239_v19  ;;  %v1262_v22 = vpop.permute.xlu1 %1261 }
 0x1c6   : > { %v1268_v2 = vadd.f32 %v4383_v20, %v1262_v22  ;;  %5142 = vset.pattern.permute.xlu0 %v5459_v43  ;;  %v4389_v22 = vld [vmem:[#allocation7 + $0x45] ss:$0 sm:$0xff]  ;;  %v4393_v43 = vld [vmem:[#allocation7 + $0x47] ss:$0 sm:$0xff] }
 0x1c7   : > { %v1242_v0 = vadd.f32 %v1241_v44, %v1227_v27  ;;  %5086 = vset.pattern.permute.xlu1 %v5529_v23  ;;  %2687 = vperm.xlu0 %5142, %v6129_v32   ;;  %v1299_v44 = vmax.f32 %v1298_v31, 0.0  ;;  %v5531_v31 = vmov 108  }
 0x1c8   : > { %v1269_v34 = vmax.f32 %v1268_v2, 0.0  ;;  %1846 = vperm.xlu1 %5086, %v6037_v45   ;;  %v1300_v2 = vstv %s6213_s13  ;;  %s6301_s13 = sld [smem:[#allocation9 + $0x53]] }
 0x1c9   : > { %v1257_v19 = vadd.f32 %v1256_v3, %v1242_v0 }
 0x1ca   : > { %v1277_v58 = vpop.permute.xlu1 %1276  ;;  %v1271_v39 = vmul.f32 %v1270_v54, %v1269_v34  ;;  %v1337_v54 = vpop.permute.xlu0 %1336 }
 0x1cb   : > { %v1283_v20 = vadd.f32 %v4385_v11, %v1277_v58  ;;  %5145 = vset.pattern.permute.xlu0 %v5463_v47  ;;  %v1301_v11 = vmul.f32 %v1300_v2, %v1299_v44  ;;  %v1315_v58 = vstv %s6220_s12  ;;  %v1330_v44 = vstv %s6228_s15  ;;  %s6308_s12 = sld [smem:[#allocation9 + $0x54]]  ;;  %s6316_s15 = sld [smem:[#allocation9 + $0x55]] }
 0x1cc   : > { %5087 = vset.pattern.permute.xlu1 %v5530_v56  ;;  %v1272_v35 = vadd.f32 %v1271_v39, %v1257_v19  ;;  %2732 = vperm.xlu0 %5145, %v6129_v32   ;;  %v4391_v19 = vld [vmem:[#allocation7 + $0x46] ss:$0 sm:$0xff]  ;;  %v1343_v39 = vadd.f32 %v4393_v43, %v1337_v54  ;;  %v5532_v2 = vmov 109  }
 0x1cd   : > { %v1284_v27 = vmax.f32 %v1283_v20, 0.0  ;;  %1861 = vperm.xlu1 %5087, %v6037_v45  }
 0x1cf   : > { %v1286_v37 = vmul.f32 %v1285_v29, %v1284_v27  ;;  %v1307_v0 = vpop.permute.xlu1 %1306 }
 0x1d0   : > { %v1313_v3 = vadd.f32 %v4389_v22, %v1307_v0  ;;  %5148 = vset.pattern.permute.xlu0 %v5467_v51  ;;  %v4395_v0 = vld [vmem:[#allocation7 + $0x48] ss:$0 sm:$0xff]  ;;  %v4399_v51 = vld [vmem:[#allocation7 + $0x4a] ss:$0 sm:$0xff] }
 0x1d1   : > { %v1287_v34 = vadd.f32 %v1286_v37, %v1272_v35  ;;  %5089 = vset.pattern.permute.xlu1 %v5531_v31  ;;  %2777 = vperm.xlu0 %5148, %v6129_v32   ;;  %v1344_v37 = vmax.f32 %v1343_v39, 0.0  ;;  %v5533_v39 = vmov 111  }
 0x1d2   : > { %v1314_v20 = vmax.f32 %v1313_v3, 0.0  ;;  %1891 = vperm.xlu1 %5089, %v6037_v45   ;;  %v1345_v3 = vstv %s6230_s16  ;;  %s6318_s16 = sld [smem:[#allocation9 + $0x56]] }
 0x1d3   : > { %v1302_v27 = vadd.f32 %v1301_v11, %v1287_v34 }
 0x1d4   : > { %v1322_v29 = vpop.permute.xlu1 %1321  ;;  %v1316_v47 = vmul.f32 %v1315_v58, %v1314_v20  ;;  %v1382_v58 = vpop.permute.xlu0 %1381 }
 0x1d5   : > { %v1328_v22 = vadd.f32 %v4391_v19, %v1322_v29  ;;  %5151 = vset.pattern.permute.xlu0 %v5471_v46  ;;  %v1346_v19 = vmul.f32 %v1345_v3, %v1344_v37  ;;  %v1360_v29 = vstv %s6237_s25  ;;  %v1375_v37 = vstv %s6245_s9  ;;  %s6325_s25 = sld [smem:[#allocation9 + $0x57]]  ;;  %s6333_s9 = sld [smem:[#allocation9 + $0x58]] }
 0x1d6   : > { %5090 = vset.pattern.permute.xlu1 %v5532_v2  ;;  %v1317_v43 = vadd.f32 %v1316_v47, %v1302_v27  ;;  %2822 = vperm.xlu0 %5151, %v6129_v32   ;;  %v4397_v27 = vld [vmem:[#allocation7 + $0x49] ss:$0 sm:$0xff]  ;;  %v1388_v47 = vadd.f32 %v4399_v51, %v1382_v58  ;;  %v5534_v3 = vmov 112  }
 0x1d7   : > { %v1329_v35 = vmax.f32 %v1328_v22, 0.0  ;;  %1906 = vperm.xlu1 %5090, %v6037_v45  }
 0x1d9   : > { %v1331_v54 = vmul.f32 %v1330_v44, %v1329_v35  ;;  %v1352_v34 = vpop.permute.xlu1 %1351 }
 0x1da   : > { %v1358_v11 = vadd.f32 %v4395_v0, %v1352_v34  ;;  %5154 = vset.pattern.permute.xlu0 %v5475_v61  ;;  %v4401_v34 = vld [vmem:[#allocation7 + $0x4b] ss:$0 sm:$0xff]  ;;  %v4405_v61 = vld [vmem:[#allocation7 + $0x4d] ss:$0 sm:$0xff] }
 0x1db   : > { %v1332_v20 = vadd.f32 %v1331_v54, %v1317_v43  ;;  %5092 = vset.pattern.permute.xlu1 %v5533_v39  ;;  %2867 = vperm.xlu0 %5154, %v6129_v32   ;;  %v1389_v54 = vmax.f32 %v1388_v47, 0.0  ;;  %v5535_v47 = vmov 114  }
 0x1dc   : > { %v1359_v22 = vmax.f32 %v1358_v11, 0.0  ;;  %1936 = vperm.xlu1 %5092, %v6037_v45   ;;  %v1390_v11 = vstv %s6247_s10  ;;  %s6335_s10 = sld [smem:[#allocation9 + $0x59]] }
 0x1dd   : > { %v1347_v35 = vadd.f32 %v1346_v19, %v1332_v20 }
 0x1de   : > { %v1367_v44 = vpop.permute.xlu1 %1366  ;;  %v1361_v46 = vmul.f32 %v1360_v29, %v1359_v22  ;;  %v1427_v29 = vpop.permute.xlu0 %1426 }
 0x1df   : > { %v1373_v0 = vadd.f32 %v4397_v27, %v1367_v44  ;;  %5157 = vset.pattern.permute.xlu0 %v5478_v62  ;;  %v1391_v27 = vmul.f32 %v1390_v11, %v1389_v54  ;;  %v1405_v44 = vstv %s6254_s24  ;;  %v1420_v54 = vstv %s6262_s26  ;;  %s6342_s24 = sld [smem:[#allocation9 + $0x5a]]  ;;  %s6350_s26 = sld [smem:[#allocation9 + $0x5b]] }
 0x1e0   : > { %5093 = vset.pattern.permute.xlu1 %v5534_v3  ;;  %v1362_v51 = vadd.f32 %v1361_v46, %v1347_v35  ;;  %2912 = vperm.xlu0 %5157, %v6129_v32   ;;  %v4403_v35 = vld [vmem:[#allocation7 + $0x4c] ss:$0 sm:$0xff]  ;;  %v1433_v46 = vadd.f32 %v4405_v61, %v1427_v29  ;;  %v5536_v11 = vmov 115  }
 0x1e1   : > { %v1374_v43 = vmax.f32 %v1373_v0, 0.0  ;;  %1951 = vperm.xlu1 %5093, %v6037_v45  }
 0x1e3   : > { %v1376_v58 = vmul.f32 %v1375_v37, %v1374_v43  ;;  %v1397_v20 = vpop.permute.xlu1 %1396 }
 0x1e4   : > { %v1403_v19 = vadd.f32 %v4401_v34, %v1397_v20  ;;  %5160 = vset.pattern.permute.xlu0 %v5481_v50  ;;  %v4407_v20 = vld [vmem:[#allocation7 + $0x4e] ss:$0 sm:$0xff]  ;;  %v4411_v50 = vld [vmem:[#allocation7 + $0x50] ss:$0 sm:$0xff] }
 0x1e5   : > { %v1377_v22 = vadd.f32 %v1376_v58, %v1362_v51  ;;  %5095 = vset.pattern.permute.xlu1 %v5535_v47  ;;  %2957 = vperm.xlu0 %5160, %v6129_v32   ;;  %v1434_v58 = vmax.f32 %v1433_v46, 0.0  ;;  %v5537_v46 = vmov 117  }
 0x1e6   : > { %v1404_v0 = vmax.f32 %v1403_v19, 0.0  ;;  %1981 = vperm.xlu1 %5095, %v6037_v45   ;;  %v1435_v19 = vstv %s6264_s28  ;;  %s6352_s28 = sld [smem:[#allocation9 + $0x5c]] }
 0x1e7   : > { %v1392_v43 = vadd.f32 %v1391_v27, %v1377_v22 }
 0x1e8   : > { %v1412_v37 = vpop.permute.xlu1 %1411  ;;  %v1406_v62 = vmul.f32 %v1405_v44, %v1404_v0  ;;  %v1472_v44 = vpop.permute.xlu0 %1471 }
 0x1e9   : > { %v1418_v34 = vadd.f32 %v4403_v35, %v1412_v37  ;;  %5163 = vset.pattern.permute.xlu0 %v5484_v28  ;;  %v1436_v35 = vmul.f32 %v1435_v19, %v1434_v58  ;;  %v1450_v37 = vstv %s6271_s3  ;;  %v1465_v58 = vstv %s6279_s23  ;;  %s6359_s3 = sld [smem:[#allocation9 + $0x5d]]  ;;  %s6367_s23 = sld [smem:[#allocation9 + $0x5e]] }
 0x1ea   : > { %5096 = vset.pattern.permute.xlu1 %v5536_v11  ;;  %v1407_v61 = vadd.f32 %v1406_v62, %v1392_v43  ;;  %3002 = vperm.xlu0 %5163, %v6129_v32   ;;  %v4409_v43 = vld [vmem:[#allocation7 + $0x4f] ss:$0 sm:$0xff]  ;;  %v1478_v62 = vadd.f32 %v4411_v50, %v1472_v44  ;;  %v5538_v19 = vmov 118  }
 0x1eb   : > { %v1419_v51 = vmax.f32 %v1418_v34, 0.0  ;;  %1996 = vperm.xlu1 %5096, %v6037_v45  }
 0x1ed   : > { %v1421_v29 = vmul.f32 %v1420_v54, %v1419_v51  ;;  %v1442_v22 = vpop.permute.xlu1 %1441 }
 0x1ee   : > { %v1448_v27 = vadd.f32 %v4407_v20, %v1442_v22  ;;  %5166 = vset.pattern.permute.xlu0 %v5487_v42  ;;  %v4413_v22 = vld [vmem:[#allocation7 + $0x51] ss:$0 sm:$0xff] }
 0x1ef   : > { %v1422_v0 = vadd.f32 %v1421_v29, %v1407_v61  ;;  %5098 = vset.pattern.permute.xlu1 %v5537_v46  ;;  %3047 = vperm.xlu0 %5166, %v6129_v32   ;;  %v1479_v29 = vmax.f32 %v1478_v62, 0.0  ;;  %v5539_v62 = vmov 120  }
 0x1f0   : > { %v1449_v34 = vmax.f32 %v1448_v27, 0.0  ;;  %2026 = vperm.xlu1 %5098, %v6037_v45   ;;  %v6295_v45 = vld [vmem:[%s5744_s11] sm:$0xff]  ;;  %v1480_v27 = vstv %s6281_s29  ;;  %s6369_s29 = sld [smem:[#allocation9 + $0x5f]] }
 0x1f1   : > { %v1437_v28 = vadd.f32 %v1436_v35, %v1422_v0  ;;  %v4417_v35 = vld [vmem:[#allocation7 + $0x53] ss:$0 sm:$0xff] }
 0x1f2   : > { %v1457_v54 = vpop.permute.xlu1 %1456  ;;  %v1451_v51 = vmul.f32 %v1450_v37, %v1449_v34  ;;  %v1517_v37 = vpop.permute.xlu0 %1516 }
 0x1f3   : > { %v1463_v20 = vadd.f32 %v4409_v43, %v1457_v54  ;;  %5169 = vset.pattern.permute.xlu0 %v5490_v40  ;;  %v1481_v43 = vmul.f32 %v1480_v27, %v1479_v29  ;;  %v1495_v54 = vstv %s6288_s5  ;;  %v1510_v29 = vstv %s6299_s7  ;;  %s6376_s5 = sld [smem:[#allocation9 + $0x60]]  ;;  %s6384_s7 = sld [smem:[#allocation9 + $0x61]] }
 0x1f4   : > { %5099 = vset.pattern.permute.xlu1 %v5538_v19  ;;  %v1452_v50 = vadd.f32 %v1451_v51, %v1437_v28  ;;  %3092 = vperm.xlu0 %5169, %v6129_v32   ;;  %v4415_v28 = vld [vmem:[#allocation7 + $0x52] ss:$0 sm:$0xff]  ;;  %v1523_v51 = vadd.f32 %v4417_v35, %v1517_v37  ;;  %v5540_v27 = vmov 121  }
 0x1f5   : > { %v1464_v61 = vmax.f32 %v1463_v20, 0.0  ;;  %2041 = vperm.xlu1 %5099, %v6295_v45  }
 0x1f7   : > { %v1466_v44 = vmul.f32 %v1465_v58, %v1464_v61  ;;  %v1487_v42 = vpop.permute.xlu1 %1486 }
 0x1f8   : > { %v1493_v0 = vadd.f32 %v4413_v22, %v1487_v42  ;;  %5172 = vset.pattern.permute.xlu0 %v5493_v36  ;;  %v4419_v42 = vld [vmem:[#allocation7 + $0x54] ss:$0 sm:$0xff]  ;;  %v4423_v36 = vld [vmem:[#allocation7 + $0x56] ss:$0 sm:$0xff] }
 0x1f9   : > { %v1467_v34 = vadd.f32 %v1466_v44, %v1452_v50  ;;  %5101 = vset.pattern.permute.xlu1 %v5539_v62  ;;  %3137 = vperm.xlu0 %5172, %v6129_v32   ;;  %v1524_v44 = vmax.f32 %v1523_v51, 0.0  ;;  %v5541_v51 = vmov 123  }
 0x1fa   : > { %v1494_v20 = vmax.f32 %v1493_v0, 0.0  ;;  %2071 = vperm.xlu1 %5101, %v6295_v45   ;;  %v1525_v0 = vstv %s6301_s13  ;;  %s6386_s13 = sld [smem:[#allocation9 + $0x62]] }
 0x1fb   : > { %v1482_v61 = vadd.f32 %v1481_v43, %v1467_v34 }
 0x1fc   : > { %v1502_v58 = vpop.permute.xlu1 %1501  ;;  %v1496_v40 = vmul.f32 %v1495_v54, %v1494_v20  ;;  %v1562_v54 = vpop.permute.xlu0 %1561 }
 0x1fd   : > { %v1508_v22 = vadd.f32 %v4415_v28, %v1502_v58  ;;  %5175 = vset.pattern.permute.xlu0 %v5496_v55  ;;  %v1526_v28 = vmul.f32 %v1525_v0, %v1524_v44  ;;  %v1540_v58 = vstv %s6308_s12  ;;  %v1555_v44 = vstv %s6316_s15  ;;  %s6396_s12 = sld [smem:[#allocation9 + $0x63]]  ;;  %s6404_s15 = sld [smem:[#allocation9 + $0x64]] }
 0x1fe   : > { %5102 = vset.pattern.permute.xlu1 %v5540_v27  ;;  %v1497_v35 = vadd.f32 %v1496_v40, %v1482_v61  ;;  %3182 = vperm.xlu0 %5175, %v6129_v32   ;;  %v4421_v61 = vld [vmem:[#allocation7 + $0x55] ss:$0 sm:$0xff]  ;;  %v1568_v40 = vadd.f32 %v4423_v36, %v1562_v54  ;;  %v5542_v0 = vmov 124  }
 0x1ff   : > { %v1509_v50 = vmax.f32 %v1508_v22, 0.0  ;;  %2086 = vperm.xlu1 %5102, %v6295_v45  }
 0x201   : > { %v1511_v37 = vmul.f32 %v1510_v29, %v1509_v50  ;;  %v1532_v34 = vpop.permute.xlu1 %1531 }
 0x202   : > { %v1538_v43 = vadd.f32 %v4419_v42, %v1532_v34  ;;  %5178 = vset.pattern.permute.xlu0 %v5499_v53  ;;  %v4425_v34 = vld [vmem:[#allocation7 + $0x57] ss:$0 sm:$0xff]  ;;  %v4429_v53 = vld [vmem:[#allocation7 + $0x59] ss:$0 sm:$0xff] }
 0x203   : > { %v1512_v20 = vadd.f32 %v1511_v37, %v1497_v35  ;;  %5104 = vset.pattern.permute.xlu1 %v5541_v51  ;;  %3227 = vperm.xlu0 %5178, %v6129_v32   ;;  %v1569_v37 = vmax.f32 %v1568_v40, 0.0  ;;  %v5543_v40 = vmov 126  }
 0x204   : > { %v1539_v22 = vmax.f32 %v1538_v43, 0.0  ;;  %2116 = vperm.xlu1 %5104, %v6295_v45   ;;  %v1570_v43 = vstv %s6318_s16  ;;  %s6406_s16 = sld [smem:[#allocation9 + $0x65]] }
 0x205   : > { %v1527_v50 = vadd.f32 %v1526_v28, %v1512_v20 }
 0x206   : > { %v1547_v29 = vpop.permute.xlu1 %1546  ;;  %v1541_v55 = vmul.f32 %v1540_v58, %v1539_v22  ;;  %v1607_v58 = vpop.permute.xlu0 %1606 }
 0x207   : > { %v1553_v42 = vadd.f32 %v4421_v61, %v1547_v29  ;;  %5181 = vset.pattern.permute.xlu0 %v5502_v52  ;;  %v1571_v61 = vmul.f32 %v1570_v43, %v1569_v37  ;;  %v1585_v29 = vstv %s6325_s25  ;;  %v1600_v37 = vstv %s6333_s9  ;;  %s6413_s25 = sld [smem:[#allocation9 + $0x66]]  ;;  %s6421_s9 = sld [smem:[#allocation9 + $0x67]] }
 0x208   : > { %5105 = vset.pattern.permute.xlu1 %v5542_v0  ;;  %v1542_v36 = vadd.f32 %v1541_v55, %v1527_v50  ;;  %3272 = vperm.xlu0 %5181, %v6129_v32   ;;  %v4427_v50 = vld [vmem:[#allocation7 + $0x58] ss:$0 sm:$0xff]  ;;  %v1613_v55 = vadd.f32 %v4429_v53, %v1607_v58  ;;  %v5544_v43 = vmov 127  }
 0x209   : > { %v1554_v35 = vmax.f32 %v1553_v42, 0.0  ;;  %2131 = vperm.xlu1 %5105, %v6295_v45  }
 0x20b   : > { %v1556_v54 = vmul.f32 %v1555_v44, %v1554_v35  ;;  %v1577_v20 = vpop.permute.xlu1 %1576 }
 0x20c   : > { %v1583_v28 = vadd.f32 %v4425_v34, %v1577_v20  ;;  %5184 = vset.pattern.permute.xlu0 %v5505_v24  ;;  %v4431_v20 = vld [vmem:[#allocation7 + $0x5a] ss:$0 sm:$0xff]  ;;  %v4435_v24 = vld [vmem:[#allocation7 + $0x5c] ss:$0 sm:$0xff] }
 0x20d   : > { %v1557_v22 = vadd.f32 %v1556_v54, %v1542_v36  ;;  %5107 = vset.pattern.permute.xlu1 %v5543_v40  ;;  %3317 = vperm.xlu0 %5184, %v6129_v32   ;;  %v1614_v54 = vmax.f32 %v1613_v55, 0.0 }
 0x20e   : > { %v1584_v42 = vmax.f32 %v1583_v28, 0.0  ;;  %2161 = vperm.xlu1 %5107, %v6295_v45   ;;  %v1615_v28 = vstv %s6335_s10  ;;  %s6423_s10 = sld [smem:[#allocation9 + $0x68]] }
 0x20f   : > { %v1572_v35 = vadd.f32 %v1571_v61, %v1557_v22 }
 0x210   : > { %v1592_v44 = vpop.permute.xlu1 %1591  ;;  %v1586_v52 = vmul.f32 %v1585_v29, %v1584_v42  ;;  %v1652_v29 = vpop.permute.xlu0 %1651 }
 0x211   : > { %v1598_v34 = vadd.f32 %v4427_v50, %v1592_v44  ;;  %5187 = vset.pattern.permute.xlu0 %v5508_v41  ;;  %v1616_v50 = vmul.f32 %v1615_v28, %v1614_v54  ;;  %v4433_v44 = vld [vmem:[#allocation7 + $0x5b] ss:$0 sm:$0xff]  ;;  %v1660_v28 = vstv %s6352_s28  ;;  %s6440_s28 = sld [smem:[#allocation9 + $0x6b]] }
 0x212   : > { %5108 = vset.pattern.permute.xlu1 %v5544_v43  ;;  %v1587_v53 = vadd.f32 %v1586_v52, %v1572_v35  ;;  %3362 = vperm.xlu0 %5187, %v6129_v32   ;;  %v1658_v35 = vadd.f32 %v4435_v24, %v1652_v29  ;;  %v4441_v24 = vld [vmem:[#allocation7 + $0x5f] ss:$0 sm:$0xff] }
 0x213   : > { %v1599_v36 = vmax.f32 %v1598_v34, 0.0  ;;  %2176 = vperm.xlu1 %5108, %v6295_v45   ;;  %v1630_v45 = vstv %s6342_s24  ;;  %s6430_s24 = sld [smem:[#allocation9 + $0x69]] }
 0x214   : > { %v1659_v54 = vmax.f32 %v1658_v35, 0.0 }
 0x215   : > { %v1601_v58 = vmul.f32 %v1600_v37, %v1599_v36  ;;  %v1622_v22 = vpop.permute.xlu1 %1621  ;;  %v1645_v36 = vstv %s6350_s26  ;;  %s6438_s26 = sld [smem:[#allocation9 + $0x6a]] }
 0x216   : > { %v1628_v61 = vadd.f32 %v4431_v20, %v1622_v22  ;;  %5190 = vset.pattern.permute.xlu0 %v5511_v30  ;;  %v4437_v20 = vld [vmem:[#allocation7 + $0x5d] ss:$0 sm:$0xff]  ;;  %v1697_v30 = vpop.permute.xlu0 %1696  ;;  %v1661_v29 = vmul.f32 %v1660_v28, %v1659_v54 }
 0x217   : > { %v1602_v42 = vadd.f32 %v1601_v58, %v1587_v53  ;;  %5110 = vset.pattern.permute.xlu1 %v5420_v4  ;;  %3407 = vperm.xlu0 %5190, %v6129_v32  }
 0x218   : > { %v1629_v55 = vmax.f32 %v1628_v61, 0.0  ;;  %2207 = vperm.xlu1 %5110, %v6129_v32  }
 0x219   : > { %v1617_v34 = vadd.f32 %v1616_v50, %v1602_v42  ;;  %v1675_v42 = vstv %s6359_s3  ;;  %s6447_s3 = sld [smem:[#allocation9 + $0x6c]] }
 0x21a   : > { %v1637_v52 = vpop.permute.xlu1 %1636  ;;  %v1631_v37 = vmul.f32 %v1630_v45, %v1629_v55  ;;  %v4439_v45 = vld [vmem:[#allocation7 + $0x5e] ss:$0 sm:$0xff]  ;;  %v1703_v55 = vadd.f32 %v4441_v24, %v1697_v30  ;;  %v4445_v30 = vld [vmem:[#allocation7 + $0x61] ss:$0 sm:$0xff] }
 0x21b   : > { %v1643_v41 = vadd.f32 %v4433_v44, %v1637_v52  ;;  %5193 = vset.pattern.permute.xlu0 %v5514_v38  ;;  %v6393_v24 = vld [vmem:[%s5744_s11 + $0x8] sm:$0xff] }
 0x21c   : > { %5111 = vset.pattern.permute.xlu1 %v5417_v1  ;;  %v1632_v53 = vadd.f32 %v1631_v37, %v1617_v34  ;;  %3452 = vperm.xlu0 %5193, %v6129_v32   ;;  %v1690_v34 = vstv %s6367_s23  ;;  %v1704_v37 = vmax.f32 %v1703_v55, 0.0  ;;  %v4449_v55 = vld [vmem:[#allocation7 + $0x63] ss:$0 sm:$0xff]  ;;  %s6455_s23 = sld [smem:[#allocation9 + $0x6d]] }
 0x21d   : > { %v1644_v4 = vmax.f32 %v1643_v41, 0.0  ;;  %2222 = vperm.xlu1 %5111, %v6129_v32   ;;  %v4443_v41 = vld [vmem:[#allocation7 + $0x60] ss:$0 sm:$0xff] }
 0x21f   : > { %v1646_v58 = vmul.f32 %v1645_v36, %v1644_v4  ;;  %v1667_v22 = vpop.permute.xlu1 %1666  ;;  %v1705_v36 = vstv %s6369_s29  ;;  %s6457_s29 = sld [smem:[#allocation9 + $0x6e]] }
 0x220   : > { %v1673_v61 = vadd.f32 %v4437_v20, %v1667_v22  ;;  %5196 = vset.pattern.permute.xlu0 %v5517_v26  ;;  %v4447_v26 = vld [vmem:[#allocation7 + $0x62] ss:$0 sm:$0xff]  ;;  %v1720_v22 = vstv %s6376_s5  ;;  %s6464_s5 = sld [smem:[#allocation9 + $0x6f]] }
 0x221   : > { %v1647_v1 = vadd.f32 %v1646_v58, %v1632_v53  ;;  %5113 = vset.pattern.permute.xlu1 %v5421_v5  ;;  %3497 = vperm.xlu0 %5196, %v6129_v32   ;;  %v1706_v58 = vmul.f32 %v1705_v36, %v1704_v37 }
 0x222   : > { %v1674_v50 = vmax.f32 %v1673_v61, 0.0  ;;  %2252 = vperm.xlu1 %5113, %v6129_v32  }
 0x223   : > { %v1662_v35 = vadd.f32 %v1661_v29, %v1647_v1 }
 0x224   : > { %v1682_v44 = vpop.permute.xlu1 %1681  ;;  %v1676_v52 = vmul.f32 %v1675_v42, %v1674_v50 }
 0x225   : > { %v1688_v38 = vadd.f32 %v4439_v45, %v1682_v44  ;;  %5199 = vset.pattern.permute.xlu0 %v5519_v18  ;;  %v1750_v44 = vstv %s6386_s13  ;;  %s6474_s13 = sld [smem:[#allocation9 + $0x71]] }
 0x226   : > { %5114 = vset.pattern.permute.xlu1 %v5422_v6  ;;  %v1677_v4 = vadd.f32 %v1676_v52, %v1662_v35  ;;  %v1742_v6 = vpop.permute.xlu0 %1741  ;;  %3542 = vperm.xlu0 %5199, %v6129_v32  }
 0x227   : > { %v1689_v5 = vmax.f32 %v1688_v38, 0.0  ;;  %2267 = vperm.xlu1 %5114, %v6129_v32   ;;  %v1748_v1 = vadd.f32 %v4447_v26, %v1742_v6  ;;  %v1780_v6 = vstv %s6404_s15  ;;  %s6489_s15 = sld [smem:[#allocation9 + $0x73]] }
 0x229   : > { %v1691_v54 = vmul.f32 %v1690_v34, %v1689_v5  ;;  %v1712_v20 = vpop.permute.xlu1 %1711  ;;  %v1749_v45 = vmax.f32 %v1748_v1, 0.0  ;;  %v4453_v5 = vld [vmem:[#allocation7 + $0x65] ss:$0 sm:$0xff] }
 0x22a   : > { %v1718_v28 = vadd.f32 %v4443_v41, %v1712_v20  ;;  %5202 = vset.pattern.permute.xlu0 %v5521_v59  ;;  %v1787_v59 = vpop.permute.xlu0 %1786  ;;  %v1765_v41 = vstv %s6396_s12  ;;  %s6481_s12 = sld [smem:[#allocation9 + $0x72]] }
 0x22b   : > { %v1692_v53 = vadd.f32 %v1691_v54, %v1677_v4  ;;  %5116 = vset.pattern.permute.xlu1 %v5425_v9  ;;  %v1735_v9 = vstv %s6384_s7  ;;  %3587 = vperm.xlu0 %5202, %v6393_v24   ;;  %v1751_v37 = vmul.f32 %v1750_v44, %v1749_v45  ;;  %v4451_v4 = vld [vmem:[#allocation7 + $0x64] ss:$0 sm:$0xff]  ;;  %v1793_v54 = vadd.f32 %v4453_v5, %v1787_v59  ;;  %s6472_s7 = sld [smem:[#allocation9 + $0x70]] }
 0x22c   : > { %v1719_v61 = vmax.f32 %v1718_v28, 0.0  ;;  %2297 = vperm.xlu1 %5116, %v6393_v24   ;;  %v1840_v5 = vstv %s6423_s10  ;;  %s6505_s10 = sld [smem:[#allocation9 + $0x77]] }
 0x22d   : > { %v1707_v18 = vadd.f32 %v1706_v58, %v1692_v53  ;;  %v1794_v53 = vmax.f32 %v1793_v54, 0.0  ;;  %v4455_v58 = vld [vmem:[#allocation7 + $0x66] ss:$0 sm:$0xff]  ;;  %v1855_v54 = vstv %s6430_s24  ;;  %s4490_s24 = sld [smem:[#allocation9 + $0x78]] }
 0x22e   : > { %v1727_v29 = vpop.permute.xlu1 %1726  ;;  %v1721_v42 = vmul.f32 %v1720_v22, %v1719_v61  ;;  %v1795_v22 = vstv %s6406_s16  ;;  %s6491_s16 = sld [smem:[#allocation9 + $0x74]] }
 0x22f   : > { %v1733_v50 = vadd.f32 %v4445_v30, %v1727_v29  ;;  %5205 = vset.pattern.permute.xlu0 %v5523_v48 }
 0x230   : > { %5117 = vset.pattern.permute.xlu1 %v5424_v8  ;;  %v1722_v35 = vadd.f32 %v1721_v42, %v1707_v18  ;;  %3632 = vperm.xlu0 %5205, %v6393_v24   ;;  %v4459_v18 = vld [vmem:[#allocation7 + $0x68] ss:$0 sm:$0xff]  ;;  %v1796_v42 = vmul.f32 %v1795_v22, %v1794_v53  ;;  %v1870_v53 = vstv %s6438_s26  ;;  %v4467_v22 = vld [vmem:[#allocation7 + $0x6c] ss:$0 sm:$0xff]  ;;  %s4492_s26 = sld [smem:[#allocation9 + $0x79]] }
 0x231   : > { %v1734_v32 = vmax.f32 %v1733_v50, 0.0  ;;  %2312 = vperm.xlu1 %5117, %v6393_v24   ;;  %v1810_v50 = vstv %s6413_s25  ;;  %s6498_s25 = sld [smem:[#allocation9 + $0x75]] }
 0x233   : > { %v1736_v52 = vmul.f32 %v1735_v9, %v1734_v32  ;;  %v1757_v38 = vpop.permute.xlu1 %1756  ;;  %v4457_v32 = vld [vmem:[#allocation7 + $0x67] ss:$0 sm:$0xff] }
 0x234   : > { %v1763_v34 = vadd.f32 %v4449_v55, %v1757_v38  ;;  %5208 = vset.pattern.permute.xlu0 %v5525_v7  ;;  %v1832_v7 = vpop.permute.xlu0 %1831 }
 0x235   : > { %v1737_v8 = vadd.f32 %v1736_v52, %v1722_v35  ;;  %5119 = vset.pattern.permute.xlu1 %v5429_v13  ;;  %3677 = vperm.xlu0 %5208, %v6393_v24   ;;  %v1838_v45 = vadd.f32 %v4459_v18, %v1832_v7  ;;  %v1825_v52 = vstv %s6421_s9  ;;  %v4471_v7 = vld [vmem:[#allocation7 + $0x6e] ss:$0 sm:$0xff]  ;;  %s4486_s9 = sld [smem:[#allocation9 + $0x76]] }
 0x236   : > { %v1764_v36 = vmax.f32 %v1763_v34, 0.0  ;;  %2342 = vperm.xlu1 %5119, %v6393_v24   ;;  %v4461_v34 = vld [vmem:[#allocation7 + $0x69] ss:$0 sm:$0xff] }
 0x237   : > { %v1752_v28 = vadd.f32 %v1751_v37, %v1737_v8  ;;  %v1839_v38 = vmax.f32 %v1838_v45, 0.0 }
 0x238   : > { %v1772_v20 = vpop.permute.xlu1 %1771  ;;  %v1766_v26 = vmul.f32 %v1765_v41, %v1764_v36  ;;  %v4465_v36 = vld [vmem:[#allocation7 + $0x6b] ss:$0 sm:$0xff] }
 0x239   : > { %v1778_v48 = vadd.f32 %v4451_v4, %v1772_v20  ;;  %5211 = vset.pattern.permute.xlu0 %v5527_v15  ;;  %v1841_v4 = vmul.f32 %v1840_v5, %v1839_v38 }
 0x23a   : > { %5120 = vset.pattern.permute.xlu1 %v5426_v10  ;;  %v1767_v61 = vadd.f32 %v1766_v26, %v1752_v28  ;;  %3722 = vperm.xlu0 %5211, %v6393_v24   ;;  %v4463_v28 = vld [vmem:[#allocation7 + $0x6a] ss:$0 sm:$0xff] }
 0x23b   : > { %v1779_v13 = vmax.f32 %v1778_v48, 0.0  ;;  %2357 = vperm.xlu1 %5120, %v6393_v24  }
 0x23d   : > { %v1781_v30 = vmul.f32 %v1780_v6, %v1779_v13  ;;  %v1802_v1 = vpop.permute.xlu1 %1801 }
 0x23e   : > { %v1808_v29 = vadd.f32 %v4455_v58, %v1802_v1  ;;  %5214 = vset.pattern.permute.xlu0 %v5529_v23  ;;  %v1877_v23 = vpop.permute.xlu0 %1876 }
 0x23f   : > { %v1782_v10 = vadd.f32 %v1781_v30, %v1767_v61  ;;  %5122 = vset.pattern.permute.xlu1 %v5433_v17  ;;  %3767 = vperm.xlu0 %5214, %v6393_v24   ;;  %v1883_v26 = vadd.f32 %v4465_v36, %v1877_v23  ;;  %v1885_v61 = vstv %s6440_s28  ;;  %v1945_v36 = vstv %s6464_s5  ;;  %s6513_s28 = sld [smem:[#allocation9 + $0x7a]]  ;;  %s4502_s5 = sld [smem:[#allocation9 + $0x7e]] }
 0x240   : > { %v1809_v9 = vmax.f32 %v1808_v29, 0.0  ;;  %2387 = vperm.xlu1 %5122, %v6393_v24  }
 0x241   : > { %v1797_v44 = vadd.f32 %v1796_v42, %v1782_v10  ;;  %v1884_v58 = vmax.f32 %v1883_v26, 0.0  ;;  %v1900_v42 = vstv %s6447_s3  ;;  %v1960_v26 = vstv %s6472_s7  ;;  %s4496_s3 = sld [smem:[#allocation9 + $0x7b]]  ;;  %s4504_s7 = sld [smem:[#allocation9 + $0x7f]] }
 0x242   : > { %v1817_v55 = vpop.permute.xlu1 %1816  ;;  %v1811_v35 = vmul.f32 %v1810_v50, %v1809_v9  ;;  %v4469_v9 = vld [vmem:[#allocation7 + $0x6d] ss:$0 sm:$0xff] }
 0x243   : > { %v1823_v15 = vadd.f32 %v4457_v32, %v1817_v55  ;;  %5217 = vset.pattern.permute.xlu0 %v5531_v31  ;;  %v1886_v10 = vmul.f32 %v1885_v61, %v1884_v58 }
 0x244   : > { %5123 = vset.pattern.permute.xlu1 %v5428_v12  ;;  %v1812_v59 = vadd.f32 %v1811_v35, %v1797_v44  ;;  %3812 = vperm.xlu0 %5217, %v6393_v24   ;;  %v1915_v35 = vstv %s6455_s23  ;;  %s4498_s23 = sld [smem:[#allocation9 + $0x7c]] }
 0x245   : > { %v1824_v17 = vmax.f32 %v1823_v15, 0.0  ;;  %2402 = vperm.xlu1 %5123, %v6393_v24  }
 0x247   : > { %v1826_v8 = vmul.f32 %v1825_v52, %v1824_v17  ;;  %v1847_v37 = vpop.permute.xlu1 %1846  ;;  %v4473_v52 = vld [vmem:[#allocation7 + $0x6f] ss:$0 sm:$0xff]  ;;  %v1930_v17 = vstv %s6457_s29  ;;  %s6520_s29 = sld [smem:[#allocation9 + $0x7d]] }
 0x248   : > { %v1853_v41 = vadd.f32 %v4461_v34, %v1847_v37  ;;  %5220 = vset.pattern.permute.xlu0 %v5533_v39  ;;  %v1922_v39 = vpop.permute.xlu0 %1921 }
 0x249   : > { %v1827_v12 = vadd.f32 %v1826_v8, %v1812_v59  ;;  %5125 = vset.pattern.permute.xlu1 %v5437_v21  ;;  %3857 = vperm.xlu0 %5220, %v6393_v24   ;;  %v1928_v32 = vadd.f32 %v4471_v7, %v1922_v39  ;;  %v4477_v8 = vld [vmem:[#allocation7 + $0x71] ss:$0 sm:$0xff]  ;;  %v1990_v7 = vstv %s6481_s12  ;;  %s4508_s12 = sld [smem:[#allocation9 + $0x81]] }
 0x24a   : > { %v1854_v20 = vmax.f32 %v1853_v41, 0.0  ;;  %2432 = vperm.xlu1 %5125, %v6393_v24   ;;  %v6890_v41 = vmov 22  }
 0x24b   : > { %v1842_v6 = vadd.f32 %v1841_v4, %v1827_v12  ;;  %v1929_v15 = vmax.f32 %v1928_v32, 0.0  ;;  %v4475_v12 = vld [vmem:[#allocation7 + $0x70] ss:$0 sm:$0xff]  ;;  %v2005_v32 = vstv %s6489_s15  ;;  %s4510_s15 = sld [smem:[#allocation9 + $0x82]] }
 0x24c   : > { %v1862_v48 = vpop.permute.xlu1 %1861  ;;  %v1856_v13 = vmul.f32 %v1855_v54, %v1854_v20 }
 0x24d   : > { %v1868_v31 = vadd.f32 %v4463_v28, %v1862_v48  ;;  %5223 = vset.pattern.permute.xlu0 %v5535_v47  ;;  %v1931_v37 = vmul.f32 %v1930_v17, %v1929_v15  ;;  %v6891_v48 = vmov 23  }
 0x24e   : > { %5126 = vset.pattern.permute.xlu1 %v5430_v14  ;;  %v1857_v30 = vadd.f32 %v1856_v13, %v1842_v6  ;;  %3902 = vperm.xlu0 %5223, %v6393_v24  }
 0x24f   : > { %v1869_v21 = vmax.f32 %v1868_v31, 0.0  ;;  %2447 = vperm.xlu1 %5126, %v6393_v24   ;;  %v4479_v31 = vld [vmem:[#allocation7 + $0x72] ss:$0 sm:$0xff] }
 0x251   : > { %v1871_v1 = vmul.f32 %v1870_v53, %v1869_v21  ;;  %v1892_v29 = vpop.permute.xlu1 %1891  ;;  %v1975_v53 = vstv %s6474_s13  ;;  %s6527_s13 = sld [smem:[#allocation9 + $0x80]] }
 0x252   : > { %v1898_v18 = vadd.f32 %v4467_v22, %v1892_v29  ;;  %5226 = vset.pattern.permute.xlu0 %v5537_v46  ;;  %v1967_v46 = vpop.permute.xlu0 %1966 }
 0x253   : > { %v1872_v14 = vadd.f32 %v1871_v1, %v1857_v30  ;;  %5128 = vset.pattern.permute.xlu1 %v5441_v25  ;;  %3947 = vperm.xlu0 %5226, %v6393_v24   ;;  %v1973_v4 = vadd.f32 %v4477_v8, %v1967_v46  ;;  %v4483_v30 = vld [vmem:[#allocation7 + $0x74] ss:$0 sm:$0xff]  ;;  %v6894_v8 = vmov 28   ;;  %v2035_v46 = vstv %s6498_s25  ;;  %s4514_s25 = sld [smem:[#allocation9 + $0x84]] }
 0x254   : > { %v1899_v50 = vmax.f32 %v1898_v18, 0.0  ;;  %2477 = vperm.xlu1 %5128, %v6393_v24   ;;  %v6892_v18 = vmov 25  }
 0x255   : > { %v1887_v55 = vadd.f32 %v1886_v10, %v1872_v14  ;;  %v1974_v13 = vmax.f32 %v1973_v4, 0.0  ;;  %v4481_v14 = vld [vmem:[#allocation7 + $0x73] ss:$0 sm:$0xff] }
 0x256   : > { %v1907_v45 = vpop.permute.xlu1 %1906  ;;  %v1901_v44 = vmul.f32 %v1900_v42, %v1899_v50 }
 0x257   : > { %v1913_v47 = vadd.f32 %v4469_v9, %v1907_v45  ;;  %5229 = vset.pattern.permute.xlu0 %v5539_v62  ;;  %v1976_v29 = vmul.f32 %v1975_v53, %v1974_v13  ;;  %v6893_v45 = vmov 26  }
 0x258   : > { %5129 = vset.pattern.permute.xlu1 %v5432_v16  ;;  %v1902_v38 = vadd.f32 %v1901_v44, %v1887_v55  ;;  %3992 = vperm.xlu0 %5229, %v6393_v24  }
 0x259   : > { %v1914_v25 = vmax.f32 %v1913_v47, 0.0  ;;  %2492 = vperm.xlu1 %5129, %v6393_v24   ;;  %v4485_v47 = vld [vmem:[#allocation7 + $0x75] ss:$0 sm:$0xff] }
 0x25b   : > { %v1916_v34 = vmul.f32 %v1915_v35, %v1914_v25  ;;  %v1937_v5 = vpop.permute.xlu1 %1936  ;;  %v2020_v35 = vstv %s6491_s16  ;;  %s6534_s16 = sld [smem:[#allocation9 + $0x83]] }
 0x25c   : > { %v1943_v59 = vadd.f32 %v4473_v52, %v1937_v5  ;;  %5232 = vset.pattern.permute.xlu0 %v5541_v51  ;;  %v2012_v51 = vpop.permute.xlu0 %2011 }
 0x25d   : > { %v1917_v16 = vadd.f32 %v1916_v34, %v1902_v38  ;;  %5131 = vset.pattern.permute.xlu1 %v6890_v41  ;;  %4037 = vperm.xlu0 %5232, %v6393_v24   ;;  %v2018_v10 = vadd.f32 %v4483_v30, %v2012_v51  ;;  %v4489_v38 = vld [vmem:[#allocation7 + $0x77] ss:$0 sm:$0xff]  ;;  %v6896_v30 = vmov 31   ;;  %v2080_v51 = vstv %s4490_s24  ;;  %s4520_s24 = sld [smem:[#allocation9 + $0x87]] }
 0x25e   : > { %v1944_v23 = vmax.f32 %v1943_v59, 0.0  ;;  %2522 = vperm.xlu1 %5131, %v6393_v24  }
 0x25f   : > { %v1932_v20 = vadd.f32 %v1931_v37, %v1917_v16  ;;  %v2019_v44 = vmax.f32 %v2018_v10, 0.0  ;;  %v4487_v37 = vld [vmem:[#allocation7 + $0x76] ss:$0 sm:$0xff] }
 0x260   : > { %v1952_v54 = vpop.permute.xlu1 %1951  ;;  %v1946_v28 = vmul.f32 %v1945_v36, %v1944_v23  ;;  %v2057_v34 = vpop.permute.xlu0 %2056 }
 0x261   : > { %v1958_v62 = vadd.f32 %v4475_v12, %v1952_v54  ;;  %5235 = vset.pattern.permute.xlu0 %v5543_v40  ;;  %v2021_v59 = vmul.f32 %v2020_v35, %v2019_v44  ;;  %v2063_v41 = vadd.f32 %v4489_v38, %v2057_v34  ;;  %v2050_v54 = vstv %s4486_s9  ;;  %s4516_s9 = sld [smem:[#allocation9 + $0x85]] }
 0x262   : > { %5132 = vset.pattern.permute.xlu1 %v6891_v48  ;;  %v1947_v21 = vadd.f32 %v1946_v28, %v1932_v20  ;;  %4082 = vperm.xlu0 %5235, %v6393_v24   ;;  %v6895_v20 = vmov 29   ;;  %v2065_v48 = vstv %s6505_s10  ;;  %v6898_v38 = vmov 34   ;;  %s6541_s10 = sld [smem:[#allocation9 + $0x86]] }
 0x263   : > { %v1959_v6 = vmax.f32 %v1958_v62, 0.0  ;;  %2537 = vperm.xlu1 %5132, %v6393_v24   ;;  %v2064_v62 = vmax.f32 %v2063_v41, 0.0  ;;  %v2125_v34 = vstv %s4496_s3  ;;  %s4526_s3 = sld [smem:[#allocation9 + $0x8a]] }
 0x265   : > { %v1961_v58 = vmul.f32 %v1960_v26, %v1959_v6  ;;  %v1982_v22 = vpop.permute.xlu1 %1981  ;;  %v4491_v26 = vld [vmem:[#allocation7 + $0x78] ss:$0 sm:$0xff] }
 0x266   : > { %v1988_v61 = vadd.f32 %v4479_v31, %v1982_v22  ;;  %5237 = vset.pattern.permute.xlu0 %v5544_v43 }
 0x267   : > { %v1962_v1 = vadd.f32 %v1961_v58, %v1947_v21  ;;  %5134 = vset.pattern.permute.xlu1 %v6892_v18  ;;  %v4495_v21 = vld [vmem:[#allocation7 + $0x7a] ss:$0 sm:$0xff]  ;;  %v2102_v58 = vpop.permute.xlu0 %2101 }
 0x268   : > { %v1989_v39 = vmax.f32 %v1988_v61, 0.0  ;;  %2567 = vperm.xlu1 %5134, %v6393_v24   ;;  %v2066_v61 = vmul.f32 %v2065_v48, %v2064_v62  ;;  %v2108_v18 = vadd.f32 %v4495_v21, %v2102_v58  ;;  %v6900_v21 = vmov 37  }
 0x269   : > { %v1977_v50 = vadd.f32 %v1976_v29, %v1962_v1  ;;  %v4493_v29 = vld [vmem:[#allocation7 + $0x79] ss:$0 sm:$0xff]  ;;  %v2170_v58 = vstv %s4502_s5  ;;  %s4532_s5 = sld [smem:[#allocation9 + $0x8d]] }
 0x26a   : > { %v1997_v42 = vpop.permute.xlu1 %1996  ;;  %v1991_v9 = vmul.f32 %v1990_v7, %v1989_v39 }
 0x26b   : > { %v2003_v40 = vadd.f32 %v4481_v14, %v1997_v42  ;;  %v2095_v42 = vstv %s4492_s26  ;;  %s4522_s26 = sld [smem:[#allocation9 + $0x88]] }
 0x26c   : > { %5135 = vset.pattern.permute.xlu1 %v6893_v45  ;;  %v1992_v25 = vadd.f32 %v1991_v9, %v1977_v50  ;;  %v6897_v50 = vmov 32   ;;  %v2110_v45 = vstv %s6513_s28  ;;  %s6548_s28 = sld [smem:[#allocation9 + $0x89]] }
 0x26d   : > { %v2004_v55 = vmax.f32 %v2003_v40, 0.0  ;;  %2582 = vperm.xlu1 %5135, %v6393_v24   ;;  %v2109_v40 = vmax.f32 %v2108_v18, 0.0 }
 0x26f   : > { %v2006_v15 = vmul.f32 %v2005_v32, %v2004_v55  ;;  %v2027_v52 = vpop.permute.xlu1 %2026  ;;  %v4497_v32 = vld [vmem:[#allocation7 + $0x7b] ss:$0 sm:$0xff] }
 0x270   : > { %v2033_v17 = vadd.f32 %v4485_v47, %v2027_v52 }
 0x271   : > { %v2007_v5 = vadd.f32 %v2006_v15, %v1992_v25  ;;  %5137 = vset.pattern.permute.xlu1 %v6894_v8  ;;  %v4501_v25 = vld [vmem:[#allocation7 + $0x7d] ss:$0 sm:$0xff]  ;;  %v2147_v15 = vpop.permute.xlu0 %2146 }
 0x272   : > { %v2034_v16 = vmax.f32 %v2033_v17, 0.0  ;;  %2612 = vperm.xlu1 %5137, %v6393_v24   ;;  %v2111_v17 = vmul.f32 %v2110_v45, %v2109_v40  ;;  %v2153_v8 = vadd.f32 %v4501_v25, %v2147_v15  ;;  %v6902_v25 = vmov 40  }
 0x273   : > { %v2022_v23 = vadd.f32 %v2021_v59, %v2007_v5  ;;  %v4499_v59 = vld [vmem:[#allocation7 + $0x7c] ss:$0 sm:$0xff]  ;;  %v2216_v15 = vstv %s4508_s12  ;;  %s4538_s12 = sld [smem:[#allocation9 + $0x90]] }
 0x274   : > { %v2042_v36 = vpop.permute.xlu1 %2041  ;;  %v2036_v12 = vmul.f32 %v2035_v46, %v2034_v16 }
 0x275   : > { %v2048_v4 = vadd.f32 %v4487_v37, %v2042_v36  ;;  %v2140_v36 = vstv %s4498_s23  ;;  %s4528_s23 = sld [smem:[#allocation9 + $0x8b]] }
 0x276   : > { %5138 = vset.pattern.permute.xlu1 %v6895_v20  ;;  %v2037_v6 = vadd.f32 %v2036_v12, %v2022_v23  ;;  %v6899_v23 = vmov 35   ;;  %v2155_v20 = vstv %s6520_s29  ;;  %s6555_s29 = sld [smem:[#allocation9 + $0x8c]] }
 0x277   : > { %v2049_v28 = vmax.f32 %v2048_v4, 0.0  ;;  %2627 = vperm.xlu1 %5138, %v6393_v24   ;;  %v2154_v4 = vmax.f32 %v2153_v8, 0.0 }
 0x279   : > { %v2051_v13 = vmul.f32 %v2050_v54, %v2049_v28  ;;  %v2072_v31 = vpop.permute.xlu1 %2071  ;;  %v4503_v54 = vld [vmem:[#allocation7 + $0x7e] ss:$0 sm:$0xff] }
 0x27a   : > { %v2078_v53 = vadd.f32 %v4491_v26, %v2072_v31 }
 0x27b   : > { %v2052_v22 = vadd.f32 %v2051_v13, %v2037_v6  ;;  %5140 = vset.pattern.permute.xlu1 %v6896_v30  ;;  %v4507_v6 = vld [vmem:[#allocation7 + $0x80] ss:$0 sm:$0xff]  ;;  %v2193_v13 = vpop.permute.xlu0 %2192 }
 0x27c   : > { %v2079_v1 = vmax.f32 %v2078_v53, 0.0  ;;  %2657 = vperm.xlu1 %5140, %v6393_v24   ;;  %v2156_v53 = vmul.f32 %v2155_v20, %v2154_v4  ;;  %v2199_v30 = vadd.f32 %v4507_v6, %v2193_v13  ;;  %v6904_v6 = vmov 43  }
 0x27d   : > { %v2067_v39 = vadd.f32 %v2066_v61, %v2052_v22  ;;  %v4505_v61 = vld [vmem:[#allocation7 + $0x7f] ss:$0 sm:$0xff]  ;;  %v2261_v13 = vstv %s4514_s25  ;;  %s4544_s25 = sld [smem:[#allocation9 + $0x93]] }
 0x27e   : > { %v2087_v7 = vpop.permute.xlu1 %2086  ;;  %v2081_v14 = vmul.f32 %v2080_v51, %v2079_v1 }
 0x27f   : > { %v2093_v10 = vadd.f32 %v4493_v29, %v2087_v7  ;;  %v2185_v7 = vstv %s4504_s7  ;;  %s4534_s7 = sld [smem:[#allocation9 + $0x8e]] }
 0x280   : > { %5141 = vset.pattern.permute.xlu1 %v6897_v50  ;;  %v2082_v55 = vadd.f32 %v2081_v14, %v2067_v39  ;;  %v6901_v39 = vmov 38   ;;  %v2201_v50 = vstv %s6527_s13  ;;  %s6562_s13 = sld [smem:[#allocation9 + $0x8f]] }
 0x281   : > { %v2094_v9 = vmax.f32 %v2093_v10, 0.0  ;;  %2672 = vperm.xlu1 %5141, %v6393_v24   ;;  %v2200_v10 = vmax.f32 %v2199_v30, 0.0 }
 0x283   : > { %v2096_v44 = vmul.f32 %v2095_v42, %v2094_v9  ;;  %v2117_v47 = vpop.permute.xlu1 %2116  ;;  %v4509_v42 = vld [vmem:[#allocation7 + $0x81] ss:$0 sm:$0xff] }
 0x284   : > { %v2123_v35 = vadd.f32 %v4497_v32, %v2117_v47 }
 0x285   : > { %v2097_v52 = vadd.f32 %v2096_v44, %v2082_v55  ;;  %5143 = vset.pattern.permute.xlu1 %v6898_v38  ;;  %v4513_v55 = vld [vmem:[#allocation7 + $0x83] ss:$0 sm:$0xff]  ;;  %v2238_v44 = vpop.permute.xlu0 %2237 }
 0x286   : > { %v2124_v5 = vmax.f32 %v2123_v35, 0.0  ;;  %2702 = vperm.xlu1 %5143, %v6393_v24   ;;  %v2202_v35 = vmul.f32 %v2201_v50, %v2200_v10  ;;  %v2244_v38 = vadd.f32 %v4513_v55, %v2238_v44  ;;  %v6906_v55 = vmov 46  }
 0x287   : > { %v2112_v16 = vadd.f32 %v2111_v17, %v2097_v52  ;;  %v4511_v17 = vld [vmem:[#allocation7 + $0x82] ss:$0 sm:$0xff]  ;;  %v2306_v44 = vstv %s4520_s24  ;;  %s6582_s24 = sld [smem:[#allocation9 + $0x96]] }
 0x288   : > { %v2132_v46 = vpop.permute.xlu1 %2131  ;;  %v2126_v37 = vmul.f32 %v2125_v34, %v2124_v5 }
 0x289   : > { %v2138_v41 = vadd.f32 %v4499_v59, %v2132_v46  ;;  %v2231_v46 = vstv %s4510_s15  ;;  %s4540_s15 = sld [smem:[#allocation9 + $0x91]] }
 0x28a   : > { %5144 = vset.pattern.permute.xlu1 %v6899_v23  ;;  %v2127_v28 = vadd.f32 %v2126_v37, %v2112_v16  ;;  %v6903_v16 = vmov 41   ;;  %v2246_v23 = vstv %s6534_s16  ;;  %s6569_s16 = sld [smem:[#allocation9 + $0x92]] }
 0x28b   : > { %v2139_v12 = vmax.f32 %v2138_v41, 0.0  ;;  %2717 = vperm.xlu1 %5144, %v6393_v24   ;;  %v2245_v41 = vmax.f32 %v2244_v38, 0.0 }
 0x28d   : > { %v2141_v62 = vmul.f32 %v2140_v36, %v2139_v12  ;;  %v2162_v26 = vpop.permute.xlu1 %2161  ;;  %v4515_v36 = vld [vmem:[#allocation7 + $0x84] ss:$0 sm:$0xff] }
 0x28e   : > { %v2168_v48 = vadd.f32 %v4503_v54, %v2162_v26 }
 0x28f   : > { %v2142_v31 = vadd.f32 %v2141_v62, %v2127_v28  ;;  %5146 = vset.pattern.permute.xlu1 %v6900_v21  ;;  %v4519_v28 = vld [vmem:[#allocation7 + $0x86] ss:$0 sm:$0xff]  ;;  %v2283_v62 = vpop.permute.xlu0 %2282 }
 0x290   : > { %v2169_v22 = vmax.f32 %v2168_v48, 0.0  ;;  %2747 = vperm.xlu1 %5146, %v6393_v24   ;;  %v2247_v48 = vmul.f32 %v2246_v23, %v2245_v41  ;;  %v2289_v21 = vadd.f32 %v4519_v28, %v2283_v62  ;;  %v6908_v28 = vmov 49  }
 0x291   : > { %v2157_v1 = vadd.f32 %v2156_v53, %v2142_v31  ;;  %v4517_v53 = vld [vmem:[#allocation7 + $0x85] ss:$0 sm:$0xff]  ;;  %v2351_v62 = vstv %s4526_s3  ;;  %s4556_s3 = sld [smem:[#allocation9 + $0x99]] }
 0x292   : > { %v2177_v51 = vpop.permute.xlu1 %2176  ;;  %v2171_v29 = vmul.f32 %v2170_v58, %v2169_v22 }
 0x293   : > { %v2183_v18 = vadd.f32 %v4505_v61, %v2177_v51  ;;  %v2276_v51 = vstv %s4516_s9  ;;  %s6576_s9 = sld [smem:[#allocation9 + $0x94]] }
 0x294   : > { %5147 = vset.pattern.permute.xlu1 %v6901_v39  ;;  %v2172_v9 = vadd.f32 %v2171_v29, %v2157_v1  ;;  %v6905_v1 = vmov 44   ;;  %v2291_v39 = vstv %s6541_s10  ;;  %s6578_s10 = sld [smem:[#allocation9 + $0x95]] }
 0x295   : > { %v2184_v14 = vmax.f32 %v2183_v18, 0.0  ;;  %2762 = vperm.xlu1 %5147, %v6393_v24   ;;  %v2290_v18 = vmax.f32 %v2289_v21, 0.0 }
 0x297   : > { %v2186_v40 = vmul.f32 %v2185_v7, %v2184_v14  ;;  %v2208_v32 = vpop.permute.xlu1 %2207  ;;  %v4521_v7 = vld [vmem:[#allocation7 + $0x87] ss:$0 sm:$0xff] }
 0x298   : > { %v2214_v45 = vadd.f32 %v4509_v42, %v2208_v32 }
 0x299   : > { %v2187_v47 = vadd.f32 %v2186_v40, %v2172_v9  ;;  %5149 = vset.pattern.permute.xlu1 %v6902_v25  ;;  %v4525_v9 = vld [vmem:[#allocation7 + $0x89] ss:$0 sm:$0xff]  ;;  %v2328_v40 = vpop.permute.xlu0 %2327 }
 0x29a   : > { %v2215_v52 = vmax.f32 %v2214_v45, 0.0  ;;  %2792 = vperm.xlu1 %5149, %v6393_v24   ;;  %v2292_v45 = vmul.f32 %v2291_v39, %v2290_v18  ;;  %v2334_v25 = vadd.f32 %v4525_v9, %v2328_v40  ;;  %v6910_v9 = vmov 52  }
 0x29b   : > { %v2203_v5 = vadd.f32 %v2202_v35, %v2187_v47  ;;  %v4523_v35 = vld [vmem:[#allocation7 + $0x88] ss:$0 sm:$0xff]  ;;  %v2396_v40 = vstv %s4532_s5  ;;  %s4562_s5 = sld [smem:[#allocation9 + $0x9c]] }
 0x29c   : > { %v2223_v34 = vpop.permute.xlu1 %2222  ;;  %v2217_v59 = vmul.f32 %v2216_v15, %v2215_v52 }
 0x29d   : > { %v2229_v8 = vadd.f32 %v4511_v17, %v2223_v34  ;;  %v2321_v34 = vstv %s4522_s26  ;;  %s6591_s26 = sld [smem:[#allocation9 + $0x97]] }
 0x29e   : > { %5150 = vset.pattern.permute.xlu1 %v6903_v16  ;;  %v2218_v12 = vadd.f32 %v2217_v59, %v2203_v5  ;;  %v6907_v5 = vmov 47   ;;  %v2336_v16 = vstv %s6548_s28  ;;  %s6593_s28 = sld [smem:[#allocation9 + $0x98]] }
 0x29f   : > { %v2230_v37 = vmax.f32 %v2229_v8, 0.0  ;;  %2807 = vperm.xlu1 %5150, %v6393_v24   ;;  %v2335_v8 = vmax.f32 %v2334_v25, 0.0 }
 0x2a1   : > { %v2232_v4 = vmul.f32 %v2231_v46, %v2230_v37  ;;  %v2253_v54 = vpop.permute.xlu1 %2252  ;;  %v4527_v46 = vld [vmem:[#allocation7 + $0x8a] ss:$0 sm:$0xff] }
 0x2a2   : > { %v2259_v20 = vadd.f32 %v4515_v36, %v2253_v54 }
 0x2a3   : > { %v2233_v26 = vadd.f32 %v2232_v4, %v2218_v12  ;;  %5152 = vset.pattern.permute.xlu1 %v6904_v6  ;;  %v4531_v12 = vld [vmem:[#allocation7 + $0x8c] ss:$0 sm:$0xff]  ;;  %v2373_v4 = vpop.permute.xlu0 %2372 }
 0x2a4   : > { %v2260_v31 = vmax.f32 %v2259_v20, 0.0  ;;  %2837 = vperm.xlu1 %5152, %v6393_v24   ;;  %v2337_v20 = vmul.f32 %v2336_v16, %v2335_v8  ;;  %v2379_v6 = vadd.f32 %v4531_v12, %v2373_v4  ;;  %v6912_v12 = vmov 55  }
 0x2a5   : > { %v2248_v22 = vadd.f32 %v2247_v48, %v2233_v26  ;;  %v4529_v48 = vld [vmem:[#allocation7 + $0x8b] ss:$0 sm:$0xff]  ;;  %v2441_v4 = vstv %s4538_s12  ;;  %s4568_s12 = sld [smem:[#allocation9 + $0x9f]] }
 0x2a6   : > { %v2268_v58 = vpop.permute.xlu1 %2267  ;;  %v2262_v61 = vmul.f32 %v2261_v13, %v2260_v31 }
 0x2a7   : > { %v2274_v30 = vadd.f32 %v4517_v53, %v2268_v58  ;;  %v2366_v58 = vstv %s4528_s23  ;;  %s6602_s23 = sld [smem:[#allocation9 + $0x9a]] }
 0x2a8   : > { %5153 = vset.pattern.permute.xlu1 %v6905_v1  ;;  %v2263_v14 = vadd.f32 %v2262_v61, %v2248_v22  ;;  %v6909_v22 = vmov 50   ;;  %v2381_v1 = vstv %s6555_s29  ;;  %s6604_s29 = sld [smem:[#allocation9 + $0x9b]] }
 0x2a9   : > { %v2275_v29 = vmax.f32 %v2274_v30, 0.0  ;;  %2852 = vperm.xlu1 %5153, %v6393_v24   ;;  %v2380_v30 = vmax.f32 %v2379_v6, 0.0 }
 0x2ab   : > { %v2277_v10 = vmul.f32 %v2276_v51, %v2275_v29  ;;  %v2298_v42 = vpop.permute.xlu1 %2297  ;;  %v4533_v51 = vld [vmem:[#allocation7 + $0x8d] ss:$0 sm:$0xff] }
 0x2ac   : > { %v2304_v50 = vadd.f32 %v4521_v7, %v2298_v42 }
 0x2ad   : > { %v2278_v32 = vadd.f32 %v2277_v10, %v2263_v14  ;;  %5155 = vset.pattern.permute.xlu1 %v6906_v55  ;;  %v4537_v14 = vld [vmem:[#allocation7 + $0x8f] ss:$0 sm:$0xff]  ;;  %v2418_v10 = vpop.permute.xlu0 %2417 }
 0x2ae   : > { %v2305_v47 = vmax.f32 %v2304_v50, 0.0  ;;  %2882 = vperm.xlu1 %5155, %v6393_v24   ;;  %v2382_v50 = vmul.f32 %v2381_v1, %v2380_v30  ;;  %v2424_v55 = vadd.f32 %v4537_v14, %v2418_v10  ;;  %v6914_v14 = vmov 58  }
 0x2af   : > { %v2293_v52 = vadd.f32 %v2292_v45, %v2278_v32  ;;  %v4535_v45 = vld [vmem:[#allocation7 + $0x8e] ss:$0 sm:$0xff]  ;;  %v2486_v10 = vstv %s4544_s25  ;;  %s4574_s25 = sld [smem:[#allocation9 + $0xa2]] }
 0x2b0   : > { %v2313_v15 = vpop.permute.xlu1 %2312  ;;  %v2307_v17 = vmul.f32 %v2306_v44, %v2305_v47 }
 0x2b1   : > { %v2319_v38 = vadd.f32 %v4523_v35, %v2313_v15  ;;  %v2411_v15 = vstv %s4534_s7  ;;  %s4564_s7 = sld [smem:[#allocation9 + $0x9d]] }
 0x2b2   : > { %5156 = vset.pattern.permute.xlu1 %v6907_v5  ;;  %v2308_v37 = vadd.f32 %v2307_v17, %v2293_v52  ;;  %v6911_v52 = vmov 53   ;;  %v2426_v5 = vstv %s6562_s13  ;;  %s4566_s13 = sld [smem:[#allocation9 + $0x9e]] }
 0x2b3   : > { %v2320_v59 = vmax.f32 %v2319_v38, 0.0  ;;  %2897 = vperm.xlu1 %5156, %v6393_v24   ;;  %v2425_v38 = vmax.f32 %v2424_v55, 0.0 }
 0x2b5   : > { %v2322_v41 = vmul.f32 %v2321_v34, %v2320_v59  ;;  %v2343_v36 = vpop.permute.xlu1 %2342  ;;  %v4539_v34 = vld [vmem:[#allocation7 + $0x90] ss:$0 sm:$0xff] }
 0x2b6   : > { %v2349_v23 = vadd.f32 %v4527_v46, %v2343_v36 }
 0x2b7   : > { %v2323_v54 = vadd.f32 %v2322_v41, %v2308_v37  ;;  %5158 = vset.pattern.permute.xlu1 %v6908_v28  ;;  %v4543_v37 = vld [vmem:[#allocation7 + $0x92] ss:$0 sm:$0xff]  ;;  %v2463_v41 = vpop.permute.xlu0 %2462 }
 0x2b8   : > { %v2350_v26 = vmax.f32 %v2349_v23, 0.0  ;;  %2927 = vperm.xlu1 %5158, %v6393_v24   ;;  %v2427_v23 = vmul.f32 %v2426_v5, %v2425_v38  ;;  %v2469_v28 = vadd.f32 %v4543_v37, %v2463_v41  ;;  %v6916_v37 = vmov 61  }
 0x2b9   : > { %v2338_v31 = vadd.f32 %v2337_v20, %v2323_v54  ;;  %v4541_v20 = vld [vmem:[#allocation7 + $0x91] ss:$0 sm:$0xff]  ;;  %v2531_v41 = vstv %s6582_s24  ;;  %s4580_s24 = sld [smem:[#allocation9 + $0xa5]] }
 0x2ba   : > { %v2358_v13 = vpop.permute.xlu1 %2357  ;;  %v2352_v53 = vmul.f32 %v2351_v62, %v2350_v26 }
 0x2bb   : > { %v2364_v21 = vadd.f32 %v4529_v48, %v2358_v13  ;;  %v2456_v13 = vstv %s4540_s15  ;;  %s4570_s15 = sld [smem:[#allocation9 + $0xa0]] }
 0x2bc   : > { %5159 = vset.pattern.permute.xlu1 %v6909_v22  ;;  %v2353_v29 = vadd.f32 %v2352_v53, %v2338_v31  ;;  %v6913_v31 = vmov 56   ;;  %v2471_v22 = vstv %s6569_s16  ;;  %s4572_s16 = sld [smem:[#allocation9 + $0xa1]] }
 0x2bd   : > { %v2365_v61 = vmax.f32 %v2364_v21, 0.0  ;;  %2942 = vperm.xlu1 %5159, %v6393_v24   ;;  %v2470_v21 = vmax.f32 %v2469_v28, 0.0 }
 0x2bf   : > { %v2367_v18 = vmul.f32 %v2366_v58, %v2365_v61  ;;  %v2388_v7 = vpop.permute.xlu1 %2387  ;;  %v4545_v58 = vld [vmem:[#allocation7 + $0x93] ss:$0 sm:$0xff] }
 0x2c0   : > { %v2394_v39 = vadd.f32 %v4533_v51, %v2388_v7 }
 0x2c1   : > { %v2368_v42 = vadd.f32 %v2367_v18, %v2353_v29  ;;  %5161 = vset.pattern.permute.xlu1 %v6910_v9  ;;  %v4549_v29 = vld [vmem:[#allocation7 + $0x95] ss:$0 sm:$0xff]  ;;  %v2508_v18 = vpop.permute.xlu0 %2507 }
 0x2c2   : > { %v2395_v32 = vmax.f32 %v2394_v39, 0.0  ;;  %2972 = vperm.xlu1 %5161, %v6393_v24   ;;  %v2472_v39 = vmul.f32 %v2471_v22, %v2470_v21  ;;  %v2514_v9 = vadd.f32 %v4549_v29, %v2508_v18  ;;  %v6918_v29 = vmov 64  }
 0x2c3   : > { %v2383_v47 = vadd.f32 %v2382_v50, %v2368_v42  ;;  %v4547_v50 = vld [vmem:[#allocation7 + $0x94] ss:$0 sm:$0xff] }
 0x2c4   : > { %v2403_v44 = vpop.permute.xlu1 %2402  ;;  %v2397_v35 = vmul.f32 %v2396_v40, %v2395_v32 }
 0x2c5   : > { %v2409_v25 = vadd.f32 %v4535_v45, %v2403_v44  ;;  %v2501_v44 = vstv %s6576_s9  ;;  %s4576_s9 = sld [smem:[#allocation9 + $0xa3]] }
 0x2c6   : > { %5162 = vset.pattern.permute.xlu1 %v6911_v52  ;;  %v2398_v59 = vadd.f32 %v2397_v35, %v2383_v47  ;;  %v6915_v47 = vmov 59   ;;  %v4551_v52 = vld [vmem:[#allocation7 + $0x96] ss:$0 sm:$0xff] }
 0x2c7   : > { %v2410_v17 = vmax.f32 %v2409_v25, 0.0  ;;  %2987 = vperm.xlu1 %5162, %v6393_v24   ;;  %v2515_v25 = vmax.f32 %v2514_v9, 0.0 }
 0x2c9   : > { %v2412_v8 = vmul.f32 %v2411_v15, %v2410_v17  ;;  %v2433_v46 = vpop.permute.xlu1 %2432  ;;  %v6587_v15 = vld [vmem:[%s5744_s11 + $0x8] sm:$0xff] }
 0x2ca   : > { %v2439_v16 = vadd.f32 %v4539_v34, %v2433_v46 }
 0x2cb   : > { %v2413_v36 = vadd.f32 %v2412_v8, %v2398_v59  ;;  %5164 = vset.pattern.permute.xlu1 %v6912_v12  ;;  %v4555_v59 = vld [vmem:[#allocation7 + $0x98] ss:$0 sm:$0xff]  ;;  %v2553_v8 = vpop.permute.xlu0 %2552 }
 0x2cc   : > { %v2440_v54 = vmax.f32 %v2439_v16, 0.0  ;;  %3017 = vperm.xlu1 %5164, %v6393_v24   ;;  %v2559_v12 = vadd.f32 %v4555_v59, %v2553_v8  ;;  %v2621_v59 = vstv %s4562_s5  ;;  %v6920_v8 = vmov 67   ;;  %s4592_s5 = sld [smem:[#allocation9 + $0xab]] }
 0x2cd   : > { %v2428_v26 = vadd.f32 %v2427_v23, %v2413_v36  ;;  %v4553_v23 = vld [vmem:[#allocation7 + $0x97] ss:$0 sm:$0xff] }
 0x2ce   : > { %v2448_v62 = vpop.permute.xlu1 %2447  ;;  %v2442_v48 = vmul.f32 %v2441_v4, %v2440_v54 }
 0x2cf   : > { %v2454_v6 = vadd.f32 %v4541_v20, %v2448_v62  ;;  %v2546_v62 = vstv %s6591_s26  ;;  %v2598_v21 = vpop.permute.xlu0 %2597  ;;  %s4582_s26 = sld [smem:[#allocation9 + $0xa6]] }
 0x2d0   : > { %5165 = vset.pattern.permute.xlu1 %v6913_v31  ;;  %v2443_v61 = vadd.f32 %v2442_v48, %v2428_v26  ;;  %v6917_v26 = vmov 62   ;;  %v2561_v31 = vstv %s6593_s28  ;;  %s6627_s28 = sld [smem:[#allocation9 + $0xa7]] }
 0x2d1   : > { %v2455_v53 = vmax.f32 %v2454_v6, 0.0  ;;  %3032 = vperm.xlu1 %5165, %v6393_v24   ;;  %v2560_v6 = vmax.f32 %v2559_v12, 0.0 }
 0x2d3   : > { %v2457_v30 = vmul.f32 %v2456_v13, %v2455_v53  ;;  %v2478_v51 = vpop.permute.xlu1 %2477  ;;  %v4557_v13 = vld [vmem:[#allocation7 + $0x99] ss:$0 sm:$0xff]  ;;  %v4561_v53 = vld [vmem:[#allocation7 + $0x9b] ss:$0 sm:$0xff] }
 0x2d4   : > { %v2484_v1 = vadd.f32 %v4545_v58, %v2478_v51  ;;  %v2604_v18 = vadd.f32 %v4561_v53, %v2598_v21  ;;  %v4573_v21 = vld [vmem:[#allocation7 + $0xa1] ss:$0 sm:$0xff] }
 0x2d5   : > { %v2458_v7 = vadd.f32 %v2457_v30, %v2443_v61  ;;  %5167 = vset.pattern.permute.xlu1 %v6914_v14  ;;  %v4559_v14 = vld [vmem:[#allocation7 + $0x9a] ss:$0 sm:$0xff] }
 0x2d6   : > { %v2485_v42 = vmax.f32 %v2484_v1, 0.0  ;;  %3062 = vperm.xlu1 %5167, %v6393_v24   ;;  %v2516_v24 = vstv %s6578_s10  ;;  %v2562_v1 = vmul.f32 %v2561_v31, %v2560_v6  ;;  %s6620_s10 = sld [smem:[#allocation9 + $0xa4]] }
 0x2d7   : > { %v2473_v32 = vadd.f32 %v2472_v39, %v2458_v7  ;;  %v2517_v16 = vmul.f32 %v2516_v24, %v2515_v25  ;;  %v2576_v7 = vstv %s4556_s3  ;;  %v2643_v25 = vpop.permute.xlu0 %2642  ;;  %s4586_s3 = sld [smem:[#allocation9 + $0xa8]] }
 0x2d8   : > { %v2493_v40 = vpop.permute.xlu1 %2492  ;;  %v2487_v45 = vmul.f32 %v2486_v10, %v2485_v42 }
 0x2d9   : > { %v2499_v55 = vadd.f32 %v4547_v50, %v2493_v40  ;;  %v2605_v40 = vmax.f32 %v2604_v18, 0.0 }
 0x2da   : > { %5168 = vset.pattern.permute.xlu1 %v6915_v47  ;;  %v2488_v17 = vadd.f32 %v2487_v45, %v2473_v32  ;;  %v2591_v32 = vstv %s6602_s23  ;;  %v6919_v45 = vmov 65   ;;  %v4563_v47 = vld [vmem:[#allocation7 + $0x9c] ss:$0 sm:$0xff]  ;;  %s4588_s23 = sld [smem:[#allocation9 + $0xa9]] }
 0x2db   : > { %v2500_v35 = vmax.f32 %v2499_v55, 0.0  ;;  %3077 = vperm.xlu1 %5168, %v6587_v15   ;;  %v2606_v55 = vstv %s6604_s29  ;;  %s6634_s29 = sld [smem:[#allocation9 + $0xaa]] }
 0x2dd   : > { %v2502_v38 = vmul.f32 %v2501_v44, %v2500_v35  ;;  %v2523_v34 = vpop.permute.xlu1 %2522  ;;  %v4567_v35 = vld [vmem:[#allocation7 + $0x9e] ss:$0 sm:$0xff] }
 0x2de   : > { %v2529_v5 = vadd.f32 %v4551_v52, %v2523_v34 }
 0x2df   : > { %v2503_v46 = vadd.f32 %v2502_v38, %v2488_v17  ;;  %5170 = vset.pattern.permute.xlu1 %v6916_v37  ;;  %v2607_v17 = vmul.f32 %v2606_v55, %v2605_v40  ;;  %v4565_v37 = vld [vmem:[#allocation7 + $0x9d] ss:$0 sm:$0xff] }
 0x2e0   : > { %v2530_v36 = vmax.f32 %v2529_v5, 0.0  ;;  %3107 = vperm.xlu1 %5170, %v6587_v15  }
 0x2e1   : > { %v2518_v54 = vadd.f32 %v2517_v16, %v2503_v46  ;;  %v2649_v46 = vadd.f32 %v4567_v35, %v2643_v25  ;;  %v4579_v35 = vld [vmem:[#allocation7 + $0xa4] ss:$0 sm:$0xff] }
 0x2e2   : > { %v2538_v4 = vpop.permute.xlu1 %2537  ;;  %v2532_v20 = vmul.f32 %v2531_v41, %v2530_v36 }
 0x2e3   : > { %v2544_v28 = vadd.f32 %v4553_v23, %v2538_v4  ;;  %v2650_v4 = vmax.f32 %v2649_v46, 0.0 }
 0x2e4   : > { %5171 = vset.pattern.permute.xlu1 %v6917_v26  ;;  %v2533_v58 = vadd.f32 %v2532_v20, %v2518_v54  ;;  %v2636_v20 = vstv %s4564_s7  ;;  %s4594_s7 = sld [smem:[#allocation9 + $0xac]] }
 0x2e5   : > { %v2545_v48 = vmax.f32 %v2544_v28, 0.0  ;;  %3122 = vperm.xlu1 %5171, %v6587_v15   ;;  %v6921_v28 = vmov 68  }
 0x2e7   : > { %v2547_v22 = vmul.f32 %v2546_v62, %v2545_v48  ;;  %v2568_v61 = vpop.permute.xlu1 %2567  ;;  %v2651_v62 = vstv %s4566_s13  ;;  %v4569_v48 = vld [vmem:[#allocation7 + $0x9f] ss:$0 sm:$0xff]  ;;  %s6641_s13 = sld [smem:[#allocation9 + $0xad]] }
 0x2e8   : > { %v2574_v30 = vadd.f32 %v4557_v13, %v2568_v61  ;;  %v2652_v13 = vmul.f32 %v2651_v62, %v2650_v4  ;;  %v2666_v61 = vstv %s4568_s12  ;;  %v4581_v4 = vld [vmem:[#allocation7 + $0xa5] ss:$0 sm:$0xff]  ;;  %s4598_s12 = sld [smem:[#allocation9 + $0xae]] }
 0x2e9   : > { %v2548_v51 = vadd.f32 %v2547_v22, %v2533_v58  ;;  %5173 = vset.pattern.permute.xlu1 %v6918_v29  ;;  %v2688_v58 = vpop.permute.xlu0 %2687 }
 0x2ea   : > { %v2575_v39 = vmax.f32 %v2574_v30, 0.0  ;;  %3152 = vperm.xlu1 %5173, %v6587_v15   ;;  %v6922_v30 = vmov 70   ;;  %v2694_v18 = vadd.f32 %v4573_v21, %v2688_v58  ;;  %v2756_v21 = vstv %s4580_s24  ;;  %s4610_s24 = sld [smem:[#allocation9 + $0xb4]] }
 0x2eb   : > { %v2563_v42 = vadd.f32 %v2562_v1, %v2548_v51  ;;  %v4571_v1 = vld [vmem:[#allocation7 + $0xa0] ss:$0 sm:$0xff] }
 0x2ec   : > { %v2583_v10 = vpop.permute.xlu1 %2582  ;;  %v2577_v50 = vmul.f32 %v2576_v7, %v2575_v39  ;;  %v2695_v40 = vmax.f32 %v2694_v18, 0.0  ;;  %v2771_v18 = vstv %s4582_s26  ;;  %s4612_s26 = sld [smem:[#allocation9 + $0xb5]] }
 0x2ed   : > { %v2589_v9 = vadd.f32 %v4559_v14, %v2583_v10  ;;  %v2733_v25 = vpop.permute.xlu0 %2732 }
 0x2ee   : > { %5174 = vset.pattern.permute.xlu1 %v6919_v45  ;;  %v2578_v52 = vadd.f32 %v2577_v50, %v2563_v42  ;;  %v2681_v42 = vstv %s4570_s15  ;;  %v6923_v50 = vmov 71   ;;  %v2696_v45 = vstv %s4572_s16  ;;  %s4600_s15 = sld [smem:[#allocation9 + $0xaf]]  ;;  %s6648_s16 = sld [smem:[#allocation9 + $0xb0]] }
 0x2ef   : > { %v2590_v44 = vmax.f32 %v2589_v9, 0.0  ;;  %3167 = vperm.xlu1 %5174, %v6587_v15  }
 0x2f1   : > { %v2592_v24 = vmul.f32 %v2591_v32, %v2590_v44  ;;  %v2613_v38 = vpop.permute.xlu1 %2612  ;;  %v4575_v32 = vld [vmem:[#allocation7 + $0xa2] ss:$0 sm:$0xff] }
 0x2f2   : > { %v2619_v34 = vadd.f32 %v4563_v47, %v2613_v38  ;;  %v2711_v38 = vstv %s4574_s25  ;;  %s4604_s25 = sld [smem:[#allocation9 + $0xb1]] }
 0x2f3   : > { %v2593_v5 = vadd.f32 %v2592_v24, %v2578_v52  ;;  %5176 = vset.pattern.permute.xlu1 %v6920_v8  ;;  %v2697_v24 = vmul.f32 %v2696_v45, %v2695_v40  ;;  %v4591_v45 = vld [vmem:[#allocation7 + $0xaa] ss:$0 sm:$0xff] }
 0x2f4   : > { %v2620_v16 = vmax.f32 %v2619_v34, 0.0  ;;  %3197 = vperm.xlu1 %5176, %v6587_v15  }
 0x2f5   : > { %v2608_v41 = vadd.f32 %v2607_v17, %v2593_v5  ;;  %v6924_v17 = vmov 73   ;;  %v4577_v5 = vld [vmem:[#allocation7 + $0xa3] ss:$0 sm:$0xff] }
 0x2f6   : > { %v2622_v36 = vmul.f32 %v2621_v59, %v2620_v16  ;;  %v2628_v23 = vpop.permute.xlu1 %2627  ;;  %v2739_v59 = vadd.f32 %v4579_v35, %v2733_v25  ;;  %v6928_v35 = vmov 79   ;;  %v2801_v25 = vstv %s4586_s3  ;;  %s4616_s3 = sld [smem:[#allocation9 + $0xb7]] }
 0x2f7   : > { %v2634_v12 = vadd.f32 %v4565_v37, %v2628_v23 }
 0x2f8   : > { %v2623_v54 = vadd.f32 %v2622_v36, %v2608_v41  ;;  %5177 = vset.pattern.permute.xlu1 %v6921_v28  ;;  %v2726_v41 = vstv %s4576_s9  ;;  %v6925_v36 = vmov 74   ;;  %s4606_s9 = sld [smem:[#allocation9 + $0xb2]] }
 0x2f9   : > { %v2635_v26 = vmax.f32 %v2634_v12, 0.0  ;;  %3212 = vperm.xlu1 %5177, %v6587_v15   ;;  %v2740_v12 = vmax.f32 %v2739_v59, 0.0 }
 0x2fb   : > { %v2637_v6 = vmul.f32 %v2636_v20, %v2635_v26  ;;  %v2658_v31 = vpop.permute.xlu1 %2657 }
 0x2fc   : > { %v2664_v53 = vadd.f32 %v4569_v48, %v2658_v31  ;;  %v4585_v48 = vld [vmem:[#allocation7 + $0xa7] ss:$0 sm:$0xff] }
 0x2fd   : > { %v2638_v22 = vadd.f32 %v2637_v6, %v2623_v54  ;;  %5179 = vset.pattern.permute.xlu1 %v6922_v30  ;;  %v2741_v54 = vstv %s6620_s10  ;;  %v2778_v6 = vpop.permute.xlu0 %2777  ;;  %s6655_s10 = sld [smem:[#allocation9 + $0xb3]] }
 0x2fe   : > { %v2665_v51 = vmax.f32 %v2664_v53, 0.0  ;;  %3242 = vperm.xlu1 %5179, %v6587_v15   ;;  %v2742_v31 = vmul.f32 %v2741_v54, %v2740_v12  ;;  %v6926_v53 = vmov 76  }
 0x2ff   : > { %v2653_v29 = vadd.f32 %v2652_v13, %v2638_v22  ;;  %v4583_v22 = vld [vmem:[#allocation7 + $0xa6] ss:$0 sm:$0xff] }
 0x300   : > { %v2667_v7 = vmul.f32 %v2666_v61, %v2665_v51  ;;  %v2673_v39 = vpop.permute.xlu1 %2672  ;;  %v2784_v61 = vadd.f32 %v4585_v48, %v2778_v6  ;;  %v6930_v48 = vmov 82   ;;  %v2846_v6 = vstv %s4592_s5  ;;  %s4622_s5 = sld [smem:[#allocation9 + $0xba]] }
 0x301   : > { %v2679_v14 = vadd.f32 %v4571_v1, %v2673_v39 }
 0x302   : > { %v2668_v10 = vadd.f32 %v2667_v7, %v2653_v29  ;;  %5180 = vset.pattern.permute.xlu1 %v6923_v50  ;;  %v6927_v7 = vmov 77  }
 0x303   : > { %v2680_v9 = vmax.f32 %v2679_v14, 0.0  ;;  %3257 = vperm.xlu1 %5180, %v6587_v15   ;;  %v2785_v14 = vmax.f32 %v2784_v61, 0.0 }
 0x305   : > { %v2682_v55 = vmul.f32 %v2681_v42, %v2680_v9  ;;  %v2703_v44 = vpop.permute.xlu1 %2702  ;;  %v2786_v42 = vstv %s6627_s28  ;;  %s6662_s28 = sld [smem:[#allocation9 + $0xb6]] }
 0x306   : > { %v2709_v47 = vadd.f32 %v4575_v32, %v2703_v44 }
 0x307   : > { %v2683_v52 = vadd.f32 %v2682_v55, %v2668_v10  ;;  %5182 = vset.pattern.permute.xlu1 %v6924_v17  ;;  %v4587_v10 = vld [vmem:[#allocation7 + $0xa8] ss:$0 sm:$0xff]  ;;  %v2823_v55 = vpop.permute.xlu0 %2822 }
 0x308   : > { %v2710_v34 = vmax.f32 %v2709_v47, 0.0  ;;  %3287 = vperm.xlu1 %5182, %v6587_v15   ;;  %v2787_v47 = vmul.f32 %v2786_v42, %v2785_v14  ;;  %v2829_v17 = vadd.f32 %v4591_v45, %v2823_v55  ;;  %v2891_v45 = vstv %s4598_s12  ;;  %s4628_s12 = sld [smem:[#allocation9 + $0xbd]] }
 0x309   : > { %v2698_v46 = vadd.f32 %v2697_v24, %v2683_v52  ;;  %v4589_v24 = vld [vmem:[#allocation7 + $0xa9] ss:$0 sm:$0xff] }
 0x30a   : > { %v2718_v8 = vpop.permute.xlu1 %2717  ;;  %v2712_v16 = vmul.f32 %v2711_v38, %v2710_v34 }
 0x30b   : > { %v2724_v37 = vadd.f32 %v4577_v5, %v2718_v8  ;;  %v2816_v8 = vstv %s4588_s23  ;;  %s4618_s23 = sld [smem:[#allocation9 + $0xb8]] }
 0x30c   : > { %5183 = vset.pattern.permute.xlu1 %v6925_v36  ;;  %v2713_v20 = vadd.f32 %v2712_v16, %v2698_v46  ;;  %v6929_v46 = vmov 80   ;;  %v2831_v36 = vstv %s6634_s29  ;;  %s6669_s29 = sld [smem:[#allocation9 + $0xb9]] }
 0x30d   : > { %v2725_v23 = vmax.f32 %v2724_v37, 0.0  ;;  %3302 = vperm.xlu1 %5183, %v6587_v15   ;;  %v2830_v37 = vmax.f32 %v2829_v17, 0.0  ;;  %v2906_v17 = vstv %s4600_s15  ;;  %s4630_s15 = sld [smem:[#allocation9 + $0xbe]] }
 0x30f   : > { %v2727_v28 = vmul.f32 %v2726_v41, %v2725_v23  ;;  %v2748_v62 = vpop.permute.xlu1 %2747  ;;  %v4593_v41 = vld [vmem:[#allocation7 + $0xab] ss:$0 sm:$0xff] }
 0x310   : > { %v2754_v26 = vadd.f32 %v4581_v4, %v2748_v62 }
 0x311   : > { %v2728_v13 = vadd.f32 %v2727_v28, %v2713_v20  ;;  %5185 = vset.pattern.permute.xlu1 %v6926_v53  ;;  %v4597_v20 = vld [vmem:[#allocation7 + $0xad] ss:$0 sm:$0xff]  ;;  %v2868_v28 = vpop.permute.xlu0 %2867 }
 0x312   : > { %v2755_v58 = vmax.f32 %v2754_v26, 0.0  ;;  %3332 = vperm.xlu1 %5185, %v6587_v15   ;;  %v2832_v26 = vmul.f32 %v2831_v36, %v2830_v37  ;;  %v2874_v53 = vadd.f32 %v4597_v20, %v2868_v28  ;;  %v4607_v28 = vld [vmem:[#allocation7 + $0xb2] ss:$0 sm:$0xff] }
 0x313   : > { %v2743_v51 = vadd.f32 %v2742_v31, %v2728_v13  ;;  %v4595_v31 = vld [vmem:[#allocation7 + $0xac] ss:$0 sm:$0xff] }
 0x314   : > { %v2763_v30 = vpop.permute.xlu1 %2762  ;;  %v2757_v1 = vmul.f32 %v2756_v21, %v2755_v58 }
 0x315   : > { %v2769_v29 = vadd.f32 %v4583_v22, %v2763_v30  ;;  %v2861_v30 = vstv %s4594_s7  ;;  %s4624_s7 = sld [smem:[#allocation9 + $0xbb]] }
 0x316   : > { %5186 = vset.pattern.permute.xlu1 %v6927_v7  ;;  %v2758_v50 = vadd.f32 %v2757_v1, %v2743_v51  ;;  %v6931_v51 = vmov 83   ;;  %v2876_v7 = vstv %s6641_s13  ;;  %s6676_s13 = sld [smem:[#allocation9 + $0xbc]] }
 0x317   : > { %v2770_v39 = vmax.f32 %v2769_v29, 0.0  ;;  %3347 = vperm.xlu1 %5186, %v6587_v15   ;;  %v2875_v29 = vmax.f32 %v2874_v53, 0.0  ;;  %v6934_v53 = vmov 89  }
 0x319   : > { %v2772_v9 = vmul.f32 %v2771_v18, %v2770_v39  ;;  %v2793_v40 = vpop.permute.xlu1 %2792  ;;  %v4599_v18 = vld [vmem:[#allocation7 + $0xae] ss:$0 sm:$0xff] }
 0x31a   : > { %v2799_v32 = vadd.f32 %v4587_v10, %v2793_v40 }
 0x31b   : > { %v2773_v44 = vadd.f32 %v2772_v9, %v2758_v50  ;;  %5188 = vset.pattern.permute.xlu1 %v6928_v35  ;;  %v4603_v50 = vld [vmem:[#allocation7 + $0xb0] ss:$0 sm:$0xff]  ;;  %v2913_v9 = vpop.permute.xlu0 %2912 }
 0x31c   : > { %v2800_v52 = vmax.f32 %v2799_v32, 0.0  ;;  %3377 = vperm.xlu1 %5188, %v6587_v15   ;;  %v2877_v32 = vmul.f32 %v2876_v7, %v2875_v29 }
 0x31d   : > { %v2788_v34 = vadd.f32 %v2787_v47, %v2773_v44  ;;  %v4601_v44 = vld [vmem:[#allocation7 + $0xaf] ss:$0 sm:$0xff]  ;;  %v2919_v47 = vadd.f32 %v4603_v50, %v2913_v9  ;;  %v4613_v9 = vld [vmem:[#allocation7 + $0xb5] ss:$0 sm:$0xff] }
 0x31e   : > { %v2808_v38 = vpop.permute.xlu1 %2807  ;;  %v2802_v5 = vmul.f32 %v2801_v25, %v2800_v52 }
 0x31f   : > { %v2814_v59 = vadd.f32 %v4589_v24, %v2808_v38  ;;  %v6932_v38 = vmov 86   ;;  %v2958_v36 = vpop.permute.xlu0 %2957 }
 0x320   : > { %5189 = vset.pattern.permute.xlu1 %v6929_v46  ;;  %v2803_v23 = vadd.f32 %v2802_v5, %v2788_v34  ;;  %v2920_v5 = vmax.f32 %v2919_v47, 0.0  ;;  %v2996_v47 = vstv %s4612_s26  ;;  %s4642_s26 = sld [smem:[#allocation9 + $0xc4]] }
 0x321   : > { %v2815_v16 = vmax.f32 %v2814_v59, 0.0  ;;  %3392 = vperm.xlu1 %5189, %v6587_v15   ;;  %v2921_v59 = vstv %s6648_s16  ;;  %s6683_s16 = sld [smem:[#allocation9 + $0xbf]] }
 0x323   : > { %v2817_v12 = vmul.f32 %v2816_v8, %v2815_v16  ;;  %v2838_v4 = vpop.permute.xlu1 %2837  ;;  %v3003_v7 = vpop.permute.xlu0 %3002 }
 0x324   : > { %v2844_v54 = vadd.f32 %v4593_v41, %v2838_v4  ;;  %v4609_v41 = vld [vmem:[#allocation7 + $0xb3] ss:$0 sm:$0xff]  ;;  %v6933_v4 = vmov 88  }
 0x325   : > { %v2818_v62 = vadd.f32 %v2817_v12, %v2803_v23  ;;  %5191 = vset.pattern.permute.xlu1 %v6930_v48  ;;  %v2922_v12 = vmul.f32 %v2921_v59, %v2920_v5  ;;  %v4621_v59 = vld [vmem:[#allocation7 + $0xb9] ss:$0 sm:$0xff] }
 0x326   : > { %v2845_v13 = vmax.f32 %v2844_v54, 0.0  ;;  %3422 = vperm.xlu1 %5191, %v6587_v15   ;;  %v2936_v54 = vstv %s4604_s25  ;;  %s4634_s25 = sld [smem:[#allocation9 + $0xc0]] }
 0x327   : > { %v2833_v58 = vadd.f32 %v2832_v26, %v2818_v62  ;;  %v2964_v62 = vadd.f32 %v4609_v41, %v2958_v36  ;;  %v4619_v36 = vld [vmem:[#allocation7 + $0xb8] ss:$0 sm:$0xff] }
 0x328   : > { %v2853_v21 = vpop.permute.xlu1 %2852  ;;  %v2847_v22 = vmul.f32 %v2846_v6, %v2845_v13 }
 0x329   : > { %v2859_v61 = vadd.f32 %v4595_v31, %v2853_v21  ;;  %v2951_v31 = vstv %s4606_s9  ;;  %s4636_s9 = sld [smem:[#allocation9 + $0xc1]] }
 0x32a   : > { %5192 = vset.pattern.permute.xlu1 %v6931_v51  ;;  %v2848_v39 = vadd.f32 %v2847_v22, %v2833_v58  ;;  %v2965_v58 = vmax.f32 %v2964_v62, 0.0  ;;  %v4611_v22 = vld [vmem:[#allocation7 + $0xb4] ss:$0 sm:$0xff]  ;;  %v6937_v62 = vmov 95  }
 0x32b   : > { %v2860_v1 = vmax.f32 %v2859_v61, 0.0  ;;  %3437 = vperm.xlu1 %5192, %v6587_v15   ;;  %v2966_v61 = vstv %s6655_s10  ;;  %s6690_s10 = sld [smem:[#allocation9 + $0xc2]] }
 0x32d   : > { %v2862_v14 = vmul.f32 %v2861_v30, %v2860_v1  ;;  %v2883_v10 = vpop.permute.xlu1 %2882 }
 0x32e   : > { %v2889_v42 = vadd.f32 %v4599_v18, %v2883_v10  ;;  %v4615_v18 = vld [vmem:[#allocation7 + $0xb6] ss:$0 sm:$0xff]  ;;  %v6935_v10 = vmov 91  }
 0x32f   : > { %v2863_v40 = vadd.f32 %v2862_v14, %v2848_v39  ;;  %5194 = vset.pattern.permute.xlu1 %v5515_v49  ;;  %v4605_v49 = vld [vmem:[#allocation7 + $0xb1] ss:$0 sm:$0xff]  ;;  %v2967_v14 = vmul.f32 %v2966_v61, %v2965_v58  ;;  %v4627_v58 = vld [vmem:[#allocation7 + $0xbc] ss:$0 sm:$0xff] }
 0x330   : > { %v2890_v55 = vmax.f32 %v2889_v42, 0.0  ;;  %3467 = vperm.xlu1 %5194, %v6587_v15   ;;  %v2981_v42 = vstv %s4610_s24  ;;  %s4640_s24 = sld [smem:[#allocation9 + $0xc3]] }
 0x331   : > { %v2878_v25 = vadd.f32 %v2877_v32, %v2863_v40  ;;  %v3009_v40 = vadd.f32 %v4615_v18, %v3003_v7 }
 0x332   : > { %v2898_v35 = vpop.permute.xlu1 %2897  ;;  %v2892_v52 = vmul.f32 %v2891_v45, %v2890_v55 }
 0x333   : > { %v2904_v24 = vadd.f32 %v4601_v44, %v2898_v35  ;;  %v6936_v35 = vmov 92  }
 0x334   : > { %5195 = vset.pattern.permute.xlu1 %v6932_v38  ;;  %v2893_v8 = vadd.f32 %v2892_v52, %v2878_v25  ;;  %v3010_v52 = vmax.f32 %v3009_v40, 0.0 }
 0x335   : > { %v2905_v34 = vmax.f32 %v2904_v24, 0.0  ;;  %3482 = vperm.xlu1 %5195, %v6587_v15   ;;  %v4617_v24 = vld [vmem:[#allocation7 + $0xb7] ss:$0 sm:$0xff] }
 0x337   : > { %v2907_v46 = vmul.f32 %v2906_v17, %v2905_v34  ;;  %v2928_v16 = vpop.permute.xlu1 %2927  ;;  %v3011_v17 = vstv %s6662_s28  ;;  %s6697_s28 = sld [smem:[#allocation9 + $0xc5]] }
 0x338   : > { %v2934_v37 = vadd.f32 %v4605_v49, %v2928_v16  ;;  %v3012_v16 = vmul.f32 %v3011_v17, %v3010_v52  ;;  %v3116_v17 = vstv %s4628_s12  ;;  %s6715_s12 = sld [smem:[#allocation9 + $0xcc]] }
 0x339   : > { %v2908_v23 = vadd.f32 %v2907_v46, %v2893_v8  ;;  %5197 = vset.pattern.permute.xlu1 %v6933_v4  ;;  %v3048_v8 = vpop.permute.xlu0 %3047 }
 0x33a   : > { %v2935_v20 = vmax.f32 %v2934_v37, 0.0  ;;  %3512 = vperm.xlu1 %5197, %v6587_v15   ;;  %v3026_v37 = vstv %s4616_s3  ;;  %s4646_s3 = sld [smem:[#allocation9 + $0xc6]] }
 0x33b   : > { %v2923_v48 = vadd.f32 %v2922_v12, %v2908_v23  ;;  %v3054_v23 = vadd.f32 %v4621_v59, %v3048_v8 }
 0x33c   : > { %v2943_v26 = vpop.permute.xlu1 %2942  ;;  %v2937_v6 = vmul.f32 %v2936_v54, %v2935_v20 }
 0x33d   : > { %v2949_v13 = vadd.f32 %v4607_v28, %v2943_v26  ;;  %v3041_v28 = vstv %s4618_s23  ;;  %s4648_s23 = sld [smem:[#allocation9 + $0xc7]] }
 0x33e   : > { %5198 = vset.pattern.permute.xlu1 %v6934_v53  ;;  %v2938_v30 = vadd.f32 %v2937_v6, %v2923_v48  ;;  %v3055_v48 = vmax.f32 %v3054_v23, 0.0  ;;  %v3056_v6 = vstv %s6669_s29  ;;  %v3146_v23 = vstv %s6683_s16  ;;  %s6704_s29 = sld [smem:[#allocation9 + $0xc8]]  ;;  %s6722_s16 = sld [smem:[#allocation9 + $0xce]] }
 0x33f   : > { %v2950_v21 = vmax.f32 %v2949_v13, 0.0  ;;  %3527 = vperm.xlu1 %5198, %v6587_v15  }
 0x341   : > { %v2952_v51 = vmul.f32 %v2951_v31, %v2950_v21  ;;  %v2973_v1 = vpop.permute.xlu1 %2972 }
 0x342   : > { %v2979_v29 = vadd.f32 %v4611_v22, %v2973_v1  ;;  %v3093_v22 = vpop.permute.xlu0 %3092 }
 0x343   : > { %v2953_v39 = vadd.f32 %v2952_v51, %v2938_v30  ;;  %5200 = vset.pattern.permute.xlu1 %v6935_v10  ;;  %v3057_v30 = vmul.f32 %v3056_v6, %v3055_v48  ;;  %v3071_v51 = vstv %s4622_s5  ;;  %v3099_v18 = vadd.f32 %v4627_v58, %v3093_v22  ;;  %s4652_s5 = sld [smem:[#allocation9 + $0xc9]] }
 0x344   : > { %v2980_v50 = vmax.f32 %v2979_v29, 0.0  ;;  %3557 = vperm.xlu1 %5200, %v6587_v15   ;;  %v4625_v29 = vld [vmem:[#allocation7 + $0xbb] ss:$0 sm:$0xff] }
 0x345   : > { %v2968_v45 = vadd.f32 %v2967_v14, %v2953_v39  ;;  %v3100_v40 = vmax.f32 %v3099_v18, 0.0 }
 0x346   : > { %v2988_v32 = vpop.permute.xlu1 %2987  ;;  %v2982_v55 = vmul.f32 %v2981_v42, %v2980_v50  ;;  %v3086_v42 = vstv %s4624_s7  ;;  %v6938_v50 = vmov 98   ;;  %s4654_s7 = sld [smem:[#allocation9 + $0xca]] }
 0x347   : > { %v2994_v44 = vadd.f32 %v4613_v9, %v2988_v32  ;;  %v3101_v32 = vstv %s6676_s13  ;;  %s6711_s13 = sld [smem:[#allocation9 + $0xcb]] }
 0x348   : > { %5201 = vset.pattern.permute.xlu1 %v6936_v35  ;;  %v2983_v38 = vadd.f32 %v2982_v55, %v2968_v45  ;;  %v4633_v35 = vld [vmem:[#allocation7 + $0xbf] ss:$0 sm:$0xff] }
 0x349   : > { %v2995_v25 = vmax.f32 %v2994_v44, 0.0  ;;  %3572 = vperm.xlu1 %5201, %v6587_v15  }
 0x34b   : > { %v2997_v34 = vmul.f32 %v2996_v47, %v2995_v25  ;;  %v3018_v5 = vpop.permute.xlu1 %3017  ;;  %v3138_v25 = vpop.permute.xlu0 %3137 }
 0x34c   : > { %v3024_v49 = vadd.f32 %v4617_v24, %v3018_v5  ;;  %v3102_v24 = vmul.f32 %v3101_v32, %v3100_v40  ;;  %v3144_v5 = vadd.f32 %v4633_v35, %v3138_v25  ;;  %v3206_v40 = vstv %s4640_s24  ;;  %v4643_v32 = vld [vmem:[#allocation7 + $0xc4] ss:$0 sm:$0xff]  ;;  %s4672_s24 = sld [smem:[#allocation9 + $0xd3]] }
 0x34d   : > { %v2998_v46 = vadd.f32 %v2997_v34, %v2983_v38  ;;  %5203 = vset.pattern.permute.xlu1 %v5522_v57  ;;  %v4623_v57 = vld [vmem:[#allocation7 + $0xba] ss:$0 sm:$0xff]  ;;  %v4631_v34 = vld [vmem:[#allocation7 + $0xbe] ss:$0 sm:$0xff]  ;;  %v3221_v25 = vstv %s4642_s26  ;;  %s6741_s26 = sld [smem:[#allocation9 + $0xd4]] }
 0x34e   : > { %v3025_v41 = vmax.f32 %v3024_v49, 0.0  ;;  %3602 = vperm.xlu1 %5203, %v6587_v15  }
 0x34f   : > { %v3013_v4 = vadd.f32 %v3012_v16, %v2998_v46  ;;  %v3131_v16 = vstv %s4630_s15  ;;  %s6720_s15 = sld [smem:[#allocation9 + $0xcd]] }
 0x350   : > { %v3033_v12 = vpop.permute.xlu1 %3032  ;;  %v3027_v54 = vmul.f32 %v3026_v37, %v3025_v41  ;;  %v6939_v37 = vmov 101  }
 0x351   : > { %v3039_v20 = vadd.f32 %v4619_v36, %v3033_v12  ;;  %v3145_v36 = vmax.f32 %v3144_v5, 0.0 }
 0x352   : > { %5204 = vset.pattern.permute.xlu1 %v6937_v62  ;;  %v3028_v13 = vadd.f32 %v3027_v54, %v3013_v4  ;;  %v3183_v62 = vpop.permute.xlu0 %3182 }
 0x353   : > { %v3040_v26 = vmax.f32 %v3039_v20, 0.0  ;;  %3617 = vperm.xlu1 %5204, %v6587_v15   ;;  %v3147_v48 = vmul.f32 %v3146_v23, %v3145_v36 }
 0x355   : > { %v3042_v31 = vmul.f32 %v3041_v28, %v3040_v26  ;;  %v3063_v53 = vpop.permute.xlu1 %3062  ;;  %v4639_v28 = vld [vmem:[#allocation7 + $0xc2] ss:$0 sm:$0xff] }
 0x356   : > { %v3069_v21 = vadd.f32 %v4623_v57, %v3063_v53  ;;  %v3161_v57 = vstv %s4634_s25  ;;  %s4664_s25 = sld [smem:[#allocation9 + $0xcf]] }
 0x357   : > { %v3043_v61 = vadd.f32 %v3042_v31, %v3028_v13  ;;  %5206 = vset.pattern.permute.xlu1 %v5524_v33  ;;  %v4629_v33 = vld [vmem:[#allocation7 + $0xbd] ss:$0 sm:$0xff]  ;;  %v4637_v13 = vld [vmem:[#allocation7 + $0xc1] ss:$0 sm:$0xff]  ;;  %v3189_v31 = vadd.f32 %v4639_v28, %v3183_v62  ;;  %v3266_v28 = vstv %s4648_s23  ;;  %v6942_v62 = vmov 110   ;;  %s6748_s23 = sld [smem:[#allocation9 + $0xd7]] }
 0x358   : > { %v3070_v1 = vmax.f32 %v3069_v21, 0.0  ;;  %3647 = vperm.xlu1 %5206, %v6587_v15  }
 0x359   : > { %v3058_v39 = vadd.f32 %v3057_v30, %v3043_v61  ;;  %v3176_v61 = vstv %s4636_s9  ;;  %v6940_v30 = vmov 104   ;;  %s6734_s9 = sld [smem:[#allocation9 + $0xd1]] }
 0x35a   : > { %v3078_v7 = vpop.permute.xlu1 %3077  ;;  %v3072_v14 = vmul.f32 %v3071_v51, %v3070_v1  ;;  %v3190_v1 = vmax.f32 %v3189_v31, 0.0 }
 0x35b   : > { %v3084_v10 = vadd.f32 %v4625_v29, %v3078_v7  ;;  %v3191_v29 = vstv %s6690_s10  ;;  %s4670_s10 = sld [smem:[#allocation9 + $0xd2]] }
 0x35c   : > { %5207 = vset.pattern.permute.xlu1 %v6938_v50  ;;  %v3073_v45 = vadd.f32 %v3072_v14, %v3058_v39 }
 0x35d   : > { %v3085_v9 = vmax.f32 %v3084_v10, 0.0  ;;  %3662 = vperm.xlu1 %5207, %v6587_v15   ;;  %v4645_v10 = vld [vmem:[#allocation7 + $0xc5] ss:$0 sm:$0xff] }
 0x35f   : > { %v3087_v55 = vmul.f32 %v3086_v42, %v3085_v9  ;;  %v3108_v44 = vpop.permute.xlu1 %3107  ;;  %v3228_v42 = vpop.permute.xlu0 %3227  ;;  %v3192_v9 = vmul.f32 %v3191_v29, %v3190_v1  ;;  %v4655_v1 = vld [vmem:[#allocation7 + $0xca] ss:$0 sm:$0xff] }
 0x360   : > { %v3114_v47 = vadd.f32 %v4629_v33, %v3108_v44 }
 0x361   : > { %v3088_v52 = vadd.f32 %v3087_v55, %v3073_v45  ;;  %5209 = vset.pattern.permute.xlu1 %v5526_v60  ;;  %v4635_v60 = vld [vmem:[#allocation7 + $0xc0] ss:$0 sm:$0xff]  ;;  %v3234_v45 = vadd.f32 %v4645_v10, %v3228_v42  ;;  %v6943_v10 = vmov 113  }
 0x362   : > { %v3115_v38 = vmax.f32 %v3114_v47, 0.0  ;;  %3692 = vperm.xlu1 %5209, %v6587_v15  }
 0x363   : > { %v3103_v59 = vadd.f32 %v3102_v24, %v3088_v52  ;;  %v6941_v52 = vmov 107  }
 0x364   : > { %v3123_v49 = vpop.permute.xlu1 %3122  ;;  %v3117_v8 = vmul.f32 %v3116_v17, %v3115_v38  ;;  %v3235_v17 = vmax.f32 %v3234_v45, 0.0  ;;  %v3236_v38 = vstv %s6697_s28  ;;  %s4676_s28 = sld [smem:[#allocation9 + $0xd5]] }
 0x365   : > { %v3129_v46 = vadd.f32 %v4631_v34, %v3123_v49 }
 0x366   : > { %5210 = vset.pattern.permute.xlu1 %v6939_v37  ;;  %v3118_v12 = vadd.f32 %v3117_v8, %v3103_v59  ;;  %v4651_v8 = vld [vmem:[#allocation7 + $0xc8] ss:$0 sm:$0xff]  ;;  %v3237_v37 = vmul.f32 %v3236_v38, %v3235_v17 }
 0x367   : > { %v3130_v41 = vmax.f32 %v3129_v46, 0.0  ;;  %3707 = vperm.xlu1 %5210, %v6587_v15   ;;  %v3273_v46 = vpop.permute.xlu0 %3272 }
 0x368   : > { %v3279_v23 = vadd.f32 %v4651_v8, %v3273_v46 }
 0x369   : > { %v3132_v4 = vmul.f32 %v3131_v16, %v3130_v41  ;;  %v3153_v54 = vpop.permute.xlu1 %3152  ;;  %v3251_v41 = vstv %s4646_s3  ;;  %s4678_s3 = sld [smem:[#allocation9 + $0xd6]] }
 0x36a   : > { %v3159_v20 = vadd.f32 %v4635_v60, %v3153_v54  ;;  %v4649_v60 = vld [vmem:[#allocation7 + $0xc7] ss:$0 sm:$0xff] }
 0x36b   : > { %v3133_v26 = vadd.f32 %v3132_v4, %v3118_v12  ;;  %5212 = vset.pattern.permute.xlu1 %v5528_v63  ;;  %v4641_v63 = vld [vmem:[#allocation7 + $0xc3] ss:$0 sm:$0xff] }
 0x36c   : > { %v3160_v6 = vmax.f32 %v3159_v20, 0.0  ;;  %3737 = vperm.xlu1 %5212, %v6587_v15  }
 0x36d   : > { %v3148_v21 = vadd.f32 %v3147_v48, %v3133_v26  ;;  %v3280_v48 = vmax.f32 %v3279_v23, 0.0  ;;  %v4669_v23 = vld [vmem:[#allocation7 + $0xd1] ss:$0 sm:$0xff] }
 0x36e   : > { %v3168_v53 = vpop.permute.xlu1 %3167  ;;  %v3162_v58 = vmul.f32 %v3161_v57, %v3160_v6  ;;  %v3281_v57 = vstv %s6704_s29  ;;  %s4682_s29 = sld [smem:[#allocation9 + $0xd8]] }
 0x36f   : > { %v3174_v22 = vadd.f32 %v4637_v13, %v3168_v53 }
 0x370   : > { %5213 = vset.pattern.permute.xlu1 %v6940_v30  ;;  %v3163_v18 = vadd.f32 %v3162_v58, %v3148_v21  ;;  %v4657_v21 = vld [vmem:[#allocation7 + $0xcb] ss:$0 sm:$0xff]  ;;  %v3318_v58 = vpop.permute.xlu0 %3317  ;;  %v3296_v30 = vstv %s4652_s5  ;;  %s4684_s5 = sld [smem:[#allocation9 + $0xd9]] }
 0x371   : > { %v3175_v51 = vmax.f32 %v3174_v22, 0.0  ;;  %3752 = vperm.xlu1 %5213, %v6587_v15  }
 0x373   : > { %v3177_v7 = vmul.f32 %v3176_v61, %v3175_v51  ;;  %v3198_v39 = vpop.permute.xlu1 %3197  ;;  %v3282_v61 = vmul.f32 %v3281_v57, %v3280_v48 }
 0x374   : > { %v3204_v14 = vadd.f32 %v4641_v63, %v3198_v39  ;;  %v3324_v63 = vadd.f32 %v4657_v21, %v3318_v58  ;;  %v3416_v58 = vstv %s6734_s9  ;;  %s4700_s9 = sld [smem:[#allocation9 + $0xe1]] }
 0x375   : > { %v3178_v50 = vadd.f32 %v3177_v7, %v3163_v18  ;;  %5215 = vset.pattern.permute.xlu1 %v5530_v56  ;;  %v4647_v56 = vld [vmem:[#allocation7 + $0xc6] ss:$0 sm:$0xff] }
 0x376   : > { %v3205_v33 = vmax.f32 %v3204_v14, 0.0  ;;  %3782 = vperm.xlu1 %5215, %v6587_v15   ;;  %v3311_v14 = vstv %s4654_s7  ;;  %s4686_s7 = sld [smem:[#allocation9 + $0xda]] }
 0x377   : > { %v3193_v44 = vadd.f32 %v3192_v9, %v3178_v50  ;;  %v3325_v50 = vmax.f32 %v3324_v63, 0.0  ;;  %v3326_v9 = vstv %s6711_s13  ;;  %s4688_s13 = sld [smem:[#allocation9 + $0xdb]] }
 0x378   : > { %v3213_v55 = vpop.permute.xlu1 %3212  ;;  %v3207_v47 = vmul.f32 %v3206_v40, %v3205_v33 }
 0x379   : > { %v3219_v35 = vadd.f32 %v4643_v32, %v3213_v55  ;;  %v4663_v55 = vld [vmem:[#allocation7 + $0xce] ss:$0 sm:$0xff] }
 0x37a   : > { %5216 = vset.pattern.permute.xlu1 %v6941_v52  ;;  %v3208_v34 = vadd.f32 %v3207_v47, %v3193_v44  ;;  %v3363_v44 = vpop.permute.xlu0 %3362  ;;  %v6727_v52 = vld [vmem:[%s5744_s11 + $0x8] sm:$0xff]  ;;  %s4666_s11 = sld [smem:[#allocation9 + $0xd0]] }
 0x37b   : > { %v3220_v24 = vmax.f32 %v3219_v35, 0.0  ;;  %3797 = vperm.xlu1 %5216, %v6587_v15   ;;  %v3327_v35 = vmul.f32 %v3326_v9, %v3325_v50  ;;  %v3369_v17 = vadd.f32 %v4663_v55, %v3363_v44  ;;  %v3461_v55 = vstv %s6741_s26  ;;  %s4706_s26 = sld [smem:[#allocation9 + $0xe4]] }
 0x37d   : > { %v3222_v5 = vmul.f32 %v3221_v25, %v3220_v24  ;;  %v3243_v49 = vpop.permute.xlu1 %3242  ;;  %v3341_v25 = vstv %s6715_s12  ;;  %v4661_v24 = vld [vmem:[#allocation7 + $0xcd] ss:$0 sm:$0xff]  ;;  %v3370_v46 = vmax.f32 %v3369_v17, 0.0  ;;  %s4690_s12 = sld [smem:[#allocation9 + $0xdc]] }
 0x37e   : > { %v3249_v59 = vadd.f32 %v4647_v56, %v3243_v49  ;;  %v3356_v49 = vstv %s6720_s15  ;;  %s4692_s15 = sld [smem:[#allocation9 + $0xdd]] }
 0x37f   : > { %v3223_v16 = vadd.f32 %v3222_v5, %v3208_v34  ;;  %5218 = vset.pattern.permute.xlu1 %v5532_v2  ;;  %v4653_v2 = vld [vmem:[#allocation7 + $0xc9] ss:$0 sm:$0xff] }
 0x380   : > { %v3250_v36 = vmax.f32 %v3249_v59, 0.0  ;;  %3827 = vperm.xlu1 %5218, %v6587_v15   ;;  %v6944_v59 = vmov 116  }
 0x381   : > { %v3238_v4 = vadd.f32 %v3237_v37, %v3223_v16  ;;  %v3371_v16 = vstv %s6722_s16  ;;  %s4694_s16 = sld [smem:[#allocation9 + $0xde]] }
 0x382   : > { %v3258_v12 = vpop.permute.xlu1 %3257  ;;  %v3252_v54 = vmul.f32 %v3251_v41, %v3250_v36 }
 0x383   : > { %v3264_v20 = vadd.f32 %v4649_v60, %v3258_v12  ;;  %v3408_v12 = vpop.permute.xlu0 %3407 }
 0x384   : > { %5219 = vset.pattern.permute.xlu1 %v6942_v62  ;;  %v3253_v6 = vadd.f32 %v3252_v54, %v3238_v4  ;;  %v3372_v54 = vmul.f32 %v3371_v16, %v3370_v46  ;;  %v4667_v62 = vld [vmem:[#allocation7 + $0xd0] ss:$0 sm:$0xff]  ;;  %v3491_v16 = vstv %s4678_s3  ;;  %s4710_s3 = sld [smem:[#allocation9 + $0xe6]] }
 0x385   : > { %v3265_v26 = vmax.f32 %v3264_v20, 0.0  ;;  %3842 = vperm.xlu1 %5219, %v6587_v15   ;;  %v3386_v20 = vstv %s4664_s25  ;;  %s4696_s25 = sld [smem:[#allocation9 + $0xdf]] }
 0x387   : > { %v3267_v13 = vmul.f32 %v3266_v28, %v3265_v26  ;;  %v3288_v31 = vpop.permute.xlu1 %3287  ;;  %v3414_v26 = vadd.f32 %v4669_v23, %v3408_v12  ;;  %v3453_v63 = vpop.permute.xlu0 %3452 }
 0x388   : > { %v3294_v53 = vadd.f32 %v4653_v2, %v3288_v31  ;;  %v6945_v31 = vmov 119  }
 0x389   : > { %v3268_v22 = vadd.f32 %v3267_v13, %v3253_v6  ;;  %5221 = vset.pattern.permute.xlu1 %v5534_v3  ;;  %v4659_v3 = vld [vmem:[#allocation7 + $0xcc] ss:$0 sm:$0xff]  ;;  %v3401_v13 = vstv %s4666_s11  ;;  %v3415_v21 = vmax.f32 %v3414_v26, 0.0  ;;  %s4698_s11 = sld [smem:[#allocation9 + $0xe0]] }
 0x38a   : > { %v3295_v51 = vmax.f32 %v3294_v53, 0.0  ;;  %3872 = vperm.xlu1 %5221, %v6587_v15  }
 0x38b   : > { %v3283_v18 = vadd.f32 %v3282_v61, %v3268_v22 }
 0x38c   : > { %v3303_v29 = vpop.permute.xlu1 %3302  ;;  %v3297_v7 = vmul.f32 %v3296_v30, %v3295_v51 }
 0x38d   : > { %v3309_v39 = vadd.f32 %v4655_v1, %v3303_v29  ;;  %v4675_v1 = vld [vmem:[#allocation7 + $0xd4] ss:$0 sm:$0xff] }
 0x38e   : > { %5222 = vset.pattern.permute.xlu1 %v6943_v10  ;;  %v3298_v40 = vadd.f32 %v3297_v7, %v3283_v18  ;;  %v3417_v18 = vmul.f32 %v3416_v58, %v3415_v21  ;;  %v3431_v7 = vstv %s4670_s10  ;;  %v3459_v10 = vadd.f32 %v4675_v1, %v3453_v63  ;;  %s4702_s10 = sld [smem:[#allocation9 + $0xe2]] }
 0x38f   : > { %v3310_v42 = vmax.f32 %v3309_v39, 0.0  ;;  %3887 = vperm.xlu1 %5222, %v6587_v15  }
 0x391   : > { %v3312_v33 = vmul.f32 %v3311_v14, %v3310_v42  ;;  %v3333_v32 = vpop.permute.xlu1 %3332  ;;  %v4673_v14 = vld [vmem:[#allocation7 + $0xd3] ss:$0 sm:$0xff] }
 0x392   : > { %v3339_v45 = vadd.f32 %v4659_v3, %v3333_v32 }
 0x393   : > { %v3313_v47 = vadd.f32 %v3312_v33, %v3298_v40  ;;  %5224 = vset.pattern.permute.xlu1 %v5536_v11  ;;  %v4665_v11 = vld [vmem:[#allocation7 + $0xcf] ss:$0 sm:$0xff]  ;;  %v3446_v40 = vstv %s4672_s24  ;;  %v6946_v33 = vmov 122   ;;  %s4704_s24 = sld [smem:[#allocation9 + $0xe3]] }
 0x394   : > { %v3340_v15 = vmax.f32 %v3339_v45, 0.0  ;;  %3917 = vperm.xlu1 %5224, %v6727_v52   ;;  %v3460_v45 = vmax.f32 %v3459_v10, 0.0  ;;  %v4691_v10 = vld [vmem:[#allocation7 + $0xdc] ss:$0 sm:$0xff] }
 0x395   : > { %v3328_v38 = vadd.f32 %v3327_v35, %v3313_v47 }
 0x396   : > { %v3348_v56 = vpop.permute.xlu1 %3347  ;;  %v3342_v34 = vmul.f32 %v3341_v25, %v3340_v15  ;;  %v4681_v15 = vld [vmem:[#allocation7 + $0xd7] ss:$0 sm:$0xff] }
 0x397   : > { %v3354_v5 = vadd.f32 %v4661_v24, %v3348_v56  ;;  %v3498_v24 = vpop.permute.xlu0 %3497  ;;  %v3462_v56 = vmul.f32 %v3461_v55, %v3460_v45  ;;  %v3596_v55 = vstv %s4692_s15  ;;  %s4724_s15 = sld [smem:[#allocation9 + $0xed]] }
 0x398   : > { %5225 = vset.pattern.permute.xlu1 %v6944_v59  ;;  %v3343_v37 = vadd.f32 %v3342_v34, %v3328_v38  ;;  %v3476_v38 = vstv %s4676_s28  ;;  %s4708_s28 = sld [smem:[#allocation9 + $0xe5]] }
 0x399   : > { %v3355_v8 = vmax.f32 %v3354_v5, 0.0  ;;  %3932 = vperm.xlu1 %5225, %v6727_v52   ;;  %v4679_v5 = vld [vmem:[#allocation7 + $0xd6] ss:$0 sm:$0xff] }
 0x39b   : > { %v3357_v41 = vmul.f32 %v3356_v49, %v3355_v8  ;;  %v3378_v36 = vpop.permute.xlu1 %3377  ;;  %v3504_v49 = vadd.f32 %v4681_v15, %v3498_v24  ;;  %v4699_v15 = vld [vmem:[#allocation7 + $0xe0] ss:$0 sm:$0xff] }
 0x39c   : > { %v3384_v60 = vadd.f32 %v4665_v11, %v3378_v36 }
 0x39d   : > { %v3358_v4 = vadd.f32 %v3357_v41, %v3343_v37  ;;  %5227 = vset.pattern.permute.xlu1 %v5538_v19  ;;  %v4671_v19 = vld [vmem:[#allocation7 + $0xd2] ss:$0 sm:$0xff]  ;;  %v6947_v37 = vmov 125   ;;  %v3505_v36 = vmax.f32 %v3504_v49, 0.0 }
 0x39e   : > { %v3385_v28 = vmax.f32 %v3384_v60, 0.0  ;;  %3962 = vperm.xlu1 %5227, %v6727_v52   ;;  %v3506_v60 = vstv %s6748_s23  ;;  %s4712_s23 = sld [smem:[#allocation9 + $0xe7]] }
 0x39f   : > { %v3373_v2 = vadd.f32 %v3372_v54, %v3358_v4  ;;  %v3507_v26 = vmul.f32 %v3506_v60, %v3505_v36  ;;  %v4701_v36 = vld [vmem:[#allocation7 + $0xe1] ss:$0 sm:$0xff] }
 0x3a0   : > { %v3393_v48 = vpop.permute.xlu1 %3392  ;;  %v3387_v57 = vmul.f32 %v3386_v20, %v3385_v28  ;;  %v4687_v20 = vld [vmem:[#allocation7 + $0xda] ss:$0 sm:$0xff]  ;;  %v3543_v28 = vpop.permute.xlu0 %3542 }
 0x3a1   : > { %v3399_v6 = vadd.f32 %v4667_v62, %v3393_v48  ;;  %v3521_v48 = vstv %s4682_s29  ;;  %s4714_s29 = sld [smem:[#allocation9 + $0xe8]] }
 0x3a2   : > { %5228 = vset.pattern.permute.xlu1 %v6945_v31  ;;  %v3388_v22 = vadd.f32 %v3387_v57, %v3373_v2  ;;  %v4685_v57 = vld [vmem:[#allocation7 + $0xd9] ss:$0 sm:$0xff] }
 0x3a3   : > { %v3400_v53 = vmax.f32 %v3399_v6, 0.0  ;;  %3977 = vperm.xlu1 %5228, %v6727_v52   ;;  %v3549_v6 = vadd.f32 %v4687_v20, %v3543_v28 }
 0x3a5   : > { %v3402_v61 = vmul.f32 %v3401_v13, %v3400_v53  ;;  %v3423_v30 = vpop.permute.xlu1 %3422 }
 0x3a6   : > { %v3429_v51 = vadd.f32 %v4671_v19, %v3423_v30  ;;  %v3536_v19 = vstv %s4684_s5  ;;  %v3551_v30 = vstv %s4686_s7  ;;  %s4716_s5 = sld [smem:[#allocation9 + $0xe9]]  ;;  %s4718_s7 = sld [smem:[#allocation9 + $0xea]] }
 0x3a7   : > { %v3403_v29 = vadd.f32 %v3402_v61, %v3388_v22  ;;  %5230 = vset.pattern.permute.xlu1 %v5540_v27  ;;  %v4677_v27 = vld [vmem:[#allocation7 + $0xd5] ss:$0 sm:$0xff]  ;;  %v3550_v22 = vmax.f32 %v3549_v6, 0.0  ;;  %v4689_v61 = vld [vmem:[#allocation7 + $0xdb] ss:$0 sm:$0xff] }
 0x3a8   : > { %v3430_v39 = vmax.f32 %v3429_v51, 0.0  ;;  %4007 = vperm.xlu1 %5230, %v6727_v52  }
 0x3a9   : > { %v3418_v50 = vadd.f32 %v3417_v18, %v3403_v29  ;;  %v4693_v29 = vld [vmem:[#allocation7 + $0xdd] ss:$0 sm:$0xff] }
 0x3aa   : > { %v3438_v42 = vpop.permute.xlu1 %3437  ;;  %v3432_v3 = vmul.f32 %v3431_v7, %v3430_v39  ;;  %v3552_v7 = vmul.f32 %v3551_v30, %v3550_v22  ;;  %v3566_v39 = vstv %s4688_s13  ;;  %v4707_v22 = vld [vmem:[#allocation7 + $0xe4] ss:$0 sm:$0xff]  ;;  %s4720_s13 = sld [smem:[#allocation9 + $0xeb]] }
 0x3ab   : > { %v3444_v9 = vadd.f32 %v4673_v14, %v3438_v42 }
 0x3ac   : > { %5231 = vset.pattern.permute.xlu1 %v6946_v33  ;;  %v3433_v44 = vadd.f32 %v3432_v3, %v3418_v50  ;;  %v3581_v33 = vstv %s4690_s12  ;;  %s4722_s12 = sld [smem:[#allocation9 + $0xec]] }
 0x3ad   : > { %v3445_v32 = vmax.f32 %v3444_v9, 0.0  ;;  %4022 = vperm.xlu1 %5231, %v6727_v52  }
 0x3af   : > { %v3447_v47 = vmul.f32 %v3446_v40, %v3445_v32  ;;  %v3468_v35 = vpop.permute.xlu1 %3467 }
 0x3b0   : > { %v3474_v25 = vadd.f32 %v4677_v27, %v3468_v35  ;;  %v4695_v27 = vld [vmem:[#allocation7 + $0xde] ss:$0 sm:$0xff] }
 0x3b1   : > { %v3448_v17 = vadd.f32 %v3447_v47, %v3433_v44  ;;  %5233 = vset.pattern.permute.xlu1 %v5542_v0  ;;  %v4683_v0 = vld [vmem:[#allocation7 + $0xd8] ss:$0 sm:$0xff] }
 0x3b2   : > { %v3475_v34 = vmax.f32 %v3474_v25, 0.0  ;;  %4052 = vperm.xlu1 %5233, %v6727_v52  }
 0x3b3   : > { %v3463_v8 = vadd.f32 %v3462_v56, %v3448_v17 }
 0x3b4   : > { %v3483_v59 = vpop.permute.xlu1 %3482  ;;  %v3477_v46 = vmul.f32 %v3476_v38, %v3475_v34  ;;  %v3611_v38 = vstv %s4694_s16  ;;  %s4726_s16 = sld [smem:[#allocation9 + $0xee]] }
 0x3b5   : > { %v3489_v11 = vadd.f32 %v4679_v5, %v3483_v59  ;;  %v4697_v5 = vld [vmem:[#allocation7 + $0xdf] ss:$0 sm:$0xff] }
 0x3b6   : > { %5234 = vset.pattern.permute.xlu1 %v6947_v37  ;;  %v3478_v23 = vadd.f32 %v3477_v46, %v3463_v8 }
 0x3b7   : > { %v3490_v41 = vmax.f32 %v3489_v11, 0.0  ;;  %4067 = vperm.xlu1 %5234, %v6727_v52  }
 0x3b9   : > { %v3492_v12 = vmul.f32 %v3491_v16, %v3490_v41  ;;  %v3513_v4 = vpop.permute.xlu1 %3512  ;;  %v3626_v16 = vstv %s4696_s25  ;;  %s4728_s25 = sld [smem:[#allocation9 + $0xef]] }
 0x3ba   : > { %v3519_v54 = vadd.f32 %v4683_v0, %v3513_v4  ;;  %v3641_v0 = vstv %s4698_s11  ;;  %s4730_s11 = sld [smem:[#allocation9 + $0xf0]] }
 0x3bb   : > { %v3493_v62 = vadd.f32 %v3492_v12, %v3478_v23  ;;  %5236 = vset.pattern.permute.xlu1 %v5544_v43 }
 0x3bc   : > { %v3520_v2 = vmax.f32 %v3519_v54, 0.0  ;;  %4097 = vperm.xlu1 %5236, %v6727_v52   ;;  %v3588_v52 = vpop.permute.xlu0 %3587  ;;  %v4705_v54 = vld [vmem:[#allocation7 + $0xe3] ss:$0 sm:$0xff] }
 0x3bd   : > { %v3508_v31 = vadd.f32 %v3507_v26, %v3493_v62  ;;  %v3594_v42 = vadd.f32 %v4693_v29, %v3588_v52  ;;  %v3656_v26 = vstv %s4700_s9  ;;  %s4732_s9 = sld [smem:[#allocation9 + $0xf1]] }
 0x3be   : > { %v3528_v13 = vpop.permute.xlu1 %3527  ;;  %v3522_v53 = vmul.f32 %v3521_v48, %v3520_v2  ;;  %v4703_v2 = vld [vmem:[#allocation7 + $0xe2] ss:$0 sm:$0xff] }
 0x3bf   : > { %v3534_v21 = vadd.f32 %v4685_v57, %v3528_v13  ;;  %v3595_v45 = vmax.f32 %v3594_v42, 0.0 }
 0x3c0   : > { %v3523_v51 = vadd.f32 %v3522_v53, %v3508_v31  ;;  %v3633_v24 = vpop.permute.xlu0 %3632 }
 0x3c1   : > { %v3535_v58 = vmax.f32 %v3534_v21, 0.0  ;;  %v3597_v56 = vmul.f32 %v3596_v55, %v3595_v45  ;;  %v3639_v49 = vadd.f32 %v4699_v15, %v3633_v24  ;;  %v3671_v21 = vstv %s4702_s10  ;;  %v4713_v45 = vld [vmem:[#allocation7 + $0xe7] ss:$0 sm:$0xff]  ;;  %s4734_s10 = sld [smem:[#allocation9 + $0xf2]] }
 0x3c3   : > { %v3537_v1 = vmul.f32 %v3536_v19, %v3535_v58  ;;  %v3558_v43 = vpop.permute.xlu1 %3557  ;;  %v3640_v41 = vmax.f32 %v3639_v49, 0.0 }
 0x3c4   : > { %v3564_v63 = vadd.f32 %v4689_v61, %v3558_v43  ;;  %v3678_v20 = vpop.permute.xlu0 %3677  ;;  %v3686_v61 = vstv %s4704_s24  ;;  %s4736_s24 = sld [smem:[#allocation9 + $0xf3]] }
 0x3c5   : > { %v3538_v18 = vadd.f32 %v3537_v1, %v3523_v51  ;;  %v3642_v62 = vmul.f32 %v3641_v0, %v3640_v41  ;;  %v3684_v57 = vadd.f32 %v4705_v54, %v3678_v20  ;;  %v4719_v41 = vld [vmem:[#allocation7 + $0xea] ss:$0 sm:$0xff] }
 0x3c6   : > { %v3565_v14 = vmax.f32 %v3564_v63, 0.0  ;;  %v4711_v63 = vld [vmem:[#allocation7 + $0xe6] ss:$0 sm:$0xff] }
 0x3c7   : > { %v3553_v3 = vadd.f32 %v3552_v7, %v3538_v18  ;;  %v3685_v58 = vmax.f32 %v3684_v57, 0.0  ;;  %v3701_v7 = vstv %s4706_s26  ;;  %s4738_s26 = sld [smem:[#allocation9 + $0xf4]] }
 0x3c8   : > { %v3573_v50 = vpop.permute.xlu1 %3572  ;;  %v3567_v9 = vmul.f32 %v3566_v39, %v3565_v14  ;;  %v3723_v29 = vpop.permute.xlu0 %3722  ;;  %v4709_v14 = vld [vmem:[#allocation7 + $0xe5] ss:$0 sm:$0xff] }
 0x3c9   : > { %v3579_v40 = vadd.f32 %v4691_v10, %v3573_v50  ;;  %v3687_v18 = vmul.f32 %v3686_v61, %v3685_v58  ;;  %v3729_v10 = vadd.f32 %v4711_v63, %v3723_v29  ;;  %v4725_v58 = vld [vmem:[#allocation7 + $0xed] ss:$0 sm:$0xff] }
 0x3ca   : > { %v3568_v44 = vadd.f32 %v3567_v9, %v3553_v3 }
 0x3cb   : > { %v3580_v32 = vmax.f32 %v3579_v40, 0.0  ;;  %v3716_v40 = vstv %s4708_s28  ;;  %s4740_s28 = sld [smem:[#allocation9 + $0xf5]] }
 0x3cc   : > { %v3768_v15 = vpop.permute.xlu0 %3767 }
 0x3cd   : > { %v3582_v47 = vmul.f32 %v3581_v33, %v3580_v32  ;;  %v3603_v35 = vpop.permute.xlu1 %3602  ;;  %v3730_v32 = vmax.f32 %v3729_v10, 0.0 }
 0x3ce   : > { %v3609_v25 = vadd.f32 %v4695_v27, %v3603_v35  ;;  %v3731_v27 = vstv %s4710_s3  ;;  %s4742_s3 = sld [smem:[#allocation9 + $0xf6]] }
 0x3cf   : > { %v3583_v17 = vadd.f32 %v3582_v47, %v3568_v44 }
 0x3d0   : > { %v3610_v34 = vmax.f32 %v3609_v25, 0.0  ;;  %v4717_v25 = vld [vmem:[#allocation7 + $0xe9] ss:$0 sm:$0xff]  ;;  %v3813_v54 = vpop.permute.xlu0 %3812 }
 0x3d1   : > { %v3598_v8 = vadd.f32 %v3597_v56, %v3583_v17  ;;  %v3732_v17 = vmul.f32 %v3731_v27, %v3730_v32  ;;  %v3746_v56 = vstv %s4712_s23  ;;  %v4731_v32 = vld [vmem:[#allocation7 + $0xf0] ss:$0 sm:$0xff]  ;;  %s4744_s23 = sld [smem:[#allocation9 + $0xf7]] }
 0x3d2   : > { %v3618_v59 = vpop.permute.xlu1 %3617  ;;  %v3612_v46 = vmul.f32 %v3611_v38, %v3610_v34  ;;  %v4715_v34 = vld [vmem:[#allocation7 + $0xe8] ss:$0 sm:$0xff] }
 0x3d3   : > { %v3624_v11 = vadd.f32 %v4697_v5, %v3618_v59  ;;  %v3774_v5 = vadd.f32 %v4717_v25, %v3768_v15 }
 0x3d4   : > { %v3613_v60 = vadd.f32 %v3612_v46, %v3598_v8  ;;  %v3858_v63 = vpop.permute.xlu0 %3857 }
 0x3d5   : > { %v3625_v37 = vmax.f32 %v3624_v11, 0.0  ;;  %v3761_v11 = vstv %s4714_s29  ;;  %s4746_s29 = sld [smem:[#allocation9 + $0xf8]] }
 0x3d7   : > { %v3627_v23 = vmul.f32 %v3626_v16, %v3625_v37  ;;  %v3648_v12 = vpop.permute.xlu1 %3647  ;;  %v3775_v37 = vmax.f32 %v3774_v5, 0.0 }
 0x3d8   : > { %v3654_v4 = vadd.f32 %v4701_v36, %v3648_v12  ;;  %v3776_v36 = vstv %s4716_s5  ;;  %v3903_v25 = vpop.permute.xlu0 %3902  ;;  %s4748_s5 = sld [smem:[#allocation9 + $0xf9]] }
 0x3d9   : > { %v3628_v28 = vadd.f32 %v3627_v23, %v3613_v60 }
 0x3da   : > { %v3655_v48 = vmax.f32 %v3654_v4, 0.0  ;;  %v4723_v4 = vld [vmem:[#allocation7 + $0xec] ss:$0 sm:$0xff] }
 0x3db   : > { %v3643_v13 = vadd.f32 %v3642_v62, %v3628_v28  ;;  %v3777_v28 = vmul.f32 %v3776_v36, %v3775_v37  ;;  %v3791_v62 = vstv %s4718_s7  ;;  %v4737_v37 = vld [vmem:[#allocation7 + $0xf3] ss:$0 sm:$0xff]  ;;  %s4750_s7 = sld [smem:[#allocation9 + $0xfa]] }
 0x3dc   : > { %v3663_v6 = vpop.permute.xlu1 %3662  ;;  %v3657_v31 = vmul.f32 %v3656_v26, %v3655_v48  ;;  %v4721_v48 = vld [vmem:[#allocation7 + $0xeb] ss:$0 sm:$0xff] }
 0x3dd   : > { %v3669_v53 = vadd.f32 %v4703_v2, %v3663_v6  ;;  %v3819_v2 = vadd.f32 %v4723_v4, %v3813_v54  ;;  %v3948_v4 = vpop.permute.xlu0 %3947 }
 0x3de   : > { %v3658_v30 = vadd.f32 %v3657_v31, %v3643_v13 }
 0x3df   : > { %v3670_v19 = vmax.f32 %v3669_v53, 0.0  ;;  %v3806_v53 = vstv %s4720_s13  ;;  %s4752_s13 = sld [smem:[#allocation9 + $0xfb]] }
 0x3e1   : > { %v3672_v51 = vmul.f32 %v3671_v21, %v3670_v19  ;;  %v3693_v1 = vpop.permute.xlu1 %3692  ;;  %v3820_v19 = vmax.f32 %v3819_v2, 0.0 }
 0x3e2   : > { %v3699_v43 = vadd.f32 %v4707_v22, %v3693_v1  ;;  %v3821_v22 = vstv %s4722_s12  ;;  %s4754_s12 = sld [smem:[#allocation9 + $0xfc]] }
 0x3e3   : > { %v3673_v52 = vadd.f32 %v3672_v51, %v3658_v30 }
 0x3e4   : > { %v3700_v39 = vmax.f32 %v3699_v43, 0.0  ;;  %v4729_v43 = vld [vmem:[#allocation7 + $0xef] ss:$0 sm:$0xff] }
 0x3e5   : > { %v3688_v50 = vadd.f32 %v3687_v18, %v3673_v52  ;;  %v3822_v52 = vmul.f32 %v3821_v22, %v3820_v19  ;;  %v3836_v18 = vstv %s4724_s15  ;;  %v4743_v19 = vld [vmem:[#allocation7 + $0xf6] ss:$0 sm:$0xff]  ;;  %s4756_s15 = sld [smem:[#allocation9 + $0xfd]] }
 0x3e6   : > { %v3708_v42 = vpop.permute.xlu1 %3707  ;;  %v3702_v3 = vmul.f32 %v3701_v7, %v3700_v39  ;;  %v4727_v39 = vld [vmem:[#allocation7 + $0xee] ss:$0 sm:$0xff] }
 0x3e7   : > { %v3714_v9 = vadd.f32 %v4709_v14, %v3708_v42  ;;  %v3864_v14 = vadd.f32 %v4729_v43, %v3858_v63  ;;  %v3993_v43 = vpop.permute.xlu0 %3992 }
 0x3e8   : > { %v3703_v55 = vadd.f32 %v3702_v3, %v3688_v50 }
 0x3e9   : > { %v3715_v33 = vmax.f32 %v3714_v9, 0.0  ;;  %v3851_v9 = vstv %s4726_s16  ;;  %s4758_s16 = sld [smem:[#allocation9 + $0xfe]] }
 0x3eb   : > { %v3717_v44 = vmul.f32 %v3716_v40, %v3715_v33  ;;  %v3738_v47 = vpop.permute.xlu1 %3737  ;;  %v3865_v33 = vmax.f32 %v3864_v14, 0.0 }
 0x3ec   : > { %v3744_v35 = vadd.f32 %v4713_v45, %v3738_v47  ;;  %v3866_v45 = vstv %s4728_s25  ;;  %s4760_s25 = sld [smem:[#allocation9 + $0xff]] }
 0x3ed   : > { %v3718_v24 = vadd.f32 %v3717_v44, %v3703_v55 }
 0x3ee   : > { %v3745_v38 = vmax.f32 %v3744_v35, 0.0  ;;  %v4735_v35 = vld [vmem:[#allocation7 + $0xf2] ss:$0 sm:$0xff] }
 0x3ef   : > { %v3733_v59 = vadd.f32 %v3732_v17, %v3718_v24  ;;  %v3867_v24 = vmul.f32 %v3866_v45, %v3865_v33  ;;  %v3881_v17 = vstv %s4730_s11  ;;  %v4749_v33 = vld [vmem:[#allocation7 + $0xf9] ss:$0 sm:$0xff]  ;;  %s4109_s11 = sld [smem:[#allocation2]] }
 0x3f0   : > { %v3753_v49 = vpop.permute.xlu1 %3752  ;;  %v3747_v8 = vmul.f32 %v3746_v56, %v3745_v38  ;;  %v4733_v38 = vld [vmem:[#allocation7 + $0xf1] ss:$0 sm:$0xff] }
 0x3f1   : > { %v3759_v46 = vadd.f32 %v4715_v34, %v3753_v49  ;;  %v3909_v34 = vadd.f32 %v4735_v35, %v3903_v25  ;;  %v4038_v35 = vpop.permute.xlu0 %4037 }
 0x3f2   : > { %v3748_v0 = vadd.f32 %v3747_v8, %v3733_v59 }
 0x3f3   : > { %v3760_v16 = vmax.f32 %v3759_v46, 0.0  ;;  %v3896_v46 = vstv %s4732_s9  ;;  %s4250_s9 = sshll.u32 %s5740_s6, 3 }
 0x3f5   : > { %v3762_v60 = vmul.f32 %v3761_v11, %v3760_v16  ;;  %v3783_v23 = vpop.permute.xlu1 %3782  ;;  %v3910_v16 = vmax.f32 %v3909_v34, 0.0 }
 0x3f6   : > { %v3789_v12 = vadd.f32 %v4719_v41, %v3783_v23  ;;  %v3911_v41 = vstv %s4734_s10  ;;  %s4764_s10 = sshll.u32 %s5402_s20, 7  ;;  %s5545_s20 = smov [#allocation10]  }
 0x3f7   : > { %v3763_v20 = vadd.f32 %v3762_v60, %v3748_v0 }
 0x3f8   : > { %v3790_v26 = vmax.f32 %v3789_v12, 0.0  ;;  %v4741_v12 = vld [vmem:[#allocation7 + $0xf5] ss:$0 sm:$0xff] }
 0x3f9   : > { %v3778_v6 = vadd.f32 %v3777_v28, %v3763_v20  ;;  %v3912_v20 = vmul.f32 %v3911_v41, %v3910_v16  ;;  %v3926_v28 = vstv %s4736_s24  ;;  %v4755_v16 = vld [vmem:[#allocation7 + $0xfc] ss:$0 sm:$0xff]  ;;  %v4759_v41 = vld [vmem:[#allocation7 + $0xfe] ss:$0 sm:$0xff]  ;;  %s264_s24 = scalar_lea.vmem [#allocation10], %s4250_s9 }
 0x3fa   : > { %v3798_v57 = vpop.permute.xlu1 %3797  ;;  %v3792_v13 = vmul.f32 %v3791_v62, %v3790_v26  ;;  %v4739_v26 = vld [vmem:[#allocation7 + $0xf4] ss:$0 sm:$0xff] }
 0x3fb   : > { %v3804_v31 = vadd.f32 %v4721_v48, %v3798_v57  ;;  %v3954_v48 = vadd.f32 %v4741_v12, %v3948_v4 }
 0x3fc   : > { %v3793_v61 = vadd.f32 %v3792_v13, %v3778_v6 }
 0x3fd   : > { %v3805_v21 = vmax.f32 %v3804_v31, 0.0  ;;  %v3941_v31 = vstv %s4738_s26  ;;  %s4134_s26 = sshll.u32 %s264_s24, 4  ;;  %s6764_s26 = int_to_ptr.vmem [resolvable:$true] %s4134_s26 }
 0x3ff   : > { %v3807_v30 = vmul.f32 %v3806_v53, %v3805_v21  ;;  %v3828_v51 = vpop.permute.xlu1 %3827  ;;  %v3955_v21 = vmax.f32 %v3954_v48, 0.0 }
 0x400   : > { %v3834_v1 = vadd.f32 %v4725_v58, %v3828_v51  ;;  %v3956_v58 = vstv %s4740_s28 }
 0x401   : > { %v3808_v29 = vadd.f32 %v3807_v30, %v3793_v61 }
 0x402   : > { %v3835_v7 = vmax.f32 %v3834_v1, 0.0  ;;  %v4747_v1 = vld [vmem:[#allocation7 + $0xf8] ss:$0 sm:$0xff] }
 0x403   : > { %v3823_v42 = vadd.f32 %v3822_v52, %v3808_v29  ;;  %v3957_v29 = vmul.f32 %v3956_v58, %v3955_v21  ;;  %v3971_v52 = vstv %s4742_s3 }
 0x404   : > { %v3843_v10 = vpop.permute.xlu1 %3842  ;;  %v3837_v50 = vmul.f32 %v3836_v18, %v3835_v7  ;;  %v4745_v7 = vld [vmem:[#allocation7 + $0xf7] ss:$0 sm:$0xff] }
 0x405   : > { %v3849_v3 = vadd.f32 %v4727_v39, %v3843_v10  ;;  %v3999_v39 = vadd.f32 %v4747_v1, %v3993_v43  ;;  %v4106_v43 = vstv %s4760_s25 }
 0x406   : > { %v3838_v27 = vadd.f32 %v3837_v50, %v3823_v42 }
 0x407   : > { %v3850_v40 = vmax.f32 %v3849_v3, 0.0  ;;  %v3986_v3 = vstv %s4744_s23  ;;  %s6762_s23 = scalar_lea.hbm %s6815_s4, %s4764_s10 }
 0x409   : > { %v3852_v55 = vmul.f32 %v3851_v9, %v3850_v40  ;;  %v3873_v44 = vpop.permute.xlu1 %3872  ;;  %v4000_v40 = vmax.f32 %v3999_v39, 0.0 }
 0x40a   : > { %v3879_v47 = vadd.f32 %v4731_v32, %v3873_v44  ;;  %v4001_v32 = vstv %s4746_s29  ;;  %s4120_s29 = scalar_lea.sflag [#allocation5], %s5740_s6 }
 0x40b   : > { %v3853_v15 = vadd.f32 %v3852_v55, %v3838_v27 }
 0x40c   : > { %v3880_v56 = vmax.f32 %v3879_v47, 0.0  ;;  %v4753_v47 = vld [vmem:[#allocation7 + $0xfb] ss:$0 sm:$0xff] }
 0x40d   : > { %v3868_v49 = vadd.f32 %v3867_v24, %v3853_v15  ;;  %v4002_v15 = vmul.f32 %v4001_v32, %v4000_v40  ;;  %v4016_v24 = vstv %s4748_s5  ;;  %s5320_s5 = scalar_lea.vmem %s6764_s26, 128 }
 0x40e   : > { %v3888_v5 = vpop.permute.xlu1 %3887  ;;  %v3882_v59 = vmul.f32 %v3881_v17, %v3880_v56  ;;  %v4751_v56 = vld [vmem:[#allocation7 + $0xfa] ss:$0 sm:$0xff]  ;;  %p5321_p3 = scmp.ne.s32.totalorder %s6764_s26, %s5320_s5 }
 0x40f   : > { %v3894_v8 = vadd.f32 %v4733_v38, %v3888_v5  ;;  %v4044_v38 = vadd.f32 %v4753_v47, %v4038_v35 }
 0x410   : > { %v3883_v36 = vadd.f32 %v3882_v59, %v3868_v49  ;;  %p5322_p5 = pnand %p5321_p3, %p5688_p12 }
 0x411   : > { %v3895_v11 = vmax.f32 %v3894_v8, 0.0  ;;  %v4031_v8 = vstv %s4750_s7  ;;  %s5324_s7 = sshll.u32 %s5545_s20, 4  ;;  %s5325_s7 = int_to_ptr.vmem [resolvable:$false] %s5324_s7 }
 0x412   : > { %p5323_p7 = pneg %p5322_p5  ;;  %p5327_p9 = scmp.lt.s32.totalorder %s6764_s26, %s5325_s7 }
 0x413   : > { %v3897_v0 = vmul.f32 %v3896_v46, %v3895_v11  ;;  %v3918_v60 = vpop.permute.xlu1 %3917  ;;  %v4045_v11 = vmax.f32 %v4044_v38, 0.0 }
 0x414   : > { %v3924_v23 = vadd.f32 %v4737_v37, %v3918_v60  ;;  %v4046_v37 = vstv %s4752_s13  ;;  %s5326_s13 = scalar_lea.vmem %s5325_s7, 256 }
 0x415   : > { %v3898_v54 = vadd.f32 %v3897_v0, %v3883_v36  ;;  %v4083_v36 = vpop.permute.xlu0 %4082  ;;  %p5328_p10 = scmp.lt.s32.totalorder %s5326_s13, %s5320_s5 }
 0x416   : > { %v3925_v62 = vmax.f32 %v3924_v23, 0.0 }
 0x417   : > { %v3913_v57 = vadd.f32 %v3912_v20, %v3898_v54  ;;  %v4047_v54 = vmul.f32 %v4046_v37, %v4045_v11  ;;  %v4089_v20 = vadd.f32 %v4759_v41, %v4083_v36  ;;  %p5329_p1 = por %p5328_p10, %p5327_p9 }
 0x418   : > { %v3933_v2 = vpop.permute.xlu1 %3932  ;;  %v3927_v6 = vmul.f32 %v3926_v28, %v3925_v62  ;;  %v4061_v28 = vstv %s4754_s12 }
 0x419   : > { %v3939_v13 = vadd.f32 %v4739_v26, %v3933_v2  ;;  %v4757_v26 = vld [vmem:[#allocation7 + $0xfd] ss:$0 sm:$0xff]  ;;  %p5330_p4 = pnand %p5329_p1, %p5323_p7 }
 0x41a   : > { %v3928_v22 = vadd.f32 %v3927_v6, %v3913_v57 }
 0x41b   : > { %v3940_v53 = vmax.f32 %v3939_v13, 0.0  ;;  %v4090_v13 = vmax.f32 %v4089_v20, 0.0 }
 0x41d   : > { %v3942_v61 = vmul.f32 %v3941_v31, %v3940_v53  ;;  %v3963_v30 = vpop.permute.xlu1 %3962  ;;  %v4076_v31 = vstv %s4756_s15  ;;  %v4091_v53 = vstv %s4758_s16 }
 0x41e   : > { %v3969_v51 = vadd.f32 %v4743_v19, %v3963_v30  ;;  %v4761_v19 = vld [vmem:[#allocation7 + $0xff] ss:$0 sm:$0xff] }
 0x41f   : > { %v3943_v63 = vadd.f32 %v3942_v61, %v3928_v22  ;;  %v4092_v61 = vmul.f32 %v4091_v53, %v4090_v13 }
 0x420   : > { %v3970_v18 = vmax.f32 %v3969_v51, 0.0 }
 0x421   : > { %v3958_v10 = vadd.f32 %v3957_v29, %v3943_v63 }
 0x422   : > { %v3978_v14 = vpop.permute.xlu1 %3977  ;;  %v3972_v42 = vmul.f32 %v3971_v52, %v3970_v18  ;;  %v4110_v18 = vstv %s4109_s11 }
 0x423   : > { %v3984_v50 = vadd.f32 %v4745_v7, %v3978_v14 }
 0x424   : > { %v3973_v45 = vadd.f32 %v3972_v42, %v3958_v10 }
 0x425   : > { %v3985_v9 = vmax.f32 %v3984_v50, 0.0 }
 0x427   : > { %v3987_v27 = vmul.f32 %v3986_v3, %v3985_v9  ;;  %v4008_v55 = vpop.permute.xlu1 %4007 }
 0x428   : > { %v4014_v44 = vadd.f32 %v4749_v33, %v4008_v55 }
 0x429   : > { %v3988_v25 = vadd.f32 %v3987_v27, %v3973_v45 }
 0x42a   : > { %v4015_v17 = vmax.f32 %v4014_v44, 0.0 }
 0x42b   : > { %v4003_v5 = vadd.f32 %v4002_v15, %v3988_v25 }
 0x42c   : > { %v4023_v34 = vpop.permute.xlu1 %4022  ;;  %v4017_v49 = vmul.f32 %v4016_v24, %v4015_v17 }
 0x42d   : > { %v4029_v59 = vadd.f32 %v4751_v56, %v4023_v34 }
 0x42e   : > { %v4018_v0 = vadd.f32 %v4017_v49, %v4003_v5 }
 0x42f   : > { %v4030_v46 = vmax.f32 %v4029_v59, 0.0 }
 0x431   : > { %v4032_v60 = vmul.f32 %v4031_v8, %v4030_v46  ;;  %v4053_v23 = vpop.permute.xlu1 %4052 }
 0x432   : > { %v4059_v12 = vadd.f32 %v4755_v16, %v4053_v23 }
 0x433   : > { %v4033_v4 = vadd.f32 %v4032_v60, %v4018_v0 }
 0x434   : > { %v4060_v62 = vmax.f32 %v4059_v12, 0.0 }
 0x435   : > { %v4048_v2 = vadd.f32 %v4047_v54, %v4033_v4 }
 0x436   : > { %v4068_v48 = vpop.permute.xlu1 %4067  ;;  %v4062_v57 = vmul.f32 %v4061_v28, %v4060_v62 }
 0x437   : > { %v4074_v6 = vadd.f32 %v4757_v26, %v4068_v48 }
 0x438   : > { %v4063_v58 = vadd.f32 %v4062_v57, %v4048_v2 }
 0x439   : > { %v4075_v21 = vmax.f32 %v4074_v6, 0.0 }
 0x43b   : > { %v4077_v22 = vmul.f32 %v4076_v31, %v4075_v21  ;;  %v4098_v30 = vpop.permute.xlu1 %4097 }
 0x43c   : > { %v4104_v51 = vadd.f32 %v4761_v19, %v4098_v30 }
 0x43d   : > { %v4078_v1 = vadd.f32 %v4077_v22, %v4063_v58 }
 0x43e   : > { %v4105_v63 = vmax.f32 %v4104_v51, 0.0 }
 0x43f   : > { %v4093_v29 = vadd.f32 %v4092_v61, %v4078_v1 }
 0x440   : > { %v4107_v52 = vmul.f32 %v4106_v43, %v4105_v63 }
 0x442   : > { %v4108_v7 = vadd.f32 %v4107_v52, %v4093_v29 }
 0x444   : > { %v4111_v39 = vadd.f32 %v4110_v18, %v4108_v7 }
 0x446   : > { %v4762_v14 = vmul.f32 -1.442695, %v4111_v39 }
 0x448   : > { %5238 = vpow2.f32 %v4762_v14 }
 0x452   : > { %v5239_v10 = vpop.eup %5238 }
 0x453   : > { %v4115_v42 = vadd.f32 1.0, %v5239_v10 }
 0x455   : > { %5240 = vrcp.f32 %v4115_v42 }
 0x45f   : > { %v5241_v50 = vpop.eup %5240 }
 0x460   : > { %4118 = vst [vmem:[%s264_s24] sm:$0xff] %v5241_v50 }
 0x461   : > { %5333 = shalt.err (!%p5330_p4)
}
 0x462   : > { %s5334_s6 = scalar_lea.hbm %s6762_s23, 128  ;;  %s5338_s16 = scalar_lea.hbm %s6815_s4, 256 }
 0x463   : > { %p5335_p8 = scmp.ne.s32.totalorder %s6762_s23, %s5334_s6  ;;  %p5339_p6 = scmp.lt.u32.totalorder %s6762_s23, %s6815_s4 }
 0x464   : > { %p5340_p2 = scmp.lt.u32.totalorder %s5338_s16, %s5334_s6  ;;  %p5342_p3 = scmp.lt.u32.totalorder %s5334_s6, %s6762_s23 }
 0x465   : > { %p5336_p13 = pnand %p5335_p8, %p5688_p12 }
 0x466   : > { %p5341_p11 = por %p5340_p2, %p5339_p6 }
 0x467   : > { %p5337_p0 = pneg %p5336_p13 }
 0x468   : > { %p5343_p5 = por %p5342_p3, %p5341_p11 }
 0x46a   : > { %p5344_p7 = pnand %p5343_p5, %p5337_p0 }
 0x46c   : > { %5347 = shalt.err (!%p5344_p7)
}
 0x46d   : > { %4778 = dma.vmem_to_hbm [thread:$0]  (%p5688_p12), %s6764_s26, 128, %s6762_s23, %s4120_s29  }
 0x46e PF: > { %s4146_s9 = sand.u32 1, %s5390_s17   ;;  %p6948_p9 = scmp.ne.s32.totalorder %s6881_s27, 0 }
 0x46f   : > { %p6949_p10 = scmp.ge.s32.totalorder %s5410_s22, 2  ;;  %s4147_s10 = scalar_lea.sflag [#allocation5], %s4146_s9 }
 0x471   : > { %p4792_p1 = pnand %p6949_p10, %p6948_p9 }
 0x473   : > { %5385 = dma.done.wait (!%p4792_p1), %s4147_s10, 128  }
 0x474   : > { %5387 = vsyncadd (!%p4792_p1), %s4147_s10, 4294967168  ;;  %s23_s22 = sadd.s32 1, %s5410_s22   ;;  %s6950_s17 = smov %s5394_s18 }
 0x475   : > { %p20_p4 = scmp.ge.s32.totalorder %s23_s22, 4   ;;  %s6951_s18 = smov %s5398_s19 }
 0x476   : > { %s6952_s19 = smov %s5697_s14  ;;  %s6953_s20 = smov %s5406_s21 }
 0x477   : > { %s6954_s21 = smov %s6956_s30  ;;  %22 = sbr.rel (!%p20_p4) target bundleno = 10 (0xa), region = 91 }
 0x47e   :  { %4152 = vsyncpa [#allocation4], 1 }
 0x47f   :  { %4154 = vsyncpa [#allocation4 + $0x1], 1 }
 0x480   :  { %4155 = vsyncpa [#allocation8], 1 }
 0x481   :  { %4156 = vsyncpa [#allocation5], 1 }
 0x482   :  { %4158 = vsyncpa [#allocation5 + $0x1], 1 }
 0x483   :  { %4159 = vsyncpa [#allocation6], 1 }
 0x484   :  { %4161 = vsyncpa [#allocation6 + $0x1], 1 }

</bundles_post_ra>
